<compile_context>
chip_gen: v5e
topology: v5e:2x2
jax: 0.10.0
libtpu: 0.0.40
codegen_flags: <defaults>
</compile_context>

<pallas_src>
import math
import functools
import jax
import jax.numpy as jnp
from jax.experimental import pallas as pl
from jax.experimental.pallas import tpu as pltpu


# ---------------------------------------------------------------------------
# Weight fusion helpers (run once, outside the kernel)
# ---------------------------------------------------------------------------
def _fuse_gate_cols(m_f, m_r, Hd):
    """Reorder per-direction PyTorch-order [i|f|g|o] columns into the fused
    gate-major layout [i_f,i_r | f_f,f_r | o_f,o_r | g_f,g_r]."""
    def blk(m, k):
        return m[..., k * Hd:(k + 1) * Hd]
    return jnp.concatenate(
        [blk(m_f, 0), blk(m_r, 0),     # i
         blk(m_f, 1), blk(m_r, 1),     # f
         blk(m_f, 3), blk(m_r, 3),     # o
         blk(m_f, 2), blk(m_r, 2)],    # g
        axis=-1)


def _fuse_lstm_layer(p):
    Hd = p['whh_f'].shape[0]
    wih = _fuse_gate_cols(p['wih_f'], p['wih_r'], Hd)              # (In, 8*Hd)
    b = _fuse_gate_cols(p['b_f'], p['b_r'], Hd)                    # (1, 8*Hd)
    z = jnp.zeros_like(p['whh_f'])
    top = _fuse_gate_cols(p['whh_f'], z, Hd)                       # rows fed by h_fwd
    bot = _fuse_gate_cols(z, p['whh_r'], Hd)                       # rows fed by h_rev
    whh = jnp.concatenate([top, bot], axis=0)                      # (2*Hd, 8*Hd) block-diag
    # Fold the 0.5 pre-scale for sigmoid gates into the weights so the kernel
    # can use a single full-width tanh: sigmoid(x) = 0.5*tanh(x/2) + 0.5.
    # Sigmoid gates (i, f, o) occupy the first 6*Hd fused columns; g the rest.
    G = wih.shape[1]
    scale = jnp.where(jnp.arange(G) < 6 * Hd, 0.5, 1.0).astype(jnp.float32)
    return wih * scale, whh * scale, b * scale


def fuse_params(params):
    wih0, whh0, b0 = _fuse_lstm_layer(params['lstm0'])
    wih1, whh1, b1 = _fuse_lstm_layer(params['lstm1'])
    return {
        'embedding': params['embedding'],
        'wih0': wih0, 'whh0': whh0, 'b0': b0,
        'wih1': wih1, 'whh1': whh1, 'b1': b1,
        'wlin': params['linear_w_t'], 'blin': params['linear_b'],
        'trans': params['trans'], 'start': params['start'], 'end': params['end'],
    }


# ---------------------------------------------------------------------------
# Single fused Pallas kernel: 2x BiLSTM + Linear + CRF negative mean log-lik.
# ---------------------------------------------------------------------------
def fused_bilstm_crf_kernel(emb_ref, wih0_ref, whh0_ref, b0_ref,
                            wih1_ref, whh1_ref, b1_ref,
                            wlin_ref, blin_ref,
                            tags_ref, mask_ref, bw_ref,
                            trans_ref, start_ref, end_ref,
                            loss_ref, *, inv_nb):
    T, B, E = emb_ref.shape
    G = wih0_ref.shape[1]            # 8 * Hd (fused gate width, lane-dense)
    Hd2 = whh0_ref.shape[0]          # 2 * Hd
    Hd = Hd2 // 2
    C = wlin_ref.shape[1]

    # ---- constant lane masks (hoisted; comparisons only) --------------------
    lane = jax.lax.broadcasted_iota(jnp.int32, (B, G), 1)
    # reverse-direction columns: upper half of each 2*Hd gate block
    rev_in_mask = ((lane >= Hd) & (lane < 2 * Hd)) \
        | ((lane >= 3 * Hd) & (lane < 4 * Hd)) \
        | ((lane >= 5 * Hd) & (lane < 6 * Hd)) \
        | (lane >= 7 * Hd)
    tanh_mask = lane >= 3 * Hd2      # the g (cell candidate) block, last 2*Hd lanes
    out_lane = jax.lax.broadcasted_iota(jnp.int32, (B, Hd2), 1)
    rev_out_mask = out_lane >= Hd    # reverse half of [h_fwd | h_rev]

    def run_layer(x2d, wih, whh, b):
        # Fused input projection: both directions, all timesteps, one lane-dense
        # MXU matmul.
        xg = (jnp.dot(x2d, wih, preferred_element_type=jnp.float32)
              + b).reshape(T, B, G)
        # Direction select hoisted OFF the serial h->h chain (parallel over T):
        # forward columns take time s, reverse columns take time T-1-s.
        x_sel = [jnp.where(rev_in_mask, xg[T - 1 - s], xg[s]) for s in range(T)]

        h = jnp.zeros((B, Hd2), jnp.float32)     # [h_fwd | h_rev]
        c = jnp.zeros((B, Hd2), jnp.float32)
        hs = []
        for s in range(T):                       # fully unrolled (static T=8)
            gates = x_sel[s] + jnp.dot(h, whh, preferred_element_type=jnp.float32)
            # Single full-width EUP pass (0.5 pre-scale for sigmoid cols is
            # already folded into wih/whh/b): sigmoid = 0.5*tanh + 0.5.
            t_all = jnp.tanh(gates)
            act = jnp.where(tanh_mask, t_all, 0.5 * t_all + 0.5)
            i_g = act[:, 0 * Hd2:1 * Hd2]
            f_g = act[:, 1 * Hd2:2 * Hd2]
            o_g = act[:, 2 * Hd2:3 * Hd2]
            g_g = act[:, 3 * Hd2:4 * Hd2]
            c = f_g * c + i_g * g_g
            h = o_g * jnp.tanh(c)
            hs.append(h)
        # Assemble the layer output IN REGISTERS (no scratch round trip):
        # output at time t is [h_fwd(step t) | h_rev(step T-1-t)].
        return jnp.concatenate(
            [jnp.where(rev_out_mask, hs[T - 1 - t], hs[t]) for t in range(T)],
            axis=0)                                               # (T*B, Hd2)

    y0 = run_layer(emb_ref[...].reshape(T * B, E),
                   wih0_ref[...], whh0_ref[...], b0_ref[...])
    y1 = run_layer(y0, wih1_ref[...], whh1_ref[...], b1_ref[...])

    # ---- emissions (Linear) --------------------------------------------------
    emis = (jnp.dot(y1, wlin_ref[...], preferred_element_type=jnp.float32)
            + blin_ref[...]).reshape(T, B, C)

    tags = tags_ref[...]             # (T, B) int32
    mask = mask_ref[...]             # (T, B, 1) f32 (0/1)
    bw = bw_ref[...]                 # (B, 1) f32 batch validity (padding weight)
    trans = trans_ref[...]           # (C, C)
    start = start_ref[...]           # (1, C)
    end = end_ref[...]               # (1, C)

    # one-hot of tags over classes: (T, B, C)
    cls_iota = jax.lax.broadcasted_iota(jnp.int32, (T, B, C), 2)
    oh = (cls_iota == tags[:, :, None]).astype(jnp.float32)

    # ---------------- numerator (score of the gold path) ---------------------
    em_sel = jnp.sum(emis * oh, axis=-1, keepdims=True)                     # (T,B,1)
    # gold-path transition rows via VPU broadcast-multiply-reduce (no MXU)
    trans_rows = jnp.sum(oh[:-1][:, :, :, None] * trans[None, None],
                         axis=2)                                            # (T-1,B,C)
    trans_sel = jnp.sum(trans_rows * oh[1:], axis=-1, keepdims=True)        # (T-1,B,1)

    start_score = jnp.sum(oh[0] * start, axis=-1, keepdims=True)            # (B,1)
    steps = jnp.sum(mask[1:] * (trans_sel + em_sel[1:]), axis=0)            # (B,1)

    seq_end_i = jnp.sum(mask, axis=0).astype(jnp.int32) - 1                 # (B,1) int
    t_iota_i = jax.lax.broadcasted_iota(jnp.int32, (T, B, 1), 0)
    last_t_oh = (t_iota_i == seq_end_i[None, :, :]).astype(jnp.float32)     # (T,B,1)
    oh_last = jnp.sum(last_t_oh * oh, axis=0)                               # (B,C)
    end_score = jnp.sum(oh_last * end, axis=-1, keepdims=True)              # (B,1)

    numerator = start_score + em_sel[0] + steps + end_score                 # (B,1)

    # ---------------- denominator (forward algorithm, unrolled) --------------
    # TODO(synk): for larger C pack (B,C,C) into a lane-dense (B,C*C) view for
    # the exp/log/max calls; at C=8 this is a minor cost.
    trans_b = trans[None, :, :]                  # hoisted loop-invariant broadcast
    score = start + emis[0]                      # (B, C)
    for t in range(1, T):                        # fully unrolled (static T)
        x = score[:, :, None] + trans_b + emis[t][:, None, :]               # (B,C,C)
        mmax = jnp.max(x, axis=1, keepdims=True)                            # (B,1,C)
        nxt = jnp.log(jnp.sum(jnp.exp(x - mmax), axis=1)) + mmax[:, 0, :]   # (B,C)
        score = jnp.where(mask[t] > 0.5, nxt, score)
    score = score + end
    smax = jnp.max(score, axis=-1, keepdims=True)
    denominator = jnp.log(jnp.sum(jnp.exp(score - smax),
                                  axis=-1, keepdims=True)) + smax           # (B,1)

    ll = (numerator - denominator) * bw                                     # (B,1)
    loss_ref[...] = -jnp.sum(ll, axis=0, keepdims=True) * inv_nb            # (1,1)


def fused_forward(emb_tbe, tags_tb, mask_tb1, bw, b_real, fp):
    vmem = pl.BlockSpec(memory_space=pltpu.MemorySpace.VMEM)
    kernel = functools.partial(fused_bilstm_crf_kernel, inv_nb=1.0 / float(b_real))
    loss = pl.pallas_call(
        kernel,
        out_shape=jax.ShapeDtypeStruct((1, 1), jnp.float32),
        in_specs=[vmem] * 15,
        out_specs=vmem,
    )(emb_tbe, fp['wih0'], fp['whh0'], fp['b0'],
      fp['wih1'], fp['whh1'], fp['b1'],
      fp['wlin'], fp['blin'],
      tags_tb, mask_tb1, bw,
      fp['trans'], fp['start'], fp['end'])
    return loss[0, 0]


# ---------------------------------------------------------------------------
# Full model forward (training branch: loss)
# ---------------------------------------------------------------------------
def model_forward(fparams, x_bt, tags_bt, mask_bt):
    B, T = x_bt.shape
    # Pad batch to a sublane multiple (8 for f32) so every (B, .) op runs at
    # full sublane occupancy; padded rows are zero-weighted in the CRF sum.
    Bp = ((B + 7) // 8) * 8
    pad = Bp - B
    # Embedding gather done directly time-major: no (B,T,E) transpose copy.
    emb = jnp.take(fparams['embedding'], x_bt.T, axis=0).astype(jnp.float32)  # (T,B,E)
    emb = jnp.pad(emb, ((0, 0), (0, pad), (0, 0)))
    tags_tb = jnp.pad(tags_bt.T.astype(jnp.int32), ((0, 0), (0, pad)))        # (T,Bp)
    mask_tb1 = jnp.pad(mask_bt.T.astype(jnp.float32),
                       ((0, 0), (0, pad)))[:, :, None]                        # (T,Bp,1)
    bw = (jnp.arange(Bp) < B).astype(jnp.float32)[:, None]                    # (Bp,1)
    return fused_forward(emb, tags_tb, mask_tb1, bw, B, fparams)


# ---------------------------------------------------------------------------
# Pure-JAX reference (same math, original PyTorch-style params) for validation
# ---------------------------------------------------------------------------
def _lstm_dir_ref(x_tbf, wih_t, whh_t, b, reverse):
    T, B, _ = x_tbf.shape
    Hd = whh_t.shape[0]

    def step(carry, x_t):
        h, c = carry
        g = x_t @ wih_t + h @ whh_t + b[0]
        i = jax.nn.sigmoid(g[:, :Hd])
        f = jax.nn.sigmoid(g[:, Hd:2 * Hd])
        gg = jnp.tanh(g[:, 2 * Hd:3 * Hd])
        o = jax.nn.sigmoid(g[:, 3 * Hd:])
        c = f * c + i * gg
        h = o * jnp.tanh(c)
        return (h, c), h

    xs = x_tbf[::-1] if reverse else x_tbf
    _, ys = jax.lax.scan(step, (jnp.zeros((B, Hd)), jnp.zeros((B, Hd))), xs)
    return ys[::-1] if reverse else ys


def reference_forward(params, x_bt, tags_bt, mask_bt):
    emb = jnp.take(params['embedding'], x_bt, axis=0)
    h = jnp.transpose(emb, (1, 0, 2)).astype(jnp.float32)
    for name in ('lstm0', 'lstm1'):
        p = params[name]
        yf = _lstm_dir_ref(h, p['wih_f'], p['whh_f'], p['b_f'], False)
        yr = _lstm_dir_ref(h, p['wih_r'], p['whh_r'], p['b_r'], True)
        h = jnp.concatenate([yf, yr], axis=-1)
    T, B, _ = h.shape
    emis = h @ params['linear_w_t'] + params['linear_b'][0]      # (T,B,C)
    tags = tags_bt.T.astype(jnp.int32)
    mask = mask_bt.T.astype(jnp.float32)
    trans, start, end = params['trans'], params['start'][0], params['end'][0]
    barange = jnp.arange(B)
    num = start[tags[0]] + emis[0, barange, tags[0]]
    for t in range(1, T):
        num = num + mask[t] * (trans[tags[t - 1], tags[t]]
                               + emis[t, barange, tags[t]])
    seq_end = (jnp.sum(mask, axis=0) - 1).astype(jnp.int32)
    last_tags = tags[seq_end, barange]
    num = num + end[last_tags]
    score = start[None, :] + emis[0]
    for t in range(1, T):
        x = score[:, :, None] + trans[None] + emis[t][:, None, :]
        nxt = jax.nn.logsumexp(x, axis=1)
        score = jnp.where(mask[t][:, None] > 0.5, nxt, score)
    denom = jax.nn.logsumexp(score + end[None, :], axis=1)
    return -jnp.mean(num - denom)


# ---------------------------------------------------------------------------
# Deterministic parameter init (shapes from the module's __init__)
# ---------------------------------------------------------------------------
def init_params(key, V, E, Hdim, C):
    Hd = Hdim // 2
    ks = list(jax.random.split(key, 20))
    k_lstm = 1.0 / math.sqrt(Hd)
    k_lin = 1.0 / math.sqrt(Hdim)

    def u(k, shape, s):
        return jax.random.uniform(k, shape, jnp.float32, -s, s)

    def lstm_layer(i, in_dim):
        return {
            'wih_f': u(ks[i + 0], (in_dim, 4 * Hd), k_lstm),   # pre-transposed
            'whh_f': u(ks[i + 1], (Hd, 4 * Hd), k_lstm),
            'b_f':   u(ks[i + 2], (1, 4 * Hd), k_lstm),        # b_ih + b_hh combined
            'wih_r': u(ks[i + 3], (in_dim, 4 * Hd), k_lstm),
            'whh_r': u(ks[i + 4], (Hd, 4 * Hd), k_lstm),
            'b_r':   u(ks[i + 5], (1, 4 * Hd), k_lstm),
        }

    return {
        'embedding': jax.random.normal(ks[0], (V, E), jnp.float32),
        'lstm0': lstm_layer(1, E),
        'lstm1': lstm_layer(7, 2 * Hd),
        'linear_w_t': u(ks[13], (Hdim, C), k_lin),             # pre-transposed
        'linear_b':   u(ks[14], (1, C), k_lin),
        'trans': jax.random.uniform(ks[15], (C, C), jnp.float32, -0.1, 0.1),
        'start': jax.random.uniform(ks[16], (1, C), jnp.float32, -0.1, 0.1),
        'end':   jax.random.uniform(ks[17], (1, C), jnp.float32, -0.1, 0.1),
    }


if __name__ == "__main__":
    # config: corpus_num=50, embedding_dim=32, hidden_dim=32, num_classes=8
    V, E, Hdim, C = 50, 32, 32, 8
    B, T = 2, 8

    key = jax.random.PRNGKey(0)
    kp, kx, kt = jax.random.split(key, 3)
    params = init_params(kp, V, E, Hdim, C)
    fparams = fuse_params(params)     # one-time weight fusion (outside jit)

    x = jax.random.randint(kx, (B, T), 0, V, dtype=jnp.int32)      # token ids
    tags = jax.random.randint(kt, (B, T), 0, C, dtype=jnp.int32)   # gold tags
    lengths = jnp.array([T, 5], dtype=jnp.int32)
    mask = (jnp.arange(T)[None, :] < lengths[:, None]).astype(jnp.float32)  # (B,T)

    loss = jax.jit(model_forward)(fparams, x, tags, mask)
    jax.block_until_ready(loss)

    ref = reference_forward(params, x, tags, mask)
    assert jnp.isfinite(loss), "loss is not finite"
    assert abs(float(loss) - float(ref)) < 1e-3 * max(1.0, abs(float(ref))), (
        f"mismatch: pallas={float(loss)} ref={float(ref)}")

    # TODO(synk): viterbi_decode (is_test=True branch) not implemented; only the
    # training-loss path is reproduced. nn.Dropout is declared but unused in the
    # reference forward, so it is skipped.
    print("KERNEL_OK")
</pallas_src>

<mosaic_0001>
module attributes {stable_mosaic.version = 11 : i64} {
  func.func @fused_bilstm_crf_kernel(%arg0: memref<8x8x32xf32, #tpu.memory_space<vmem>>, %arg1: memref<32x128xf32, #tpu.memory_space<vmem>>, %arg2: memref<32x128xf32, #tpu.memory_space<vmem>>, %arg3: memref<1x128xf32, #tpu.memory_space<vmem>>, %arg4: memref<32x128xf32, #tpu.memory_space<vmem>>, %arg5: memref<32x128xf32, #tpu.memory_space<vmem>>, %arg6: memref<1x128xf32, #tpu.memory_space<vmem>>, %arg7: memref<32x8xf32, #tpu.memory_space<vmem>>, %arg8: memref<1x8xf32, #tpu.memory_space<vmem>>, %arg9: memref<8x8xi32, #tpu.memory_space<vmem>>, %arg10: memref<8x8x1xf32, #tpu.memory_space<vmem>>, %arg11: memref<8x1xf32, #tpu.memory_space<vmem>>, %arg12: memref<8x8xf32, #tpu.memory_space<vmem>>, %arg13: memref<1x8xf32, #tpu.memory_space<vmem>>, %arg14: memref<1x8xf32, #tpu.memory_space<vmem>>, %arg15: memref<1x1xf32, #tpu.memory_space<vmem>>) attributes {dimension_semantics = [], scalar_prefetch = 0 : i64, scratch_operands = 0 : i64, tpu.core_type = #tpu.core_type<tc>} {
    %0 = tpu.iota {dimensions = array<i32: 1>} : vector<8x128xi32>
    %c16_i32 = arith.constant 16 : i32
    %1 = vector.broadcast %c16_i32 : i32 to vector<8x128xi32>
    %2 = arith.cmpi sge, %0, %1 : vector<8x128xi32>
    %c32_i32 = arith.constant 32 : i32
    %3 = vector.broadcast %c32_i32 : i32 to vector<8x128xi32>
    %4 = arith.cmpi slt, %0, %3 : vector<8x128xi32>
    %5 = arith.andi %2, %4 : vector<8x128xi1>
    %c48_i32 = arith.constant 48 : i32
    %6 = vector.broadcast %c48_i32 : i32 to vector<8x128xi32>
    %7 = arith.cmpi sge, %0, %6 : vector<8x128xi32>
    %c64_i32 = arith.constant 64 : i32
    %8 = vector.broadcast %c64_i32 : i32 to vector<8x128xi32>
    %9 = arith.cmpi slt, %0, %8 : vector<8x128xi32>
    %10 = arith.andi %7, %9 : vector<8x128xi1>
    %11 = arith.ori %5, %10 : vector<8x128xi1>
    %c80_i32 = arith.constant 80 : i32
    %12 = vector.broadcast %c80_i32 : i32 to vector<8x128xi32>
    %13 = arith.cmpi sge, %0, %12 : vector<8x128xi32>
    %c96_i32 = arith.constant 96 : i32
    %14 = vector.broadcast %c96_i32 : i32 to vector<8x128xi32>
    %15 = arith.cmpi slt, %0, %14 : vector<8x128xi32>
    %16 = arith.andi %13, %15 : vector<8x128xi1>
    %17 = arith.ori %11, %16 : vector<8x128xi1>
    %c112_i32 = arith.constant 112 : i32
    %18 = vector.broadcast %c112_i32 : i32 to vector<8x128xi32>
    %19 = arith.cmpi sge, %0, %18 : vector<8x128xi32>
    %20 = arith.ori %17, %19 : vector<8x128xi1>
    %c96_i32_0 = arith.constant 96 : i32
    %21 = vector.broadcast %c96_i32_0 : i32 to vector<8x128xi32>
    %22 = arith.cmpi sge, %0, %21 : vector<8x128xi32>
    %23 = tpu.iota {dimensions = array<i32: 1>} : vector<8x32xi32>
    %c16_i32_1 = arith.constant 16 : i32
    %24 = vector.broadcast %c16_i32_1 : i32 to vector<8x32xi32>
    %25 = arith.cmpi sge, %23, %24 : vector<8x32xi32>
    %c0 = arith.constant 0 : index
    %c0_2 = arith.constant 0 : index
    %c0_3 = arith.constant 0 : index
    %26 = vector.load %arg0[%c0, %c0_2, %c0_3] : memref<8x8x32xf32, #tpu.memory_space<vmem>>, vector<8x8x32xf32>
    %27 = vector.shape_cast %26 : vector<8x8x32xf32> to vector<64x32xf32>
    %c0_4 = arith.constant 0 : index
    %c0_5 = arith.constant 0 : index
    %28 = vector.load %arg1[%c0_4, %c0_5] : memref<32x128xf32, #tpu.memory_space<vmem>>, vector<32x128xf32>
    %c0_6 = arith.constant 0 : index
    %c0_7 = arith.constant 0 : index
    %29 = vector.load %arg2[%c0_6, %c0_7] : memref<32x128xf32, #tpu.memory_space<vmem>>, vector<32x128xf32>
    %c0_8 = arith.constant 0 : index
    %c0_9 = arith.constant 0 : index
    %30 = vector.load %arg3[%c0_8, %c0_9] : memref<1x128xf32, #tpu.memory_space<vmem>>, vector<1x128xf32>
    %cst = arith.constant dense<0.000000e+00> : vector<64x128xf32>
    %31 = tpu.matmul %27, %28, %cst {dimension_numbers = #tpu.dot_dimension_numbers<[1], [0], [0], [1], [0, 0, 1, 1], [], []>} : vector<64x32xf32>, vector<32x128xf32>, vector<64x128xf32> -> vector<64x128xf32>
    %32 = vector.broadcast %30 : vector<1x128xf32> to vector<64x128xf32>
    %33 = arith.addf %31, %32 : vector<64x128xf32>
    %34 = vector.shape_cast %33 : vector<64x128xf32> to vector<8x8x128xf32>
    %35 = vector.extract_strided_slice %34 {offsets = [7, 0, 0], sizes = [1, 8, 128], strides = [1, 1, 1]} : vector<8x8x128xf32> to vector<1x8x128xf32>
    %36 = vector.shape_cast %35 : vector<1x8x128xf32> to vector<8x128xf32>
    %37 = vector.extract_strided_slice %34 {offsets = [0, 0, 0], sizes = [1, 8, 128], strides = [1, 1, 1]} : vector<8x8x128xf32> to vector<1x8x128xf32>
    %38 = vector.shape_cast %37 : vector<1x8x128xf32> to vector<8x128xf32>
    %39 = arith.select %20, %36, %38 : vector<8x128xi1>, vector<8x128xf32>
    %40 = vector.extract_strided_slice %34 {offsets = [6, 0, 0], sizes = [1, 8, 128], strides = [1, 1, 1]} : vector<8x8x128xf32> to vector<1x8x128xf32>
    %41 = vector.shape_cast %40 : vector<1x8x128xf32> to vector<8x128xf32>
    %42 = vector.extract_strided_slice %34 {offsets = [1, 0, 0], sizes = [1, 8, 128], strides = [1, 1, 1]} : vector<8x8x128xf32> to vector<1x8x128xf32>
    %43 = vector.shape_cast %42 : vector<1x8x128xf32> to vector<8x128xf32>
    %44 = arith.select %20, %41, %43 : vector<8x128xi1>, vector<8x128xf32>
    %45 = vector.extract_strided_slice %34 {offsets = [5, 0, 0], sizes = [1, 8, 128], strides = [1, 1, 1]} : vector<8x8x128xf32> to vector<1x8x128xf32>
    %46 = vector.shape_cast %45 : vector<1x8x128xf32> to vector<8x128xf32>
    %47 = vector.extract_strided_slice %34 {offsets = [2, 0, 0], sizes = [1, 8, 128], strides = [1, 1, 1]} : vector<8x8x128xf32> to vector<1x8x128xf32>
    %48 = vector.shape_cast %47 : vector<1x8x128xf32> to vector<8x128xf32>
    %49 = arith.select %20, %46, %48 : vector<8x128xi1>, vector<8x128xf32>
    %50 = vector.extract_strided_slice %34 {offsets = [4, 0, 0], sizes = [1, 8, 128], strides = [1, 1, 1]} : vector<8x8x128xf32> to vector<1x8x128xf32>
    %51 = vector.shape_cast %50 : vector<1x8x128xf32> to vector<8x128xf32>
    %52 = vector.extract_strided_slice %34 {offsets = [3, 0, 0], sizes = [1, 8, 128], strides = [1, 1, 1]} : vector<8x8x128xf32> to vector<1x8x128xf32>
    %53 = vector.shape_cast %52 : vector<1x8x128xf32> to vector<8x128xf32>
    %54 = arith.select %20, %51, %53 : vector<8x128xi1>, vector<8x128xf32>
    %55 = vector.extract_strided_slice %34 {offsets = [3, 0, 0], sizes = [1, 8, 128], strides = [1, 1, 1]} : vector<8x8x128xf32> to vector<1x8x128xf32>
    %56 = vector.shape_cast %55 : vector<1x8x128xf32> to vector<8x128xf32>
    %57 = vector.extract_strided_slice %34 {offsets = [4, 0, 0], sizes = [1, 8, 128], strides = [1, 1, 1]} : vector<8x8x128xf32> to vector<1x8x128xf32>
    %58 = vector.shape_cast %57 : vector<1x8x128xf32> to vector<8x128xf32>
    %59 = arith.select %20, %56, %58 : vector<8x128xi1>, vector<8x128xf32>
    %60 = vector.extract_strided_slice %34 {offsets = [2, 0, 0], sizes = [1, 8, 128], strides = [1, 1, 1]} : vector<8x8x128xf32> to vector<1x8x128xf32>
    %61 = vector.shape_cast %60 : vector<1x8x128xf32> to vector<8x128xf32>
    %62 = vector.extract_strided_slice %34 {offsets = [5, 0, 0], sizes = [1, 8, 128], strides = [1, 1, 1]} : vector<8x8x128xf32> to vector<1x8x128xf32>
    %63 = vector.shape_cast %62 : vector<1x8x128xf32> to vector<8x128xf32>
    %64 = arith.select %20, %61, %63 : vector<8x128xi1>, vector<8x128xf32>
    %65 = vector.extract_strided_slice %34 {offsets = [1, 0, 0], sizes = [1, 8, 128], strides = [1, 1, 1]} : vector<8x8x128xf32> to vector<1x8x128xf32>
    %66 = vector.shape_cast %65 : vector<1x8x128xf32> to vector<8x128xf32>
    %67 = vector.extract_strided_slice %34 {offsets = [6, 0, 0], sizes = [1, 8, 128], strides = [1, 1, 1]} : vector<8x8x128xf32> to vector<1x8x128xf32>
    %68 = vector.shape_cast %67 : vector<1x8x128xf32> to vector<8x128xf32>
    %69 = arith.select %20, %66, %68 : vector<8x128xi1>, vector<8x128xf32>
    %70 = vector.extract_strided_slice %34 {offsets = [0, 0, 0], sizes = [1, 8, 128], strides = [1, 1, 1]} : vector<8x8x128xf32> to vector<1x8x128xf32>
    %71 = vector.shape_cast %70 : vector<1x8x128xf32> to vector<8x128xf32>
    %72 = vector.extract_strided_slice %34 {offsets = [7, 0, 0], sizes = [1, 8, 128], strides = [1, 1, 1]} : vector<8x8x128xf32> to vector<1x8x128xf32>
    %73 = vector.shape_cast %72 : vector<1x8x128xf32> to vector<8x128xf32>
    %74 = arith.select %20, %71, %73 : vector<8x128xi1>, vector<8x128xf32>
    %cst_10 = arith.constant 0.000000e+00 : f32
    %75 = vector.broadcast %cst_10 : f32 to vector<8x32xf32>
    %cst_11 = arith.constant 0.000000e+00 : f32
    %76 = vector.broadcast %cst_11 : f32 to vector<8x32xf32>
    %cst_12 = arith.constant dense<0.000000e+00> : vector<8x128xf32>
    %77 = tpu.matmul %75, %29, %cst_12 {dimension_numbers = #tpu.dot_dimension_numbers<[1], [0], [0], [1], [0, 0, 1, 1], [], []>} : vector<8x32xf32>, vector<32x128xf32>, vector<8x128xf32> -> vector<8x128xf32>
    %78 = arith.addf %39, %77 : vector<8x128xf32>
    %79 = math.tanh %78 : vector<8x128xf32>
    %cst_13 = arith.constant 5.000000e-01 : f32
    %80 = vector.broadcast %cst_13 : f32 to vector<8x128xf32>
    %81 = arith.mulf %80, %79 : vector<8x128xf32>
    %cst_14 = arith.constant 5.000000e-01 : f32
    %82 = vector.broadcast %cst_14 : f32 to vector<8x128xf32>
    %83 = arith.addf %81, %82 : vector<8x128xf32>
    %84 = arith.select %22, %79, %83 : vector<8x128xi1>, vector<8x128xf32>
    %85 = vector.extract_strided_slice %84 {offsets = [0, 0], sizes = [8, 32], strides = [1, 1]} : vector<8x128xf32> to vector<8x32xf32>
    %86 = vector.extract_strided_slice %84 {offsets = [0, 32], sizes = [8, 32], strides = [1, 1]} : vector<8x128xf32> to vector<8x32xf32>
    %87 = vector.extract_strided_slice %84 {offsets = [0, 64], sizes = [8, 32], strides = [1, 1]} : vector<8x128xf32> to vector<8x32xf32>
    %88 = vector.extract_strided_slice %84 {offsets = [0, 96], sizes = [8, 32], strides = [1, 1]} : vector<8x128xf32> to vector<8x32xf32>
    %89 = arith.mulf %86, %76 : vector<8x32xf32>
    %90 = arith.mulf %85, %88 : vector<8x32xf32>
    %91 = arith.addf %89, %90 : vector<8x32xf32>
    %92 = math.tanh %91 : vector<8x32xf32>
    %93 = arith.mulf %87, %92 : vector<8x32xf32>
    %cst_15 = arith.constant dense<0.000000e+00> : vector<8x128xf32>
    %94 = tpu.matmul %93, %29, %cst_15 {dimension_numbers = #tpu.dot_dimension_numbers<[1], [0], [0], [1], [0, 0, 1, 1], [], []>} : vector<8x32xf32>, vector<32x128xf32>, vector<8x128xf32> -> vector<8x128xf32>
    %95 = arith.addf %44, %94 : vector<8x128xf32>
    %96 = math.tanh %95 : vector<8x128xf32>
    %cst_16 = arith.constant 5.000000e-01 : f32
    %97 = vector.broadcast %cst_16 : f32 to vector<8x128xf32>
    %98 = arith.mulf %97, %96 : vector<8x128xf32>
    %cst_17 = arith.constant 5.000000e-01 : f32
    %99 = vector.broadcast %cst_17 : f32 to vector<8x128xf32>
    %100 = arith.addf %98, %99 : vector<8x128xf32>
    %101 = arith.select %22, %96, %100 : vector<8x128xi1>, vector<8x128xf32>
    %102 = vector.extract_strided_slice %101 {offsets = [0, 0], sizes = [8, 32], strides = [1, 1]} : vector<8x128xf32> to vector<8x32xf32>
    %103 = vector.extract_strided_slice %101 {offsets = [0, 32], sizes = [8, 32], strides = [1, 1]} : vector<8x128xf32> to vector<8x32xf32>
    %104 = vector.extract_strided_slice %101 {offsets = [0, 64], sizes = [8, 32], strides = [1, 1]} : vector<8x128xf32> to vector<8x32xf32>
    %105 = vector.extract_strided_slice %101 {offsets = [0, 96], sizes = [8, 32], strides = [1, 1]} : vector<8x128xf32> to vector<8x32xf32>
    %106 = arith.mulf %103, %91 : vector<8x32xf32>
    %107 = arith.mulf %102, %105 : vector<8x32xf32>
    %108 = arith.addf %106, %107 : vector<8x32xf32>
    %109 = math.tanh %108 : vector<8x32xf32>
    %110 = arith.mulf %104, %109 : vector<8x32xf32>
    %cst_18 = arith.constant dense<0.000000e+00> : vector<8x128xf32>
    %111 = tpu.matmul %110, %29, %cst_18 {dimension_numbers = #tpu.dot_dimension_numbers<[1], [0], [0], [1], [0, 0, 1, 1], [], []>} : vector<8x32xf32>, vector<32x128xf32>, vector<8x128xf32> -> vector<8x128xf32>
    %112 = arith.addf %49, %111 : vector<8x128xf32>
    %113 = math.tanh %112 : vector<8x128xf32>
    %cst_19 = arith.constant 5.000000e-01 : f32
    %114 = vector.broadcast %cst_19 : f32 to vector<8x128xf32>
    %115 = arith.mulf %114, %113 : vector<8x128xf32>
    %cst_20 = arith.constant 5.000000e-01 : f32
    %116 = vector.broadcast %cst_20 : f32 to vector<8x128xf32>
    %117 = arith.addf %115, %116 : vector<8x128xf32>
    %118 = arith.select %22, %113, %117 : vector<8x128xi1>, vector<8x128xf32>
    %119 = vector.extract_strided_slice %118 {offsets = [0, 0], sizes = [8, 32], strides = [1, 1]} : vector<8x128xf32> to vector<8x32xf32>
    %120 = vector.extract_strided_slice %118 {offsets = [0, 32], sizes = [8, 32], strides = [1, 1]} : vector<8x128xf32> to vector<8x32xf32>
    %121 = vector.extract_strided_slice %118 {offsets = [0, 64], sizes = [8, 32], strides = [1, 1]} : vector<8x128xf32> to vector<8x32xf32>
    %122 = vector.extract_strided_slice %118 {offsets = [0, 96], sizes = [8, 32], strides = [1, 1]} : vector<8x128xf32> to vector<8x32xf32>
    %123 = arith.mulf %120, %108 : vector<8x32xf32>
    %124 = arith.mulf %119, %122 : vector<8x32xf32>
    %125 = arith.addf %123, %124 : vector<8x32xf32>
    %126 = math.tanh %125 : vector<8x32xf32>
    %127 = arith.mulf %121, %126 : vector<8x32xf32>
    %cst_21 = arith.constant dense<0.000000e+00> : vector<8x128xf32>
    %128 = tpu.matmul %127, %29, %cst_21 {dimension_numbers = #tpu.dot_dimension_numbers<[1], [0], [0], [1], [0, 0, 1, 1], [], []>} : vector<8x32xf32>, vector<32x128xf32>, vector<8x128xf32> -> vector<8x128xf32>
    %129 = arith.addf %54, %128 : vector<8x128xf32>
    %130 = math.tanh %129 : vector<8x128xf32>
    %cst_22 = arith.constant 5.000000e-01 : f32
    %131 = vector.broadcast %cst_22 : f32 to vector<8x128xf32>
    %132 = arith.mulf %131, %130 : vector<8x128xf32>
    %cst_23 = arith.constant 5.000000e-01 : f32
    %133 = vector.broadcast %cst_23 : f32 to vector<8x128xf32>
    %134 = arith.addf %132, %133 : vector<8x128xf32>
    %135 = arith.select %22, %130, %134 : vector<8x128xi1>, vector<8x128xf32>
    %136 = vector.extract_strided_slice %135 {offsets = [0, 0], sizes = [8, 32], strides = [1, 1]} : vector<8x128xf32> to vector<8x32xf32>
    %137 = vector.extract_strided_slice %135 {offsets = [0, 32], sizes = [8, 32], strides = [1, 1]} : vector<8x128xf32> to vector<8x32xf32>
    %138 = vector.extract_strided_slice %135 {offsets = [0, 64], sizes = [8, 32], strides = [1, 1]} : vector<8x128xf32> to vector<8x32xf32>
    %139 = vector.extract_strided_slice %135 {offsets = [0, 96], sizes = [8, 32], strides = [1, 1]} : vector<8x128xf32> to vector<8x32xf32>
    %140 = arith.mulf %137, %125 : vector<8x32xf32>
    %141 = arith.mulf %136, %139 : vector<8x32xf32>
    %142 = arith.addf %140, %141 : vector<8x32xf32>
    %143 = math.tanh %142 : vector<8x32xf32>
    %144 = arith.mulf %138, %143 : vector<8x32xf32>
    %cst_24 = arith.constant dense<0.000000e+00> : vector<8x128xf32>
    %145 = tpu.matmul %144, %29, %cst_24 {dimension_numbers = #tpu.dot_dimension_numbers<[1], [0], [0], [1], [0, 0, 1, 1], [], []>} : vector<8x32xf32>, vector<32x128xf32>, vector<8x128xf32> -> vector<8x128xf32>
    %146 = arith.addf %59, %145 : vector<8x128xf32>
    %147 = math.tanh %146 : vector<8x128xf32>
    %cst_25 = arith.constant 5.000000e-01 : f32
    %148 = vector.broadcast %cst_25 : f32 to vector<8x128xf32>
    %149 = arith.mulf %148, %147 : vector<8x128xf32>
    %cst_26 = arith.constant 5.000000e-01 : f32
    %150 = vector.broadcast %cst_26 : f32 to vector<8x128xf32>
    %151 = arith.addf %149, %150 : vector<8x128xf32>
    %152 = arith.select %22, %147, %151 : vector<8x128xi1>, vector<8x128xf32>
    %153 = vector.extract_strided_slice %152 {offsets = [0, 0], sizes = [8, 32], strides = [1, 1]} : vector<8x128xf32> to vector<8x32xf32>
    %154 = vector.extract_strided_slice %152 {offsets = [0, 32], sizes = [8, 32], strides = [1, 1]} : vector<8x128xf32> to vector<8x32xf32>
    %155 = vector.extract_strided_slice %152 {offsets = [0, 64], sizes = [8, 32], strides = [1, 1]} : vector<8x128xf32> to vector<8x32xf32>
    %156 = vector.extract_strided_slice %152 {offsets = [0, 96], sizes = [8, 32], strides = [1, 1]} : vector<8x128xf32> to vector<8x32xf32>
    %157 = arith.mulf %154, %142 : vector<8x32xf32>
    %158 = arith.mulf %153, %156 : vector<8x32xf32>
    %159 = arith.addf %157, %158 : vector<8x32xf32>
    %160 = math.tanh %159 : vector<8x32xf32>
    %161 = arith.mulf %155, %160 : vector<8x32xf32>
    %cst_27 = arith.constant dense<0.000000e+00> : vector<8x128xf32>
    %162 = tpu.matmul %161, %29, %cst_27 {dimension_numbers = #tpu.dot_dimension_numbers<[1], [0], [0], [1], [0, 0, 1, 1], [], []>} : vector<8x32xf32>, vector<32x128xf32>, vector<8x128xf32> -> vector<8x128xf32>
    %163 = arith.addf %64, %162 : vector<8x128xf32>
    %164 = math.tanh %163 : vector<8x128xf32>
    %cst_28 = arith.constant 5.000000e-01 : f32
    %165 = vector.broadcast %cst_28 : f32 to vector<8x128xf32>
    %166 = arith.mulf %165, %164 : vector<8x128xf32>
    %cst_29 = arith.constant 5.000000e-01 : f32
    %167 = vector.broadcast %cst_29 : f32 to vector<8x128xf32>
    %168 = arith.addf %166, %167 : vector<8x128xf32>
    %169 = arith.select %22, %164, %168 : vector<8x128xi1>, vector<8x128xf32>
    %170 = vector.extract_strided_slice %169 {offsets = [0, 0], sizes = [8, 32], strides = [1, 1]} : vector<8x128xf32> to vector<8x32xf32>
    %171 = vector.extract_strided_slice %169 {offsets = [0, 32], sizes = [8, 32], strides = [1, 1]} : vector<8x128xf32> to vector<8x32xf32>
    %172 = vector.extract_strided_slice %169 {offsets = [0, 64], sizes = [8, 32], strides = [1, 1]} : vector<8x128xf32> to vector<8x32xf32>
    %173 = vector.extract_strided_slice %169 {offsets = [0, 96], sizes = [8, 32], strides = [1, 1]} : vector<8x128xf32> to vector<8x32xf32>
    %174 = arith.mulf %171, %159 : vector<8x32xf32>
    %175 = arith.mulf %170, %173 : vector<8x32xf32>
    %176 = arith.addf %174, %175 : vector<8x32xf32>
    %177 = math.tanh %176 : vector<8x32xf32>
    %178 = arith.mulf %172, %177 : vector<8x32xf32>
    %cst_30 = arith.constant dense<0.000000e+00> : vector<8x128xf32>
    %179 = tpu.matmul %178, %29, %cst_30 {dimension_numbers = #tpu.dot_dimension_numbers<[1], [0], [0], [1], [0, 0, 1, 1], [], []>} : vector<8x32xf32>, vector<32x128xf32>, vector<8x128xf32> -> vector<8x128xf32>
    %180 = arith.addf %69, %179 : vector<8x128xf32>
    %181 = math.tanh %180 : vector<8x128xf32>
    %cst_31 = arith.constant 5.000000e-01 : f32
    %182 = vector.broadcast %cst_31 : f32 to vector<8x128xf32>
    %183 = arith.mulf %182, %181 : vector<8x128xf32>
    %cst_32 = arith.constant 5.000000e-01 : f32
    %184 = vector.broadcast %cst_32 : f32 to vector<8x128xf32>
    %185 = arith.addf %183, %184 : vector<8x128xf32>
    %186 = arith.select %22, %181, %185 : vector<8x128xi1>, vector<8x128xf32>
    %187 = vector.extract_strided_slice %186 {offsets = [0, 0], sizes = [8, 32], strides = [1, 1]} : vector<8x128xf32> to vector<8x32xf32>
    %188 = vector.extract_strided_slice %186 {offsets = [0, 32], sizes = [8, 32], strides = [1, 1]} : vector<8x128xf32> to vector<8x32xf32>
    %189 = vector.extract_strided_slice %186 {offsets = [0, 64], sizes = [8, 32], strides = [1, 1]} : vector<8x128xf32> to vector<8x32xf32>
    %190 = vector.extract_strided_slice %186 {offsets = [0, 96], sizes = [8, 32], strides = [1, 1]} : vector<8x128xf32> to vector<8x32xf32>
    %191 = arith.mulf %188, %176 : vector<8x32xf32>
    %192 = arith.mulf %187, %190 : vector<8x32xf32>
    %193 = arith.addf %191, %192 : vector<8x32xf32>
    %194 = math.tanh %193 : vector<8x32xf32>
    %195 = arith.mulf %189, %194 : vector<8x32xf32>
    %cst_33 = arith.constant dense<0.000000e+00> : vector<8x128xf32>
    %196 = tpu.matmul %195, %29, %cst_33 {dimension_numbers = #tpu.dot_dimension_numbers<[1], [0], [0], [1], [0, 0, 1, 1], [], []>} : vector<8x32xf32>, vector<32x128xf32>, vector<8x128xf32> -> vector<8x128xf32>
    %197 = arith.addf %74, %196 : vector<8x128xf32>
    %198 = math.tanh %197 : vector<8x128xf32>
    %cst_34 = arith.constant 5.000000e-01 : f32
    %199 = vector.broadcast %cst_34 : f32 to vector<8x128xf32>
    %200 = arith.mulf %199, %198 : vector<8x128xf32>
    %cst_35 = arith.constant 5.000000e-01 : f32
    %201 = vector.broadcast %cst_35 : f32 to vector<8x128xf32>
    %202 = arith.addf %200, %201 : vector<8x128xf32>
    %203 = arith.select %22, %198, %202 : vector<8x128xi1>, vector<8x128xf32>
    %204 = vector.extract_strided_slice %203 {offsets = [0, 0], sizes = [8, 32], strides = [1, 1]} : vector<8x128xf32> to vector<8x32xf32>
    %205 = vector.extract_strided_slice %203 {offsets = [0, 32], sizes = [8, 32], strides = [1, 1]} : vector<8x128xf32> to vector<8x32xf32>
    %206 = vector.extract_strided_slice %203 {offsets = [0, 64], sizes = [8, 32], strides = [1, 1]} : vector<8x128xf32> to vector<8x32xf32>
    %207 = vector.extract_strided_slice %203 {offsets = [0, 96], sizes = [8, 32], strides = [1, 1]} : vector<8x128xf32> to vector<8x32xf32>
    %208 = arith.mulf %205, %193 : vector<8x32xf32>
    %209 = arith.mulf %204, %207 : vector<8x32xf32>
    %210 = arith.addf %208, %209 : vector<8x32xf32>
    %211 = math.tanh %210 : vector<8x32xf32>
    %212 = arith.mulf %206, %211 : vector<8x32xf32>
    %213 = arith.select %25, %212, %93 : vector<8x32xi1>, vector<8x32xf32>
    %214 = arith.select %25, %195, %110 : vector<8x32xi1>, vector<8x32xf32>
    %215 = arith.select %25, %178, %127 : vector<8x32xi1>, vector<8x32xf32>
    %216 = arith.select %25, %161, %144 : vector<8x32xi1>, vector<8x32xf32>
    %217 = arith.select %25, %144, %161 : vector<8x32xi1>, vector<8x32xf32>
    %218 = arith.select %25, %127, %178 : vector<8x32xi1>, vector<8x32xf32>
    %219 = arith.select %25, %110, %195 : vector<8x32xi1>, vector<8x32xf32>
    %220 = arith.select %25, %93, %212 : vector<8x32xi1>, vector<8x32xf32>
    %221 = tpu.concatenate %213, %214, %215, %216, %217, %218, %219, %220 in 0 : vector<8x32xf32>, vector<8x32xf32>, vector<8x32xf32>, vector<8x32xf32>, vector<8x32xf32>, vector<8x32xf32>, vector<8x32xf32>, vector<8x32xf32> -> vector<64x32xf32>
    %c0_36 = arith.constant 0 : index
    %c0_37 = arith.constant 0 : index
    %222 = vector.load %arg4[%c0_36, %c0_37] : memref<32x128xf32, #tpu.memory_space<vmem>>, vector<32x128xf32>
    %c0_38 = arith.constant 0 : index
    %c0_39 = arith.constant 0 : index
    %223 = vector.load %arg5[%c0_38, %c0_39] : memref<32x128xf32, #tpu.memory_space<vmem>>, vector<32x128xf32>
    %c0_40 = arith.constant 0 : index
    %c0_41 = arith.constant 0 : index
    %224 = vector.load %arg6[%c0_40, %c0_41] : memref<1x128xf32, #tpu.memory_space<vmem>>, vector<1x128xf32>
    %cst_42 = arith.constant dense<0.000000e+00> : vector<64x128xf32>
    %225 = tpu.matmul %221, %222, %cst_42 {dimension_numbers = #tpu.dot_dimension_numbers<[1], [0], [0], [1], [0, 0, 1, 1], [], []>} : vector<64x32xf32>, vector<32x128xf32>, vector<64x128xf32> -> vector<64x128xf32>
    %226 = vector.broadcast %224 : vector<1x128xf32> to vector<64x128xf32>
    %227 = arith.addf %225, %226 : vector<64x128xf32>
    %228 = vector.shape_cast %227 : vector<64x128xf32> to vector<8x8x128xf32>
    %229 = vector.extract_strided_slice %228 {offsets = [7, 0, 0], sizes = [1, 8, 128], strides = [1, 1, 1]} : vector<8x8x128xf32> to vector<1x8x128xf32>
    %230 = vector.shape_cast %229 : vector<1x8x128xf32> to vector<8x128xf32>
    %231 = vector.extract_strided_slice %228 {offsets = [0, 0, 0], sizes = [1, 8, 128], strides = [1, 1, 1]} : vector<8x8x128xf32> to vector<1x8x128xf32>
    %232 = vector.shape_cast %231 : vector<1x8x128xf32> to vector<8x128xf32>
    %233 = arith.select %20, %230, %232 : vector<8x128xi1>, vector<8x128xf32>
    %234 = vector.extract_strided_slice %228 {offsets = [6, 0, 0], sizes = [1, 8, 128], strides = [1, 1, 1]} : vector<8x8x128xf32> to vector<1x8x128xf32>
    %235 = vector.shape_cast %234 : vector<1x8x128xf32> to vector<8x128xf32>
    %236 = vector.extract_strided_slice %228 {offsets = [1, 0, 0], sizes = [1, 8, 128], strides = [1, 1, 1]} : vector<8x8x128xf32> to vector<1x8x128xf32>
    %237 = vector.shape_cast %236 : vector<1x8x128xf32> to vector<8x128xf32>
    %238 = arith.select %20, %235, %237 : vector<8x128xi1>, vector<8x128xf32>
    %239 = vector.extract_strided_slice %228 {offsets = [5, 0, 0], sizes = [1, 8, 128], strides = [1, 1, 1]} : vector<8x8x128xf32> to vector<1x8x128xf32>
    %240 = vector.shape_cast %239 : vector<1x8x128xf32> to vector<8x128xf32>
    %241 = vector.extract_strided_slice %228 {offsets = [2, 0, 0], sizes = [1, 8, 128], strides = [1, 1, 1]} : vector<8x8x128xf32> to vector<1x8x128xf32>
    %242 = vector.shape_cast %241 : vector<1x8x128xf32> to vector<8x128xf32>
    %243 = arith.select %20, %240, %242 : vector<8x128xi1>, vector<8x128xf32>
    %244 = vector.extract_strided_slice %228 {offsets = [4, 0, 0], sizes = [1, 8, 128], strides = [1, 1, 1]} : vector<8x8x128xf32> to vector<1x8x128xf32>
    %245 = vector.shape_cast %244 : vector<1x8x128xf32> to vector<8x128xf32>
    %246 = vector.extract_strided_slice %228 {offsets = [3, 0, 0], sizes = [1, 8, 128], strides = [1, 1, 1]} : vector<8x8x128xf32> to vector<1x8x128xf32>
    %247 = vector.shape_cast %246 : vector<1x8x128xf32> to vector<8x128xf32>
    %248 = arith.select %20, %245, %247 : vector<8x128xi1>, vector<8x128xf32>
    %249 = vector.extract_strided_slice %228 {offsets = [3, 0, 0], sizes = [1, 8, 128], strides = [1, 1, 1]} : vector<8x8x128xf32> to vector<1x8x128xf32>
    %250 = vector.shape_cast %249 : vector<1x8x128xf32> to vector<8x128xf32>
    %251 = vector.extract_strided_slice %228 {offsets = [4, 0, 0], sizes = [1, 8, 128], strides = [1, 1, 1]} : vector<8x8x128xf32> to vector<1x8x128xf32>
    %252 = vector.shape_cast %251 : vector<1x8x128xf32> to vector<8x128xf32>
    %253 = arith.select %20, %250, %252 : vector<8x128xi1>, vector<8x128xf32>
    %254 = vector.extract_strided_slice %228 {offsets = [2, 0, 0], sizes = [1, 8, 128], strides = [1, 1, 1]} : vector<8x8x128xf32> to vector<1x8x128xf32>
    %255 = vector.shape_cast %254 : vector<1x8x128xf32> to vector<8x128xf32>
    %256 = vector.extract_strided_slice %228 {offsets = [5, 0, 0], sizes = [1, 8, 128], strides = [1, 1, 1]} : vector<8x8x128xf32> to vector<1x8x128xf32>
    %257 = vector.shape_cast %256 : vector<1x8x128xf32> to vector<8x128xf32>
    %258 = arith.select %20, %255, %257 : vector<8x128xi1>, vector<8x128xf32>
    %259 = vector.extract_strided_slice %228 {offsets = [1, 0, 0], sizes = [1, 8, 128], strides = [1, 1, 1]} : vector<8x8x128xf32> to vector<1x8x128xf32>
    %260 = vector.shape_cast %259 : vector<1x8x128xf32> to vector<8x128xf32>
    %261 = vector.extract_strided_slice %228 {offsets = [6, 0, 0], sizes = [1, 8, 128], strides = [1, 1, 1]} : vector<8x8x128xf32> to vector<1x8x128xf32>
    %262 = vector.shape_cast %261 : vector<1x8x128xf32> to vector<8x128xf32>
    %263 = arith.select %20, %260, %262 : vector<8x128xi1>, vector<8x128xf32>
    %264 = vector.extract_strided_slice %228 {offsets = [0, 0, 0], sizes = [1, 8, 128], strides = [1, 1, 1]} : vector<8x8x128xf32> to vector<1x8x128xf32>
    %265 = vector.shape_cast %264 : vector<1x8x128xf32> to vector<8x128xf32>
    %266 = vector.extract_strided_slice %228 {offsets = [7, 0, 0], sizes = [1, 8, 128], strides = [1, 1, 1]} : vector<8x8x128xf32> to vector<1x8x128xf32>
    %267 = vector.shape_cast %266 : vector<1x8x128xf32> to vector<8x128xf32>
    %268 = arith.select %20, %265, %267 : vector<8x128xi1>, vector<8x128xf32>
    %cst_43 = arith.constant 0.000000e+00 : f32
    %269 = vector.broadcast %cst_43 : f32 to vector<8x32xf32>
    %cst_44 = arith.constant 0.000000e+00 : f32
    %270 = vector.broadcast %cst_44 : f32 to vector<8x32xf32>
    %cst_45 = arith.constant dense<0.000000e+00> : vector<8x128xf32>
    %271 = tpu.matmul %269, %223, %cst_45 {dimension_numbers = #tpu.dot_dimension_numbers<[1], [0], [0], [1], [0, 0, 1, 1], [], []>} : vector<8x32xf32>, vector<32x128xf32>, vector<8x128xf32> -> vector<8x128xf32>
    %272 = arith.addf %233, %271 : vector<8x128xf32>
    %273 = math.tanh %272 : vector<8x128xf32>
    %cst_46 = arith.constant 5.000000e-01 : f32
    %274 = vector.broadcast %cst_46 : f32 to vector<8x128xf32>
    %275 = arith.mulf %274, %273 : vector<8x128xf32>
    %cst_47 = arith.constant 5.000000e-01 : f32
    %276 = vector.broadcast %cst_47 : f32 to vector<8x128xf32>
    %277 = arith.addf %275, %276 : vector<8x128xf32>
    %278 = arith.select %22, %273, %277 : vector<8x128xi1>, vector<8x128xf32>
    %279 = vector.extract_strided_slice %278 {offsets = [0, 0], sizes = [8, 32], strides = [1, 1]} : vector<8x128xf32> to vector<8x32xf32>
    %280 = vector.extract_strided_slice %278 {offsets = [0, 32], sizes = [8, 32], strides = [1, 1]} : vector<8x128xf32> to vector<8x32xf32>
    %281 = vector.extract_strided_slice %278 {offsets = [0, 64], sizes = [8, 32], strides = [1, 1]} : vector<8x128xf32> to vector<8x32xf32>
    %282 = vector.extract_strided_slice %278 {offsets = [0, 96], sizes = [8, 32], strides = [1, 1]} : vector<8x128xf32> to vector<8x32xf32>
    %283 = arith.mulf %280, %270 : vector<8x32xf32>
    %284 = arith.mulf %279, %282 : vector<8x32xf32>
    %285 = arith.addf %283, %284 : vector<8x32xf32>
    %286 = math.tanh %285 : vector<8x32xf32>
    %287 = arith.mulf %281, %286 : vector<8x32xf32>
    %cst_48 = arith.constant dense<0.000000e+00> : vector<8x128xf32>
    %288 = tpu.matmul %287, %223, %cst_48 {dimension_numbers = #tpu.dot_dimension_numbers<[1], [0], [0], [1], [0, 0, 1, 1], [], []>} : vector<8x32xf32>, vector<32x128xf32>, vector<8x128xf32> -> vector<8x128xf32>
    %289 = arith.addf %238, %288 : vector<8x128xf32>
    %290 = math.tanh %289 : vector<8x128xf32>
    %cst_49 = arith.constant 5.000000e-01 : f32
    %291 = vector.broadcast %cst_49 : f32 to vector<8x128xf32>
    %292 = arith.mulf %291, %290 : vector<8x128xf32>
    %cst_50 = arith.constant 5.000000e-01 : f32
    %293 = vector.broadcast %cst_50 : f32 to vector<8x128xf32>
    %294 = arith.addf %292, %293 : vector<8x128xf32>
    %295 = arith.select %22, %290, %294 : vector<8x128xi1>, vector<8x128xf32>
    %296 = vector.extract_strided_slice %295 {offsets = [0, 0], sizes = [8, 32], strides = [1, 1]} : vector<8x128xf32> to vector<8x32xf32>
    %297 = vector.extract_strided_slice %295 {offsets = [0, 32], sizes = [8, 32], strides = [1, 1]} : vector<8x128xf32> to vector<8x32xf32>
    %298 = vector.extract_strided_slice %295 {offsets = [0, 64], sizes = [8, 32], strides = [1, 1]} : vector<8x128xf32> to vector<8x32xf32>
    %299 = vector.extract_strided_slice %295 {offsets = [0, 96], sizes = [8, 32], strides = [1, 1]} : vector<8x128xf32> to vector<8x32xf32>
    %300 = arith.mulf %297, %285 : vector<8x32xf32>
    %301 = arith.mulf %296, %299 : vector<8x32xf32>
    %302 = arith.addf %300, %301 : vector<8x32xf32>
    %303 = math.tanh %302 : vector<8x32xf32>
    %304 = arith.mulf %298, %303 : vector<8x32xf32>
    %cst_51 = arith.constant dense<0.000000e+00> : vector<8x128xf32>
    %305 = tpu.matmul %304, %223, %cst_51 {dimension_numbers = #tpu.dot_dimension_numbers<[1], [0], [0], [1], [0, 0, 1, 1], [], []>} : vector<8x32xf32>, vector<32x128xf32>, vector<8x128xf32> -> vector<8x128xf32>
    %306 = arith.addf %243, %305 : vector<8x128xf32>
    %307 = math.tanh %306 : vector<8x128xf32>
    %cst_52 = arith.constant 5.000000e-01 : f32
    %308 = vector.broadcast %cst_52 : f32 to vector<8x128xf32>
    %309 = arith.mulf %308, %307 : vector<8x128xf32>
    %cst_53 = arith.constant 5.000000e-01 : f32
    %310 = vector.broadcast %cst_53 : f32 to vector<8x128xf32>
    %311 = arith.addf %309, %310 : vector<8x128xf32>
    %312 = arith.select %22, %307, %311 : vector<8x128xi1>, vector<8x128xf32>
    %313 = vector.extract_strided_slice %312 {offsets = [0, 0], sizes = [8, 32], strides = [1, 1]} : vector<8x128xf32> to vector<8x32xf32>
    %314 = vector.extract_strided_slice %312 {offsets = [0, 32], sizes = [8, 32], strides = [1, 1]} : vector<8x128xf32> to vector<8x32xf32>
    %315 = vector.extract_strided_slice %312 {offsets = [0, 64], sizes = [8, 32], strides = [1, 1]} : vector<8x128xf32> to vector<8x32xf32>
    %316 = vector.extract_strided_slice %312 {offsets = [0, 96], sizes = [8, 32], strides = [1, 1]} : vector<8x128xf32> to vector<8x32xf32>
    %317 = arith.mulf %314, %302 : vector<8x32xf32>
    %318 = arith.mulf %313, %316 : vector<8x32xf32>
    %319 = arith.addf %317, %318 : vector<8x32xf32>
    %320 = math.tanh %319 : vector<8x32xf32>
    %321 = arith.mulf %315, %320 : vector<8x32xf32>
    %cst_54 = arith.constant dense<0.000000e+00> : vector<8x128xf32>
    %322 = tpu.matmul %321, %223, %cst_54 {dimension_numbers = #tpu.dot_dimension_numbers<[1], [0], [0], [1], [0, 0, 1, 1], [], []>} : vector<8x32xf32>, vector<32x128xf32>, vector<8x128xf32> -> vector<8x128xf32>
    %323 = arith.addf %248, %322 : vector<8x128xf32>
    %324 = math.tanh %323 : vector<8x128xf32>
    %cst_55 = arith.constant 5.000000e-01 : f32
    %325 = vector.broadcast %cst_55 : f32 to vector<8x128xf32>
    %326 = arith.mulf %325, %324 : vector<8x128xf32>
    %cst_56 = arith.constant 5.000000e-01 : f32
    %327 = vector.broadcast %cst_56 : f32 to vector<8x128xf32>
    %328 = arith.addf %326, %327 : vector<8x128xf32>
    %329 = arith.select %22, %324, %328 : vector<8x128xi1>, vector<8x128xf32>
    %330 = vector.extract_strided_slice %329 {offsets = [0, 0], sizes = [8, 32], strides = [1, 1]} : vector<8x128xf32> to vector<8x32xf32>
    %331 = vector.extract_strided_slice %329 {offsets = [0, 32], sizes = [8, 32], strides = [1, 1]} : vector<8x128xf32> to vector<8x32xf32>
    %332 = vector.extract_strided_slice %329 {offsets = [0, 64], sizes = [8, 32], strides = [1, 1]} : vector<8x128xf32> to vector<8x32xf32>
    %333 = vector.extract_strided_slice %329 {offsets = [0, 96], sizes = [8, 32], strides = [1, 1]} : vector<8x128xf32> to vector<8x32xf32>
    %334 = arith.mulf %331, %319 : vector<8x32xf32>
    %335 = arith.mulf %330, %333 : vector<8x32xf32>
    %336 = arith.addf %334, %335 : vector<8x32xf32>
    %337 = math.tanh %336 : vector<8x32xf32>
    %338 = arith.mulf %332, %337 : vector<8x32xf32>
    %cst_57 = arith.constant dense<0.000000e+00> : vector<8x128xf32>
    %339 = tpu.matmul %338, %223, %cst_57 {dimension_numbers = #tpu.dot_dimension_numbers<[1], [0], [0], [1], [0, 0, 1, 1], [], []>} : vector<8x32xf32>, vector<32x128xf32>, vector<8x128xf32> -> vector<8x128xf32>
    %340 = arith.addf %253, %339 : vector<8x128xf32>
    %341 = math.tanh %340 : vector<8x128xf32>
    %cst_58 = arith.constant 5.000000e-01 : f32
    %342 = vector.broadcast %cst_58 : f32 to vector<8x128xf32>
    %343 = arith.mulf %342, %341 : vector<8x128xf32>
    %cst_59 = arith.constant 5.000000e-01 : f32
    %344 = vector.broadcast %cst_59 : f32 to vector<8x128xf32>
    %345 = arith.addf %343, %344 : vector<8x128xf32>
    %346 = arith.select %22, %341, %345 : vector<8x128xi1>, vector<8x128xf32>
    %347 = vector.extract_strided_slice %346 {offsets = [0, 0], sizes = [8, 32], strides = [1, 1]} : vector<8x128xf32> to vector<8x32xf32>
    %348 = vector.extract_strided_slice %346 {offsets = [0, 32], sizes = [8, 32], strides = [1, 1]} : vector<8x128xf32> to vector<8x32xf32>
    %349 = vector.extract_strided_slice %346 {offsets = [0, 64], sizes = [8, 32], strides = [1, 1]} : vector<8x128xf32> to vector<8x32xf32>
    %350 = vector.extract_strided_slice %346 {offsets = [0, 96], sizes = [8, 32], strides = [1, 1]} : vector<8x128xf32> to vector<8x32xf32>
    %351 = arith.mulf %348, %336 : vector<8x32xf32>
    %352 = arith.mulf %347, %350 : vector<8x32xf32>
    %353 = arith.addf %351, %352 : vector<8x32xf32>
    %354 = math.tanh %353 : vector<8x32xf32>
    %355 = arith.mulf %349, %354 : vector<8x32xf32>
    %cst_60 = arith.constant dense<0.000000e+00> : vector<8x128xf32>
    %356 = tpu.matmul %355, %223, %cst_60 {dimension_numbers = #tpu.dot_dimension_numbers<[1], [0], [0], [1], [0, 0, 1, 1], [], []>} : vector<8x32xf32>, vector<32x128xf32>, vector<8x128xf32> -> vector<8x128xf32>
    %357 = arith.addf %258, %356 : vector<8x128xf32>
    %358 = math.tanh %357 : vector<8x128xf32>
    %cst_61 = arith.constant 5.000000e-01 : f32
    %359 = vector.broadcast %cst_61 : f32 to vector<8x128xf32>
    %360 = arith.mulf %359, %358 : vector<8x128xf32>
    %cst_62 = arith.constant 5.000000e-01 : f32
    %361 = vector.broadcast %cst_62 : f32 to vector<8x128xf32>
    %362 = arith.addf %360, %361 : vector<8x128xf32>
    %363 = arith.select %22, %358, %362 : vector<8x128xi1>, vector<8x128xf32>
    %364 = vector.extract_strided_slice %363 {offsets = [0, 0], sizes = [8, 32], strides = [1, 1]} : vector<8x128xf32> to vector<8x32xf32>
    %365 = vector.extract_strided_slice %363 {offsets = [0, 32], sizes = [8, 32], strides = [1, 1]} : vector<8x128xf32> to vector<8x32xf32>
    %366 = vector.extract_strided_slice %363 {offsets = [0, 64], sizes = [8, 32], strides = [1, 1]} : vector<8x128xf32> to vector<8x32xf32>
    %367 = vector.extract_strided_slice %363 {offsets = [0, 96], sizes = [8, 32], strides = [1, 1]} : vector<8x128xf32> to vector<8x32xf32>
    %368 = arith.mulf %365, %353 : vector<8x32xf32>
    %369 = arith.mulf %364, %367 : vector<8x32xf32>
    %370 = arith.addf %368, %369 : vector<8x32xf32>
    %371 = math.tanh %370 : vector<8x32xf32>
    %372 = arith.mulf %366, %371 : vector<8x32xf32>
    %cst_63 = arith.constant dense<0.000000e+00> : vector<8x128xf32>
    %373 = tpu.matmul %372, %223, %cst_63 {dimension_numbers = #tpu.dot_dimension_numbers<[1], [0], [0], [1], [0, 0, 1, 1], [], []>} : vector<8x32xf32>, vector<32x128xf32>, vector<8x128xf32> -> vector<8x128xf32>
    %374 = arith.addf %263, %373 : vector<8x128xf32>
    %375 = math.tanh %374 : vector<8x128xf32>
    %cst_64 = arith.constant 5.000000e-01 : f32
    %376 = vector.broadcast %cst_64 : f32 to vector<8x128xf32>
    %377 = arith.mulf %376, %375 : vector<8x128xf32>
    %cst_65 = arith.constant 5.000000e-01 : f32
    %378 = vector.broadcast %cst_65 : f32 to vector<8x128xf32>
    %379 = arith.addf %377, %378 : vector<8x128xf32>
    %380 = arith.select %22, %375, %379 : vector<8x128xi1>, vector<8x128xf32>
    %381 = vector.extract_strided_slice %380 {offsets = [0, 0], sizes = [8, 32], strides = [1, 1]} : vector<8x128xf32> to vector<8x32xf32>
    %382 = vector.extract_strided_slice %380 {offsets = [0, 32], sizes = [8, 32], strides = [1, 1]} : vector<8x128xf32> to vector<8x32xf32>
    %383 = vector.extract_strided_slice %380 {offsets = [0, 64], sizes = [8, 32], strides = [1, 1]} : vector<8x128xf32> to vector<8x32xf32>
    %384 = vector.extract_strided_slice %380 {offsets = [0, 96], sizes = [8, 32], strides = [1, 1]} : vector<8x128xf32> to vector<8x32xf32>
    %385 = arith.mulf %382, %370 : vector<8x32xf32>
    %386 = arith.mulf %381, %384 : vector<8x32xf32>
    %387 = arith.addf %385, %386 : vector<8x32xf32>
    %388 = math.tanh %387 : vector<8x32xf32>
    %389 = arith.mulf %383, %388 : vector<8x32xf32>
    %cst_66 = arith.constant dense<0.000000e+00> : vector<8x128xf32>
    %390 = tpu.matmul %389, %223, %cst_66 {dimension_numbers = #tpu.dot_dimension_numbers<[1], [0], [0], [1], [0, 0, 1, 1], [], []>} : vector<8x32xf32>, vector<32x128xf32>, vector<8x128xf32> -> vector<8x128xf32>
    %391 = arith.addf %268, %390 : vector<8x128xf32>
    %392 = math.tanh %391 : vector<8x128xf32>
    %cst_67 = arith.constant 5.000000e-01 : f32
    %393 = vector.broadcast %cst_67 : f32 to vector<8x128xf32>
    %394 = arith.mulf %393, %392 : vector<8x128xf32>
    %cst_68 = arith.constant 5.000000e-01 : f32
    %395 = vector.broadcast %cst_68 : f32 to vector<8x128xf32>
    %396 = arith.addf %394, %395 : vector<8x128xf32>
    %397 = arith.select %22, %392, %396 : vector<8x128xi1>, vector<8x128xf32>
    %398 = vector.extract_strided_slice %397 {offsets = [0, 0], sizes = [8, 32], strides = [1, 1]} : vector<8x128xf32> to vector<8x32xf32>
    %399 = vector.extract_strided_slice %397 {offsets = [0, 32], sizes = [8, 32], strides = [1, 1]} : vector<8x128xf32> to vector<8x32xf32>
    %400 = vector.extract_strided_slice %397 {offsets = [0, 64], sizes = [8, 32], strides = [1, 1]} : vector<8x128xf32> to vector<8x32xf32>
    %401 = vector.extract_strided_slice %397 {offsets = [0, 96], sizes = [8, 32], strides = [1, 1]} : vector<8x128xf32> to vector<8x32xf32>
    %402 = arith.mulf %399, %387 : vector<8x32xf32>
    %403 = arith.mulf %398, %401 : vector<8x32xf32>
    %404 = arith.addf %402, %403 : vector<8x32xf32>
    %405 = math.tanh %404 : vector<8x32xf32>
    %406 = arith.mulf %400, %405 : vector<8x32xf32>
    %407 = arith.select %25, %406, %287 : vector<8x32xi1>, vector<8x32xf32>
    %408 = arith.select %25, %389, %304 : vector<8x32xi1>, vector<8x32xf32>
    %409 = arith.select %25, %372, %321 : vector<8x32xi1>, vector<8x32xf32>
    %410 = arith.select %25, %355, %338 : vector<8x32xi1>, vector<8x32xf32>
    %411 = arith.select %25, %338, %355 : vector<8x32xi1>, vector<8x32xf32>
    %412 = arith.select %25, %321, %372 : vector<8x32xi1>, vector<8x32xf32>
    %413 = arith.select %25, %304, %389 : vector<8x32xi1>, vector<8x32xf32>
    %414 = arith.select %25, %287, %406 : vector<8x32xi1>, vector<8x32xf32>
    %415 = tpu.concatenate %407, %408, %409, %410, %411, %412, %413, %414 in 0 : vector<8x32xf32>, vector<8x32xf32>, vector<8x32xf32>, vector<8x32xf32>, vector<8x32xf32>, vector<8x32xf32>, vector<8x32xf32>, vector<8x32xf32> -> vector<64x32xf32>
    %c0_69 = arith.constant 0 : index
    %c0_70 = arith.constant 0 : index
    %416 = vector.load %arg7[%c0_69, %c0_70] : memref<32x8xf32, #tpu.memory_space<vmem>>, vector<32x8xf32>
    %cst_71 = arith.constant dense<0.000000e+00> : vector<64x8xf32>
    %417 = tpu.matmul %415, %416, %cst_71 {dimension_numbers = #tpu.dot_dimension_numbers<[1], [0], [0], [1], [0, 0, 1, 1], [], []>} : vector<64x32xf32>, vector<32x8xf32>, vector<64x8xf32> -> vector<64x8xf32>
    %c0_72 = arith.constant 0 : index
    %c0_73 = arith.constant 0 : index
    %418 = vector.load %arg8[%c0_72, %c0_73] : memref<1x8xf32, #tpu.memory_space<vmem>>, vector<1x8xf32>
    %419 = vector.broadcast %418 : vector<1x8xf32> to vector<64x8xf32>
    %420 = arith.addf %417, %419 : vector<64x8xf32>
    %421 = vector.shape_cast %420 : vector<64x8xf32> to vector<8x8x8xf32>
    %c0_74 = arith.constant 0 : index
    %c0_75 = arith.constant 0 : index
    %422 = vector.load %arg9[%c0_74, %c0_75] : memref<8x8xi32, #tpu.memory_space<vmem>>, vector<8x8xi32>
    %c0_76 = arith.constant 0 : index
    %c0_77 = arith.constant 0 : index
    %c0_78 = arith.constant 0 : index
    %423 = vector.load %arg10[%c0_76, %c0_77, %c0_78] : memref<8x8x1xf32, #tpu.memory_space<vmem>>, vector<8x8x1xf32>
    %c0_79 = arith.constant 0 : index
    %c0_80 = arith.constant 0 : index
    %424 = vector.load %arg11[%c0_79, %c0_80] : memref<8x1xf32, #tpu.memory_space<vmem>>, vector<8x1xf32>
    %c0_81 = arith.constant 0 : index
    %c0_82 = arith.constant 0 : index
    %425 = vector.load %arg12[%c0_81, %c0_82] : memref<8x8xf32, #tpu.memory_space<vmem>>, vector<8x8xf32>
    %c0_83 = arith.constant 0 : index
    %c0_84 = arith.constant 0 : index
    %426 = vector.load %arg13[%c0_83, %c0_84] : memref<1x8xf32, #tpu.memory_space<vmem>>, vector<1x8xf32>
    %c0_85 = arith.constant 0 : index
    %c0_86 = arith.constant 0 : index
    %427 = vector.load %arg14[%c0_85, %c0_86] : memref<1x8xf32, #tpu.memory_space<vmem>>, vector<1x8xf32>
    %428 = tpu.iota {dimensions = array<i32: 2>} : vector<8x8x8xi32>
    %429 = vector.shape_cast %422 : vector<8x8xi32> to vector<8x8x1xi32>
    %430 = vector.broadcast %429 : vector<8x8x1xi32> to vector<8x8x8xi32>
    %431 = arith.cmpi eq, %428, %430 : vector<8x8x8xi32>
    %432 = arith.extui %431 : vector<8x8x8xi1> to vector<8x8x8xi32>
    %433 = arith.sitofp %432 : vector<8x8x8xi32> to vector<8x8x8xf32>
    %434 = arith.mulf %421, %433 : vector<8x8x8xf32>
    %cst_87 = arith.constant dense<0.000000e+00> : vector<8x8xf32>
    %435 = vector.multi_reduction <add>, %434, %cst_87 [2] : vector<8x8x8xf32> to vector<8x8xf32>
    %436 = vector.shape_cast %435 : vector<8x8xf32> to vector<8x8x1xf32>
    %437 = vector.extract_strided_slice %433 {offsets = [0, 0, 0], sizes = [7, 8, 8], strides = [1, 1, 1]} : vector<8x8x8xf32> to vector<7x8x8xf32>
    %438 = vector.shape_cast %437 : vector<7x8x8xf32> to vector<7x8x8x1xf32>
    %439 = vector.shape_cast %425 : vector<8x8xf32> to vector<1x1x8x8xf32>
    %440 = vector.broadcast %438 : vector<7x8x8x1xf32> to vector<7x8x8x8xf32>
    %441 = vector.broadcast %439 : vector<1x1x8x8xf32> to vector<7x8x8x8xf32>
    %442 = arith.mulf %440, %441 : vector<7x8x8x8xf32>
    %cst_88 = arith.constant dense<0.000000e+00> : vector<7x8x8xf32>
    %443 = vector.multi_reduction <add>, %442, %cst_88 [2] : vector<7x8x8x8xf32> to vector<7x8x8xf32>
    %444 = vector.extract_strided_slice %433 {offsets = [1, 0, 0], sizes = [7, 8, 8], strides = [1, 1, 1]} : vector<8x8x8xf32> to vector<7x8x8xf32>
    %445 = arith.mulf %443, %444 : vector<7x8x8xf32>
    %cst_89 = arith.constant dense<0.000000e+00> : vector<7x8xf32>
    %446 = vector.multi_reduction <add>, %445, %cst_89 [2] : vector<7x8x8xf32> to vector<7x8xf32>
    %447 = vector.shape_cast %446 : vector<7x8xf32> to vector<7x8x1xf32>
    %448 = vector.extract_strided_slice %433 {offsets = [0, 0, 0], sizes = [1, 8, 8], strides = [1, 1, 1]} : vector<8x8x8xf32> to vector<1x8x8xf32>
    %449 = vector.shape_cast %448 : vector<1x8x8xf32> to vector<8x8xf32>
    %450 = vector.broadcast %426 : vector<1x8xf32> to vector<8x8xf32>
    %451 = arith.mulf %449, %450 : vector<8x8xf32>
    %cst_90 = arith.constant dense<0.000000e+00> : vector<8xf32>
    %452 = vector.multi_reduction <add>, %451, %cst_90 [1] : vector<8x8xf32> to vector<8xf32>
    %453 = vector.shape_cast %452 : vector<8xf32> to vector<8x1xf32>
    %454 = vector.extract_strided_slice %423 {offsets = [1, 0, 0], sizes = [7, 8, 1], strides = [1, 1, 1]} : vector<8x8x1xf32> to vector<7x8x1xf32>
    %455 = vector.extract_strided_slice %436 {offsets = [1, 0, 0], sizes = [7, 8, 1], strides = [1, 1, 1]} : vector<8x8x1xf32> to vector<7x8x1xf32>
    %456 = arith.addf %447, %455 : vector<7x8x1xf32>
    %457 = arith.mulf %454, %456 : vector<7x8x1xf32>
    %cst_91 = arith.constant dense<0.000000e+00> : vector<8x1xf32>
    %458 = vector.multi_reduction <add>, %457, %cst_91 [0] : vector<7x8x1xf32> to vector<8x1xf32>
    %cst_92 = arith.constant dense<0.000000e+00> : vector<8x1xf32>
    %459 = vector.multi_reduction <add>, %423, %cst_92 [0] : vector<8x8x1xf32> to vector<8x1xf32>
    %460 = arith.fptosi %459 : vector<8x1xf32> to vector<8x1xi32>
    %c1_i32 = arith.constant 1 : i32
    %461 = vector.broadcast %c1_i32 : i32 to vector<8x1xi32>
    %462 = arith.subi %460, %461 : vector<8x1xi32>
    %463 = tpu.iota {dimensions = array<i32: 0>} : vector<8x8x1xi32>
    %464 = vector.shape_cast %462 : vector<8x1xi32> to vector<1x8x1xi32>
    %465 = vector.broadcast %464 : vector<1x8x1xi32> to vector<8x8x1xi32>
    %466 = arith.cmpi eq, %463, %465 : vector<8x8x1xi32>
    %467 = arith.extui %466 : vector<8x8x1xi1> to vector<8x8x1xi32>
    %468 = arith.sitofp %467 : vector<8x8x1xi32> to vector<8x8x1xf32>
    %469 = vector.broadcast %468 : vector<8x8x1xf32> to vector<8x8x8xf32>
    %470 = arith.mulf %469, %433 : vector<8x8x8xf32>
    %cst_93 = arith.constant dense<0.000000e+00> : vector<8x8xf32>
    %471 = vector.multi_reduction <add>, %470, %cst_93 [0] : vector<8x8x8xf32> to vector<8x8xf32>
    %472 = vector.broadcast %427 : vector<1x8xf32> to vector<8x8xf32>
    %473 = arith.mulf %471, %472 : vector<8x8xf32>
    %cst_94 = arith.constant dense<0.000000e+00> : vector<8xf32>
    %474 = vector.multi_reduction <add>, %473, %cst_94 [1] : vector<8x8xf32> to vector<8xf32>
    %475 = vector.shape_cast %474 : vector<8xf32> to vector<8x1xf32>
    %476 = vector.extract_strided_slice %436 {offsets = [0, 0, 0], sizes = [1, 8, 1], strides = [1, 1, 1]} : vector<8x8x1xf32> to vector<1x8x1xf32>
    %477 = vector.shape_cast %476 : vector<1x8x1xf32> to vector<8x1xf32>
    %478 = arith.addf %453, %477 : vector<8x1xf32>
    %479 = arith.addf %478, %458 : vector<8x1xf32>
    %480 = arith.addf %479, %475 : vector<8x1xf32>
    %481 = vector.shape_cast %425 : vector<8x8xf32> to vector<1x8x8xf32>
    %482 = vector.extract_strided_slice %421 {offsets = [0, 0, 0], sizes = [1, 8, 8], strides = [1, 1, 1]} : vector<8x8x8xf32> to vector<1x8x8xf32>
    %483 = vector.shape_cast %482 : vector<1x8x8xf32> to vector<8x8xf32>
    %484 = vector.broadcast %426 : vector<1x8xf32> to vector<8x8xf32>
    %485 = arith.addf %484, %483 : vector<8x8xf32>
    %486 = vector.shape_cast %485 : vector<8x8xf32> to vector<8x8x1xf32>
    %487 = vector.broadcast %486 : vector<8x8x1xf32> to vector<8x8x8xf32>
    %488 = vector.broadcast %481 : vector<1x8x8xf32> to vector<8x8x8xf32>
    %489 = arith.addf %487, %488 : vector<8x8x8xf32>
    %490 = vector.extract_strided_slice %421 {offsets = [1, 0, 0], sizes = [1, 8, 8], strides = [1, 1, 1]} : vector<8x8x8xf32> to vector<1x8x8xf32>
    %491 = vector.shape_cast %490 : vector<1x8x8xf32> to vector<8x8xf32>
    %492 = vector.shape_cast %491 : vector<8x8xf32> to vector<8x1x8xf32>
    %493 = vector.broadcast %492 : vector<8x1x8xf32> to vector<8x8x8xf32>
    %494 = arith.addf %489, %493 : vector<8x8x8xf32>
    %cst_95 = arith.constant dense<0xFF800000> : vector<8x8xf32>
    %495 = vector.multi_reduction <maximumf>, %494, %cst_95 [1] : vector<8x8x8xf32> to vector<8x8xf32>
    %496 = vector.shape_cast %495 : vector<8x8xf32> to vector<8x1x8xf32>
    %497 = vector.broadcast %496 : vector<8x1x8xf32> to vector<8x8x8xf32>
    %498 = arith.subf %494, %497 : vector<8x8x8xf32>
    %499 = math.exp %498 : vector<8x8x8xf32>
    %cst_96 = arith.constant dense<0.000000e+00> : vector<8x8xf32>
    %500 = vector.multi_reduction <add>, %499, %cst_96 [1] : vector<8x8x8xf32> to vector<8x8xf32>
    %501 = math.log %500 : vector<8x8xf32>
    %502 = vector.shape_cast %496 : vector<8x1x8xf32> to vector<8x8xf32>
    %503 = arith.addf %501, %502 : vector<8x8xf32>
    %504 = vector.extract_strided_slice %423 {offsets = [1, 0, 0], sizes = [1, 8, 1], strides = [1, 1, 1]} : vector<8x8x1xf32> to vector<1x8x1xf32>
    %505 = vector.shape_cast %504 : vector<1x8x1xf32> to vector<8x1xf32>
    %cst_97 = arith.constant 5.000000e-01 : f32
    %506 = vector.broadcast %cst_97 : f32 to vector<8x1xf32>
    %507 = arith.cmpf ogt, %505, %506 : vector<8x1xf32>
    %508 = vector.shape_cast %507 : vector<8x1xi1> to vector<8x1xi1>
    %509 = vector.broadcast %508 : vector<8x1xi1> to vector<8x8xi1>
    %510 = arith.select %509, %503, %485 : vector<8x8xi1>, vector<8x8xf32>
    %511 = vector.shape_cast %510 : vector<8x8xf32> to vector<8x8x1xf32>
    %512 = vector.broadcast %511 : vector<8x8x1xf32> to vector<8x8x8xf32>
    %513 = vector.broadcast %481 : vector<1x8x8xf32> to vector<8x8x8xf32>
    %514 = arith.addf %512, %513 : vector<8x8x8xf32>
    %515 = vector.extract_strided_slice %421 {offsets = [2, 0, 0], sizes = [1, 8, 8], strides = [1, 1, 1]} : vector<8x8x8xf32> to vector<1x8x8xf32>
    %516 = vector.shape_cast %515 : vector<1x8x8xf32> to vector<8x8xf32>
    %517 = vector.shape_cast %516 : vector<8x8xf32> to vector<8x1x8xf32>
    %518 = vector.broadcast %517 : vector<8x1x8xf32> to vector<8x8x8xf32>
    %519 = arith.addf %514, %518 : vector<8x8x8xf32>
    %cst_98 = arith.constant dense<0xFF800000> : vector<8x8xf32>
    %520 = vector.multi_reduction <maximumf>, %519, %cst_98 [1] : vector<8x8x8xf32> to vector<8x8xf32>
    %521 = vector.shape_cast %520 : vector<8x8xf32> to vector<8x1x8xf32>
    %522 = vector.broadcast %521 : vector<8x1x8xf32> to vector<8x8x8xf32>
    %523 = arith.subf %519, %522 : vector<8x8x8xf32>
    %524 = math.exp %523 : vector<8x8x8xf32>
    %cst_99 = arith.constant dense<0.000000e+00> : vector<8x8xf32>
    %525 = vector.multi_reduction <add>, %524, %cst_99 [1] : vector<8x8x8xf32> to vector<8x8xf32>
    %526 = math.log %525 : vector<8x8xf32>
    %527 = vector.shape_cast %521 : vector<8x1x8xf32> to vector<8x8xf32>
    %528 = arith.addf %526, %527 : vector<8x8xf32>
    %529 = vector.extract_strided_slice %423 {offsets = [2, 0, 0], sizes = [1, 8, 1], strides = [1, 1, 1]} : vector<8x8x1xf32> to vector<1x8x1xf32>
    %530 = vector.shape_cast %529 : vector<1x8x1xf32> to vector<8x1xf32>
    %cst_100 = arith.constant 5.000000e-01 : f32
    %531 = vector.broadcast %cst_100 : f32 to vector<8x1xf32>
    %532 = arith.cmpf ogt, %530, %531 : vector<8x1xf32>
    %533 = vector.shape_cast %532 : vector<8x1xi1> to vector<8x1xi1>
    %534 = vector.broadcast %533 : vector<8x1xi1> to vector<8x8xi1>
    %535 = arith.select %534, %528, %510 : vector<8x8xi1>, vector<8x8xf32>
    %536 = vector.shape_cast %535 : vector<8x8xf32> to vector<8x8x1xf32>
    %537 = vector.broadcast %536 : vector<8x8x1xf32> to vector<8x8x8xf32>
    %538 = vector.broadcast %481 : vector<1x8x8xf32> to vector<8x8x8xf32>
    %539 = arith.addf %537, %538 : vector<8x8x8xf32>
    %540 = vector.extract_strided_slice %421 {offsets = [3, 0, 0], sizes = [1, 8, 8], strides = [1, 1, 1]} : vector<8x8x8xf32> to vector<1x8x8xf32>
    %541 = vector.shape_cast %540 : vector<1x8x8xf32> to vector<8x8xf32>
    %542 = vector.shape_cast %541 : vector<8x8xf32> to vector<8x1x8xf32>
    %543 = vector.broadcast %542 : vector<8x1x8xf32> to vector<8x8x8xf32>
    %544 = arith.addf %539, %543 : vector<8x8x8xf32>
    %cst_101 = arith.constant dense<0xFF800000> : vector<8x8xf32>
    %545 = vector.multi_reduction <maximumf>, %544, %cst_101 [1] : vector<8x8x8xf32> to vector<8x8xf32>
    %546 = vector.shape_cast %545 : vector<8x8xf32> to vector<8x1x8xf32>
    %547 = vector.broadcast %546 : vector<8x1x8xf32> to vector<8x8x8xf32>
    %548 = arith.subf %544, %547 : vector<8x8x8xf32>
    %549 = math.exp %548 : vector<8x8x8xf32>
    %cst_102 = arith.constant dense<0.000000e+00> : vector<8x8xf32>
    %550 = vector.multi_reduction <add>, %549, %cst_102 [1] : vector<8x8x8xf32> to vector<8x8xf32>
    %551 = math.log %550 : vector<8x8xf32>
    %552 = vector.shape_cast %546 : vector<8x1x8xf32> to vector<8x8xf32>
    %553 = arith.addf %551, %552 : vector<8x8xf32>
    %554 = vector.extract_strided_slice %423 {offsets = [3, 0, 0], sizes = [1, 8, 1], strides = [1, 1, 1]} : vector<8x8x1xf32> to vector<1x8x1xf32>
    %555 = vector.shape_cast %554 : vector<1x8x1xf32> to vector<8x1xf32>
    %cst_103 = arith.constant 5.000000e-01 : f32
    %556 = vector.broadcast %cst_103 : f32 to vector<8x1xf32>
    %557 = arith.cmpf ogt, %555, %556 : vector<8x1xf32>
    %558 = vector.shape_cast %557 : vector<8x1xi1> to vector<8x1xi1>
    %559 = vector.broadcast %558 : vector<8x1xi1> to vector<8x8xi1>
    %560 = arith.select %559, %553, %535 : vector<8x8xi1>, vector<8x8xf32>
    %561 = vector.shape_cast %560 : vector<8x8xf32> to vector<8x8x1xf32>
    %562 = vector.broadcast %561 : vector<8x8x1xf32> to vector<8x8x8xf32>
    %563 = vector.broadcast %481 : vector<1x8x8xf32> to vector<8x8x8xf32>
    %564 = arith.addf %562, %563 : vector<8x8x8xf32>
    %565 = vector.extract_strided_slice %421 {offsets = [4, 0, 0], sizes = [1, 8, 8], strides = [1, 1, 1]} : vector<8x8x8xf32> to vector<1x8x8xf32>
    %566 = vector.shape_cast %565 : vector<1x8x8xf32> to vector<8x8xf32>
    %567 = vector.shape_cast %566 : vector<8x8xf32> to vector<8x1x8xf32>
    %568 = vector.broadcast %567 : vector<8x1x8xf32> to vector<8x8x8xf32>
    %569 = arith.addf %564, %568 : vector<8x8x8xf32>
    %cst_104 = arith.constant dense<0xFF800000> : vector<8x8xf32>
    %570 = vector.multi_reduction <maximumf>, %569, %cst_104 [1] : vector<8x8x8xf32> to vector<8x8xf32>
    %571 = vector.shape_cast %570 : vector<8x8xf32> to vector<8x1x8xf32>
    %572 = vector.broadcast %571 : vector<8x1x8xf32> to vector<8x8x8xf32>
    %573 = arith.subf %569, %572 : vector<8x8x8xf32>
    %574 = math.exp %573 : vector<8x8x8xf32>
    %cst_105 = arith.constant dense<0.000000e+00> : vector<8x8xf32>
    %575 = vector.multi_reduction <add>, %574, %cst_105 [1] : vector<8x8x8xf32> to vector<8x8xf32>
    %576 = math.log %575 : vector<8x8xf32>
    %577 = vector.shape_cast %571 : vector<8x1x8xf32> to vector<8x8xf32>
    %578 = arith.addf %576, %577 : vector<8x8xf32>
    %579 = vector.extract_strided_slice %423 {offsets = [4, 0, 0], sizes = [1, 8, 1], strides = [1, 1, 1]} : vector<8x8x1xf32> to vector<1x8x1xf32>
    %580 = vector.shape_cast %579 : vector<1x8x1xf32> to vector<8x1xf32>
    %cst_106 = arith.constant 5.000000e-01 : f32
    %581 = vector.broadcast %cst_106 : f32 to vector<8x1xf32>
    %582 = arith.cmpf ogt, %580, %581 : vector<8x1xf32>
    %583 = vector.shape_cast %582 : vector<8x1xi1> to vector<8x1xi1>
    %584 = vector.broadcast %583 : vector<8x1xi1> to vector<8x8xi1>
    %585 = arith.select %584, %578, %560 : vector<8x8xi1>, vector<8x8xf32>
    %586 = vector.shape_cast %585 : vector<8x8xf32> to vector<8x8x1xf32>
    %587 = vector.broadcast %586 : vector<8x8x1xf32> to vector<8x8x8xf32>
    %588 = vector.broadcast %481 : vector<1x8x8xf32> to vector<8x8x8xf32>
    %589 = arith.addf %587, %588 : vector<8x8x8xf32>
    %590 = vector.extract_strided_slice %421 {offsets = [5, 0, 0], sizes = [1, 8, 8], strides = [1, 1, 1]} : vector<8x8x8xf32> to vector<1x8x8xf32>
    %591 = vector.shape_cast %590 : vector<1x8x8xf32> to vector<8x8xf32>
    %592 = vector.shape_cast %591 : vector<8x8xf32> to vector<8x1x8xf32>
    %593 = vector.broadcast %592 : vector<8x1x8xf32> to vector<8x8x8xf32>
    %594 = arith.addf %589, %593 : vector<8x8x8xf32>
    %cst_107 = arith.constant dense<0xFF800000> : vector<8x8xf32>
    %595 = vector.multi_reduction <maximumf>, %594, %cst_107 [1] : vector<8x8x8xf32> to vector<8x8xf32>
    %596 = vector.shape_cast %595 : vector<8x8xf32> to vector<8x1x8xf32>
    %597 = vector.broadcast %596 : vector<8x1x8xf32> to vector<8x8x8xf32>
    %598 = arith.subf %594, %597 : vector<8x8x8xf32>
    %599 = math.exp %598 : vector<8x8x8xf32>
    %cst_108 = arith.constant dense<0.000000e+00> : vector<8x8xf32>
    %600 = vector.multi_reduction <add>, %599, %cst_108 [1] : vector<8x8x8xf32> to vector<8x8xf32>
    %601 = math.log %600 : vector<8x8xf32>
    %602 = vector.shape_cast %596 : vector<8x1x8xf32> to vector<8x8xf32>
    %603 = arith.addf %601, %602 : vector<8x8xf32>
    %604 = vector.extract_strided_slice %423 {offsets = [5, 0, 0], sizes = [1, 8, 1], strides = [1, 1, 1]} : vector<8x8x1xf32> to vector<1x8x1xf32>
    %605 = vector.shape_cast %604 : vector<1x8x1xf32> to vector<8x1xf32>
    %cst_109 = arith.constant 5.000000e-01 : f32
    %606 = vector.broadcast %cst_109 : f32 to vector<8x1xf32>
    %607 = arith.cmpf ogt, %605, %606 : vector<8x1xf32>
    %608 = vector.shape_cast %607 : vector<8x1xi1> to vector<8x1xi1>
    %609 = vector.broadcast %608 : vector<8x1xi1> to vector<8x8xi1>
    %610 = arith.select %609, %603, %585 : vector<8x8xi1>, vector<8x8xf32>
    %611 = vector.shape_cast %610 : vector<8x8xf32> to vector<8x8x1xf32>
    %612 = vector.broadcast %611 : vector<8x8x1xf32> to vector<8x8x8xf32>
    %613 = vector.broadcast %481 : vector<1x8x8xf32> to vector<8x8x8xf32>
    %614 = arith.addf %612, %613 : vector<8x8x8xf32>
    %615 = vector.extract_strided_slice %421 {offsets = [6, 0, 0], sizes = [1, 8, 8], strides = [1, 1, 1]} : vector<8x8x8xf32> to vector<1x8x8xf32>
    %616 = vector.shape_cast %615 : vector<1x8x8xf32> to vector<8x8xf32>
    %617 = vector.shape_cast %616 : vector<8x8xf32> to vector<8x1x8xf32>
    %618 = vector.broadcast %617 : vector<8x1x8xf32> to vector<8x8x8xf32>
    %619 = arith.addf %614, %618 : vector<8x8x8xf32>
    %cst_110 = arith.constant dense<0xFF800000> : vector<8x8xf32>
    %620 = vector.multi_reduction <maximumf>, %619, %cst_110 [1] : vector<8x8x8xf32> to vector<8x8xf32>
    %621 = vector.shape_cast %620 : vector<8x8xf32> to vector<8x1x8xf32>
    %622 = vector.broadcast %621 : vector<8x1x8xf32> to vector<8x8x8xf32>
    %623 = arith.subf %619, %622 : vector<8x8x8xf32>
    %624 = math.exp %623 : vector<8x8x8xf32>
    %cst_111 = arith.constant dense<0.000000e+00> : vector<8x8xf32>
    %625 = vector.multi_reduction <add>, %624, %cst_111 [1] : vector<8x8x8xf32> to vector<8x8xf32>
    %626 = math.log %625 : vector<8x8xf32>
    %627 = vector.shape_cast %621 : vector<8x1x8xf32> to vector<8x8xf32>
    %628 = arith.addf %626, %627 : vector<8x8xf32>
    %629 = vector.extract_strided_slice %423 {offsets = [6, 0, 0], sizes = [1, 8, 1], strides = [1, 1, 1]} : vector<8x8x1xf32> to vector<1x8x1xf32>
    %630 = vector.shape_cast %629 : vector<1x8x1xf32> to vector<8x1xf32>
    %cst_112 = arith.constant 5.000000e-01 : f32
    %631 = vector.broadcast %cst_112 : f32 to vector<8x1xf32>
    %632 = arith.cmpf ogt, %630, %631 : vector<8x1xf32>
    %633 = vector.shape_cast %632 : vector<8x1xi1> to vector<8x1xi1>
    %634 = vector.broadcast %633 : vector<8x1xi1> to vector<8x8xi1>
    %635 = arith.select %634, %628, %610 : vector<8x8xi1>, vector<8x8xf32>
    %636 = vector.shape_cast %635 : vector<8x8xf32> to vector<8x8x1xf32>
    %637 = vector.broadcast %636 : vector<8x8x1xf32> to vector<8x8x8xf32>
    %638 = vector.broadcast %481 : vector<1x8x8xf32> to vector<8x8x8xf32>
    %639 = arith.addf %637, %638 : vector<8x8x8xf32>
    %640 = vector.extract_strided_slice %421 {offsets = [7, 0, 0], sizes = [1, 8, 8], strides = [1, 1, 1]} : vector<8x8x8xf32> to vector<1x8x8xf32>
    %641 = vector.shape_cast %640 : vector<1x8x8xf32> to vector<8x8xf32>
    %642 = vector.shape_cast %641 : vector<8x8xf32> to vector<8x1x8xf32>
    %643 = vector.broadcast %642 : vector<8x1x8xf32> to vector<8x8x8xf32>
    %644 = arith.addf %639, %643 : vector<8x8x8xf32>
    %cst_113 = arith.constant dense<0xFF800000> : vector<8x8xf32>
    %645 = vector.multi_reduction <maximumf>, %644, %cst_113 [1] : vector<8x8x8xf32> to vector<8x8xf32>
    %646 = vector.shape_cast %645 : vector<8x8xf32> to vector<8x1x8xf32>
    %647 = vector.broadcast %646 : vector<8x1x8xf32> to vector<8x8x8xf32>
    %648 = arith.subf %644, %647 : vector<8x8x8xf32>
    %649 = math.exp %648 : vector<8x8x8xf32>
    %cst_114 = arith.constant dense<0.000000e+00> : vector<8x8xf32>
    %650 = vector.multi_reduction <add>, %649, %cst_114 [1] : vector<8x8x8xf32> to vector<8x8xf32>
    %651 = math.log %650 : vector<8x8xf32>
    %652 = vector.shape_cast %646 : vector<8x1x8xf32> to vector<8x8xf32>
    %653 = arith.addf %651, %652 : vector<8x8xf32>
    %654 = vector.extract_strided_slice %423 {offsets = [7, 0, 0], sizes = [1, 8, 1], strides = [1, 1, 1]} : vector<8x8x1xf32> to vector<1x8x1xf32>
    %655 = vector.shape_cast %654 : vector<1x8x1xf32> to vector<8x1xf32>
    %cst_115 = arith.constant 5.000000e-01 : f32
    %656 = vector.broadcast %cst_115 : f32 to vector<8x1xf32>
    %657 = arith.cmpf ogt, %655, %656 : vector<8x1xf32>
    %658 = vector.shape_cast %657 : vector<8x1xi1> to vector<8x1xi1>
    %659 = vector.broadcast %658 : vector<8x1xi1> to vector<8x8xi1>
    %660 = arith.select %659, %653, %635 : vector<8x8xi1>, vector<8x8xf32>
    %661 = vector.broadcast %427 : vector<1x8xf32> to vector<8x8xf32>
    %662 = arith.addf %660, %661 : vector<8x8xf32>
    %cst_116 = arith.constant dense<0xFF800000> : vector<8xf32>
    %663 = vector.multi_reduction <maximumf>, %662, %cst_116 [1] : vector<8x8xf32> to vector<8xf32>
    %664 = vector.shape_cast %663 : vector<8xf32> to vector<8x1xf32>
    %665 = vector.broadcast %664 : vector<8x1xf32> to vector<8x8xf32>
    %666 = arith.subf %662, %665 : vector<8x8xf32>
    %667 = math.exp %666 : vector<8x8xf32>
    %cst_117 = arith.constant dense<0.000000e+00> : vector<8xf32>
    %668 = vector.multi_reduction <add>, %667, %cst_117 [1] : vector<8x8xf32> to vector<8xf32>
    %669 = vector.shape_cast %668 : vector<8xf32> to vector<8x1xf32>
    %670 = math.log %669 : vector<8x1xf32>
    %671 = arith.addf %670, %664 : vector<8x1xf32>
    %672 = arith.subf %480, %671 : vector<8x1xf32>
    %673 = arith.mulf %672, %424 : vector<8x1xf32>
    %cst_118 = arith.constant dense<0.000000e+00> : vector<1xf32>
    %674 = vector.multi_reduction <add>, %673, %cst_118 [0] : vector<8x1xf32> to vector<1xf32>
    %675 = vector.shape_cast %674 : vector<1xf32> to vector<1x1xf32>
    %cst_119 = arith.constant 0.000000e+00 : f32
    %676 = vector.broadcast %cst_119 : f32 to vector<1x1xf32>
    %677 = arith.subf %676, %675 : vector<1x1xf32>
    %cst_120 = arith.constant 5.000000e-01 : f32
    %678 = vector.broadcast %cst_120 : f32 to vector<1x1xf32>
    %679 = arith.mulf %677, %678 : vector<1x1xf32>
    %c0_121 = arith.constant 0 : index
    %c0_122 = arith.constant 0 : index
    %680 = vector.load %arg15[%c0_121, %c0_122] : memref<1x1xf32, #tpu.memory_space<vmem>>, vector<1x1xf32>
    tpu.vector_store %arg15[%c0_121, %c0_122], %679 {strides = array<i32>} : memref<1x1xf32, #tpu.memory_space<vmem>>, vector<1x1xf32>,
    return
  }
}

</mosaic_0001>

<bundles_post_ra>
// kernel: model_forward.1
= control target key start
LH: loop header
LB: loop body
LE: loop exit
PB: predicated region body
PF: predicated region fallthrough
CT: control target
= control target key end

     0   :  { %s7277_s0 = inlined_call_operand.vmem [shape: f32[8,8,32], index: 0, kind: input, shape index: {}]   ;;  %s7278_s1 = inlined_call_operand.vmem [shape: f32[32,128], index: 1, kind: input, shape index: {}]   ;;  %s7279_s2 = inlined_call_operand.vmem [shape: f32[32,128], index: 2, kind: input, shape index: {}]   ;;  %s7280_s3 = inlined_call_operand.vmem [shape: f32[1,128], index: 3, kind: input, shape index: {}]   ;;  %s7281_s4 = inlined_call_operand.vmem [shape: f32[32,128], index: 4, kind: input, shape index: {}]   ;;  %s7282_s5 = inlined_call_operand.vmem [shape: f32[32,128], index: 5, kind: input, shape index: {}]   ;;  %s7283_s6 = inlined_call_operand.vmem [shape: f32[1,128], index: 6, kind: input, shape index: {}]   ;;  %s7284_s7 = inlined_call_operand.vmem [shape: f32[32,8], index: 7, kind: input, shape index: {}]   ;;  %s7285_s8 = inlined_call_operand.vmem [shape: f32[1,8], index: 8, kind: input, shape index: {}]   ;;  %s7286_s9 = inlined_call_operand.vmem [shape: s32[8,8], index: 9, kind: input, shape index: {}]   ;;  %s7287_s10 = inlined_call_operand.vmem [shape: f32[8,8,1], index: 10, kind: input, shape index: {}]   ;;  %s7288_s11 = inlined_call_operand.vmem [shape: f32[8,1], index: 11, kind: input, shape index: {}]   ;;  %s7289_s12 = inlined_call_operand.vmem [shape: f32[8,8], index: 12, kind: input, shape index: {}]   ;;  %s7290_s13 = inlined_call_operand.vmem [shape: f32[1,8], index: 13, kind: input, shape index: {}]   ;;  %s7291_s14 = inlined_call_operand.vmem [shape: f32[1,8], index: 14, kind: input, shape index: {}]   ;;  %s7292_s15 = inlined_call_operand.hbm [shape: f32[1,1], index: 15, kind: output, shape index: {}]  }
   0x1   :  { %v78_v0 = vld [vmem:[%s7278_s1 + $0x18] sm:$0xff]  ;;  %v77_v1 = vld [vmem:[%s7278_s1 + $0x10] sm:$0xff]  ;;  %v76_v2 = vld [vmem:[%s7278_s1 + $0x8] sm:$0xff] }
   0x2   :  { %124 = vmatpush.msra.mxu0 %v78_v0  ;;  %v75_v3 = vld [vmem:[%s7278_s1] sm:$0xff] }
   0x4   :  { %125 = vmatpush.msra.mxu0 %v77_v1 }
   0x5   :  { %20 = vsyncpa [#allocation3], 0  ;;  %v67_v4 = vld [vmem:[%s7277_s0] sm:$0xff]  ;;  %vm87_vm0 = vcmask 261120   ;;  %v68_v5 = vld [vmem:[%s7277_s0 + $0x8] sm:$0xff]  ;;  %v7293_v12 = vmov 0.0   ;;  %v51_v21 = vlaneseq }
   0x6   :  { %126 = vmatpush.msra.mxu0 %v76_v2  ;;  %v69_v6 = vld [vmem:[%s7277_s0 + $0x10] sm:$0xff]  ;;  %v5271_v7 = vld [vmem:[%s7279_s2 + $0x18] sm:$0xff]  ;;  %v5290_v10 = vld [vmem:[%s7279_s2 + $0x8] sm:$0xff]  ;;  %s4561_s30 = sshll.u32 %s7292_s15, 4  ;;  %s4562_s30 = int_to_ptr.hbm [resolvable:$true] %s4561_s30 }
   0x7   :  { %v5276_v8 = vld [vmem:[%s7279_s2 + $0x10] sm:$0xff]  ;;  %176 = vmatpush.msra.mxu1 %v5271_v7  ;;  %223 = vmatpush.msra.mxu2 %v5271_v7  ;;  %v70_v9 = vld [vmem:[%s7277_s0 + $0x18] sm:$0xff]  ;;  %v5297_v11 = vld [vmem:[%s7279_s2] sm:$0xff]  ;;  %v5343_v22 = vand.u32 127, %v51_v21 }
   0x8   :  { %127 = vmatpush.msra.mxu0 %v75_v3  ;;  %270 = vmatpush.msra.mxu3 %v5271_v7  ;;  %v71_v13 = vld [vmem:[%s7277_s0 + $0x20] sm:$0xff]  ;;  %v72_v14 = vld [vmem:[%s7277_s0 + $0x28] sm:$0xff]  ;;  %v73_v15 = vld [vmem:[%s7277_s0 + $0x30] sm:$0xff] }
   0x9   :  { %4570 = vmatmul.msk.f32.vlgmr.msra.gmra.mxu0 %vm87_vm0, %v67_v4  ;;  %177 = vmatpush.msra.mxu1 %v5276_v8  ;;  %v74_v16 = vld [vmem:[%s7277_s0 + $0x38] sm:$0xff]  ;;  %v4819_v18 = vld [vmem:[%s7280_s3] ss:$0 sm:$0xff]  ;;  %vm53_vm1 = vcmp.ge.s32.totalorder %v5343_v22, 16  ;;  %vm54_vm2 = vcmp.lt.s32.totalorder %v5343_v22, 32  ;;  %vm56_vm3 = vcmp.ge.s32.totalorder %v5343_v22, 48 }
   0xa   :  { %224 = vmatpush.msra.mxu2 %v5276_v8  ;;  %271 = vmatpush.msra.mxu3 %v5276_v8  ;;  %vm57_vm4 = vcmp.lt.s32.totalorder %v5343_v22, 64  ;;  %vm55_vm5 = vmand %vm53_vm1, %vm54_vm2  ;;  %vm60_vm7 = vcmp.ge.s32.totalorder %v5343_v22, 80  ;;  %vm61_vm8 = vcmp.lt.s32.totalorder %v5343_v22, 96  ;;  %vm64_vm12 = vcmp.ge.s32.totalorder %v5343_v22, 112  ;;  %s5160_s0 = smov 32   ;;  %s5161_s3 = smov 64  }
   0xb   :  { %178 = vmatpush.msra.mxu1 %v5290_v10  ;;  %vm58_vm6 = vmand %vm56_vm3, %vm57_vm4  ;;  %vm66_vm14 = vcmp.ge.s32.totalorder %v5343_v22, 96  ;;  %vm1203_vm2 = vcmask 64512  }
   0xc   :  { %225 = vmatpush.msra.mxu2 %v5290_v10  ;;  %272 = vmatpush.msra.mxu3 %v5290_v10  ;;  %vm59_vm9 = vmor %vm55_vm5, %vm58_vm6 }
   0xd   :  { %179 = vmatpush.msra.mxu1 %v5297_v11  ;;  %vm62_vm10 = vmand %vm60_vm7, %vm61_vm8 }
   0xe   :  { %180 = vmatmul.f32.vlgmr.msra.gmra.mxu1 %v7293_v12  ;;  %226 = vmatpush.msra.mxu2 %v5297_v11  ;;  %vm63_vm11 = vmor %vm59_vm9, %vm62_vm10  ;;  %vm2293_vm9 = vcmask 1041409   ;;  %vm2296_vm10 = vcmask 1042434  }
   0xf   :  { %273 = vmatpush.msra.mxu3 %v5297_v11  ;;  %317 = vmatpush.msrb.mxu1 %v5271_v7  ;;  %vm5358_vm13 = vmor %vm63_vm11, %vm64_vm12  ;;  %vm2299_vm11 = vcmask 1043459   ;;  %vm2302_vm12 = vcmask 1044484  }
  0x10   :  { %364 = vmatpush.msrb.mxu2 %v5271_v7 }
  0x11   :  { %4571 = vmatmul.msk.f32.gmra.mxu0 %vm87_vm0, %v68_v5  ;;  %411 = vmatpush.msrb.mxu3 %v5271_v7 }
  0x12   :  { %318 = vmatpush.msrb.mxu1 %v5276_v8  ;;  %365 = vmatpush.msrb.mxu2 %v5276_v8 }
  0x13   :  { %412 = vmatpush.msrb.mxu3 %v5276_v8 }
  0x14   :  { %319 = vmatpush.msrb.mxu1 %v5290_v10  ;;  %366 = vmatpush.msrb.mxu2 %v5290_v10 }
  0x15   :  { %413 = vmatpush.msrb.mxu3 %v5290_v10 }
  0x16   :  { %320 = vmatpush.msrb.mxu1 %v5297_v11  ;;  %367 = vmatpush.msrb.mxu2 %v5297_v11 }
  0x17   :  { %414 = vmatpush.msrb.mxu3 %v5297_v11 }
  0x18   :  { %458 = vmatpush.msra.mxu1 %v5271_v7 }
  0x19   :  { %4572 = vmatmul.msk.f32.gmra.mxu0 %vm87_vm0, %v69_v6 }
  0x1a   :  { %459 = vmatpush.msra.mxu1 %v5276_v8 }
  0x1c   :  { %460 = vmatpush.msra.mxu1 %v5290_v10 }
  0x1e   :  { %461 = vmatpush.msra.mxu1 %v5297_v11 }
  0x21   :  { %4573 = vmatmul.msk.f32.gmra.mxu0 %vm87_vm0, %v70_v9 }
  0x29   :  { %4574 = vmatmul.msk.f32.gmra.mxu0 %vm87_vm0, %v71_v13 }
  0x31   :  { %4575 = vmatmul.msk.f32.gmra.mxu0 %vm87_vm0, %v72_v14 }
  0x39   :  { %4576 = vmatmul.msk.f32.gmra.mxu0 %vm87_vm0, %v73_v15 }
  0x41   :  { %4577 = vmatmul.msk.f32.gmra.mxu0 %vm87_vm0, %v74_v16 }
  0x86   :  { %v129_v17 = vpop.f32.mrf.mxu0 }
  0x87   :  { %v5392_v41 = vadd.f32 %v4819_v18, %v129_v17 }
  0x8b   :  { %v181_v43 = vpop.f32.mrf.mxu1 }
  0x8e   :  { %v132_v19 = vpop.f32.mrf.mxu0 }
  0x8f   :  { %v5340_v20 = vadd.f32 %v4819_v18, %v132_v19 }
  0x96   :  { %v135_v23 = vpop.f32.mrf.mxu0 }
  0x97   :  { %v5345_v24 = vadd.f32 %v4819_v18, %v135_v23 }
  0x9e   :  { %v138_v25 = vpop.f32.mrf.mxu0 }
  0x9f   :  { %v5355_v26 = vadd.f32 %v4819_v18, %v138_v25 }
  0xa6   :  { %v141_v27 = vpop.f32.mrf.mxu0 }
  0xa7   :  { %v5362_v29 = vadd.f32 %v4819_v18, %v141_v27 }
  0xa9   :  { %v156_v30 = vsel %vm5358_vm13, %v5362_v29, %v5355_v26  ;;  %v157_v31 = vsel %vm5358_vm13, %v5355_v26, %v5362_v29 }
  0xae   :  { %v144_v32 = vpop.f32.mrf.mxu0 }
  0xaf   :  { %v5372_v33 = vadd.f32 %v4819_v18, %v144_v32 }
  0xb1   :  { %v155_v34 = vsel %vm5358_vm13, %v5372_v33, %v5345_v24  ;;  %v158_v35 = vsel %vm5358_vm13, %v5345_v24, %v5372_v33 }
  0xb6   :  { %v147_v36 = vpop.f32.mrf.mxu0 }
  0xb7   :  { %v5382_v37 = vadd.f32 %v4819_v18, %v147_v36 }
  0xb9   :  { %v154_v38 = vsel %vm5358_vm13, %v5382_v37, %v5340_v20  ;;  %v159_v39 = vsel %vm5358_vm13, %v5340_v20, %v5382_v37 }
  0xbe   :  { %v150_v40 = vpop.f32.mrf.mxu0 }
  0xbf   :  { %v5394_v42 = vadd.f32 %v4819_v18, %v150_v40 }
  0xc1   :  { %v153_v44 = vsel %vm5358_vm13, %v5394_v42, %v5392_v41  ;;  %v160_v45 = vsel %vm5358_vm13, %v5392_v41, %v5394_v42  ;;  %v557_v41 = vld [vmem:[%s7281_s4 + $0x18] sm:$0xff]  ;;  %v556_v42 = vld [vmem:[%s7281_s4 + $0x10] sm:$0xff] }
  0xc2   :  { %v184_v46 = vadd.f32 %v181_v43, %v153_v44 }
  0xc4   :  { %4824 = vtanh.f32 %v184_v46 }
  0xca   :  { %v4825_v47 = vpop.eup %4824 }
  0xcb   :  { %v186_v48 = vmul.f32 0.5, %v4825_v47 }
  0xcd   :  { %v187_v49 = vadd.f32 0.5, %v186_v48 }
  0xcf   :  { %v188_v50 = vsel %vm66_vm14, %v4825_v47, %v187_v49 }
  0xd0   :  { %191 = vrot.lane.b32.xlu0 %v188_v50, %s5160_s0  ;;  %v189_v53 = vmul.f32 0.0, %v188_v50 }
 0x142   :  { %v192_v51 = vpop.permute.xlu0 %191 }
 0x143   :  { %v194_v52 = vmul.f32 %v192_v51, %v188_v50 }
 0x145   :  { %196 = vrot.lane.b32.xlu0 %v194_v52, %s5160_s0 }
 0x1b7   :  { %v197_v54 = vpop.permute.xlu0 %196 }
 0x1b8   :  { %v199_v55 = vadd.f32 %v197_v54, %v189_v53 }
 0x1ba   :  { %4826 = vtanh.f32 %v199_v55 }
 0x1c0   :  { %v4827_v56 = vpop.eup %4826 }
 0x1c1   :  { %202 = vrot.lane.b32.xlu1 %v4827_v56, %s5160_s0 }
 0x233   :  { %v203_v57 = vpop.permute.xlu1 %202 }
 0x234   :  { %v205_v58 = vmul.f32 %v203_v57, %v188_v50 }
 0x236   :  { %207 = vrot.lane.b32.xlu1 %v205_v58, %s5161_s3 }
 0x2a8   :  { %v5411_v59 = vpop.permute.xlu1 %207 }
 0x2a9   :  { %4578 = vmatmul.msk.f32.vlgmr.msra.gmra.mxu2 %vm87_vm0, %v5411_v59 }
 0x2aa   :  { %505 = vmatpush.msra.mxu2 %v5271_v7 }
 0x2ac   :  { %506 = vmatpush.msra.mxu2 %v5276_v8 }
 0x2ae   :  { %507 = vmatpush.msra.mxu2 %v5290_v10 }
 0x2b0   :  { %508 = vmatpush.msra.mxu2 %v5297_v11 }
 0x32c   :  { %v228_v60 = vpop.f32.mrf.mxu2 }
 0x32d   :  { %v231_v61 = vadd.f32 %v228_v60, %v154_v38 }
 0x32f   :  { %4828 = vtanh.f32 %v231_v61 }
 0x335   :  { %v4829_v62 = vpop.eup %4828 }
 0x336   :  { %v233_v63 = vmul.f32 0.5, %v4829_v62 }
 0x338   :  { %v234_v0 = vadd.f32 0.5, %v233_v63 }
 0x33a   :  { %v235_v1 = vsel %vm66_vm14, %v4829_v62, %v234_v0 }
 0x33b   :  { %238 = vrot.lane.b32.xlu2 %v235_v1, %s5160_s0  ;;  %v236_v4 = vmul.f32 %v235_v1, %v199_v55 }
 0x395   :  { %v239_v2 = vpop.permute.xlu2 %238 }
 0x396   :  { %v241_v3 = vmul.f32 %v239_v2, %v235_v1 }
 0x398   :  { %243 = vrot.lane.b32.xlu2 %v241_v3, %s5160_s0 }
 0x3f2   :  { %v244_v5 = vpop.permute.xlu2 %243 }
 0x3f3   :  { %v246_v6 = vadd.f32 %v244_v5, %v236_v4 }
 0x3f5   :  { %4830 = vtanh.f32 %v246_v6 }
 0x3fb   :  { %v4831_v7 = vpop.eup %4830 }
 0x3fc   :  { %249 = vrot.lane.b32.xlu0 %v4831_v7, %s5160_s0 }
 0x46e   :  { %v250_v8 = vpop.permute.xlu0 %249 }
 0x46f   :  { %v252_v9 = vmul.f32 %v250_v8, %v235_v1 }
 0x471   :  { %254 = vrot.lane.b32.xlu1 %v252_v9, %s5161_s3 }
 0x4e3   :  { %v5425_v10 = vpop.permute.xlu1 %254 }
 0x4e4   :  { %4579 = vmatmul.msk.f32.vlgmr.msra.gmra.mxu3 %vm87_vm0, %v5425_v10 }
 0x4e5   :  { %602 = vmatpush.msra.mxu3 %v557_v41 }
 0x4e7   :  { %603 = vmatpush.msra.mxu3 %v556_v42 }
 0x567   :  { %v275_v11 = vpop.f32.mrf.mxu3 }
 0x568   :  { %v278_v13 = vadd.f32 %v275_v11, %v155_v34 }
 0x56a   :  { %4832 = vtanh.f32 %v278_v13 }
 0x570   :  { %v4833_v14 = vpop.eup %4832 }
 0x571   :  { %v280_v15 = vmul.f32 0.5, %v4833_v14 }
 0x573   :  { %v281_v16 = vadd.f32 0.5, %v280_v15 }
 0x575   :  { %v282_v17 = vsel %vm66_vm14, %v4833_v14, %v281_v16 }
 0x576   :  { %285 = vrot.lane.b32.xlu2 %v282_v17, %s5160_s0  ;;  %v283_v23 = vmul.f32 %v282_v17, %v246_v6 }
 0x5d0   :  { %v286_v18 = vpop.permute.xlu2 %285 }
 0x5d1   :  { %v288_v19 = vmul.f32 %v286_v18, %v282_v17 }
 0x5d3   :  { %290 = vrot.lane.b32.xlu0 %v288_v19, %s5160_s0 }
 0x645   :  { %v291_v25 = vpop.permute.xlu0 %290 }
 0x646   :  { %v293_v27 = vadd.f32 %v291_v25, %v283_v23 }
 0x648   :  { %4834 = vtanh.f32 %v293_v27 }
 0x64e   :  { %v4835_v32 = vpop.eup %4834 }
 0x64f   :  { %296 = vrot.lane.b32.xlu1 %v4835_v32, %s5160_s0 }
 0x6c1   :  { %v297_v34 = vpop.permute.xlu1 %296 }
 0x6c2   :  { %v299_v36 = vmul.f32 %v297_v34, %v282_v17 }
 0x6c4   :  { %301 = vrot.lane.b32.xlu2 %v299_v36, %s5161_s3 }
 0x71e   :  { %v5440_v38 = vpop.permute.xlu2 %301 }
 0x71f   :  { %4580 = vmatmul.msk.f32.vlgmr.msrb.gmra.mxu1 %vm87_vm0, %v5440_v38 }
 0x79c   :  { %v322_v40 = vpop.f32.mrf.mxu1 }
 0x79d   :  { %v325_v43 = vadd.f32 %v322_v40, %v156_v30 }
 0x79f   :  { %4836 = vtanh.f32 %v325_v43 }
 0x7a5   :  { %v4837_v44 = vpop.eup %4836 }
 0x7a6   :  { %v327_v46 = vmul.f32 0.5, %v4837_v44 }
 0x7a8   :  { %v328_v47 = vadd.f32 0.5, %v327_v46 }
 0x7aa   :  { %v329_v48 = vsel %vm66_vm14, %v4837_v44, %v328_v47 }
 0x7ab   :  { %332 = vrot.lane.b32.xlu0 %v329_v48, %s5160_s0  ;;  %v330_v51 = vmul.f32 %v329_v48, %v293_v27 }
 0x81d   :  { %v333_v49 = vpop.permute.xlu0 %332 }
 0x81e   :  { %v335_v50 = vmul.f32 %v333_v49, %v329_v48 }
 0x820   :  { %337 = vrot.lane.b32.xlu1 %v335_v50, %s5160_s0 }
 0x892   :  { %v338_v52 = vpop.permute.xlu1 %337 }
 0x893   :  { %v340_v53 = vadd.f32 %v338_v52, %v330_v51 }
 0x895   :  { %4838 = vtanh.f32 %v340_v53 }
 0x89b   :  { %v4839_v54 = vpop.eup %4838 }
 0x89c   :  { %343 = vrot.lane.b32.xlu2 %v4839_v54, %s5160_s0 }
 0x8f6   :  { %v344_v30 = vpop.permute.xlu2 %343 }
 0x8f7   :  { %v346_v55 = vmul.f32 %v344_v30, %v329_v48 }
 0x8f9   :  { %348 = vrot.lane.b32.xlu0 %v346_v55, %s5161_s3 }
 0x96b   :  { %v5455_v56 = vpop.permute.xlu0 %348 }
 0x96c   :  { %4581 = vmatmul.msk.f32.vlgmr.msrb.gmra.mxu2 %vm87_vm0, %v5455_v56 }
 0x9ef   :  { %v369_v57 = vpop.f32.mrf.mxu2 }
 0x9f0   :  { %v372_v58 = vadd.f32 %v369_v57, %v157_v31 }
 0x9f2   :  { %4840 = vtanh.f32 %v372_v58 }
 0x9f8   :  { %v4841_v60 = vpop.eup %4840 }
 0x9f9   :  { %v374_v61 = vmul.f32 0.5, %v4841_v60 }
 0x9fb   :  { %v375_v62 = vadd.f32 0.5, %v374_v61 }
 0x9fd   :  { %v376_v63 = vsel %vm66_vm14, %v4841_v60, %v375_v62  ;;  %v554_v62 = vld [vmem:[%s7281_s4] sm:$0xff] }
 0x9fe   :  { %379 = vrot.lane.b32.xlu1 %v376_v63, %s5160_s0  ;;  %v377_v2 = vmul.f32 %v376_v63, %v340_v53 }
 0xa70   :  { %v380_v0 = vpop.permute.xlu1 %379 }
 0xa71   :  { %v382_v1 = vmul.f32 %v380_v0, %v376_v63 }
 0xa73   :  { %384 = vrot.lane.b32.xlu2 %v382_v1, %s5160_s0 }
 0xacd   :  { %v385_v3 = vpop.permute.xlu2 %384 }
 0xace   :  { %v387_v4 = vadd.f32 %v385_v3, %v377_v2 }
 0xad0   :  { %4842 = vtanh.f32 %v387_v4 }
 0xad6   :  { %v4843_v5 = vpop.eup %4842 }
 0xad7   :  { %390 = vrot.lane.b32.xlu0 %v4843_v5, %s5160_s0 }
 0xb49   :  { %v391_v26 = vpop.permute.xlu0 %390 }
 0xb4a   :  { %v393_v29 = vmul.f32 %v391_v26, %v376_v63  ;;  %v5549_v26 = vld [vmem:[%s7282_s5 + $0x18] sm:$0xff] }
 0xb4b   :  { %651 = vmatpush.msrb.mxu1 %v5549_v26  ;;  %698 = vmatpush.msrb.mxu2 %v5549_v26 }
 0xb4c   :  { %395 = vrot.lane.b32.xlu1 %v393_v29, %s5161_s3  ;;  %v5554_v29 = vld [vmem:[%s7282_s5 + $0x10] sm:$0xff] }
 0xb4d   :  { %652 = vmatpush.msrb.mxu1 %v5554_v29  ;;  %699 = vmatpush.msrb.mxu2 %v5554_v29 }
 0xbbe   :  { %v5470_v31 = vpop.permute.xlu1 %395 }
 0xbbf   :  { %4582 = vmatmul.msk.f32.vlgmr.msrb.gmra.mxu3 %vm87_vm0, %v5470_v31  ;;  %v549_v5 = vsel %vm53_vm1, %v5470_v31, %v5455_v56 }
 0xc42   :  { %v416_v6 = vpop.f32.mrf.mxu3 }
 0xc43   :  { %v419_v7 = vadd.f32 %v416_v6, %v158_v35  ;;  %v5561_v6 = vld [vmem:[%s7282_s5 + $0x8] sm:$0xff] }
 0xc44   :  { %653 = vmatpush.msrb.mxu1 %v5561_v6  ;;  %700 = vmatpush.msrb.mxu2 %v5561_v6 }
 0xc45   :  { %4844 = vtanh.f32 %v419_v7  ;;  %v5568_v7 = vld [vmem:[%s7282_s5] sm:$0xff] }
 0xc46   :  { %654 = vmatpush.msrb.mxu1 %v5568_v7  ;;  %701 = vmatpush.msrb.mxu2 %v5568_v7 }
 0xc4b   :  { %v4845_v8 = vpop.eup %4844 }
 0xc4c   :  { %v421_v9 = vmul.f32 0.5, %v4845_v8 }
 0xc4e   :  { %v422_v11 = vadd.f32 0.5, %v421_v9 }
 0xc50   :  { %v423_v13 = vsel %vm66_vm14, %v4845_v8, %v422_v11  ;;  %v550_v8 = vsel %vm53_vm1, %v5455_v56, %v5470_v31  ;;  %v4820_v11 = vld [vmem:[%s7283_s6] ss:$0 sm:$0xff] }
 0xc51   :  { %426 = vrot.lane.b32.xlu2 %v423_v13, %s5160_s0  ;;  %v424_v16 = vmul.f32 %v423_v13, %v387_v4 }
 0xcab   :  { %v427_v14 = vpop.permute.xlu2 %426 }
 0xcac   :  { %v429_v15 = vmul.f32 %v427_v14, %v423_v13 }
 0xcae   :  { %431 = vrot.lane.b32.xlu0 %v429_v15, %s5160_s0 }
 0xd20   :  { %v432_v17 = vpop.permute.xlu0 %431 }
 0xd21   :  { %v434_v18 = vadd.f32 %v432_v17, %v424_v16 }
 0xd23   :  { %4846 = vtanh.f32 %v434_v18 }
 0xd29   :  { %v4847_v19 = vpop.eup %4846 }
 0xd2a   :  { %437 = vrot.lane.b32.xlu1 %v4847_v19, %s5160_s0 }
 0xd9c   :  { %v438_v24 = vpop.permute.xlu1 %437 }
 0xd9d   :  { %v440_v33 = vmul.f32 %v438_v24, %v423_v13 }
 0xd9f   :  { %442 = vrot.lane.b32.xlu2 %v440_v33, %s5161_s3 }
 0xdf9   :  { %v5485_v35 = vpop.permute.xlu2 %442 }
 0xdfa   :  { %4583 = vmatmul.msk.f32.vlgmr.msra.gmra.mxu1 %vm87_vm0, %v5485_v35  ;;  %v546_v4 = vsel %vm53_vm1, %v5485_v35, %v5440_v38  ;;  %v551_v56 = vsel %vm53_vm1, %v5440_v38, %v5485_v35 }
 0xdfb   :  { %745 = vmatpush.msra.mxu1 %v5549_v26 }
 0xdfd   :  { %746 = vmatpush.msra.mxu1 %v5554_v29 }
 0xdff   :  { %747 = vmatpush.msra.mxu1 %v5561_v6 }
 0xe01   :  { %748 = vmatpush.msra.mxu1 %v5568_v7 }
 0xe02   :  { %655 = vmatmul.f32.vlgmr.msrb.gmra.mxu1 %v7293_v12 }
 0xe03   :  { %839 = vmatpush.msrb.mxu1 %v5549_v26 }
 0xe05   :  { %840 = vmatpush.msrb.mxu1 %v5554_v29 }
 0xe07   :  { %841 = vmatpush.msrb.mxu1 %v5561_v6 }
 0xe09   :  { %842 = vmatpush.msrb.mxu1 %v5568_v7 }
 0xe77   :  { %v463_v23 = vpop.f32.mrf.mxu1 }
 0xe78   :  { %v466_v25 = vadd.f32 %v463_v23, %v159_v39 }
 0xe7a   :  { %4848 = vtanh.f32 %v466_v25 }
 0xe80   :  { %v4849_v27 = vpop.eup %4848 }
 0xe81   :  { %v468_v32 = vmul.f32 0.5, %v4849_v27 }
 0xe83   :  { %v469_v34 = vadd.f32 0.5, %v468_v32 }
 0xe85   :  { %v470_v36 = vsel %vm66_vm14, %v4849_v27, %v469_v34 }
 0xe86   :  { %473 = vrot.lane.b32.xlu0 %v470_v36, %s5160_s0  ;;  %v471_v44 = vmul.f32 %v470_v36, %v434_v18 }
 0xef8   :  { %v474_v40 = vpop.permute.xlu0 %473 }
 0xef9   :  { %v476_v43 = vmul.f32 %v474_v40, %v470_v36 }
 0xefb   :  { %478 = vrot.lane.b32.xlu1 %v476_v43, %s5160_s0 }
 0xf6d   :  { %v479_v46 = vpop.permute.xlu1 %478 }
 0xf6e   :  { %v481_v47 = vadd.f32 %v479_v46, %v471_v44  ;;  %v656_v46 = vpop.f32.mrf.mxu1 }
 0xf70   :  { %4850 = vtanh.f32 %v481_v47 }
 0xf76   :  { %v4851_v48 = vpop.eup %4850 }
 0xf77   :  { %484 = vrot.lane.b32.xlu2 %v4851_v48, %s5160_s0 }
 0xfd1   :  { %v485_v20 = vpop.permute.xlu2 %484 }
 0xfd2   :  { %v487_v37 = vmul.f32 %v485_v20, %v470_v36 }
 0xfd4   :  { %489 = vrot.lane.b32.xlu0 %v487_v37, %s5161_s3 }
0x1046   :  { %v5500_v39 = vpop.permute.xlu0 %489 }
0x1047   :  { %4584 = vmatmul.msk.f32.vlgmr.msra.gmra.mxu2 %vm87_vm0, %v5500_v39  ;;  %v543_v3 = vsel %vm53_vm1, %v5500_v39, %v5425_v10  ;;  %v552_v31 = vsel %vm53_vm1, %v5425_v10, %v5500_v39 }
0x1048   :  { %792 = vmatpush.msra.mxu2 %v5549_v26 }
0x104a   :  { %793 = vmatpush.msra.mxu2 %v5554_v29 }
0x104c   :  { %794 = vmatpush.msra.mxu2 %v5561_v6 }
0x104e   :  { %795 = vmatpush.msra.mxu2 %v5568_v7 }
0x10ca   :  { %v510_v49 = vpop.f32.mrf.mxu2 }
0x10cb   :  { %v513_v50 = vadd.f32 %v510_v49, %v160_v45  ;;  %v555_v45 = vld [vmem:[%s7281_s4 + $0x8] sm:$0xff] }
0x10cc   :  { %604 = vmatpush.msra.mxu3 %v555_v45 }
0x10cd   :  { %4852 = vtanh.f32 %v513_v50 }
0x10ce   :  { %605 = vmatpush.msra.mxu3 %v554_v62 }
0x10d3   :  { %v4853_v51 = vpop.eup %4852 }
0x10d4   :  { %v515_v52 = vmul.f32 0.5, %v4853_v51 }
0x10d6   :  { %v516_v53 = vadd.f32 0.5, %v515_v52 }
0x10d8   :  { %v517_v54 = vsel %vm66_vm14, %v4853_v51, %v516_v53 }
0x10d9   :  { %520 = vrot.lane.b32.xlu1 %v517_v54, %s5160_s0  ;;  %v518_v57 = vmul.f32 %v517_v54, %v481_v47 }
0x114b   :  { %v521_v30 = vpop.permute.xlu1 %520 }
0x114c   :  { %v523_v55 = vmul.f32 %v521_v30, %v517_v54 }
0x114e   :  { %525 = vrot.lane.b32.xlu2 %v523_v55, %s5160_s0 }
0x11a8   :  { %v526_v58 = vpop.permute.xlu2 %525 }
0x11a9   :  { %v528_v60 = vadd.f32 %v526_v58, %v518_v57 }
0x11ab   :  { %4854 = vtanh.f32 %v528_v60 }
0x11b1   :  { %v4855_v61 = vpop.eup %4854 }
0x11b2   :  { %531 = vrot.lane.b32.xlu0 %v4855_v61, %s5160_s0 }
0x1224   :  { %v532_v63 = vpop.permute.xlu0 %531 }
0x1225   :  { %v534_v0 = vmul.f32 %v532_v63, %v517_v54 }
0x1227   :  { %536 = vrot.lane.b32.xlu1 %v534_v0, %s5161_s3 }
0x1299   :  { %v537_v1 = vpop.permute.xlu1 %536 }
0x129a   :  { %v540_v2 = vsel %vm53_vm1, %v537_v1, %v5411_v59  ;;  %v553_v38 = vsel %vm53_vm1, %v5411_v59, %v537_v1 }
0x129b   :  { %4585 = vmatmul.msk.f32.vlgmr.msra.gmra.mxu3 %vm87_vm0, %v540_v2 }
0x12a3   :  { %4586 = vmatmul.msk.f32.gmra.mxu3 %vm87_vm0, %v543_v3 }
0x12ab   :  { %4587 = vmatmul.msk.f32.gmra.mxu3 %vm87_vm0, %v546_v4 }
0x12b3   :  { %4588 = vmatmul.msk.f32.gmra.mxu3 %vm87_vm0, %v549_v5 }
0x12bb   :  { %4589 = vmatmul.msk.f32.gmra.mxu3 %vm87_vm0, %v550_v8 }
0x12c3   :  { %4590 = vmatmul.msk.f32.gmra.mxu3 %vm87_vm0, %v551_v56 }
0x12cb   :  { %4591 = vmatmul.msk.f32.gmra.mxu3 %vm87_vm0, %v552_v31 }
0x12d3   :  { %4592 = vmatmul.msk.f32.gmra.mxu3 %vm87_vm0, %v553_v38 }
0x131e   :  { %v607_v9 = vpop.f32.mrf.mxu3 }
0x131f   :  { %v5645_v43 = vadd.f32 %v4820_v11, %v607_v9 }
0x1326   :  { %v610_v13 = vpop.f32.mrf.mxu3 }
0x1327   :  { %v5609_v14 = vadd.f32 %v4820_v11, %v610_v13 }
0x132e   :  { %v613_v15 = vpop.f32.mrf.mxu3 }
0x132f   :  { %v5611_v16 = vadd.f32 %v4820_v11, %v613_v15 }
0x1336   :  { %v616_v10 = vpop.f32.mrf.mxu3 }
0x1337   :  { %v5613_v17 = vadd.f32 %v4820_v11, %v616_v10 }
0x133e   :  { %v619_v18 = vpop.f32.mrf.mxu3 }
0x133f   :  { %v5615_v19 = vadd.f32 %v4820_v11, %v619_v18 }
0x1341   :  { %v634_v59 = vsel %vm5358_vm13, %v5615_v19, %v5613_v17  ;;  %v635_v24 = vsel %vm5358_vm13, %v5613_v17, %v5615_v19 }
0x1346   :  { %v622_v33 = vpop.f32.mrf.mxu3 }
0x1347   :  { %v5625_v35 = vadd.f32 %v4820_v11, %v622_v33 }
0x1349   :  { %v633_v23 = vsel %vm5358_vm13, %v5625_v35, %v5611_v16  ;;  %v636_v25 = vsel %vm5358_vm13, %v5611_v16, %v5625_v35 }
0x134e   :  { %v625_v27 = vpop.f32.mrf.mxu3 }
0x134f   :  { %v5635_v32 = vadd.f32 %v4820_v11, %v625_v27 }
0x1351   :  { %v632_v34 = vsel %vm5358_vm13, %v5635_v32, %v5609_v14  ;;  %v637_v36 = vsel %vm5358_vm13, %v5609_v14, %v5635_v32 }
0x1356   :  { %v628_v40 = vpop.f32.mrf.mxu3 }
0x1357   :  { %v5647_v44 = vadd.f32 %v4820_v11, %v628_v40 }
0x1359   :  { %v631_v47 = vsel %vm5358_vm13, %v5647_v44, %v5645_v43  ;;  %v638_v48 = vsel %vm5358_vm13, %v5645_v43, %v5647_v44  ;;  %v5809_v44 = vld [vmem:[%s7286_s9] sm:$0xff]  ;;  %vm2305_vm13 = vcmask 1045509  }
0x135a   :  { %v659_v20 = vadd.f32 %v656_v46, %v631_v47 }
0x135c   :  { %4856 = vtanh.f32 %v659_v20 }
0x1362   :  { %v4857_v37 = vpop.eup %4856 }
0x1363   :  { %v661_v39 = vmul.f32 0.5, %v4857_v37 }
0x1365   :  { %v662_v49 = vadd.f32 0.5, %v661_v39 }
0x1367   :  { %v663_v50 = vsel %vm66_vm14, %v4857_v37, %v662_v49 }
0x1368   :  { %666 = vrot.lane.b32.xlu2 %v663_v50, %s5160_s0  ;;  %v664_v53 = vmul.f32 0.0, %v663_v50 }
0x13c2   :  { %v667_v51 = vpop.permute.xlu2 %666 }
0x13c3   :  { %v669_v52 = vmul.f32 %v667_v51, %v663_v50 }
0x13c5   :  { %671 = vrot.lane.b32.xlu0 %v669_v52, %s5160_s0 }
0x1437   :  { %v672_v54 = vpop.permute.xlu0 %671 }
0x1438   :  { %v674_v30 = vadd.f32 %v672_v54, %v664_v53 }
0x143a   :  { %4858 = vtanh.f32 %v674_v30 }
0x1440   :  { %v4859_v55 = vpop.eup %4858 }
0x1441   :  { %677 = vrot.lane.b32.xlu1 %v4859_v55, %s5160_s0 }
0x14b3   :  { %v678_v57 = vpop.permute.xlu1 %677 }
0x14b4   :  { %v680_v58 = vmul.f32 %v678_v57, %v663_v50 }
0x14b6   :  { %682 = vrot.lane.b32.xlu2 %v680_v58, %s5161_s3 }
0x1510   :  { %v5663_v60 = vpop.permute.xlu2 %682 }
0x1511   :  { %4593 = vmatmul.msk.f32.vlgmr.msrb.gmra.mxu2 %vm87_vm0, %v5663_v60 }
0x1512   :  { %886 = vmatpush.msrb.mxu2 %v5549_v26 }
0x1514   :  { %887 = vmatpush.msrb.mxu2 %v5554_v29 }
0x1516   :  { %888 = vmatpush.msrb.mxu2 %v5561_v6 }
0x1518   :  { %889 = vmatpush.msrb.mxu2 %v5568_v7 }
0x1594   :  { %v703_v61 = vpop.f32.mrf.mxu2 }
0x1595   :  { %v706_v41 = vadd.f32 %v703_v61, %v632_v34 }
0x1597   :  { %4860 = vtanh.f32 %v706_v41 }
0x159d   :  { %v4861_v42 = vpop.eup %4860 }
0x159e   :  { %v708_v45 = vmul.f32 0.5, %v4861_v42 }
0x15a0   :  { %v709_v62 = vadd.f32 0.5, %v708_v45 }
0x15a2   :  { %v710_v63 = vsel %vm66_vm14, %v4861_v42, %v709_v62 }
0x15a3   :  { %713 = vrot.lane.b32.xlu0 %v710_v63, %s5160_s0  ;;  %v711_v2 = vmul.f32 %v710_v63, %v674_v30 }
0x1615   :  { %v714_v0 = vpop.permute.xlu0 %713 }
0x1616   :  { %v716_v1 = vmul.f32 %v714_v0, %v710_v63 }
0x1618   :  { %718 = vrot.lane.b32.xlu1 %v716_v1, %s5160_s0 }
0x168a   :  { %v719_v3 = vpop.permute.xlu1 %718 }
0x168b   :  { %v721_v4 = vadd.f32 %v719_v3, %v711_v2 }
0x168d   :  { %4862 = vtanh.f32 %v721_v4 }
0x1693   :  { %v4863_v5 = vpop.eup %4862 }
0x1694   :  { %724 = vrot.lane.b32.xlu2 %v4863_v5, %s5160_s0 }
0x16ee   :  { %v725_v8 = vpop.permute.xlu2 %724 }
0x16ef   :  { %v727_v56 = vmul.f32 %v725_v8, %v710_v63 }
0x16f1   :  { %729 = vrot.lane.b32.xlu0 %v727_v56, %s5161_s3 }
0x1763   :  { %v5677_v31 = vpop.permute.xlu0 %729 }
0x1764   :  { %4594 = vmatmul.msk.f32.vlgmr.msra.gmra.mxu1 %vm87_vm0, %v5677_v31 }
0x1765   :  { %933 = vmatpush.msra.mxu1 %v5549_v26 }
0x1767   :  { %934 = vmatpush.msra.mxu1 %v5554_v29 }
0x1769   :  { %935 = vmatpush.msra.mxu1 %v5561_v6 }
0x176b   :  { %936 = vmatpush.msra.mxu1 %v5568_v7 }
0x17e1   :  { %v750_v38 = vpop.f32.mrf.mxu1 }
0x17e2   :  { %v753_v9 = vadd.f32 %v750_v38, %v633_v23 }
0x17e4   :  { %4864 = vtanh.f32 %v753_v9 }
0x17ea   :  { %v4865_v11 = vpop.eup %4864 }
0x17eb   :  { %v755_v13 = vmul.f32 0.5, %v4865_v11 }
0x17ed   :  { %v756_v15 = vadd.f32 0.5, %v755_v13 }
0x17ef   :  { %v757_v10 = vsel %vm66_vm14, %v4865_v11, %v756_v15 }
0x17f0   :  { %760 = vrot.lane.b32.xlu1 %v757_v10, %s5160_s0  ;;  %v758_v27 = vmul.f32 %v757_v10, %v721_v4 }
0x1862   :  { %v761_v18 = vpop.permute.xlu1 %760 }
0x1863   :  { %v763_v33 = vmul.f32 %v761_v18, %v757_v10 }
0x1865   :  { %765 = vrot.lane.b32.xlu2 %v763_v33, %s5160_s0 }
0x18bf   :  { %v766_v34 = vpop.permute.xlu2 %765 }
0x18c0   :  { %v768_v40 = vadd.f32 %v766_v34, %v758_v27  ;;  %v1031_v27 = vld [vmem:[%s7284_s7 + $0x10] sm:$0xff]  ;;  %v1030_v34 = vld [vmem:[%s7284_s7 + $0x8] sm:$0xff] }
0x18c2   :  { %4866 = vtanh.f32 %v768_v40 }
0x18c8   :  { %v4867_v46 = vpop.eup %4866 }
0x18c9   :  { %771 = vrot.lane.b32.xlu0 %v4867_v46, %s5160_s0 }
0x193b   :  { %v772_v23 = vpop.permute.xlu0 %771 }
0x193c   :  { %v774_v47 = vmul.f32 %v772_v23, %v757_v10 }
0x193e   :  { %776 = vrot.lane.b32.xlu1 %v774_v47, %s5161_s3 }
0x19b0   :  { %v5696_v20 = vpop.permute.xlu1 %776 }
0x19b1   :  { %4595 = vmatmul.msk.f32.vlgmr.msra.gmra.mxu2 %vm87_vm0, %v5696_v20 }
0x19b2   :  { %980 = vmatpush.msra.mxu2 %v5549_v26 }
0x19b4   :  { %981 = vmatpush.msra.mxu2 %v5554_v29 }
0x19b6   :  { %982 = vmatpush.msra.mxu2 %v5561_v6 }
0x19b8   :  { %983 = vmatpush.msra.mxu2 %v5568_v7 }
0x1a34   :  { %v797_v37 = vpop.f32.mrf.mxu2 }
0x1a35   :  { %v800_v39 = vadd.f32 %v797_v37, %v634_v59 }
0x1a37   :  { %4868 = vtanh.f32 %v800_v39 }
0x1a3d   :  { %v4869_v49 = vpop.eup %4868 }
0x1a3e   :  { %v802_v50 = vmul.f32 0.5, %v4869_v49 }
0x1a40   :  { %v803_v51 = vadd.f32 0.5, %v802_v50 }
0x1a42   :  { %v804_v26 = vsel %vm66_vm14, %v4869_v49, %v803_v51 }
0x1a43   :  { %807 = vrot.lane.b32.xlu2 %v804_v26, %s5160_s0  ;;  %v805_v7 = vmul.f32 %v804_v26, %v768_v40  ;;  %v1029_v40 = vld [vmem:[%s7284_s7] sm:$0xff] }
0x1a9d   :  { %v808_v29 = vpop.permute.xlu2 %807 }
0x1a9e   :  { %v810_v6 = vmul.f32 %v808_v29, %v804_v26 }
0x1aa0   :  { %812 = vrot.lane.b32.xlu0 %v810_v6, %s5160_s0 }
0x1b12   :  { %v813_v52 = vpop.permute.xlu0 %812 }
0x1b13   :  { %v815_v53 = vadd.f32 %v813_v52, %v805_v7 }
0x1b15   :  { %4870 = vtanh.f32 %v815_v53 }
0x1b1b   :  { %v4871_v54 = vpop.eup %4870 }
0x1b1c   :  { %818 = vrot.lane.b32.xlu1 %v4871_v54, %s5160_s0 }
0x1b8e   :  { %v819_v59 = vpop.permute.xlu1 %818 }
0x1b8f   :  { %v821_v30 = vmul.f32 %v819_v59, %v804_v26 }
0x1b91   :  { %823 = vrot.lane.b32.xlu2 %v821_v30, %s5161_s3 }
0x1beb   :  { %v5715_v55 = vpop.permute.xlu2 %823 }
0x1bec   :  { %4596 = vmatmul.msk.f32.vlgmr.msrb.gmra.mxu1 %vm87_vm0, %v5715_v55 }
0x1c69   :  { %v844_v57 = vpop.f32.mrf.mxu1 }
0x1c6a   :  { %v847_v58 = vadd.f32 %v844_v57, %v635_v24 }
0x1c6c   :  { %4872 = vtanh.f32 %v847_v58 }
0x1c72   :  { %v4873_v61 = vpop.eup %4872 }
0x1c73   :  { %v849_v41 = vmul.f32 0.5, %v4873_v61 }
0x1c75   :  { %v850_v42 = vadd.f32 0.5, %v849_v41 }
0x1c77   :  { %v851_v45 = vsel %vm66_vm14, %v4873_v61, %v850_v42 }
0x1c78   :  { %854 = vrot.lane.b32.xlu0 %v851_v45, %s5160_s0  ;;  %v852_v0 = vmul.f32 %v851_v45, %v815_v53 }
0x1cea   :  { %v855_v62 = vpop.permute.xlu0 %854 }
0x1ceb   :  { %v857_v63 = vmul.f32 %v855_v62, %v851_v45  ;;  %v1150_v62 = vperm.slane %v5809_v44, 5 }
0x1ced   :  { %859 = vrot.lane.b32.xlu1 %v857_v63, %s5160_s0 }
0x1d5f   :  { %v860_v1 = vpop.permute.xlu1 %859 }
0x1d60   :  { %v862_v2 = vadd.f32 %v860_v1, %v852_v0 }
0x1d62   :  { %4874 = vtanh.f32 %v862_v2 }
0x1d68   :  { %v4875_v3 = vpop.eup %4874 }
0x1d69   :  { %865 = vrot.lane.b32.xlu2 %v4875_v3, %s5160_s0  ;;  %v1122_v3 = vperm.slane %v5809_v44, 1 }
0x1dc3   :  { %v866_v17 = vpop.permute.xlu2 %865 }
0x1dc4   :  { %v868_v19 = vmul.f32 %v866_v17, %v851_v45  ;;  %v5800_v45 = vshrl.u32 %v51_v21, 7  ;;  %v1136_v21 = vperm.slane %v5809_v44, 3  ;;  %v1143_v17 = vperm.slane %v5809_v44, 4 }
0x1dc6   :  { %870 = vrot.lane.b32.xlu0 %v868_v19, %s5161_s3  ;;  %4643 = vset.pattern.permute.xlu1 %v5800_v45 }
0x1dc7   :  { %4644 = vset.pattern.permute.xlu2 %v5800_v45  ;;  %4645 = vset.pattern.permute.xlu0 %v5800_v45 }
0x1e38   :  { %v871_v24 = vpop.permute.xlu0 %870 }
0x1e39   :  { %4597 = vmatmul.msk.f32.vlgmr.msrb.gmra.mxu2 %vm87_vm0, %v871_v24  ;;  %v1024_v47 = vsel %vm53_vm1, %v871_v24, %v5715_v55  ;;  %v1025_v37 = vsel %vm53_vm1, %v5715_v55, %v871_v24 }
0x1ebc   :  { %v891_v4 = vpop.f32.mrf.mxu2 }
0x1ebd   :  { %v894_v5 = vadd.f32 %v891_v4, %v636_v25  ;;  %v1032_v25 = vld [vmem:[%s7284_s7 + $0x18] sm:$0xff] }
0x1ebe   :  { %4625 = vmatpush.msrb.mxu1 %v1032_v25  ;;  %4626 = vmatpush.msrb.mxu2 %v1032_v25 }
0x1ebf   :  { %4876 = vtanh.f32 %v894_v5  ;;  %1073 = vmatpush.msrb.mxu0 %v1032_v25 }
0x1ec0   :  { %4627 = vmatpush.msrb.mxu1 %v1031_v27  ;;  %4628 = vmatpush.msrb.mxu2 %v1031_v27 }
0x1ec1   :  { %1074 = vmatpush.msrb.mxu0 %v1031_v27 }
0x1ec2   :  { %4629 = vmatpush.msrb.mxu1 %v1030_v34  ;;  %4630 = vmatpush.msrb.mxu2 %v1030_v34 }
0x1ec3   :  { %1075 = vmatpush.msrb.mxu0 %v1030_v34 }
0x1ec4   :  { %4631 = vmatpush.msrb.mxu1 %v1029_v40  ;;  %4632 = vmatpush.msrb.mxu2 %v1029_v40 }
0x1ec5   :  { %v4877_v8 = vpop.eup %4876  ;;  %1076 = vmatpush.msrb.mxu0 %v1029_v40 }
0x1ec6   :  { %v896_v56 = vmul.f32 0.5, %v4877_v8 }
0x1ec8   :  { %v897_v38 = vadd.f32 0.5, %v896_v56 }
0x1eca   :  { %v898_v9 = vsel %vm66_vm14, %v4877_v8, %v897_v38  ;;  %v5821_v8 = vld [vmem:[%s7285_s8] ss:$0 sm:$0xff] }
0x1ecb   :  { %901 = vrot.lane.b32.xlu1 %v898_v9, %s5160_s0  ;;  %v899_v15 = vmul.f32 %v898_v9, %v862_v2 }
0x1f3d   :  { %v902_v11 = vpop.permute.xlu1 %901 }
0x1f3e   :  { %v904_v13 = vmul.f32 %v902_v11, %v898_v9 }
0x1f40   :  { %906 = vrot.lane.b32.xlu2 %v904_v13, %s5160_s0 }
0x1f9a   :  { %v907_v10 = vpop.permute.xlu2 %906 }
0x1f9b   :  { %v909_v18 = vadd.f32 %v907_v10, %v899_v15 }
0x1f9d   :  { %4878 = vtanh.f32 %v909_v18 }
0x1fa3   :  { %v4879_v33 = vpop.eup %4878 }
0x1fa4   :  { %912 = vrot.lane.b32.xlu0 %v4879_v33, %s5160_s0 }
0x2016   :  { %v913_v16 = vpop.permute.xlu0 %912 }
0x2017   :  { %v915_v35 = vmul.f32 %v913_v16, %v898_v9 }
0x2019   :  { %917 = vrot.lane.b32.xlu1 %v915_v35, %s5161_s3  ;;  %v1157_v35 = vperm.slane %v5809_v44, 6 }
0x208b   :  { %v918_v46 = vpop.permute.xlu1 %917 }
0x208c   :  { %4598 = vmatmul.msk.f32.vlgmr.msra.gmra.mxu1 %vm87_vm0, %v918_v46  ;;  %v1021_v23 = vsel %vm53_vm1, %v918_v46, %v5696_v20  ;;  %v1026_v30 = vsel %vm53_vm1, %v5696_v20, %v918_v46 }
0x2094   :  { %4602 = vmatmul.msk.f32.vlgmr.msrb.gmra.mxu1 %vm87_vm0, %v1021_v23 }
0x209c   :  { %4603 = vmatmul.msk.f32.gmra.mxu1 %vm87_vm0, %v1024_v47  ;;  %v1129_v47 = vperm.slane %v5809_v44, 2 }
0x20a4   :  { %4604 = vmatmul.msk.f32.gmra.mxu1 %vm87_vm0, %v1025_v37 }
0x2109   :  { %v938_v39 = vpop.f32.mrf.mxu1 }
0x210a   :  { %v941_v49 = vadd.f32 %v938_v39, %v637_v36 }
0x210c   :  { %4880 = vtanh.f32 %v941_v49 }
0x2111   :  { %v1084_v24 = vpop.f32.mrf.mxu1 }
0x2112   :  { %v4881_v50 = vpop.eup %4880 }
0x2113   :  { %v943_v51 = vmul.f32 0.5, %v4881_v50 }
0x2115   :  { %v944_v26 = vadd.f32 0.5, %v943_v51 }
0x2117   :  { %v945_v29 = vsel %vm66_vm14, %v4881_v50, %v944_v26 }
0x2118   :  { %948 = vrot.lane.b32.xlu2 %v945_v29, %s5160_s0  ;;  %v946_v52 = vmul.f32 %v945_v29, %v909_v18 }
0x2119   :  { %v1087_v5 = vpop.f32.mrf.mxu1 }
0x211a   :  { %v5827_v38 = vadd.f32 %v5821_v8, %v1087_v5 }
0x2121   :  { %v1090_v39 = vpop.f32.mrf.mxu1 }
0x2122   :  { %v5854_v50 = vadd.f32 %v5821_v8, %v1090_v39 }
0x2172   :  { %v949_v6 = vpop.permute.xlu2 %948 }
0x2173   :  { %v951_v7 = vmul.f32 %v949_v6, %v945_v29 }
0x2175   :  { %953 = vrot.lane.b32.xlu0 %v951_v7, %s5160_s0 }
0x21e7   :  { %v954_v53 = vpop.permute.xlu0 %953 }
0x21e8   :  { %v956_v54 = vadd.f32 %v954_v53, %v946_v52 }
0x21ea   :  { %4882 = vtanh.f32 %v956_v54 }
0x21f0   :  { %v4883_v59 = vpop.eup %4882 }
0x21f1   :  { %959 = vrot.lane.b32.xlu1 %v4883_v59, %s5160_s0 }
0x2263   :  { %v960_v14 = vpop.permute.xlu1 %959 }
0x2264   :  { %v962_v32 = vmul.f32 %v960_v14, %v945_v29 }
0x2266   :  { %964 = vrot.lane.b32.xlu2 %v962_v32, %s5161_s3  ;;  %v5876_v32 = vadd.f32 %v5821_v8, %v1084_v24 }
0x22c0   :  { %v5778_v36 = vpop.permute.xlu2 %964 }
0x22c1   :  { %4599 = vmatmul.msk.f32.vlgmr.msra.gmra.mxu2 %vm87_vm0, %v5778_v36  ;;  %v1027_v55 = vsel %vm53_vm1, %v5677_v31, %v5778_v36 }
0x22c9   :  { %4605 = vmatmul.msk.f32.vlgmr.msrb.gmra.mxu2 %vm87_vm0, %v1026_v30  ;;  %v1018_v30 = vsel %vm53_vm1, %v5778_v36, %v5677_v31 }
0x22d1   :  { %4606 = vmatmul.msk.f32.gmra.mxu2 %vm87_vm0, %v1027_v55 }
0x2344   :  { %v985_v57 = vpop.f32.mrf.mxu2 }
0x2345   :  { %v988_v58 = vadd.f32 %v985_v57, %v638_v48  ;;  %v1115_v48 = vperm.slane %v5809_v44, 0 }
0x2347   :  { %4884 = vtanh.f32 %v988_v58 }
0x234c   :  { %v1093_v13 = vpop.f32.mrf.mxu2 }
0x234d   :  { %v4885_v61 = vpop.eup %4884  ;;  %v5837_v18 = vadd.f32 %v5821_v8, %v1093_v13 }
0x234e   :  { %v990_v41 = vmul.f32 0.5, %v4885_v61 }
0x2350   :  { %v991_v20 = vadd.f32 0.5, %v990_v41 }
0x2352   :  { %v992_v42 = vsel %vm66_vm14, %v4885_v61, %v991_v20  ;;  %v1164_v20 = vperm.slane %v5809_v44, 7 }
0x2353   :  { %995 = vrot.lane.b32.xlu0 %v992_v42, %s5160_s0  ;;  %v993_v63 = vmul.f32 %v992_v42, %v956_v54 }
0x2354   :  { %v1096_v57 = vpop.f32.mrf.mxu2 }
0x2355   :  { %v5895_v41 = vadd.f32 %v5821_v8, %v1096_v57 }
0x23c5   :  { %v996_v28 = vpop.permute.xlu0 %995 }
0x23c6   :  { %v998_v43 = vmul.f32 %v996_v28, %v992_v42 }
0x23c8   :  { %1000 = vrot.lane.b32.xlu1 %v998_v43, %s5160_s0  ;;  %v4822_v43 = vld [vmem:[%s7290_s13] ss:$0 sm:$0xff] }
0x23d0   :  { %1120 = vperm.xlu1 %4643, %v1115_v48  }
0x23d8   :  { %1141 = vperm.xlu1 %4643, %v1136_v21  }
0x23e0   :  { %1155 = vperm.xlu1 %4643, %v1150_v62  }
0x243a   :  { %v1001_v0 = vpop.permute.xlu1 %1000 }
0x243b   :  { %v1003_v1 = vadd.f32 %v1001_v0, %v993_v63 }
0x243d   :  { %4886 = vtanh.f32 %v1003_v1 }
0x2442   :  { %v1121_v19 = vpop.permute.xlu1 %1120 }
0x2443   :  { %v4887_v2 = vpop.eup %4886  ;;  %vm1171_vm4 = vcmp.eq.s32.totalorder %v5343_v22, %v1121_v19 }
0x2444   :  { %1006 = vrot.lane.b32.xlu2 %v4887_v2, %s5160_s0  ;;  %v5845_v25 = vsel %vm1171_vm4, 1.0, %v7293_v12  ;;  %v1104_v2 = vld [vmem:[%s7287_s10 + $0x8] sm:$0xff] }
0x2445   :  { %7311 = vst [vmem:[#allocation5_spill] sm:$0xff] %v5845_v25  ;;  %v1228_v27 = vperm.slane %v5845_v25, 0  ;;  %v1235_v34 = vperm.slane %v5845_v25, 1  ;;  %v1242_v24 = vperm.slane %v5845_v25, 2  ;;  %v1270_v13 = vperm.slane %v5845_v25, 6 }
0x2447   :  { %v4646_v23 = vpack.i.bf16 %v1235_v34, %v1228_v27 }
0x244a   :  { %v1142_v4 = vpop.permute.xlu1 %1141 }
0x244b   :  { %vm1174_vm15 = vcmp.eq.s32.totalorder %v5343_v22, %v1142_v4  ;;  %v1249_v4 = vperm.slane %v5845_v25, 3 }
0x244c   :  { %1127 = vperm.xlu2 %4644, %v1122_v3   ;;  %v5824_v56 = vsel %vm1174_vm15, 1.0, %v7293_v12  ;;  %vm2308_vm15 = vcmask 1046534  }
0x244d   :  { %v1198_v11 = vmul.f32 %v5824_v56, %v5827_v38 }
0x244f   :  { %v1213_v15 = vsel %vm1203_vm2, %v1198_v11, 0.0 }
0x2452   :  { %v1156_v9 = vpop.permute.xlu1 %1155 }
0x2453   :  { %vm1176_vm3 = vcmp.eq.s32.totalorder %v5343_v22, %v1156_v9  ;;  %v4651_v9 = vpack.i.bf16 %v1249_v4, %v1242_v24 }
0x2454   :  { %1148 = vperm.xlu2 %4644, %v1143_v17   ;;  %v5834_v10 = vsel %vm1176_vm3, 1.0, %v7293_v12  ;;  %v7295_v17 = vmov 0   ;;  %vm2311_vm3 = vcmask 1047559  }
0x2455   :  { %v1200_v33 = vmul.f32 %v5834_v10, %v5837_v18 }
0x2457   :  { %v1219_v16 = vsel %vm1203_vm2, %v1200_v33, 0.0 }
0x247d   :  { %1214 = vadd.xlane.f32.xlu2 %v1213_v15  ;;  %v1277_v15 = vperm.slane %v5845_v25, 7 }
0x247f   :  { %v4662_v27 = vpack.i.bf16 %v1277_v15, %v1270_v13 }
0x2485   :  { %1220 = vadd.xlane.f32.xlu2 %v1219_v16 }
0x249d   :  { %1162 = vperm.xlu2 %4644, %v1157_v35  }
0x249e   :  { %v1007_v40 = vpop.permute.xlu2 %1006 }
0x249f   :  { %v1009_v46 = vmul.f32 %v1007_v40, %v992_v42 }
0x24a1   :  { %1011 = vrot.lane.b32.xlu0 %v1009_v46, %s5161_s3  ;;  %v1256_v46 = vperm.slane %v5845_v25, 4 }
0x24a5   :  { %4647 = vperm.xlu2 %4644, %v4646_v23   ;;  %v1263_v23 = vperm.slane %v5845_v25, 5 }
0x24a6   :  { %v5851_v37 = vpop.permute.xlu2 %1127 }
0x24a9   :  { %1134 = vperm.xlu0 %4645, %v1129_v47   ;;  %v4657_v47 = vpack.i.bf16 %v1263_v23, %v1256_v46 }
0x24ae   :  { %v1149_v49 = vpop.permute.xlu2 %1148 }
0x24af   :  { %vm1175_vm5 = vcmp.eq.s32.totalorder %v5343_v22, %v1149_v49 }
0x24b0   :  { %v5858_v51 = vsel %vm1175_vm5, 1.0, %v7293_v12 }
0x24b1   :  { %v1199_v26 = vmul.f32 %v5858_v51, %v5854_v50 }
0x24b3   :  { %v1216_v29 = vsel %vm1203_vm2, %v1199_v26, 0.0 }
0x24b4   :  { %1217 = vadd.xlane.f32.xlu1 %v1216_v29 }
0x24f0   :  { %v5863_v6 = vpop.xlane.xlu2 %1214 }
0x24f1   :  { %7312 = vst [vmem:[#allocation6_spill] sm:$0xff] %v5863_v6 }
0x24f8   :  { %v5865_v7 = vpop.xlane.xlu2 %1220 }
0x24f9   :  { %7313 = vst [vmem:[#allocation7_spill] sm:$0xff] %v5865_v7 }
0x2500   :  { %v1163_v59 = vpop.permute.xlu2 %1162 }
0x2501   :  { %vm1177_vm7 = vcmp.eq.s32.totalorder %v5343_v22, %v1163_v59 }
0x2502   :  { %v5892_v61 = vsel %vm1177_vm7, 1.0, %v7293_v12 }
0x2503   :  { %v1201_v31 = vmul.f32 %v5892_v61, %v5895_v41 }
0x2505   :  { %v1222_v36 = vsel %vm1203_vm2, %v1201_v31, 0.0 }
0x2508   :  { %v5956_v57 = vpop.permute.xlu2 %4647 }
0x2513   :  { %v1012_v52 = vpop.permute.xlu0 %1011 }
0x2514   :  { %v1015_v53 = vsel %vm53_vm1, %v1012_v52, %v5663_v60  ;;  %v1028_v54 = vsel %vm53_vm1, %v5663_v60, %v1012_v52  ;;  %vm1172_vm1 = vcmp.eq.s32.totalorder %v5343_v22, %v5851_v37 }
0x2515   :  { %4600 = vmatmul.msk.f32.vlgmr.msrb.gmra.mxu0 %vm87_vm0, %v1015_v53  ;;  %4607 = vmatmul.msk.f32.gmra.mxu2 %vm87_vm0, %v1028_v54  ;;  %v5926_v11 = vsel %vm1172_vm1, 1.0, %v7293_v12 }
0x2516   :  { %7315 = vst [vmem:[#allocation9_spill] sm:$0xff] %v5926_v11  ;;  %v1284_v33 = vperm.slane %v5926_v11, 0  ;;  %v1291_v16 = vperm.slane %v5926_v11, 1 }
0x2518   :  { %v4668_v34 = vpack.i.bf16 %v1291_v16, %v1284_v33 }
0x251b   :  { %v1135_v14 = vpop.permute.xlu0 %1134 }
0x251c   :  { %vm1173_vm6 = vcmp.eq.s32.totalorder %v5343_v22, %v1135_v14 }
0x251d   :  { %v5884_v55 = vsel %vm1173_vm6, 1.0, %v7293_v12  ;;  %4601 = vmatmul.msk.f32.gmra.mxu0 %vm87_vm0, %v1018_v30  ;;  %vm2831_vm0 = vcmp.gt.f32.partialorder %v1104_v2, 0.5 }
0x251e   :  { %7314 = vst [vmem:[#allocation8_spill] sm:$0xff] %v5884_v55  ;;  %v1197_v60 = vmul.f32 %v5884_v55, %v5876_v32  ;;  %v2832_v19 = vsel %vm2831_vm0, 1, %v7295_v17 }
0x2520   :  { %v1210_v58 = vsel %vm1203_vm2, %v1197_v60, 0.0 }
0x2521   :  { %1211 = vadd.xlane.f32.xlu0 %v1210_v58 }
0x2529   :  { %1223 = vadd.xlane.f32.xlu0 %v1222_v36 }
0x253d   :  { %1169 = vperm.xlu0 %4645, %v1164_v20  }
0x2592   :  { %v1078_v42 = vpop.f32.mrf.mxu0 }
0x2593   :  { %v1079_v28 = vadd.f32 %v5821_v8, %v1078_v42 }
0x2594   :  { %v5936_v37 = vpop.xlane.xlu0 %1211 }
0x2595   :  { %v5905_v48 = vadd.f32 %v4822_v43, %v1079_v28  ;;  %v1195_v21 = vmul.f32 %v5845_v25, %v1079_v28  ;;  %7316 = vst [vmem:[#allocation10_spill] sm:$0xff] %v5936_v37  ;;  %v2089_v25 = vrot.slane %v5824_v56, 1 }
0x2597   :  { %v1204_v62 = vsel %vm1203_vm2, %v1195_v21, 0.0  ;;  %v2596_v63 = vperm.slane %v5905_v48, 3  ;;  %v2575_v0 = vperm.slane %v5905_v48, 0  ;;  %v2617_v44 = vperm.slane %v5905_v48, 6 }
0x2598   :  { %1205 = vadd.xlane.f32.xlu1 %v1204_v62  ;;  %v2589_v1 = vperm.slane %v5905_v48, 2  ;;  %v2610_v3 = vperm.slane %v5905_v48, 5  ;;  %v2582_v5 = vperm.slane %v5905_v48, 1  ;;  %v2603_v35 = vperm.slane %v5905_v48, 4  ;;  %v1099_v54 = vpop.f32.mrf.mxu2 }
0x2599   :  { %2601 = vperm.xlu2 %4644, %v2596_v63   ;;  %2580 = vperm.xlu0 %4645, %v2575_v0   ;;  %v2624_v40 = vperm.slane %v5905_v48, 7  ;;  %v5951_v14 = vadd.f32 %v5821_v8, %v1099_v54 }
0x259a   :  { %v1081_v39 = vpop.f32.mrf.mxu0 }
0x259b   :  { %v5939_v49 = vadd.f32 %v5821_v8, %v1081_v39  ;;  %7319 = vst [vmem:[#allocation13_spill] sm:$0xff] %v5951_v14 }
0x259c   :  { %v5941_v26 = vpop.xlane.xlu0 %1223 }
0x259d   :  { %7317 = vst [vmem:[#allocation11_spill] sm:$0xff] %v5941_v26  ;;  %v1196_v29 = vmul.f32 %v5926_v11, %v5939_v49  ;;  %v2642_v31 = vrot.slane %v5939_v49, 3  ;;  %v2647_v28 = vperm.slane %v5939_v49, 0  ;;  %v2645_v0 = vrot.slane %v5939_v49, 6 }
0x259f   :  { %v1207_v52 = vsel %vm1203_vm2, %v1196_v29, 0.0  ;;  %v2650_v8 = vperm.slane %v2642_v31, 0 }
0x25a1   :  { %2622 = vperm.xlu2 %4644, %v2617_v44   ;;  %2594 = vperm.xlu0 %4645, %v2589_v1   ;;  %v2641_v1 = vrot.slane %v5939_v49, 2 }
0x25a9   :  { %4656 = vset.pattern.permute.xlu2 %v7295_v17  ;;  %2615 = vperm.xlu0 %4645, %v2610_v3  }
0x25aa   :  { %2834 = vperm.xlu2 %4656, %v2832_v19   ;;  %v5978_v19 = vpop.xlane.xlu1 %1217 }
0x25ab   :  { %7320 = vst [vmem:[#allocation14_spill] sm:$0xff] %v5978_v19 }
0x25af   :  { %v1170_v53 = vpop.permute.xlu0 %1169 }
0x25b0   :  { %vm1178_vm8 = vcmp.eq.s32.totalorder %v5343_v22, %v1170_v53  ;;  %v5962_v22 = vld [vmem:[%s7289_s12] sm:$0xff] }
0x25b1   :  { %2587 = vperm.xlu1 %4643, %v2582_v5   ;;  %4652 = vperm.xlu0 %4645, %v4651_v9   ;;  %v5948_v59 = vsel %vm1178_vm8, 1.0, %v7293_v12  ;;  %v2653_v5 = vperm.slane %v2645_v0, 0  ;;  %v2649_v9 = vperm.slane %v2641_v1, 0 }
0x25b2   :  { %4667 = vset.pattern.permute.xlu2 %v5800_v45  ;;  %7318 = vst [vmem:[#allocation12_spill] sm:$0xff] %v5948_v59  ;;  %v1202_v30 = vmul.f32 %v5948_v59, %v5951_v14 }
0x25b4   :  { %v1225_v60 = vsel %vm1203_vm2, %v1202_v30, 0.0 }
0x25b9   :  { %2608 = vperm.xlu1 %4643, %v2603_v35   ;;  %4663 = vperm.xlu0 %4645, %v4662_v27  }
0x25ba   :  { %4669 = vperm.xlu2 %4667, %v4668_v34   ;;  %v2644_v34 = vrot.slane %v5939_v49, 5 }
0x25bc   :  { %v2652_v53 = vperm.slane %v2644_v34, 0 }
0x25c1   :  { %2629 = vperm.xlu1 %4643, %v2624_v40  }
0x25c9   :  { %4658 = vperm.xlu1 %4643, %v4657_v47  }
0x25e3   :  { %1208 = vadd.xlane.f32.xlu2 %v1207_v52 }
0x25f3   :  { %1226 = vadd.xlane.f32.xlu1 %v1225_v60  ;;  %v2602_v58 = vpop.permute.xlu2 %2601 }
0x25f4   :  { %v2634_v36 = vadd.f32 %v2602_v58, %v5962_v22 }
0x25f6   :  { %v5965_v42 = vadd.f32 %v2650_v8, %v2634_v36 }
0x25f8   :  { %v2692_v63 = vsel %vm1203_vm2, %v5965_v42, -inf }
0x25f9   :  { %v2693_v24 = vrot.slane %v2692_v63, 4 }
0x25fb   :  { %v2623_v62 = vpop.permute.xlu2 %2622  ;;  %v2694_v35 = vmax.f32 %v2692_v63, %v2693_v24 }
0x25fc   :  { %v2637_v3 = vadd.f32 %v2623_v62, %v5962_v22 }
0x25fd   :  { %v2695_v47 = vrot.slane %v2694_v35, 2 }
0x25fe   :  { %v5981_v33 = vadd.f32 %v2653_v5, %v2637_v3 }
0x25ff   :  { %v2696_v36 = vmax.f32 %v2694_v35, %v2695_v47 }
0x2600   :  { %v2713_v23 = vsel %vm1203_vm2, %v5981_v33, -inf }
0x2601   :  { %v2714_v30 = vrot.slane %v2713_v23, 4  ;;  %v2697_v0 = vrot.slane %v2696_v36, 1 }
0x260b   :  { %v2581_v20 = vpop.permute.xlu0 %2580  ;;  %v5987_v39 = vpop.xlane.xlu1 %1205 }
0x260c   :  { %v2631_v43 = vadd.f32 %v2581_v20, %v5962_v22  ;;  %7321 = vst [vmem:[#allocation15_spill] sm:$0xff] %v5987_v39 }
0x260e   :  { %v5969_v21 = vadd.f32 %v2647_v28, %v2631_v43  ;;  %v2640_v28 = vrot.slane %v5939_v49, 1  ;;  %v2715_v43 = vmax.f32 %v2713_v23, %v2714_v30 }
0x2610   :  { %v2671_v44 = vsel %vm1203_vm2, %v5969_v21, -inf  ;;  %v2648_v3 = vperm.slane %v2640_v28, 0 }
0x2611   :  { %v2672_v2 = vrot.slane %v2671_v44, 4 }
0x2613   :  { %v2595_v4 = vpop.permute.xlu0 %2594  ;;  %v2673_v15 = vmax.f32 %v2671_v44, %v2672_v2 }
0x2614   :  { %v2633_v13 = vadd.f32 %v2595_v4, %v5962_v22  ;;  %v2716_v4 = vrot.slane %v2715_v43, 2 }
0x2615   :  { %v2674_v40 = vrot.slane %v2673_v15, 2 }
0x2616   :  { %v2665_v16 = vadd.f32 %v2649_v9, %v2633_v13 }
0x2617   :  { %v2675_v60 = vmax.f32 %v2673_v15, %v2674_v40  ;;  %v5995_v15 = vmax.f32 %v2696_v36, %v2697_v0  ;;  %v2643_v40 = vrot.slane %v5939_v49, 4 }
0x2618   :  { %v2685_v27 = vsel %vm1203_vm2, %v2665_v16, -inf }
0x2619   :  { %v2686_v46 = vrot.slane %v2685_v27, 4  ;;  %v2676_v62 = vrot.slane %v2675_v60, 1 }
0x261b   :  { %v2687_v29 = vmax.f32 %v2685_v27, %v2686_v46  ;;  %v2616_v52 = vpop.permute.xlu0 %2615  ;;  %v5993_v5 = vmax.f32 %v2675_v60, %v2676_v62  ;;  %v2717_v46 = vmax.f32 %v2715_v43, %v2716_v4  ;;  %v2651_v60 = vperm.slane %v2643_v40, 0 }
0x261c   :  { %v2636_v54 = vadd.f32 %v2616_v52, %v5962_v22 }
0x261d   :  { %v2688_v58 = vrot.slane %v2687_v29, 2  ;;  %v2727_v23 = vsub.f32 %v5969_v21, %v5993_v5  ;;  %v2718_v36 = vrot.slane %v2717_v46, 1 }
0x261e   :  { %v2668_v31 = vadd.f32 %v2652_v53, %v2636_v54 }
0x261f   :  { %v2689_v8 = vmax.f32 %v2687_v29, %v2688_v58  ;;  %v2730_v29 = vsub.f32 %v5965_v42, %v5995_v15  ;;  %v6010_v42 = vmax.f32 %v2717_v46, %v2718_v36 }
0x2620   :  { %v2706_v20 = vsel %vm1203_vm2, %v2668_v31, -inf }
0x2621   :  { %v2707_v63 = vrot.slane %v2706_v20, 4  ;;  %v2690_v2 = vrot.slane %v2689_v8, 1  ;;  %v2741_v43 = vmul.f32 1.442695, %v2730_v29 }
0x2623   :  { %v2708_v44 = vmax.f32 %v2706_v20, %v2707_v63  ;;  %v2588_v1 = vpop.permute.xlu1 %2587  ;;  %v5997_v27 = vmax.f32 %v2689_v8, %v2690_v2  ;;  %v2735_v8 = vmul.f32 1.442695, %v2727_v23 }
0x2624   :  { %v2632_v24 = vadd.f32 %v2588_v1, %v5962_v22 }
0x2625   :  { %v2709_v9 = vrot.slane %v2708_v44, 2  ;;  %v2729_v30 = vsub.f32 %v2665_v16, %v5997_v27  ;;  %4888 = vpow2.f32 %v2735_v8 }
0x2626   :  { %v2664_v13 = vadd.f32 %v2648_v3, %v2632_v24  ;;  %4890 = vpow2.f32 %v2741_v43  ;;  %v2733_v24 = vsub.f32 %v5981_v33, %v6010_v42 }
0x2627   :  { %v2710_v35 = vmax.f32 %v2708_v44, %v2709_v9  ;;  %v2739_v63 = vmul.f32 1.442695, %v2729_v30 }
0x2628   :  { %v2678_v34 = vsel %vm1203_vm2, %v2664_v13, -inf }
0x2629   :  { %v2679_v47 = vrot.slane %v2678_v34, 4  ;;  %v2711_v52 = vrot.slane %v2710_v35, 1  ;;  %4892 = vpow2.f32 %v2739_v63 }
0x262b   :  { %v2680_v53 = vmax.f32 %v2678_v34, %v2679_v47  ;;  %v2609_v54 = vpop.permute.xlu1 %2608  ;;  %v6007_v62 = vmax.f32 %v2710_v35, %v2711_v52  ;;  %v4889_v35 = vpop.eup %4888  ;;  %v2747_v47 = vmul.f32 1.442695, %v2733_v24 }
0x262c   :  { %v2635_v58 = vadd.f32 %v2609_v54, %v5962_v22  ;;  %v4891_v23 = vpop.eup %4890 }
0x262d   :  { %v2681_v20 = vrot.slane %v2680_v53, 2  ;;  %v2732_v16 = vsub.f32 %v2668_v31, %v6007_v62  ;;  %v2751_v31 = vsel %vm1203_vm2, %v4889_v35, 0.0  ;;  %v2772_v33 = vsel %vm1203_vm2, %v4891_v23, 0.0 }
0x262e   :  { %v2667_v28 = vadd.f32 %v2651_v60, %v2635_v58  ;;  %v2773_v43 = vrot.slane %v2772_v33, 4 }
0x262f   :  { %v2682_v21 = vmax.f32 %v2680_v53, %v2681_v20  ;;  %v2745_v34 = vmul.f32 1.442695, %v2732_v16  ;;  %v4893_v29 = vpop.eup %4892  ;;  %v2646_v53 = vrot.slane %v5939_v49, 7 }
0x2630   :  { %v2699_v0 = vsel %vm1203_vm2, %v2667_v28, -inf  ;;  %v2765_v60 = vsel %vm1203_vm2, %v4893_v29, 0.0 }
0x2631   :  { %v2683_v44 = vrot.slane %v2682_v21, 1  ;;  %v2700_v1 = vrot.slane %v2699_v0, 4  ;;  %v2654_v36 = vperm.slane %v2646_v53, 0 }
0x2633   :  { %v6013_v2 = vmax.f32 %v2682_v21, %v2683_v44  ;;  %v2701_v3 = vmax.f32 %v2699_v0, %v2700_v1  ;;  %v2630_v54 = vpop.permute.xlu1 %2629  ;;  %v2766_v21 = vrot.slane %v2765_v60, 4 }
0x2634   :  { %v2638_v8 = vadd.f32 %v2630_v54, %v5962_v22 }
0x2635   :  { %v2728_v4 = vsub.f32 %v2664_v13, %v6013_v2  ;;  %v2702_v9 = vrot.slane %v2701_v3, 2  ;;  %v2752_v13 = vrot.slane %v2751_v31, 4  ;;  %v2767_v35 = vadd.f32 %v2766_v21, %v2765_v60 }
0x2636   :  { %v2670_v0 = vadd.f32 %v2654_v36, %v2638_v8  ;;  %v4650_v60 = vunpack.i.h.bf16 %v5956_v57 }
0x2637   :  { %v2737_v40 = vmul.f32 1.442695, %v2728_v4  ;;  %v2703_v46 = vmax.f32 %v2701_v3, %v2702_v9  ;;  %v2753_v1 = vadd.f32 %v2752_v13, %v2751_v31  ;;  %v2768_v13 = vrot.slane %v2767_v35, 2 }
0x2638   :  { %v2720_v3 = vsel %vm1203_vm2, %v2670_v0, -inf }
0x2639   :  { %4894 = vpow2.f32 %v2737_v40  ;;  %v2704_v52 = vrot.slane %v2703_v46, 1  ;;  %v2721_v9 = vrot.slane %v2720_v3, 4  ;;  %v2754_v40 = vrot.slane %v2753_v1, 2 }
0x263a   :  { %4896 = vpow2.f32 %v2745_v34 }
0x263b   :  { %v6021_v30 = vmax.f32 %v2703_v46, %v2704_v52  ;;  %4898 = vpow2.f32 %v2747_v47  ;;  %v2722_v23 = vmax.f32 %v2720_v3, %v2721_v9  ;;  %v2755_v8 = vadd.f32 %v2754_v40, %v2753_v1  ;;  %v4659_v1 = vpop.permute.xlu1 %4658 }
0x263c   :  { %v2769_v3 = vadd.f32 %v2768_v13, %v2767_v35  ;;  %v1621_v40 = vmul.f32 %v4650_v60, %v5962_v22 }
0x263d   :  { %v2731_v58 = vsub.f32 %v2667_v28, %v6021_v30  ;;  %v2774_v28 = vadd.f32 %v2773_v43, %v2772_v33  ;;  %v2723_v53 = vrot.slane %v2722_v23, 2 }
0x263e   :  { %v2770_v35 = vrot.slane %v2769_v3, 1 }
0x263f   :  { %v4895_v20 = vpop.eup %4894  ;;  %v2743_v63 = vmul.f32 1.442695, %v2731_v58  ;;  %v2775_v54 = vrot.slane %v2774_v28, 2  ;;  %v4653_v58 = vpop.permute.xlu0 %4652  ;;  %v2724_v33 = vmax.f32 %v2722_v23, %v2723_v53 }
0x2640   :  { %v2758_v49 = vsel %vm1203_vm2, %v4895_v20, 0.0  ;;  %v4897_v44 = vpop.eup %4896  ;;  %v4655_v53 = vunpack.i.h.bf16 %v4653_v58 }
0x2641   :  { %v2759_v16 = vrot.slane %v2758_v49, 4  ;;  %4900 = vpow2.f32 %v2743_v63  ;;  %v4899_v24 = vpop.eup %4898  ;;  %v2786_v34 = vsel %vm1203_vm2, %v4897_v44, 0.0  ;;  %v4654_v63 = vunpack.i.l.bf16 %v4653_v58 }
0x2642   :  { %v2793_v47 = vsel %vm1203_vm2, %v4899_v24, 0.0  ;;  %v2787_v29 = vrot.slane %v2786_v34, 4  ;;  %v2725_v44 = vrot.slane %v2724_v33, 1 }
0x2643   :  { %v2760_v4 = vadd.f32 %v2759_v16, %v2758_v49  ;;  %v2794_v36 = vrot.slane %v2793_v47, 4  ;;  %v4649_v16 = vunpack.i.l.bf16 %v5956_v57 }
0x2644   :  { %v2788_v49 = vadd.f32 %v2787_v29, %v2786_v34  ;;  %v6033_v12 = vmax.f32 %v2724_v33, %v2725_v44  ;;  %v1622_v34 = vmul.f32 %v4654_v63, %v5962_v22  ;;  %v1683_v33 = vsel %vm1203_vm2, %v1621_v40, 0.0 }
0x2645   :  { %v2761_v46 = vrot.slane %v2760_v4, 2  ;;  %v2795_v9 = vadd.f32 %v2794_v36, %v2793_v47  ;;  %v1620_v57 = vmul.f32 %v4649_v16, %v5962_v22  ;;  %v2771_v63 = vadd.f32 %v2770_v35, %v2769_v3 }
0x2646   :  { %v2789_v17 = vrot.slane %v2788_v49, 2  ;;  %v2734_v29 = vsub.f32 %v2670_v0, %v6033_v12  ;;  %v4661_v0 = vunpack.i.h.bf16 %v4659_v1  ;;  %v1684_v16 = vrot.slane %v1683_v33, 4 }
0x2647   :  { %v2762_v52 = vadd.f32 %v2761_v46, %v2760_v4  ;;  %v4901_v31 = vpop.eup %4900  ;;  %v2776_v4 = vadd.f32 %v2775_v54, %v2774_v28  ;;  %v2756_v46 = vrot.slane %v2755_v8, 1  ;;  %v4660_v28 = vunpack.i.l.bf16 %v4659_v1 }
0x2648   :  { %v2779_v20 = vsel %vm1203_vm2, %v4901_v31, 0.0  ;;  %v2796_v54 = vrot.slane %v2795_v9, 2  ;;  %v2790_v60 = vadd.f32 %v2789_v17, %v2788_v49  ;;  %v1625_v17 = vmul.f32 %v4661_v0, %v5962_v22 }
0x2649   :  { %v2763_v43 = vrot.slane %v2762_v52, 1  ;;  %v2780_v21 = vrot.slane %v2779_v20, 4  ;;  %v2777_v47 = vrot.slane %v2776_v4, 1  ;;  %v2757_v36 = vadd.f32 %v2756_v46, %v2755_v8 }
0x264a   :  { %v1624_v44 = vmul.f32 %v4660_v28, %v5962_v22  ;;  %v2797_v8 = vadd.f32 %v2796_v54, %v2795_v9  ;;  %v1685_v3 = vadd.f32 %v1684_v16, %v1683_v33 }
0x264b   :  { %v2781_v24 = vadd.f32 %v2780_v21, %v2779_v20  ;;  %v2764_v23 = vadd.f32 %v2763_v43, %v2762_v52  ;;  %v2749_v20 = vmul.f32 1.442695, %v2734_v29  ;;  %v1623_v52 = vmul.f32 %v4655_v53, %v5962_v22 }
0x264c   :  { %v1690_v43 = vsel %vm1203_vm2, %v1622_v34, 0.0  ;;  %v1676_v21 = vsel %vm1203_vm2, %v1620_v57, 0.0  ;;  %v1704_v1 = vsel %vm1203_vm2, %v1624_v44, 0.0  ;;  %v2798_v29 = vrot.slane %v2797_v8, 1 }
0x264d   :  { %v2782_v31 = vrot.slane %v2781_v24, 2  ;;  %4902 = vlog2.f32 %v2764_v23  ;;  %v1691_v46 = vrot.slane %v1690_v43, 4  ;;  %v2791_v23 = vrot.slane %v2790_v60, 1 }
0x264e   :  { %4904 = vpow2.f32 %v2749_v20  ;;  %v1697_v53 = vsel %vm1203_vm2, %v1623_v52, 0.0  ;;  %v1705_v54 = vrot.slane %v1704_v1, 4  ;;  %v1686_v52 = vrot.slane %v1685_v3, 2 }
0x264f   :  { %v2783_v13 = vadd.f32 %v2782_v31, %v2781_v24  ;;  %v2778_v24 = vadd.f32 %v2777_v47, %v2776_v4  ;;  %4906 = vlog2.f32 %v2757_v36  ;;  %v1677_v31 = vrot.slane %v1676_v21, 4 }
0x2650   :  { %4908 = vlog2.f32 %v2771_v63  ;;  %v1698_v57 = vrot.slane %v1697_v53, 4  ;;  %v1692_v4 = vadd.f32 %v1691_v46, %v1690_v43  ;;  %v1711_v47 = vsel %vm1203_vm2, %v1625_v17, 0.0 }
0x2651   :  { %v2784_v58 = vrot.slane %v2783_v13, 1  ;;  %4910 = vlog2.f32 %v2778_v24  ;;  %v1678_v36 = vadd.f32 %v1677_v31, %v1676_v21  ;;  %v1712_v24 = vrot.slane %v1711_v47, 4 }
0x2652   :  { %v1699_v44 = vadd.f32 %v1698_v57, %v1697_v53  ;;  %v1693_v16 = vrot.slane %v1692_v4, 2  ;;  %v1687_v17 = vadd.f32 %v1686_v52, %v1685_v3 }
0x2653   :  { %v2785_v40 = vadd.f32 %v2784_v58, %v2783_v13  ;;  %v4903_v49 = vpop.eup %4902  ;;  %v2792_v13 = vadd.f32 %v2791_v23, %v2790_v60  ;;  %v2799_v58 = vadd.f32 %v2798_v29, %v2797_v8  ;;  %v1679_v60 = vrot.slane %v1678_v36, 2 }
0x2654   :  { %v4905_v34 = vpop.eup %4904  ;;  %v2810_v20 = vmul.f32 0.6931472, %v4903_v49  ;;  %v1700_v31 = vrot.slane %v1699_v44, 2  ;;  %v1694_v29 = vadd.f32 %v1693_v16, %v1692_v4  ;;  %v2075_v16 = vrot.slane %v5926_v11, 1 }
0x2655   :  { %4912 = vlog2.f32 %v2785_v40  ;;  %v2800_v9 = vsel %vm1203_vm2, %v4905_v34, 0.0  ;;  %v4907_v35 = vpop.eup %4906  ;;  %v1706_v40 = vadd.f32 %v1705_v54, %v1704_v1  ;;  %v1688_v54 = vrot.slane %v1687_v17, 1 }
0x2656   :  { %v2801_v28 = vrot.slane %v2800_v9, 4  ;;  %v4909_v63 = vpop.eup %4908  ;;  %v2808_v33 = vmul.f32 0.6931472, %v4907_v35  ;;  %4914 = vlog2.f32 %v2792_v13  ;;  %v2824_v23 = vadd.f32 %v2810_v20, %v6013_v2 }
0x2657   :  { %v4911_v43 = vpop.eup %4910  ;;  %4916 = vlog2.f32 %v2799_v58  ;;  %v2812_v21 = vmul.f32 0.6931472, %v4909_v63  ;;  %v1707_v35 = vrot.slane %v1706_v40, 2  ;;  %v1680_v39 = vadd.f32 %v1679_v60, %v1678_v36 }
0x2658   :  { %v2802_v0 = vadd.f32 %v2801_v28, %v2800_v9  ;;  %v2823_v8 = vadd.f32 %v2808_v33, %v5993_v5  ;;  %v1713_v9 = vadd.f32 %v1712_v24, %v1711_v47  ;;  %v2814_v13 = vmul.f32 0.6931472, %v4911_v43 }
0x2659   :  { %v2825_v2 = vadd.f32 %v2812_v21, %v5997_v27  ;;  %v1701_v20 = vadd.f32 %v1700_v31, %v1699_v44  ;;  %v1695_v52 = vrot.slane %v1694_v29, 1  ;;  %v1689_v36 = vadd.f32 %v1688_v54, %v1687_v17 }
0x265a   :  { %v2803_v46 = vrot.slane %v2802_v0, 2  ;;  %v2845_v1 = vsel %vm2293_vm9, %v2824_v23, %v2823_v8  ;;  %v1714_v5 = vrot.slane %v1713_v9, 2  ;;  %v2826_v63 = vadd.f32 %v2814_v13, %v5995_v15 }
0x265b   :  { %v4913_v34 = vpop.eup %4912  ;;  %v2846_v4 = vsel %vm2296_vm10, %v2825_v2, %v2845_v1  ;;  %v1681_v24 = vrot.slane %v1680_v39, 1  ;;  %v1702_v43 = vrot.slane %v1701_v20, 1  ;;  %v2076_v21 = vrot.slane %v5926_v11, 2 }
0x265c   :  { %v2804_v49 = vadd.f32 %v2803_v46, %v2802_v0  ;;  %v2816_v53 = vmul.f32 0.6931472, %v4913_v34  ;;  %v4915_v28 = vpop.eup %4914  ;;  %v1708_v0 = vadd.f32 %v1707_v35, %v1706_v40  ;;  %v2847_v44 = vsel %vm2299_vm11, %v2826_v63, %v2846_v4 }
0x265d   :  { %v4917_v58 = vpop.eup %4916  ;;  %v2818_v33 = vmul.f32 0.6931472, %v4915_v28  ;;  %v1696_v46 = vadd.f32 %v1695_v52, %v1694_v29  ;;  %v1715_v60 = vadd.f32 %v1714_v5, %v1713_v9  ;;  %v1682_v15 = vadd.f32 %v1681_v24, %v1680_v39 }
0x265e   :  { %v2805_v57 = vrot.slane %v2804_v49, 1  ;;  %v2827_v47 = vadd.f32 %v2816_v53, %v6021_v30  ;;  %v2820_v27 = vmul.f32 0.6931472, %v4917_v58  ;;  %v1709_v30 = vrot.slane %v1708_v0, 1 }
0x265f   :  { %v2828_v40 = vadd.f32 %v2818_v33, %v6007_v62  ;;  %v2181_v17 = vmul.f32 %v2075_v16, %v1689_v36  ;;  %v2182_v29 = vmul.f32 %v2076_v21, %v1696_v46  ;;  %v1716_v35 = vrot.slane %v1715_v60, 1  ;;  %v1105_v21 = vld [vmem:[%s7287_s10 + $0x10] sm:$0xff] }
0x2660   :  { %v2806_v3 = vadd.f32 %v2805_v57, %v2804_v49  ;;  %v2848_v34 = vsel %vm2302_vm12, %v2827_v47, %v2847_v44  ;;  %v1703_v49 = vadd.f32 %v1702_v43, %v1701_v20  ;;  %v2829_v53 = vadd.f32 %v2820_v27, %v6010_v42  ;;  %v2835_v57 = vpop.permute.xlu2 %2834 }
0x2661   :  { %v2849_v8 = vsel %vm2305_vm13, %v2828_v40, %v2848_v34  ;;  %v1710_v13 = vadd.f32 %v1709_v30, %v1708_v0  ;;  %vm2836_vm14 = vcmp.eq.s32.totalorder %v2835_v57, 1  ;;  %v2077_v9 = vrot.slane %v5926_v11, 3 }
0x2662   :  { %4918 = vlog2.f32 %v2806_v3  ;;  %v2850_v62 = vsel %vm2308_vm15, %v2829_v53, %v2849_v8  ;;  %v2078_v1 = vrot.slane %v5926_v11, 4  ;;  %v2292_v28 = vrot.slane %v2181_v17, 7 }
0x2663   :  { %v2180_v54 = vmul.f32 %v5926_v11, %v1682_v15  ;;  %v2183_v2 = vmul.f32 %v2077_v9, %v1703_v49  ;;  %v2295_v3 = vrot.slane %v2182_v29, 6  ;;  %v1717_v52 = vadd.f32 %v1716_v35, %v1715_v60 }
0x2664   :  { %v2184_v5 = vmul.f32 %v2078_v1, %v1710_v13  ;;  %v2079_v47 = vrot.slane %v5926_v11, 5  ;;  %v1298_v60 = vperm.slane %v5926_v11, 2  ;;  %v1305_v30 = vperm.slane %v5926_v11, 3 }
0x2665   :  { %v2298_v0 = vrot.slane %v2183_v2, 5  ;;  %v2294_v63 = vsel %vm2293_vm9, %v2292_v28, %v2180_v54  ;;  %v1326_v17 = vperm.slane %v5926_v11, 6  ;;  %v1333_v49 = vperm.slane %v5926_v11, 7 }
0x2666   :  { %v2301_v33 = vrot.slane %v2184_v5, 4  ;;  %v2185_v16 = vmul.f32 %v2079_v47, %v1717_v52  ;;  %v4673_v40 = vpack.i.bf16 %v1305_v30, %v1298_v60  ;;  %v1312_v8 = vperm.slane %v5926_v11, 4 }
0x2667   :  { %vm3110_vm4 = vcmp.gt.f32.partialorder %v1105_v21, 0.5  ;;  %v4684_v53 = vpack.i.bf16 %v1333_v49, %v1326_v17  ;;  %v7323_v29 = vmov 0   ;;  %v1340_v13 = vperm.slane %v5884_v55, 0 }
0x2668   :  { %v4919_v23 = vpop.eup %4918  ;;  %v2304_v36 = vrot.slane %v2185_v16, 3  ;;  %v3111_v35 = vsel %vm3110_vm4, 1, %v7323_v29  ;;  %v1347_v9 = vperm.slane %v5884_v55, 1  ;;  %v2920_v28 = vrot.slane %v5876_v32, 2 }
0x2669   :  { %v2822_v31 = vmul.f32 0.6931472, %v4919_v23  ;;  %v2923_v5 = vrot.slane %v5876_v32, 5  ;;  %v2919_v60 = vrot.slane %v5876_v32, 1 }
0x266a   :  { %v2928_v2 = vperm.slane %v2920_v28, 0 }
0x266b   :  { %v2830_v39 = vadd.f32 %v2822_v31, %v6033_v12  ;;  %v1319_v31 = vperm.slane %v5926_v11, 5  ;;  %v2931_v47 = vperm.slane %v2923_v5, 0 }
0x266d   :  { %v2851_v42 = vsel %vm2311_vm3, %v2830_v39, %v2850_v62  ;;  %v4679_v57 = vpack.i.bf16 %v1319_v31, %v1312_v8  ;;  %v4690_v39 = vpack.i.bf16 %v1347_v9, %v1340_v13  ;;  %v6102_v62 = vpop.permute.xlu2 %4669  ;;  %v2926_v8 = vperm.slane %v5876_v32, 0 }
0x266e   :  { %v6070_v20 = vsel %vm2836_vm14, %v2851_v42, %v5905_v48  ;;  %v2297_v48 = vsel %vm2296_vm10, %v2295_v3, %v2294_v63  ;;  %v2922_v9 = vrot.slane %v5876_v32, 4 }
0x266f   :  { %v2868_v58 = vperm.slane %v6070_v20, 2  ;;  %v2861_v12 = vperm.slane %v6070_v20, 1  ;;  %v2854_v4 = vperm.slane %v6070_v20, 0  ;;  %v2300_v24 = vsel %vm2299_vm11, %v2298_v0, %v2297_v48 }
0x2670   :  { %v2303_v27 = vsel %vm2302_vm12, %v2301_v33, %v2300_v24  ;;  %v2889_v43 = vperm.slane %v6070_v20, 5  ;;  %v2882_v44 = vperm.slane %v6070_v20, 4  ;;  %v2875_v34 = vperm.slane %v6070_v20, 3 }
0x2671   :  { %2873 = vperm.xlu2 %4667, %v2868_v58   ;;  %2866 = vperm.xlu0 %4645, %v2861_v12   ;;  %v6083_v46 = vsel %vm2305_vm13, %v2304_v36, %v2303_v27  ;;  %v2903_v23 = vperm.slane %v6070_v20, 7  ;;  %v2896_v15 = vperm.slane %v6070_v20, 6  ;;  %v6112_v36 = vpop.permute.xlu0 %4663  ;;  %v6114_v27 = vpop.xlane.xlu1 %1226 }
0x2672   :  { %2859 = vperm.xlu1 %4643, %v2854_v4   ;;  %7322 = vst [vmem:[#allocation16_spill] sm:$0xff] %v6083_v46 }
0x2673   :  { %7325 = vst [vmem:[#allocation18_spill] sm:$0xff] %v6114_v27 }
0x2675   :  { %v6104_v1 = vpop.xlane.xlu2 %1208 }
0x2676   :  { %7324 = vst [vmem:[#allocation17_spill] sm:$0xff] %v6104_v1 }
0x2679   :  { %2894 = vperm.xlu2 %4667, %v2889_v43   ;;  %2887 = vperm.xlu0 %4645, %v2882_v44  }
0x267a   :  { %2880 = vperm.xlu1 %4643, %v2875_v34  }
0x2681   :  { %4674 = vperm.xlu2 %4667, %v4673_v40   ;;  %2908 = vperm.xlu0 %4645, %v2903_v23  }
0x2682   :  { %2901 = vperm.xlu1 %4643, %v2896_v15   ;;  %v2927_v15 = vperm.slane %v2919_v60, 0 }
0x2689   :  { %4685 = vperm.xlu2 %4667, %v4684_v53   ;;  %4680 = vperm.xlu0 %4645, %v4679_v57  }
0x268a   :  { %4678 = vset.pattern.permute.xlu1 %v7323_v29 }
0x268b   :  { %3113 = vperm.xlu1 %4678, %v3111_v35  }
0x2693   :  { %4689 = vset.pattern.permute.xlu1 %v5800_v45 }
0x269b   :  { %4691 = vperm.xlu1 %4689, %v4690_v39  }
0x26cb   :  { %v2874_v54 = vpop.permute.xlu2 %2873 }
0x26cc   :  { %v2912_v42 = vadd.f32 %v2874_v54, %v5962_v22 }
0x26ce   :  { %v2944_v3 = vadd.f32 %v2928_v2, %v2912_v42 }
0x26d0   :  { %v2964_v52 = vsel %vm1203_vm2, %v2944_v3, -inf }
0x26d1   :  { %v2965_v58 = vrot.slane %v2964_v52, 4 }
0x26d3   :  { %v2895_v12 = vpop.permute.xlu2 %2894  ;;  %v2966_v4 = vmax.f32 %v2964_v52, %v2965_v58  ;;  %v2930_v58 = vperm.slane %v2922_v9, 0 }
0x26d4   :  { %v2915_v0 = vadd.f32 %v2895_v12, %v5962_v22 }
0x26d5   :  { %v2967_v33 = vrot.slane %v2966_v4, 2 }
0x26d6   :  { %v2947_v63 = vadd.f32 %v2931_v47, %v2915_v0 }
0x26d7   :  { %v2968_v43 = vmax.f32 %v2966_v4, %v2967_v33 }
0x26d8   :  { %v2985_v16 = vsel %vm1203_vm2, %v2947_v63, -inf }
0x26d9   :  { %v2986_v48 = vrot.slane %v2985_v16, 4  ;;  %v2969_v34 = vrot.slane %v2968_v43, 1 }
0x26db   :  { %v2987_v24 = vmax.f32 %v2985_v16, %v2986_v48  ;;  %v6117_v23 = vmax.f32 %v2968_v43, %v2969_v34  ;;  %v2921_v48 = vrot.slane %v5876_v32, 3  ;;  %v2925_v43 = vrot.slane %v5876_v32, 7 }
0x26dd   :  { %v2988_v44 = vrot.slane %v2987_v24, 2  ;;  %v3008_v35 = vsub.f32 %v2944_v3, %v6117_v23 }
0x26df   :  { %v2989_v30 = vmax.f32 %v2987_v24, %v2988_v44  ;;  %v3018_v52 = vmul.f32 1.442695, %v3008_v35  ;;  %v2933_v35 = vperm.slane %v2925_v43, 0 }
0x26e1   :  { %v2990_v49 = vrot.slane %v2989_v30, 1  ;;  %4920 = vpow2.f32 %v3018_v52 }
0x26e3   :  { %v2867_v40 = vpop.permute.xlu0 %2866  ;;  %v6125_v39 = vmax.f32 %v2989_v30, %v2990_v49  ;;  %v2924_v49 = vrot.slane %v5876_v32, 6 }
0x26e4   :  { %v2911_v21 = vadd.f32 %v2867_v40, %v5962_v22  ;;  %v2860_v17 = vpop.permute.xlu1 %2859 }
0x26e5   :  { %v2910_v31 = vadd.f32 %v2860_v17, %v5962_v22  ;;  %v3011_v47 = vsub.f32 %v2947_v63, %v6125_v39 }
0x26e6   :  { %v2943_v53 = vadd.f32 %v2927_v15, %v2911_v21  ;;  %v2929_v21 = vperm.slane %v2921_v48, 0 }
0x26e7   :  { %v2942_v57 = vadd.f32 %v2926_v8, %v2910_v31  ;;  %v3024_v44 = vmul.f32 1.442695, %v3011_v47 }
0x26e8   :  { %v2957_v13 = vsel %vm1203_vm2, %v2943_v53, -inf }
0x26e9   :  { %v2958_v28 = vrot.slane %v2957_v13, 4  ;;  %v2950_v54 = vsel %vm1203_vm2, %v2942_v57, -inf  ;;  %4922 = vpow2.f32 %v3024_v44 }
0x26ea   :  { %v2951_v2 = vrot.slane %v2950_v54, 4 }
0x26eb   :  { %v2888_v42 = vpop.permute.xlu0 %2887  ;;  %v2959_v5 = vmax.f32 %v2957_v13, %v2958_v28 }
0x26ec   :  { %v2914_v12 = vadd.f32 %v2888_v42, %v5962_v22  ;;  %v2881_v4 = vpop.permute.xlu1 %2880  ;;  %v2952_v3 = vmax.f32 %v2950_v54, %v2951_v2  ;;  %v4921_v2 = vpop.eup %4920 }
0x26ed   :  { %v2960_v0 = vrot.slane %v2959_v5, 2  ;;  %v2913_v63 = vadd.f32 %v2881_v4, %v5962_v22  ;;  %v2932_v4 = vperm.slane %v2924_v49, 0  ;;  %v3044_v48 = vsel %vm1203_vm2, %v4921_v2, 0.0 }
0x26ee   :  { %v2946_v33 = vadd.f32 %v2930_v58, %v2914_v12  ;;  %v2953_v16 = vrot.slane %v2952_v3, 2 }
0x26ef   :  { %v2961_v24 = vmax.f32 %v2959_v5, %v2960_v0  ;;  %v2945_v54 = vadd.f32 %v2929_v21, %v2913_v63 }
0x26f0   :  { %v2954_v34 = vmax.f32 %v2952_v3, %v2953_v16  ;;  %v2978_v60 = vsel %vm1203_vm2, %v2946_v33, -inf }
0x26f1   :  { %v2962_v30 = vrot.slane %v2961_v24, 1  ;;  %v2979_v40 = vrot.slane %v2978_v60, 4  ;;  %v2971_v12 = vsel %vm1203_vm2, %v2945_v54, -inf }
0x26f2   :  { %v2955_v15 = vrot.slane %v2954_v34, 1  ;;  %v2972_v0 = vrot.slane %v2971_v12, 4 }
0x26f3   :  { %v2909_v17 = vpop.permute.xlu0 %2908  ;;  %v6135_v8 = vmax.f32 %v2961_v24, %v2962_v30  ;;  %v2980_v31 = vmax.f32 %v2978_v60, %v2979_v40  ;;  %v4923_v60 = vpop.eup %4922  ;;  %v3045_v30 = vrot.slane %v3044_v48, 4 }
0x26f4   :  { %v2917_v13 = vadd.f32 %v2909_v17, %v5962_v22  ;;  %v2902_v9 = vpop.permute.xlu1 %2901  ;;  %v6138_v28 = vmax.f32 %v2954_v34, %v2955_v15  ;;  %v2973_v34 = vmax.f32 %v2971_v12, %v2972_v0  ;;  %v3065_v17 = vsel %vm1203_vm2, %v4923_v60, 0.0 }
0x26f5   :  { %v3007_v42 = vsub.f32 %v2943_v53, %v6135_v8  ;;  %v2981_v52 = vrot.slane %v2980_v31, 2  ;;  %v2916_v58 = vadd.f32 %v2902_v9, %v5962_v22  ;;  %v3046_v2 = vadd.f32 %v3045_v30, %v3044_v48 }
0x26f6   :  { %v2949_v5 = vadd.f32 %v2933_v35, %v2917_v13  ;;  %v3006_v32 = vsub.f32 %v2942_v57, %v6138_v28  ;;  %v2974_v15 = vrot.slane %v2973_v34, 2  ;;  %v3066_v12 = vrot.slane %v3065_v17, 4 }
0x26f7   :  { %v3016_v47 = vmul.f32 1.442695, %v3007_v42  ;;  %v2982_v3 = vmax.f32 %v2980_v31, %v2981_v52  ;;  %v2948_v44 = vadd.f32 %v2932_v4, %v2916_v58 }
0x26f8   :  { %v2999_v16 = vsel %vm1203_vm2, %v2949_v5, -inf  ;;  %v3014_v24 = vmul.f32 1.442695, %v3006_v32  ;;  %v2975_v31 = vmax.f32 %v2973_v34, %v2974_v15  ;;  %v3067_v30 = vadd.f32 %v3066_v12, %v3065_v17 }
0x26f9   :  { %v3000_v43 = vrot.slane %v2999_v16, 4  ;;  %4924 = vpow2.f32 %v3016_v47  ;;  %v2983_v53 = vrot.slane %v2982_v3, 1  ;;  %v2992_v57 = vsel %vm1203_vm2, %v2948_v44, -inf }
0x26fa   :  { %4926 = vpow2.f32 %v3014_v24  ;;  %v2993_v21 = vrot.slane %v2992_v57, 4  ;;  %v2976_v52 = vrot.slane %v2975_v31, 1 }
0x26fb   :  { %v3001_v22 = vmax.f32 %v2999_v16, %v3000_v43  ;;  %v6147_v40 = vmax.f32 %v2982_v3, %v2983_v53  ;;  %v3047_v53 = vrot.slane %v3046_v2, 2 }
0x26fc   :  { %v2994_v35 = vmax.f32 %v2992_v57, %v2993_v21  ;;  %v6153_v16 = vmax.f32 %v2975_v31, %v2976_v52 }
0x26fd   :  { %v3002_v63 = vrot.slane %v3001_v22, 2  ;;  %v3010_v49 = vsub.f32 %v2946_v33, %v6147_v40 }
0x26fe   :  { %v2995_v58 = vrot.slane %v2994_v35, 2  ;;  %v3009_v34 = vsub.f32 %v2945_v54, %v6153_v16 }
0x26ff   :  { %v3003_v13 = vmax.f32 %v3001_v22, %v3002_v63  ;;  %v4925_v9 = vpop.eup %4924  ;;  %v3022_v42 = vmul.f32 1.442695, %v3010_v49 }
0x2700   :  { %v4927_v32 = vpop.eup %4926  ;;  %v3037_v4 = vsel %vm1203_vm2, %v4925_v9, 0.0  ;;  %v2996_v43 = vmax.f32 %v2994_v35, %v2995_v58  ;;  %v3020_v21 = vmul.f32 1.442695, %v3009_v34  ;;  %v3068_v58 = vrot.slane %v3067_v30, 2 }
0x2701   :  { %v3004_v47 = vrot.slane %v3003_v13, 1  ;;  %v3038_v3 = vrot.slane %v3037_v4, 4  ;;  %v3030_v0 = vsel %vm1203_vm2, %v4927_v32, 0.0  ;;  %4928 = vpow2.f32 %v3022_v42 }
0x2702   :  { %v3031_v33 = vrot.slane %v3030_v0, 4  ;;  %v2997_v57 = vrot.slane %v2996_v43, 1  ;;  %v3048_v42 = vadd.f32 %v3047_v53, %v3046_v2  ;;  %4930 = vpow2.f32 %v3020_v21 }
0x2703   :  { %v6155_v24 = vmax.f32 %v3003_v13, %v3004_v47  ;;  %v3039_v48 = vadd.f32 %v3038_v3, %v3037_v4 }
0x2704   :  { %v3032_v60 = vadd.f32 %v3031_v33, %v3030_v0  ;;  %v6159_v9 = vmax.f32 %v2996_v43, %v2997_v57  ;;  %v3049_v47 = vrot.slane %v3048_v42, 1  ;;  %v3069_v33 = vadd.f32 %v3068_v58, %v3067_v30 }
0x2705   :  { %v3013_v22 = vsub.f32 %v2949_v5, %v6155_v24  ;;  %v3040_v15 = vrot.slane %v3039_v48, 2 }
0x2706   :  { %v3033_v63 = vrot.slane %v3032_v60, 2  ;;  %v3012_v54 = vsub.f32 %v2948_v44, %v6159_v9 }
0x2707   :  { %v3028_v49 = vmul.f32 1.442695, %v3013_v22  ;;  %v4929_v31 = vpop.eup %4928  ;;  %v3041_v13 = vadd.f32 %v3040_v15, %v3039_v48  ;;  %v3050_v22 = vadd.f32 %v3049_v47, %v3048_v42  ;;  %v3070_v15 = vrot.slane %v3069_v33, 1 }
0x2708   :  { %v3034_v35 = vadd.f32 %v3033_v63, %v3032_v60  ;;  %v3058_v52 = vsel %vm1203_vm2, %v4929_v31, 0.0  ;;  %v3026_v12 = vmul.f32 1.442695, %v3012_v54  ;;  %v4931_v0 = vpop.eup %4930 }
0x2709   :  { %4932 = vpow2.f32 %v3028_v49  ;;  %v3042_v5 = vrot.slane %v3041_v13, 1  ;;  %v3059_v32 = vrot.slane %v3058_v52, 4  ;;  %v3051_v48 = vsel %vm1203_vm2, %v4931_v0, 0.0 }
0x270a   :  { %v3035_v17 = vrot.slane %v3034_v35, 1  ;;  %4934 = vpow2.f32 %v3026_v12  ;;  %v3052_v60 = vrot.slane %v3051_v48, 4  ;;  %v3071_v58 = vadd.f32 %v3070_v15, %v3069_v33 }
0x270b   :  { %v3060_v4 = vadd.f32 %v3059_v32, %v3058_v52  ;;  %v3043_v3 = vadd.f32 %v3042_v5, %v3041_v13 }
0x270c   :  { %v3036_v2 = vadd.f32 %v3035_v17, %v3034_v35  ;;  %v3053_v63 = vadd.f32 %v3052_v60, %v3051_v48 }
0x270d   :  { %v3061_v43 = vrot.slane %v3060_v4, 2  ;;  %4936 = vlog2.f32 %v3043_v3 }
0x270e   :  { %4938 = vlog2.f32 %v3036_v2  ;;  %v3054_v30 = vrot.slane %v3053_v63, 2 }
0x270f   :  { %v4933_v53 = vpop.eup %4932  ;;  %v3062_v34 = vadd.f32 %v3061_v43, %v3060_v4  ;;  %4940 = vlog2.f32 %v3050_v22 }
0x2710   :  { %v3079_v44 = vsel %vm1203_vm2, %v4933_v53, 0.0  ;;  %v4935_v49 = vpop.eup %4934  ;;  %v3055_v5 = vadd.f32 %v3054_v30, %v3053_v63 }
0x2711   :  { %v3080_v57 = vrot.slane %v3079_v44, 4  ;;  %v3063_v21 = vrot.slane %v3062_v34, 1  ;;  %v3072_v35 = vsel %vm1203_vm2, %v4935_v49, 0.0 }
0x2712   :  { %v3073_v54 = vrot.slane %v3072_v35, 4  ;;  %v3056_v4 = vrot.slane %v3055_v5, 1 }
0x2713   :  { %v3081_v31 = vadd.f32 %v3080_v57, %v3079_v44  ;;  %v3064_v13 = vadd.f32 %v3063_v21, %v3062_v34  ;;  %v4937_v32 = vpop.eup %4936 }
0x2714   :  { %v3074_v17 = vadd.f32 %v3073_v54, %v3072_v35  ;;  %v4939_v12 = vpop.eup %4938  ;;  %v3057_v0 = vadd.f32 %v3056_v4, %v3055_v5  ;;  %v3089_v2 = vmul.f32 0.6931472, %v4937_v32 }
0x2715   :  { %v3082_v52 = vrot.slane %v3081_v31, 2  ;;  %4942 = vlog2.f32 %v3064_v13  ;;  %v3087_v43 = vmul.f32 0.6931472, %v4939_v12  ;;  %v4941_v34 = vpop.eup %4940 }
0x2716   :  { %v3075_v3 = vrot.slane %v3074_v17, 2  ;;  %4944 = vlog2.f32 %v3071_v58  ;;  %v3103_v44 = vadd.f32 %v3089_v2, %v6135_v8  ;;  %v3091_v21 = vmul.f32 0.6931472, %v4941_v34 }
0x2717   :  { %v3083_v42 = vadd.f32 %v3082_v52, %v3081_v31  ;;  %4946 = vlog2.f32 %v3057_v0  ;;  %v3102_v22 = vadd.f32 %v3087_v43, %v6138_v28 }
0x2718   :  { %v3076_v48 = vadd.f32 %v3075_v3, %v3074_v17  ;;  %v3104_v35 = vadd.f32 %v3091_v21, %v6117_v23  ;;  %v1375_v21 = vperm.slane %v5884_v55, 5 }
0x2719   :  { %v3084_v47 = vrot.slane %v3083_v42, 1  ;;  %v3124_v13 = vsel %vm2293_vm9, %v3103_v44, %v3102_v22  ;;  %v1106_v44 = vld [vmem:[%s7287_s10 + $0x18] sm:$0xff]  ;;  %v1382_v22 = vperm.slane %v5884_v55, 6 }
0x271a   :  { %v3077_v33 = vrot.slane %v3076_v48, 1  ;;  %v3125_v28 = vsel %vm2296_vm10, %v3104_v35, %v3124_v13  ;;  %vm3389_vm6 = vcmp.gt.f32.partialorder %v1106_v44, 0.5  ;;  %v1396_v13 = vperm.slane %v5824_v56, 0 }
0x271b   :  { %v3085_v53 = vadd.f32 %v3084_v47, %v3083_v42  ;;  %v4943_v60 = vpop.eup %4942  ;;  %v3114_v47 = vpop.permute.xlu1 %3113 }
0x271c   :  { %v3078_v57 = vadd.f32 %v3077_v33, %v3076_v48  ;;  %v4945_v15 = vpop.eup %4944  ;;  %v3095_v63 = vmul.f32 0.6931472, %v4943_v60  ;;  %vm3115_vm5 = vcmp.eq.s32.totalorder %v3114_v47, 1  ;;  %v1361_v48 = vperm.slane %v5884_v55, 3  ;;  %v6223_v47 = vpop.permute.xlu0 %4680 }
0x271d   :  { %4948 = vlog2.f32 %v3085_v53  ;;  %v4947_v49 = vpop.eup %4946  ;;  %v3097_v54 = vmul.f32 0.6931472, %v4945_v15  ;;  %v1368_v15 = vperm.slane %v5884_v55, 4  ;;  %7327 = vst [vmem:[#allocation20_spill] sm:$0xff] %v6223_v47 }
0x271e   :  { %4950 = vlog2.f32 %v3078_v57  ;;  %v3093_v30 = vmul.f32 0.6931472, %v4947_v49  ;;  %v3106_v52 = vadd.f32 %v3095_v63, %v6147_v40  ;;  %v1389_v57 = vperm.slane %v5884_v55, 7 }
0x271f   :  { %v3107_v12 = vadd.f32 %v3097_v54, %v6125_v39  ;;  %v4701_v49 = vpack.i.bf16 %v1375_v21, %v1368_v15 }
0x2720   :  { %v3105_v58 = vadd.f32 %v3093_v30, %v6153_v16  ;;  %v4706_v63 = vpack.i.bf16 %v1389_v57, %v1382_v22  ;;  %v1403_v30 = vperm.slane %v5824_v56, 1  ;;  %v3205_v57 = vperm.slane %v5827_v38, 0 }
0x2722   :  { %v3126_v32 = vsel %vm2299_vm11, %v3105_v58, %v3125_v28  ;;  %v4711_v35 = vpack.i.bf16 %v1403_v30, %v1396_v13 }
0x2723   :  { %v4949_v31 = vpop.eup %4948  ;;  %v3127_v17 = vsel %vm2302_vm12, %v3106_v52, %v3126_v32  ;;  %v6206_v52 = vpop.permute.xlu2 %4674 }
0x2724   :  { %v3101_v8 = vmul.f32 0.6931472, %v4949_v31  ;;  %v4951_v5 = vpop.eup %4950  ;;  %v3128_v40 = vsel %vm2305_vm13, %v3107_v12, %v3127_v17  ;;  %v3390_v31 = vsel %vm3389_vm6, 1, %v7323_v29  ;;  %v3201_v12 = vrot.slane %v5827_v38, 4 }
0x2725   :  { %v3099_v42 = vmul.f32 0.6931472, %v4951_v5  ;;  %v6214_v5 = vld [vmem:[%s7289_s12] sm:$0xff] }
0x2726   :  { %v3109_v4 = vadd.f32 %v3101_v8, %v6155_v24  ;;  %v3198_v8 = vrot.slane %v5827_v38, 1 }
0x2727   :  { %v3108_v23 = vadd.f32 %v3099_v42, %v6159_v9 }
0x2728   :  { %v3206_v42 = vperm.slane %v3198_v8, 0 }
0x2729   :  { %v3129_v16 = vsel %vm2308_vm15, %v3108_v23, %v3128_v40 }
0x272a   :  { %v3130_v3 = vsel %vm2311_vm3, %v3109_v4, %v3129_v16  ;;  %v6220_v4 = vpop.permute.xlu1 %4691  ;;  %v3209_v16 = vperm.slane %v3201_v12, 0 }
0x272b   :  { %v6182_v0 = vsel %vm3115_vm5, %v3130_v3, %v6070_v20  ;;  %v1354_v20 = vperm.slane %v5884_v55, 2  ;;  %v6208_v54 = vpop.permute.xlu2 %4685  ;;  %vm2446_vm5 = vcmask 7168  }
0x272c   :  { %v3147_v2 = vperm.slane %v6182_v0, 2  ;;  %v3140_v43 = vperm.slane %v6182_v0, 1  ;;  %v3133_v39 = vperm.slane %v6182_v0, 0  ;;  %v3168_v24 = vperm.slane %v6182_v0, 5  ;;  %7326 = vst [vmem:[#allocation19_spill] sm:$0xff] %v6208_v54 }
0x272d   :  { %v3161_v9 = vperm.slane %v6182_v0, 4  ;;  %v3154_v53 = vperm.slane %v6182_v0, 3  ;;  %v4695_v34 = vpack.i.bf16 %v1361_v48, %v1354_v20  ;;  %v3182_v60 = vperm.slane %v6182_v0, 7 }
0x272e   :  { %3152 = vperm.xlu1 %4689, %v3147_v2   ;;  %3145 = vperm.xlu2 %4667, %v3140_v43   ;;  %v3175_v33 = vperm.slane %v6182_v0, 6  ;;  %v3204_v2 = vrot.slane %v5827_v38, 7 }
0x272f   :  { %3138 = vperm.xlu0 %4645, %v3133_v39  }
0x2736   :  { %3173 = vperm.xlu1 %4689, %v3168_v24   ;;  %3166 = vperm.xlu2 %4667, %v3161_v9   ;;  %v3199_v9 = vrot.slane %v5827_v38, 2 }
0x2737   :  { %3159 = vperm.xlu0 %4645, %v3154_v53   ;;  %v3212_v53 = vperm.slane %v3204_v2, 0 }
0x273e   :  { %4696 = vperm.xlu1 %4689, %v4695_v34   ;;  %3187 = vperm.xlu2 %4667, %v3182_v60  }
0x273f   :  { %3180 = vperm.xlu0 %4645, %v3175_v33   ;;  %v3207_v33 = vperm.slane %v3199_v9, 0  ;;  %v3200_v9 = vrot.slane %v5827_v38, 3 }
0x2746   :  { %4707 = vperm.xlu1 %4689, %v4706_v63   ;;  %4702 = vperm.xlu2 %4667, %v4701_v49  }
0x2747   :  { %4700 = vset.pattern.permute.xlu0 %v7323_v29 }
0x2748   :  { %3392 = vperm.xlu0 %4700, %v3390_v31  }
0x274e   :  { %4712 = vperm.xlu2 %4667, %v4711_v35   ;;  %v3202_v35 = vrot.slane %v5827_v38, 5 }
0x2750   :  { %4716 = vset.pattern.permute.xlu0 %v5800_v45 }
0x2788   :  { %v3146_v58 = vpop.permute.xlu2 %3145 }
0x2789   :  { %v3190_v32 = vadd.f32 %v6214_v5, %v3146_v58 }
0x278b   :  { %v6217_v17 = vadd.f32 %v3206_v42, %v3190_v32 }
0x278d   :  { %v3236_v40 = vsel %vm1203_vm2, %v6217_v17, -inf }
0x278e   :  { %v3237_v39 = vrot.slane %v3236_v40, 4 }
0x2790   :  { %v3167_v28 = vpop.permute.xlu2 %3166  ;;  %v3238_v34 = vmax.f32 %v3236_v40, %v3237_v39 }
0x2791   :  { %v3193_v23 = vadd.f32 %v6214_v5, %v3167_v28 }
0x2792   :  { %v3239_v31 = vrot.slane %v3238_v34, 2 }
0x2793   :  { %v6228_v43 = vadd.f32 %v3209_v16, %v3193_v23  ;;  %v3210_v16 = vperm.slane %v3202_v35, 0 }
0x2794   :  { %v3240_v40 = vmax.f32 %v3238_v34, %v3239_v31 }
0x2795   :  { %v3257_v20 = vsel %vm1203_vm2, %v6228_v43, -inf }
0x2796   :  { %v3258_v21 = vrot.slane %v3257_v20, 4 }
0x2798   :  { %v3188_v3 = vpop.permute.xlu2 %3187  ;;  %v3259_v8 = vmax.f32 %v3257_v20, %v3258_v21  ;;  %v3208_v21 = vperm.slane %v3200_v9, 0  ;;  %v4694_v9 = vunpack.i.h.bf16 %v6220_v4 }
0x2799   :  { %v3196_v24 = vadd.f32 %v6214_v5, %v3188_v3 }
0x279b   :  { %v6234_v60 = vadd.f32 %v3212_v53, %v3196_v24  ;;  %v3260_v53 = vrot.slane %v3259_v8, 2 }
0x279d   :  { %v3278_v13 = vsel %vm1203_vm2, %v6234_v60, -inf  ;;  %v3261_v31 = vmax.f32 %v3259_v8, %v3260_v53 }
0x279e   :  { %v3279_v32 = vrot.slane %v3278_v13, 4 }
0x27a0   :  { %v3153_v48 = vpop.permute.xlu1 %3152 }
0x27a1   :  { %v3191_v44 = vadd.f32 %v6214_v5, %v3153_v48  ;;  %v3139_v22 = vpop.permute.xlu0 %3138 }
0x27a2   :  { %v3189_v15 = vadd.f32 %v6214_v5, %v3139_v22 }
0x27a3   :  { %v3223_v63 = vadd.f32 %v3207_v33, %v3191_v44  ;;  %v3280_v33 = vmax.f32 %v3278_v13, %v3279_v32 }
0x27a4   :  { %v3221_v49 = vadd.f32 %v3205_v57, %v3189_v15  ;;  %v3241_v57 = vrot.slane %v3240_v40, 1 }
0x27a5   :  { %v3243_v30 = vsel %vm1203_vm2, %v3223_v63, -inf }
0x27a6   :  { %v3244_v58 = vrot.slane %v3243_v30, 4  ;;  %v3229_v28 = vsel %vm1203_vm2, %v3221_v49, -inf }
0x27a7   :  { %v3230_v12 = vrot.slane %v3229_v28, 4 }
0x27a8   :  { %v3245_v42 = vmax.f32 %v3243_v30, %v3244_v58  ;;  %v3174_v23 = vpop.permute.xlu1 %3173  ;;  %v3281_v58 = vrot.slane %v3280_v33, 2 }
0x27a9   :  { %v3194_v3 = vadd.f32 %v6214_v5, %v3174_v23  ;;  %v3160_v2 = vpop.permute.xlu0 %3159  ;;  %v3231_v24 = vmax.f32 %v3229_v28, %v3230_v12  ;;  %v6251_v12 = vmax.f32 %v3240_v40, %v3241_v57 }
0x27aa   :  { %v3246_v39 = vrot.slane %v3245_v42, 2  ;;  %v3192_v22 = vadd.f32 %v6214_v5, %v3160_v2  ;;  %v3282_v8 = vmax.f32 %v3280_v33, %v3281_v58  ;;  %v1637_v33 = vmul.f32 %v6214_v5, %v4694_v9 }
0x27ab   :  { %v6246_v48 = vadd.f32 %v3210_v16, %v3194_v3  ;;  %v3232_v44 = vrot.slane %v3231_v24, 2  ;;  %v3286_v40 = vsub.f32 %v6217_v17, %v6251_v12 }
0x27ac   :  { %v3247_v20 = vmax.f32 %v3245_v42, %v3246_v39  ;;  %v3224_v28 = vadd.f32 %v3208_v21, %v3192_v22  ;;  %v3262_v42 = vrot.slane %v3261_v31, 1  ;;  %v1795_v9 = vsel %vm1203_vm2, %v1637_v33, 0.0 }
0x27ad   :  { %v3264_v34 = vsel %vm1203_vm2, %v6246_v48, -inf  ;;  %v3233_v30 = vmax.f32 %v3231_v24, %v3232_v44  ;;  %v4693_v24 = vunpack.i.l.bf16 %v6220_v4  ;;  %v3295_v58 = vmul.f32 1.442695, %v3286_v40 }
0x27ae   :  { %v3248_v15 = vrot.slane %v3247_v20, 1  ;;  %v3265_v35 = vrot.slane %v3264_v34, 4  ;;  %v3250_v32 = vsel %vm1203_vm2, %v3224_v28, -inf  ;;  %v6264_v57 = vmax.f32 %v3261_v31, %v3262_v42 }
0x27af   :  { %v3234_v23 = vrot.slane %v3233_v30, 1  ;;  %v3251_v39 = vrot.slane %v3250_v32, 4  ;;  %v1636_v4 = vmul.f32 %v6214_v5, %v4693_v24 }
0x27b0   :  { %v3266_v16 = vmax.f32 %v3264_v34, %v3265_v35  ;;  %v6253_v13 = vmax.f32 %v3247_v20, %v3248_v15  ;;  %v4703_v15 = vpop.permute.xlu2 %4702 }
0x27b1   :  { %v6256_v3 = vmax.f32 %v3233_v30, %v3234_v23  ;;  %v3252_v22 = vmax.f32 %v3250_v32, %v3251_v39  ;;  %v3283_v30 = vrot.slane %v3282_v8, 1  ;;  %v4697_v23 = vpop.permute.xlu1 %4696  ;;  %v4704_v27 = vunpack.i.l.bf16 %v4703_v15 }
0x27b2   :  { %v3267_v2 = vrot.slane %v3266_v16, 2  ;;  %v3287_v20 = vsub.f32 %v3223_v63, %v6253_v13  ;;  %v3289_v63 = vsub.f32 %v6228_v43, %v6264_v57  ;;  %v4705_v31 = vunpack.i.h.bf16 %v4703_v15 }
0x27b3   :  { %v3285_v53 = vsub.f32 %v3221_v49, %v6256_v3  ;;  %v3253_v35 = vrot.slane %v3252_v22, 2  ;;  %v4699_v32 = vunpack.i.h.bf16 %v4697_v23  ;;  %v6272_v42 = vmax.f32 %v3282_v8, %v3283_v30 }
0x27b4   :  { %v3268_v44 = vmax.f32 %v3266_v16, %v3267_v2  ;;  %v3297_v17 = vmul.f32 1.442695, %v3287_v20  ;;  %v4698_v39 = vunpack.i.l.bf16 %v4697_v23  ;;  %v1640_v40 = vmul.f32 %v6214_v5, %v4704_v27 }
0x27b5   :  { %v3293_v34 = vmul.f32 1.442695, %v3285_v53  ;;  %v3254_v16 = vmax.f32 %v3252_v22, %v3253_v35  ;;  %v1639_v24 = vmul.f32 %v6214_v5, %v4699_v32  ;;  %v1788_v43 = vsel %vm1203_vm2, %v1636_v4, 0.0 }
0x27b6   :  { %v3269_v21 = vrot.slane %v3268_v44, 1  ;;  %v3301_v20 = vmul.f32 1.442695, %v3289_v63  ;;  %v1641_v8 = vmul.f32 %v6214_v5, %v4705_v31  ;;  %v3292_v22 = vsub.f32 %v6234_v60, %v6272_v42 }
0x27b7   :  { %4952 = vpow2.f32 %v3293_v34  ;;  %v3255_v2 = vrot.slane %v3254_v16, 1  ;;  %v1809_v15 = vsel %vm1203_vm2, %v1639_v24, 0.0  ;;  %v1796_v30 = vrot.slane %v1795_v9, 4 }
0x27b8   :  { %v6268_v49 = vmax.f32 %v3268_v44, %v3269_v21  ;;  %4954 = vpow2.f32 %v3295_v58  ;;  %v1638_v21 = vmul.f32 %v6214_v5, %v4698_v39  ;;  %v1816_v35 = vsel %vm1203_vm2, %v1640_v40, 0.0 }
0x27b9   :  { %4956 = vpow2.f32 %v3297_v17  ;;  %v6279_v44 = vmax.f32 %v3254_v16, %v3255_v2  ;;  %v1789_v58 = vrot.slane %v1788_v43, 4  ;;  %v1823_v17 = vsel %vm1203_vm2, %v1641_v8, 0.0  ;;  %v3181_v16 = vpop.permute.xlu0 %3180 }
0x27ba   :  { %v3290_v53 = vsub.f32 %v6246_v48, %v6268_v49  ;;  %v3203_v48 = vrot.slane %v5827_v38, 6  ;;  %4958 = vpow2.f32 %v3301_v20  ;;  %v1810_v60 = vrot.slane %v1809_v15, 4 }
0x27bb   :  { %v3288_v34 = vsub.f32 %v3224_v28, %v6279_v44  ;;  %v3307_v63 = vmul.f32 1.442695, %v3292_v22  ;;  %v1802_v32 = vsel %vm1203_vm2, %v1638_v21, 0.0  ;;  %v1797_v2 = vadd.f32 %v1796_v30, %v1795_v9 }
0x27bc   :  { %v3303_v23 = vmul.f32 1.442695, %v3290_v53  ;;  %v1817_v38 = vrot.slane %v1816_v35, 4  ;;  %v1803_v39 = vrot.slane %v1802_v32, 4  ;;  %v3211_v24 = vperm.slane %v3203_v48, 0 }
0x27bd   :  { %v4953_v27 = vpop.eup %4952  ;;  %v3299_v33 = vmul.f32 1.442695, %v3288_v34  ;;  %v1824_v53 = vrot.slane %v1823_v17, 4  ;;  %v3195_v20 = vadd.f32 %v6214_v5, %v3181_v16  ;;  %v1811_v26 = vadd.f32 %v1810_v60, %v1809_v15 }
0x27be   :  { %v4955_v4 = vpop.eup %4954  ;;  %v3309_v31 = vsel %vm1203_vm2, %v4953_v27, 0.0  ;;  %v1790_v22 = vadd.f32 %v1789_v58, %v1788_v43  ;;  %v1804_v27 = vadd.f32 %v1803_v39, %v1802_v32  ;;  %v1798_v9 = vrot.slane %v1797_v2, 2 }
0x27bf   :  { %v4957_v28 = vpop.eup %4956  ;;  %4960 = vpow2.f32 %v3299_v33  ;;  %v3316_v40 = vsel %vm1203_vm2, %v4955_v4, 0.0  ;;  %v3310_v34 = vrot.slane %v3309_v31, 4  ;;  %v6296_v33 = vadd.f32 %v3211_v24, %v3195_v20 }
0x27c0   :  { %4962 = vpow2.f32 %v3303_v23  ;;  %v3323_v8 = vsel %vm1203_vm2, %v4957_v28, 0.0  ;;  %v4959_v21 = vpop.eup %4958  ;;  %v3317_v30 = vrot.slane %v3316_v40, 4  ;;  %v1818_v7 = vadd.f32 %v1817_v38, %v1816_v35 }
0x27c1   :  { %4964 = vpow2.f32 %v3307_v63  ;;  %v3324_v19 = vrot.slane %v3323_v8, 4  ;;  %v1825_v4 = vadd.f32 %v1824_v53, %v1823_v17  ;;  %v1805_v6 = vrot.slane %v1804_v27, 2 }
0x27c2   :  { %v3271_v23 = vsel %vm1203_vm2, %v6296_v33, -inf  ;;  %v3311_v16 = vadd.f32 %v3310_v34, %v3309_v31  ;;  %v1812_v15 = vrot.slane %v1811_v26, 2  ;;  %v1791_v58 = vrot.slane %v1790_v22, 2 }
0x27c3   :  { %v3272_v63 = vrot.slane %v3271_v23, 4  ;;  %v1799_v32 = vadd.f32 %v1798_v9, %v1797_v2  ;;  %v3318_v39 = vadd.f32 %v3317_v30, %v3316_v40  ;;  %v3337_v24 = vsel %vm1203_vm2, %v4959_v21, 0.0 }
0x27c4   :  { %v1819_v35 = vrot.slane %v1818_v7, 2  ;;  %v3325_v20 = vadd.f32 %v3324_v19, %v3323_v8  ;;  %v1826_v17 = vrot.slane %v1825_v4, 2  ;;  %v1806_v53 = vadd.f32 %v1805_v6, %v1804_v27 }
0x27c5   :  { %v4961_v48 = vpop.eup %4960  ;;  %v3273_v1 = vmax.f32 %v3271_v23, %v3272_v63  ;;  %v3312_v37 = vrot.slane %v3311_v16, 2  ;;  %v1792_v59 = vadd.f32 %v1791_v58, %v1790_v22  ;;  %v3338_v14 = vrot.slane %v3337_v24, 4 }
0x27c6   :  { %v3330_v28 = vsel %vm1203_vm2, %v4961_v48, 0.0  ;;  %v4963_v43 = vpop.eup %4962  ;;  %v1813_v48 = vadd.f32 %v1812_v15, %v1811_v26  ;;  %v1800_v2 = vrot.slane %v1799_v32, 1  ;;  %v3319_v40 = vrot.slane %v3318_v39, 2 }
0x27c7   :  { %v3331_v60 = vrot.slane %v3330_v28, 4  ;;  %v4965_v38 = vpop.eup %4964  ;;  %v3344_v31 = vsel %vm1203_vm2, %v4963_v43, 0.0  ;;  %v3274_v55 = vrot.slane %v3273_v1, 2  ;;  %v1820_v9 = vadd.f32 %v1819_v35, %v1818_v7 }
0x27c8   :  { %v3358_v21 = vsel %vm1203_vm2, %v4965_v38, 0.0  ;;  %v3326_v30 = vrot.slane %v3325_v20, 2  ;;  %v3345_v19 = vrot.slane %v3344_v31, 4  ;;  %v1807_v8 = vrot.slane %v1806_v53, 1 }
0x27c9   :  { %v3332_v34 = vadd.f32 %v3331_v60, %v3330_v28  ;;  %v3275_v6 = vmax.f32 %v3273_v1, %v3274_v55  ;;  %v3313_v27 = vadd.f32 %v3312_v37, %v3311_v16  ;;  %v1827_v23 = vadd.f32 %v1826_v17, %v1825_v4 }
0x27ca   :  { %v1814_v43 = vrot.slane %v1813_v48, 1  ;;  %v1793_v28 = vrot.slane %v1792_v59, 1  ;;  %v3339_v26 = vadd.f32 %v3338_v14, %v3337_v24  ;;  %v2090_v15 = vrot.slane %v5824_v56, 2 }
0x27cb   :  { %v3333_v63 = vrot.slane %v3332_v34, 2  ;;  %v3276_v22 = vrot.slane %v3275_v6, 1  ;;  %v1801_v58 = vadd.f32 %v1800_v2, %v1799_v32  ;;  %v3320_v60 = vadd.f32 %v3319_v40, %v3318_v39 }
0x27cc   :  { %v3359_v46 = vrot.slane %v3358_v21, 4  ;;  %v1821_v54 = vrot.slane %v1820_v9, 1  ;;  %v3327_v11 = vadd.f32 %v3326_v30, %v3325_v20  ;;  %v3346_v38 = vadd.f32 %v3345_v19, %v3344_v31 }
0x27cd   :  { %v1808_v7 = vadd.f32 %v1807_v8, %v1806_v53  ;;  %v6306_v35 = vmax.f32 %v3275_v6, %v3276_v22  ;;  %v3314_v47 = vrot.slane %v3313_v27, 1  ;;  %v1828_v55 = vrot.slane %v1827_v23, 1 }
0x27ce   :  { %v3334_v37 = vadd.f32 %v3333_v63, %v3332_v34  ;;  %v1815_v1 = vadd.f32 %v1814_v43, %v1813_v48  ;;  %v1794_v4 = vadd.f32 %v1793_v28, %v1792_v59  ;;  %v3340_v16 = vrot.slane %v3339_v26, 2 }
0x27cf   :  { %v2091_v14 = vrot.slane %v5824_v56, 3  ;;  %v3291_v24 = vsub.f32 %v6296_v33, %v6306_v35  ;;  %v2197_v32 = vmul.f32 %v2089_v25, %v1801_v58  ;;  %v3321_v39 = vrot.slane %v3320_v60, 1 }
0x27d0   :  { %v3360_v17 = vadd.f32 %v3359_v46, %v3358_v21  ;;  %v1822_v2 = vadd.f32 %v1821_v54, %v1820_v9  ;;  %v3328_v20 = vrot.slane %v3327_v11, 1  ;;  %v3347_v31 = vrot.slane %v3346_v38, 2 }
0x27d1   :  { %v2198_v53 = vmul.f32 %v2090_v15, %v1808_v7  ;;  %v3305_v40 = vmul.f32 1.442695, %v3291_v24  ;;  %v3315_v30 = vadd.f32 %v3314_v47, %v3313_v27  ;;  %v1829_v19 = vadd.f32 %v1828_v55, %v1827_v23 }
0x27d2   :  { %v3335_v8 = vrot.slane %v3334_v37, 1  ;;  %v2199_v34 = vmul.f32 %v2091_v14, %v1815_v1  ;;  %v3341_v48 = vadd.f32 %v3340_v16, %v3339_v26  ;;  %v2092_v59 = vrot.slane %v5824_v56, 4 }
0x27d3   :  { %4966 = vpow2.f32 %v3305_v40  ;;  %v2093_v6 = vrot.slane %v5824_v56, 5  ;;  %v2327_v63 = vrot.slane %v2197_v32, 7  ;;  %v2196_v25 = vmul.f32 %v5824_v56, %v1794_v4 }
0x27d4   :  { %v3322_v33 = vadd.f32 %v3321_v39, %v3320_v60  ;;  %v3361_v46 = vrot.slane %v3360_v17, 2  ;;  %v3329_v54 = vadd.f32 %v3328_v20, %v3327_v11  ;;  %v2200_v21 = vmul.f32 %v2092_v59, %v1822_v2 }
0x27d5   :  { %v3348_v9 = vadd.f32 %v3347_v31, %v3346_v38  ;;  %v2329_v43 = vrot.slane %v2198_v53, 6  ;;  %4968 = vlog2.f32 %v3315_v30  ;;  %v3336_v47 = vadd.f32 %v3335_v8, %v3334_v37 }
0x27d6   :  { %v2331_v27 = vrot.slane %v2199_v34, 5  ;;  %v2201_v23 = vmul.f32 %v2093_v6, %v1829_v19  ;;  %v3342_v28 = vrot.slane %v3341_v48, 1  ;;  %4970 = vlog2.f32 %v3322_v33 }
0x27d7   :  { %v3362_v26 = vadd.f32 %v3361_v46, %v3360_v17  ;;  %v2328_v15 = vsel %vm2293_vm9, %v2327_v63, %v2196_v25  ;;  %4972 = vlog2.f32 %v3329_v54  ;;  %v2333_v58 = vrot.slane %v2200_v21, 4 }
0x27d8   :  { %v3349_v7 = vrot.slane %v3348_v9, 1  ;;  %v2330_v60 = vsel %vm2296_vm10, %v2329_v43, %v2328_v15  ;;  %4974 = vlog2.f32 %v3336_v47  ;;  %v2335_v55 = vrot.slane %v2201_v23, 3  ;;  %v3393_v15 = vpop.permute.xlu0 %3392 }
0x27d9   :  { %v4967_v22 = vpop.eup %4966  ;;  %v2332_v38 = vsel %vm2299_vm11, %v2331_v27, %v2330_v60  ;;  %v3343_v37 = vadd.f32 %v3342_v28, %v3341_v48  ;;  %v3363_v14 = vrot.slane %v3362_v26, 1  ;;  %vm3394_vm7 = vcmp.eq.s32.totalorder %v3393_v15, 1 }
0x27da   :  { %v3351_v11 = vsel %vm1203_vm2, %v4967_v22, 0.0  ;;  %v2334_v4 = vsel %vm2302_vm12, %v2333_v58, %v2332_v38  ;;  %v3350_v17 = vadd.f32 %v3349_v7, %v3348_v9 }
0x27db   :  { %v3352_v1 = vrot.slane %v3351_v11, 4  ;;  %v4969_v16 = vpop.eup %4968  ;;  %v6320_v24 = vsel %vm2305_vm13, %v2335_v55, %v2334_v4  ;;  %4976 = vlog2.f32 %v3343_v37  ;;  %v3364_v40 = vadd.f32 %v3363_v14, %v3362_v26 }
0x27dc   :  { %v4971_v39 = vpop.eup %4970  ;;  %v3366_v20 = vmul.f32 0.6931472, %v4969_v16  ;;  %4978 = vlog2.f32 %v3350_v17  ;;  %v1424_v14 = vperm.slane %v5824_v56, 4  ;;  %v1417_v17 = vperm.slane %v5824_v56, 3 }
0x27dd   :  { %v3353_v32 = vadd.f32 %v3352_v1, %v3351_v11  ;;  %v4973_v2 = vpop.eup %4972  ;;  %v3368_v30 = vmul.f32 0.6931472, %v4971_v39  ;;  %4980 = vlog2.f32 %v3364_v40  ;;  %v1410_v39 = vperm.slane %v5824_v56, 2 }
0x27de   :  { %v4975_v53 = vpop.eup %4974  ;;  %v3370_v8 = vmul.f32 0.6931472, %v4973_v2  ;;  %v3381_v34 = vadd.f32 %v3366_v20, %v6256_v3  ;;  %v1438_v40 = vperm.slane %v5824_v56, 6 }
0x27df   :  { %v3354_v31 = vrot.slane %v3353_v32, 2  ;;  %v3372_v48 = vmul.f32 0.6931472, %v4975_v53  ;;  %v3382_v63 = vadd.f32 %v3368_v30, %v6251_v12  ;;  %v4717_v20 = vpack.i.bf16 %v1417_v17, %v1410_v39 }
0x27e0   :  { %v3383_v33 = vadd.f32 %v3370_v8, %v6253_v13  ;;  %v1459_v53 = vperm.slane %v5858_v51, 1  ;;  %v1445_v30 = vperm.slane %v5824_v56, 7  ;;  %v3482_v39 = vrot.slane %v5854_v50, 6 }
0x27e1   :  { %v3355_v19 = vadd.f32 %v3354_v31, %v3353_v32  ;;  %v4977_v6 = vpop.eup %4976  ;;  %v3403_v46 = vsel %vm2293_vm9, %v3382_v63, %v3381_v34  ;;  %v3384_v54 = vadd.f32 %v3372_v48, %v6279_v44  ;;  %v1431_v32 = vperm.slane %v5824_v56, 5  ;;  %v6362_v34 = vpop.permute.xlu2 %4712 }
0x27e2   :  { %v4979_v21 = vpop.eup %4978  ;;  %v3374_v9 = vmul.f32 0.6931472, %v4977_v6  ;;  %v3404_v47 = vsel %vm2296_vm10, %v3383_v33, %v3403_v46  ;;  %v1452_v31 = vperm.slane %v5858_v51, 0  ;;  %v4728_v8 = vpack.i.bf16 %v1445_v30, %v1438_v40 }
0x27e3   :  { %v3356_v59 = vrot.slane %v3355_v19, 1  ;;  %v4981_v43 = vpop.eup %4980  ;;  %v3376_v3 = vmul.f32 0.6931472, %v4979_v21  ;;  %v3405_v27 = vsel %vm2299_vm11, %v3384_v54, %v3404_v47  ;;  %v4723_v2 = vpack.i.bf16 %v1431_v32, %v1424_v14 }
0x27e4   :  { %v3385_v23 = vadd.f32 %v3374_v9, %v6264_v57  ;;  %v3380_v12 = vmul.f32 0.6931472, %v4981_v43  ;;  %v3483_v43 = vrot.slane %v5854_v50, 7 }
0x27e5   :  { %v3357_v25 = vadd.f32 %v3356_v59, %v3355_v19  ;;  %v3386_v22 = vadd.f32 %v3376_v3, %v6268_v49  ;;  %v4733_v19 = vpack.i.bf16 %v1459_v53, %v1452_v31  ;;  %v3478_v59 = vrot.slane %v5854_v50, 2 }
0x27e6   :  { %v3406_v13 = vsel %vm2302_vm12, %v3385_v23, %v3405_v27  ;;  %v3388_v58 = vadd.f32 %v3380_v12, %v6272_v42  ;;  %v6375_v23 = vpop.permute.xlu1 %4707 }
0x27e7   :  { %4982 = vlog2.f32 %v3357_v25  ;;  %v3407_v7 = vsel %vm2305_vm13, %v3386_v22, %v3406_v13  ;;  %v3486_v63 = vperm.slane %v3478_v59, 0  ;;  %v3480_v25 = vrot.slane %v5854_v50, 4 }
0x27e9   :  { %v3488_v21 = vperm.slane %v3480_v25, 0 }
0x27ed   :  { %v4983_v28 = vpop.eup %4982 }
0x27ee   :  { %v3378_v26 = vmul.f32 0.6931472, %v4983_v28  ;;  %v3491_v28 = vperm.slane %v3483_v43, 0 }
0x27f0   :  { %v3387_v44 = vadd.f32 %v3378_v26, %v6306_v35 }
0x27f2   :  { %v3408_v60 = vsel %vm2308_vm15, %v3387_v44, %v3407_v7 }
0x27f3   :  { %v3409_v11 = vsel %vm2311_vm3, %v3388_v58, %v3408_v60  ;;  %v3477_v58 = vrot.slane %v5854_v50, 1 }
0x27f4   :  { %v6338_v57 = vsel %vm3394_vm7, %v3409_v11, %v6182_v0  ;;  %v1107_v0 = vld [vmem:[%s7287_s10 + $0x20] sm:$0xff] }
0x27f5   :  { %v3426_v38 = vperm.slane %v6338_v57, 2  ;;  %v3419_v55 = vperm.slane %v6338_v57, 1  ;;  %v3412_v49 = vperm.slane %v6338_v57, 0  ;;  %v3440_v42 = vperm.slane %v6338_v57, 4 }
0x27f6   :  { %v3454_v35 = vperm.slane %v6338_v57, 6  ;;  %v3433_v37 = vperm.slane %v6338_v57, 3  ;;  %vm3668_vm0 = vcmp.gt.f32.partialorder %v1107_v0, 0.5  ;;  %v3461_v1 = vperm.slane %v6338_v57, 7 }
0x27f7   :  { %3431 = vperm.xlu2 %4667, %v3426_v38   ;;  %3424 = vperm.xlu0 %4716, %v3419_v55   ;;  %v3669_v4 = vsel %vm3668_vm0, 1, %v7323_v29  ;;  %v3447_v16 = vperm.slane %v6338_v57, 5  ;;  %v3485_v55 = vperm.slane %v3477_v58, 0 }
0x27f8   :  { %3417 = vperm.xlu1 %4689, %v3412_v49  }
0x27ff   :  { %3445 = vperm.xlu2 %4667, %v3440_v42   ;;  %3459 = vperm.xlu0 %4716, %v3454_v35  }
0x2800   :  { %3438 = vperm.xlu1 %4689, %v3433_v37   ;;  %v3484_v37 = vperm.slane %v5854_v50, 0 }
0x2807   :  { %3466 = vperm.xlu2 %4667, %v3461_v1   ;;  %4722 = vset.pattern.permute.xlu0 %v7323_v29 }
0x2808   :  { %3452 = vperm.xlu1 %4689, %v3447_v16   ;;  %3671 = vperm.xlu0 %4722, %v3669_v4  }
0x280f   :  { %4724 = vperm.xlu2 %4667, %v4723_v2  }
0x2810   :  { %4718 = vperm.xlu1 %4689, %v4717_v20   ;;  %4738 = vset.pattern.permute.xlu0 %v5800_v45 }
0x2817   :  { %4734 = vperm.xlu2 %4667, %v4733_v19  }
0x2818   :  { %4729 = vperm.xlu1 %4689, %v4728_v8   ;;  %v3490_v8 = vperm.slane %v3482_v39, 0  ;;  %v4714_v39 = vunpack.i.l.bf16 %v6362_v34 }
0x2851   :  { %v3432_v48 = vpop.permute.xlu2 %3431 }
0x2852   :  { %v3470_v6 = vadd.f32 %v6214_v5, %v3432_v48 }
0x2854   :  { %v6367_v46 = vadd.f32 %v3486_v63, %v3470_v6 }
0x2856   :  { %v3522_v9 = vsel %vm1203_vm2, %v6367_v46, -inf }
0x2857   :  { %v3523_v3 = vrot.slane %v3522_v9, 4 }
0x2859   :  { %v3446_v33 = vpop.permute.xlu2 %3445  ;;  %v3524_v13 = vmax.f32 %v3522_v9, %v3523_v3 }
0x285a   :  { %v3472_v54 = vadd.f32 %v6214_v5, %v3446_v33  ;;  %v3479_v33 = vrot.slane %v5854_v50, 3 }
0x285b   :  { %v3525_v60 = vrot.slane %v3524_v13, 2 }
0x285c   :  { %v6373_v47 = vadd.f32 %v3488_v21, %v3472_v54 }
0x285d   :  { %v3526_v4 = vmax.f32 %v3524_v13, %v3525_v60  ;;  %v3487_v13 = vperm.slane %v3479_v33, 0 }
0x285e   :  { %v3536_v26 = vsel %vm1203_vm2, %v6373_v47, -inf }
0x285f   :  { %v3537_v22 = vrot.slane %v3536_v26, 4  ;;  %v3527_v31 = vrot.slane %v3526_v4, 1 }
0x2861   :  { %v3467_v27 = vpop.permute.xlu2 %3466  ;;  %v3538_v38 = vmax.f32 %v3536_v26, %v3537_v22  ;;  %v6395_v21 = vmax.f32 %v3526_v4, %v3527_v31  ;;  %v4715_v22 = vunpack.i.h.bf16 %v6362_v34 }
0x2862   :  { %v3475_v12 = vadd.f32 %v6214_v5, %v3467_v27 }
0x2863   :  { %v3539_v14 = vrot.slane %v3538_v38, 2  ;;  %v1645_v4 = vmul.f32 %v6214_v5, %v4715_v22 }
0x2864   :  { %v6380_v15 = vadd.f32 %v3491_v28, %v3475_v12 }
0x2865   :  { %v3540_v19 = vmax.f32 %v3538_v38, %v3539_v14 }
0x2866   :  { %v3557_v44 = vsel %vm1203_vm2, %v6380_v15, -inf }
0x2867   :  { %v3558_v7 = vrot.slane %v3557_v44, 4  ;;  %v3541_v27 = vrot.slane %v3540_v19, 1 }
0x2869   :  { %v3425_v11 = vpop.permute.xlu0 %3424  ;;  %v3559_v35 = vmax.f32 %v3557_v44, %v3558_v7  ;;  %v3566_v7 = vsub.f32 %v6367_v46, %v6395_v21  ;;  %v6407_v38 = vmax.f32 %v3540_v19, %v3541_v27  ;;  %v3481_v19 = vrot.slane %v5854_v50, 5 }
0x286a   :  { %v3469_v49 = vadd.f32 %v6214_v5, %v3425_v11  ;;  %v3418_v42 = vpop.permute.xlu1 %3417 }
0x286b   :  { %v3468_v0 = vadd.f32 %v6214_v5, %v3418_v42  ;;  %v3560_v17 = vrot.slane %v3559_v35, 2  ;;  %v3568_v31 = vsub.f32 %v6373_v47, %v6407_v38  ;;  %v3489_v27 = vperm.slane %v3481_v19, 0 }
0x286c   :  { %v3501_v1 = vadd.f32 %v3485_v55, %v3469_v49 }
0x286d   :  { %v3500_v16 = vadd.f32 %v3484_v37, %v3468_v0  ;;  %v3561_v6 = vmax.f32 %v3559_v35, %v3560_v17  ;;  %v3576_v17 = vmul.f32 1.442695, %v3566_v7  ;;  %v3580_v47 = vmul.f32 1.442695, %v3568_v31 }
0x286e   :  { %v3515_v32 = vsel %vm1203_vm2, %v3501_v1, -inf }
0x286f   :  { %v3516_v2 = vrot.slane %v3515_v32, 4  ;;  %v3508_v20 = vsel %vm1203_vm2, %v3500_v16, -inf  ;;  %v3562_v12 = vrot.slane %v3561_v6, 1 }
0x2870   :  { %v3509_v40 = vrot.slane %v3508_v20, 4 }
0x2871   :  { %v3517_v53 = vmax.f32 %v3515_v32, %v3516_v2  ;;  %v3460_v30 = vpop.permute.xlu0 %3459  ;;  %v6409_v35 = vmax.f32 %v3561_v6, %v3562_v12  ;;  %v1644_v6 = vmul.f32 %v6214_v5, %v4714_v39 }
0x2872   :  { %v3474_v48 = vadd.f32 %v6214_v5, %v3460_v30  ;;  %v3439_v59 = vpop.permute.xlu1 %3438  ;;  %v3510_v25 = vmax.f32 %v3508_v20, %v3509_v40  ;;  %v4725_v20 = vpop.permute.xlu2 %4724 }
0x2873   :  { %v3518_v63 = vrot.slane %v3517_v53, 2  ;;  %v3471_v3 = vadd.f32 %v6214_v5, %v3439_v59  ;;  %v3571_v40 = vsub.f32 %v6380_v15, %v6409_v35  ;;  %v4726_v34 = vunpack.i.l.bf16 %v4725_v20 }
0x2874   :  { %v6393_v54 = vadd.f32 %v3490_v8, %v3474_v48  ;;  %v3511_v43 = vrot.slane %v3510_v25, 2  ;;  %v1851_v8 = vsel %vm1203_vm2, %v1645_v4, 0.0 }
0x2875   :  { %v3519_v9 = vmax.f32 %v3517_v53, %v3518_v63  ;;  %v6405_v11 = vadd.f32 %v3487_v13, %v3471_v3  ;;  %v1852_v15 = vrot.slane %v1851_v8, 4  ;;  %v3586_v33 = vmul.f32 1.442695, %v3571_v40 }
0x2876   :  { %v3550_v28 = vsel %vm1203_vm2, %v6393_v54, -inf  ;;  %v3512_v44 = vmax.f32 %v3510_v25, %v3511_v43  ;;  %v1648_v50 = vmul.f32 %v6214_v5, %v4726_v34 }
0x2877   :  { %v3520_v26 = vrot.slane %v3519_v9, 1  ;;  %v3551_v58 = vrot.slane %v3550_v28, 4  ;;  %v3529_v0 = vsel %vm1203_vm2, %v6405_v11, -inf }
0x2878   :  { %v3513_v55 = vrot.slane %v3512_v44, 1  ;;  %v3530_v32 = vrot.slane %v3529_v0, 4  ;;  %v1872_v4 = vsel %vm1203_vm2, %v1648_v50, 0.0 }
0x2879   :  { %v6403_v60 = vmax.f32 %v3519_v9, %v3520_v26  ;;  %v3552_v49 = vmax.f32 %v3550_v28, %v3551_v58  ;;  %v4727_v9 = vunpack.i.h.bf16 %v4725_v20  ;;  %v1844_v26 = vsel %vm1203_vm2, %v1644_v6, 0.0 }
0x287a   :  { %v3453_v42 = vpop.permute.xlu1 %3452  ;;  %v6415_v14 = vmax.f32 %v3512_v44, %v3513_v55  ;;  %v3531_v30 = vmax.f32 %v3529_v0, %v3530_v32 }
0x287b   :  { %v3565_v37 = vsub.f32 %v3501_v1, %v6403_v60  ;;  %v3553_v46 = vrot.slane %v3552_v49, 2  ;;  %v3473_v28 = vadd.f32 %v6214_v5, %v3453_v42 }
0x287c   :  { %v3564_v53 = vsub.f32 %v3500_v16, %v6415_v14  ;;  %v3532_v63 = vrot.slane %v3531_v30, 2 }
0x287d   :  { %v3574_v2 = vmul.f32 1.442695, %v3565_v37  ;;  %v3554_v1 = vmax.f32 %v3552_v49, %v3553_v46  ;;  %v6437_v7 = vadd.f32 %v3489_v27, %v3473_v28  ;;  %v1853_v49 = vadd.f32 %v1852_v15, %v1851_v8 }
0x287e   :  { %v3572_v48 = vmul.f32 1.442695, %v3564_v53  ;;  %v3533_v43 = vmax.f32 %v3531_v30, %v3532_v63 }
0x287f   :  { %4984 = vpow2.f32 %v3574_v2  ;;  %v3555_v59 = vrot.slane %v3554_v1, 1  ;;  %v3543_v46 = vsel %vm1203_vm2, %v6437_v7, -inf  ;;  %v1845_v2 = vrot.slane %v1844_v26, 4 }
0x2880   :  { %4986 = vpow2.f32 %v3576_v17  ;;  %v3534_v13 = vrot.slane %v3533_v43, 1  ;;  %v3544_v30 = vrot.slane %v3543_v46, 4  ;;  %v1854_v8 = vrot.slane %v1853_v49, 2 }
0x2881   :  { %4988 = vpow2.f32 %v3572_v48  ;;  %v6426_v16 = vmax.f32 %v3554_v1, %v3555_v59  ;;  %v1873_v1 = vrot.slane %v1872_v4, 4  ;;  %v1846_v15 = vadd.f32 %v1845_v2, %v1844_v26 }
0x2882   :  { %v6428_v25 = vpop.permute.xlu1 %4718  ;;  %4990 = vpow2.f32 %v3580_v47  ;;  %v6440_v37 = vmax.f32 %v3533_v43, %v3534_v13 }
0x2883   :  { %v3570_v3 = vsub.f32 %v6393_v54, %v6426_v16  ;;  %v4721_v22 = vunpack.i.h.bf16 %v6428_v25  ;;  %4992 = vpow2.f32 %v3586_v33  ;;  %v1649_v54 = vmul.f32 %v6214_v5, %v4727_v9 }
0x2884   :  { %v3567_v39 = vsub.f32 %v6405_v11, %v6440_v37  ;;  %v3545_v11 = vmax.f32 %v3543_v46, %v3544_v30  ;;  %v4720_v28 = vunpack.i.l.bf16 %v6428_v25 }
0x2885   :  { %v4985_v12 = vpop.eup %4984  ;;  %v3584_v58 = vmul.f32 1.442695, %v3570_v3  ;;  %v1647_v17 = vmul.f32 %v6214_v5, %v4721_v22  ;;  %v1879_v53 = vsel %vm1203_vm2, %v1649_v54, 0.0  ;;  %v1874_v3 = vadd.f32 %v1873_v1, %v1872_v4 }
0x2886   :  { %v3595_v44 = vsel %vm1203_vm2, %v4985_v12, 0.0  ;;  %v4987_v55 = vpop.eup %4986  ;;  %v3578_v40 = vmul.f32 1.442695, %v3567_v39  ;;  %v1880_v9 = vrot.slane %v1879_v53, 4  ;;  %v3546_v27 = vrot.slane %v3545_v11, 2 }
0x2887   :  { %v4989_v42 = vpop.eup %4988  ;;  %v3596_v0 = vrot.slane %v3595_v44, 4  ;;  %4994 = vpow2.f32 %v3584_v58  ;;  %v3602_v20 = vsel %vm1203_vm2, %v4987_v55, 0.0  ;;  %v1865_v63 = vsel %vm1203_vm2, %v1647_v17, 0.0 }
0x2888   :  { %v3588_v32 = vsel %vm1203_vm2, %v4989_v42, 0.0  ;;  %v4991_v19 = vpop.eup %4990  ;;  %4996 = vpow2.f32 %v3578_v40  ;;  %v3603_v33 = vrot.slane %v3602_v20, 4  ;;  %v1866_v43 = vrot.slane %v1865_v63, 4 }
0x2889   :  { %v3589_v31 = vrot.slane %v3588_v32, 4  ;;  %v3597_v48 = vadd.f32 %v3596_v0, %v3595_v44  ;;  %v4993_v59 = vpop.eup %4992  ;;  %v3616_v50 = vsel %vm1203_vm2, %v4991_v19, 0.0  ;;  %v1855_v12 = vadd.f32 %v1854_v8, %v1853_v49 }
0x288a   :  { %v3637_v13 = vsel %vm1203_vm2, %v4993_v59, 0.0  ;;  %v3547_v55 = vmax.f32 %v3545_v11, %v3546_v27  ;;  %v1867_v54 = vadd.f32 %v1866_v43, %v1865_v63  ;;  %v1646_v26 = vmul.f32 %v6214_v5, %v4720_v28 }
0x288b   :  { %v3590_v34 = vadd.f32 %v3589_v31, %v3588_v32  ;;  %v3598_v22 = vrot.slane %v3597_v48, 2  ;;  %v1847_v42 = vrot.slane %v1846_v15, 2  ;;  %v3604_v0 = vadd.f32 %v3603_v33, %v3602_v20 }
0x288c   :  { %v3617_v46 = vrot.slane %v3616_v50, 4  ;;  %v1881_v32 = vadd.f32 %v1880_v9, %v1879_v53  ;;  %v1875_v4 = vrot.slane %v1874_v3, 2  ;;  %v3548_v17 = vrot.slane %v3547_v55, 1 }
0x288d   :  { %v4995_v47 = vpop.eup %4994  ;;  %v3591_v44 = vrot.slane %v3590_v34, 2  ;;  %v1868_v2 = vrot.slane %v1867_v54, 2  ;;  %v1858_v25 = vsel %vm1203_vm2, %v1646_v26, 0.0  ;;  %v3638_v49 = vrot.slane %v3637_v13, 4 }
0x288e   :  { %v3630_v58 = vsel %vm1203_vm2, %v4995_v47, 0.0  ;;  %v4997_v39 = vpop.eup %4996  ;;  %v3599_v31 = vadd.f32 %v3598_v22, %v3597_v48  ;;  %v6460_v8 = vmax.f32 %v3547_v55, %v3548_v17  ;;  %v1859_v5 = vrot.slane %v1858_v25, 4 }
0x288f   :  { %v3631_v1 = vrot.slane %v3630_v58, 4  ;;  %v3609_v40 = vsel %vm1203_vm2, %v4997_v39, 0.0  ;;  %v3592_v30 = vadd.f32 %v3591_v44, %v3590_v34  ;;  %v1856_v59 = vrot.slane %v1855_v12, 1 }
0x2890   :  { %v3610_v19 = vrot.slane %v3609_v40, 4  ;;  %v3605_v20 = vrot.slane %v3604_v0, 2  ;;  %v3618_v11 = vadd.f32 %v3617_v46, %v3616_v50  ;;  %v1882_v53 = vrot.slane %v1881_v32, 2 }
0x2891   :  { %v3569_v47 = vsub.f32 %v6437_v7, %v6460_v8  ;;  %v1869_v33 = vadd.f32 %v1868_v2, %v1867_v54  ;;  %v1860_v9 = vadd.f32 %v1859_v5, %v1858_v25  ;;  %v3639_v43 = vadd.f32 %v3638_v49, %v3637_v13 }
0x2892   :  { %v3611_v63 = vadd.f32 %v3610_v19, %v3609_v40  ;;  %v3600_v48 = vrot.slane %v3599_v31, 1  ;;  %v1876_v27 = vadd.f32 %v1875_v4, %v1874_v3  ;;  %v3632_v28 = vadd.f32 %v3631_v1, %v3630_v58 }
0x2893   :  { %v3593_v22 = vrot.slane %v3592_v30, 1  ;;  %v3582_v44 = vmul.f32 1.442695, %v3569_v47  ;;  %v1861_v55 = vrot.slane %v1860_v9, 2  ;;  %v1848_v26 = vadd.f32 %v1847_v42, %v1846_v15 }
0x2894   :  { %v3612_v34 = vrot.slane %v3611_v63, 2  ;;  %v3606_v39 = vadd.f32 %v3605_v20, %v3604_v0  ;;  %v3619_v17 = vrot.slane %v3618_v11, 2  ;;  %v1883_v6 = vadd.f32 %v1882_v53, %v1881_v32 }
0x2895   :  { %4998 = vpow2.f32 %v3582_v44  ;;  %v1870_v46 = vrot.slane %v1869_v33, 1  ;;  %v1862_v40 = vadd.f32 %v1861_v55, %v1860_v9  ;;  %v1857_v19 = vadd.f32 %v1856_v59, %v1855_v12 }
0x2896   :  { %v3613_v50 = vadd.f32 %v3612_v34, %v3611_v63  ;;  %v3601_v7 = vadd.f32 %v3600_v48, %v3599_v31  ;;  %v1877_v54 = vrot.slane %v1876_v27, 1  ;;  %v3633_v2 = vrot.slane %v3632_v28, 2 }
0x2897   :  { %v3640_v13 = vrot.slane %v3639_v43, 2  ;;  %v3594_v25 = vadd.f32 %v3593_v22, %v3592_v30  ;;  %v1863_v58 = vrot.slane %v1862_v40, 1  ;;  %v3607_v4 = vrot.slane %v3606_v39, 1 }
0x2898   :  { %v3614_v3 = vrot.slane %v3613_v50, 1  ;;  %v3620_v49 = vadd.f32 %v3619_v17, %v3618_v11  ;;  %v2099_v1 = vrot.slane %v5858_v51, 4  ;;  %v2097_v15 = vrot.slane %v5858_v51, 2 }
0x2899   :  { %v1849_v42 = vrot.slane %v1848_v26, 1  ;;  %v1884_v0 = vrot.slane %v1883_v6, 1  ;;  %v1871_v32 = vadd.f32 %v1870_v46, %v1869_v33  ;;  %v1864_v5 = vadd.f32 %v1863_v58, %v1862_v40 }
0x289a   :  { %v7328_v20 = vrot.slane %v5858_v51, 1  ;;  %5000 = vlog2.f32 %v3601_v7  ;;  %v3634_v31 = vadd.f32 %v3633_v2, %v3632_v28  ;;  %v2098_v59 = vrot.slane %v5858_v51, 3 }
0x289b   :  { %v4999_v30 = vpop.eup %4998  ;;  %v3641_v53 = vadd.f32 %v3640_v13, %v3639_v43  ;;  %5002 = vlog2.f32 %v3594_v25  ;;  %v1878_v63 = vadd.f32 %v1877_v54, %v1876_v27  ;;  %v3615_v11 = vadd.f32 %v3614_v3, %v3613_v50 }
0x289c   :  { %v2205_v12 = vmul.f32 %v7328_v20, %v1857_v19  ;;  %v3608_v47 = vadd.f32 %v3607_v4, %v3606_v39  ;;  %v3621_v9 = vrot.slane %v3620_v49, 1  ;;  %v3623_v48 = vsel %vm1203_vm2, %v4999_v30, 0.0 }
0x289d   :  { %v2206_v22 = vmul.f32 %v2097_v15, %v1864_v5  ;;  %v1850_v34 = vadd.f32 %v1849_v42, %v1848_v26  ;;  %v1885_v33 = vadd.f32 %v1884_v0, %v1883_v6  ;;  %v3624_v44 = vrot.slane %v3623_v48, 4 }
0x289e   :  { %v2207_v55 = vmul.f32 %v2098_v59, %v1871_v32  ;;  %v2341_v17 = vrot.slane %v2205_v12, 7  ;;  %v3635_v46 = vrot.slane %v3634_v31, 1  ;;  %v2100_v28 = vrot.slane %v5858_v51, 5 }
0x289f   :  { %v3642_v40 = vrot.slane %v3641_v53, 1  ;;  %v2208_v19 = vmul.f32 %v2099_v1, %v1878_v63  ;;  %5004 = vlog2.f32 %v3615_v11  ;;  %v3625_v43 = vadd.f32 %v3624_v44, %v3623_v48 }
0x28a0   :  { %v5001_v7 = vpop.eup %5000  ;;  %5006 = vlog2.f32 %v3608_v47  ;;  %v3622_v27 = vadd.f32 %v3621_v9, %v3620_v49  ;;  %v2343_v39 = vrot.slane %v2206_v22, 6  ;;  %v2204_v54 = vmul.f32 %v5858_v51, %v1850_v34 }
0x28a1   :  { %v5003_v50 = vpop.eup %5002  ;;  %v3626_v2 = vrot.slane %v3625_v43, 2  ;;  %v2345_v26 = vrot.slane %v2207_v55, 5  ;;  %v2209_v6 = vmul.f32 %v2100_v28, %v1885_v33  ;;  %v3636_v13 = vadd.f32 %v3635_v46, %v3634_v31 }
0x28a2   :  { %v3643_v25 = vadd.f32 %v3642_v40, %v3641_v53  ;;  %v2347_v3 = vrot.slane %v2208_v19, 4  ;;  %v2342_v4 = vsel %vm2293_vm9, %v2341_v17, %v2204_v54  ;;  %5008 = vlog2.f32 %v3622_v27  ;;  %v3672_v19 = vpop.permute.xlu0 %3671 }
0x28a3   :  { %v3627_v58 = vadd.f32 %v3626_v2, %v3625_v43  ;;  %v3647_v1 = vmul.f32 0.6931472, %v5001_v7  ;;  %v3645_v15 = vmul.f32 0.6931472, %v5003_v50  ;;  %v2344_v42 = vsel %vm2296_vm10, %v2343_v39, %v2342_v4 }
0x28a4   :  { %v2346_v32 = vsel %vm2299_vm11, %v2345_v26, %v2344_v42  ;;  %v2349_v5 = vrot.slane %v2209_v6, 3  ;;  %5010 = vlog2.f32 %v3636_v13  ;;  %vm3673_vm1 = vcmp.eq.s32.totalorder %v3672_v19, 1 }
0x28a5   :  { %v5005_v0 = vpop.eup %5004  ;;  %v3628_v49 = vrot.slane %v3627_v58, 1  ;;  %v2348_v12 = vsel %vm2302_vm12, %v2347_v3, %v2346_v32  ;;  %5012 = vlog2.f32 %v3643_v25  ;;  %v3661_v30 = vadd.f32 %v3647_v1, %v6403_v60 }
0x28a6   :  { %v5007_v20 = vpop.eup %5006  ;;  %v6477_v59 = vsel %vm2305_vm13, %v2349_v5, %v2348_v12  ;;  %v3660_v53 = vadd.f32 %v3645_v15, %v6415_v14  ;;  %v3651_v63 = vmul.f32 0.6931472, %v5005_v0  ;;  %v1480_v3 = vperm.slane %v5858_v51, 4 }
0x28a7   :  { %v3629_v31 = vadd.f32 %v3628_v49, %v3627_v58  ;;  %v3649_v11 = vmul.f32 0.6931472, %v5007_v20  ;;  %v1487_v58 = vperm.slane %v5858_v51, 5  ;;  %v1466_v4 = vperm.slane %v5858_v51, 2 }
0x28a8   :  { %v5009_v47 = vpop.eup %5008  ;;  %v3682_v48 = vsel %vm2293_vm9, %v3661_v30, %v3660_v53  ;;  %v3663_v22 = vadd.f32 %v3651_v63, %v6440_v37  ;;  %v1473_v1 = vperm.slane %v5858_v51, 3  ;;  %v1508_v0 = vperm.slane %v5834_v10, 0  ;;  %v6525_v63 = vld [vmem:[%s7289_s12] sm:$0xff] }
0x28a9   :  { %5014 = vlog2.f32 %v3629_v31  ;;  %v3662_v33 = vadd.f32 %v3649_v11, %v6395_v21  ;;  %v3653_v44 = vmul.f32 0.6931472, %v5009_v47  ;;  %v4745_v15 = vpack.i.bf16 %v1487_v58, %v1480_v3  ;;  %v6519_v31 = vpop.permute.xlu2 %4734 }
0x28aa   :  { %v5011_v9 = vpop.eup %5010  ;;  %v4739_v42 = vpack.i.bf16 %v1473_v1, %v1466_v4  ;;  %v1515_v49 = vperm.slane %v5834_v10, 1  ;;  %v1494_v32 = vperm.slane %v5858_v51, 6  ;;  %v1501_v5 = vperm.slane %v5858_v51, 7 }
0x28ab   :  { %v5013_v34 = vpop.eup %5012  ;;  %v3657_v17 = vmul.f32 0.6931472, %v5011_v9  ;;  %v3683_v46 = vsel %vm2296_vm10, %v3662_v33, %v3682_v48  ;;  %v3664_v40 = vadd.f32 %v3653_v44, %v6407_v38  ;;  %v3757_v30 = vrot.slane %v5837_v18, 2 }
0x28ac   :  { %v3659_v60 = vmul.f32 0.6931472, %v5013_v34  ;;  %v3684_v14 = vsel %vm2299_vm11, %v3663_v22, %v3683_v46  ;;  %v4755_v20 = vpack.i.bf16 %v1515_v49, %v1508_v0  ;;  %v4750_v12 = vpack.i.bf16 %v1501_v5, %v1494_v32 }
0x28ad   :  { %v3666_v7 = vadd.f32 %v3657_v17, %v6426_v16  ;;  %v3685_v37 = vsel %vm2302_vm12, %v3664_v40, %v3684_v14  ;;  %v3765_v47 = vperm.slane %v3757_v30, 0  ;;  %v3759_v48 = vrot.slane %v5837_v18, 4  ;;  %v6537_v14 = vpop.permute.xlu1 %4729 }
0x28ae   :  { %v3667_v21 = vadd.f32 %v3659_v60, %v6409_v35  ;;  %v3762_v46 = vrot.slane %v5837_v18, 7  ;;  %v4737_v49 = vunpack.i.h.bf16 %v6519_v31 }
0x28af   :  { %v5015_v55 = vpop.eup %5014  ;;  %v3767_v44 = vperm.slane %v3759_v48, 0 }
0x28b0   :  { %v3655_v28 = vmul.f32 0.6931472, %v5015_v55  ;;  %v3770_v19 = vperm.slane %v3762_v46, 0  ;;  %v4736_v46 = vunpack.i.l.bf16 %v6519_v31 }
0x28b2   :  { %v3665_v43 = vadd.f32 %v3655_v28, %v6460_v8 }
0x28b4   :  { %v3686_v27 = vsel %vm2305_vm13, %v3665_v43, %v3685_v37 }
0x28b5   :  { %v3687_v39 = vsel %vm2308_vm15, %v3666_v7, %v3686_v27 }
0x28b6   :  { %v3688_v50 = vsel %vm2311_vm3, %v3667_v21, %v3687_v39  ;;  %v3756_v39 = vrot.slane %v5837_v18, 1 }
0x28b7   :  { %v6495_v54 = vsel %vm3673_vm1, %v3688_v50, %v6338_v57  ;;  %v1108_v57 = vld [vmem:[%s7287_s10 + $0x28] sm:$0xff] }
0x28b8   :  { %v3705_v38 = vperm.slane %v6495_v54, 2  ;;  %v3698_v8 = vperm.slane %v6495_v54, 1  ;;  %v3691_v16 = vperm.slane %v6495_v54, 0  ;;  %v3719_v35 = vperm.slane %v6495_v54, 4 }
0x28b9   :  { %v3733_v2 = vperm.slane %v6495_v54, 6  ;;  %v3712_v26 = vperm.slane %v6495_v54, 3  ;;  %vm3947_vm8 = vcmp.gt.f32.partialorder %v1108_v57, 0.5  ;;  %v3740_v6 = vperm.slane %v6495_v54, 7 }
0x28ba   :  { %3710 = vperm.xlu2 %4667, %v3705_v38   ;;  %3703 = vperm.xlu0 %4738, %v3698_v8   ;;  %v3948_v13 = vsel %vm3947_vm8, 1, %v7323_v29  ;;  %v3726_v25 = vperm.slane %v6495_v54, 5 }
0x28bb   :  { %3696 = vperm.xlu1 %4689, %v3691_v16  }
0x28c2   :  { %3724 = vperm.xlu2 %4667, %v3719_v35   ;;  %3738 = vperm.xlu0 %4738, %v3733_v2   ;;  %v3764_v35 = vperm.slane %v3756_v39, 0 }
0x28c3   :  { %3717 = vperm.xlu1 %4689, %v3712_v26  }
0x28ca   :  { %3745 = vperm.xlu2 %4667, %v3740_v6   ;;  %4744 = vset.pattern.permute.xlu0 %v7323_v29  ;;  %v3763_v6 = vperm.slane %v5837_v18, 0 }
0x28cb   :  { %3731 = vperm.xlu1 %4689, %v3726_v25   ;;  %3950 = vperm.xlu0 %4744, %v3948_v13  }
0x28d2   :  { %4746 = vperm.xlu2 %4667, %v4745_v15   ;;  %v3761_v15 = vrot.slane %v5837_v18, 6 }
0x28d3   :  { %4740 = vperm.xlu1 %4689, %v4739_v42   ;;  %4760 = vset.pattern.permute.xlu0 %v5800_v45 }
0x28da   :  { %4756 = vperm.xlu2 %4667, %v4755_v20  }
0x28db   :  { %4751 = vperm.xlu1 %4689, %v4750_v12  }
0x2914   :  { %v3711_v53 = vpop.permute.xlu2 %3710 }
0x2915   :  { %v3749_v11 = vadd.f32 %v6525_v63, %v3711_v53 }
0x2917   :  { %v6528_v9 = vadd.f32 %v3765_v47, %v3749_v11  ;;  %v3769_v11 = vperm.slane %v3761_v15, 0 }
0x2919   :  { %v3801_v33 = vsel %vm1203_vm2, %v6528_v9, -inf }
0x291a   :  { %v3802_v55 = vrot.slane %v3801_v33, 4 }
0x291c   :  { %v3725_v22 = vpop.permute.xlu2 %3724  ;;  %v3803_v28 = vmax.f32 %v3801_v33, %v3802_v55  ;;  %v1653_v55 = vmul.f32 %v6525_v63, %v4737_v49 }
0x291d   :  { %v3751_v34 = vadd.f32 %v6525_v63, %v3725_v22 }
0x291e   :  { %v3804_v21 = vrot.slane %v3803_v28, 2 }
0x291f   :  { %v6534_v17 = vadd.f32 %v3767_v44, %v3751_v34  ;;  %v3758_v44 = vrot.slane %v5837_v18, 3 }
0x2920   :  { %v3805_v16 = vmax.f32 %v3803_v28, %v3804_v21 }
0x2921   :  { %v3815_v40 = vsel %vm1203_vm2, %v6534_v17, -inf }
0x2922   :  { %v3816_v37 = vrot.slane %v3815_v40, 4  ;;  %v3806_v4 = vrot.slane %v3805_v16, 1 }
0x2924   :  { %v3746_v60 = vpop.permute.xlu2 %3745  ;;  %v3817_v38 = vmax.f32 %v3815_v40, %v3816_v37  ;;  %v6557_v53 = vmax.f32 %v3805_v16, %v3806_v4 }
0x2925   :  { %v3754_v43 = vadd.f32 %v6525_v63, %v3746_v60 }
0x2926   :  { %v3818_v3 = vrot.slane %v3817_v38, 2  ;;  %v3845_v37 = vsub.f32 %v6528_v9, %v6557_v53 }
0x2927   :  { %v6542_v7 = vadd.f32 %v3770_v19, %v3754_v43 }
0x2928   :  { %v3819_v5 = vmax.f32 %v3817_v38, %v3818_v3  ;;  %v1907_v38 = vsel %vm1203_vm2, %v1653_v55, 0.0  ;;  %v3855_v9 = vmul.f32 1.442695, %v3845_v37 }
0x2929   :  { %v3836_v27 = vsel %vm1203_vm2, %v6542_v7, -inf }
0x292a   :  { %v3837_v50 = vrot.slane %v3836_v27, 4  ;;  %v3820_v28 = vrot.slane %v3819_v5, 1  ;;  %5016 = vpow2.f32 %v3855_v9 }
0x292c   :  { %v3704_v8 = vpop.permute.xlu0 %3703  ;;  %v3838_v57 = vmax.f32 %v3836_v27, %v3837_v50  ;;  %v3766_v50 = vperm.slane %v3758_v44, 0  ;;  %v4747_v31 = vpop.permute.xlu2 %4746 }
0x292d   :  { %v3748_v2 = vadd.f32 %v6525_v63, %v3704_v8  ;;  %v3697_v26 = vpop.permute.xlu1 %3696  ;;  %v4748_v15 = vunpack.i.l.bf16 %v4747_v31 }
0x292e   :  { %v3747_v13 = vadd.f32 %v6525_v63, %v3697_v26  ;;  %v3839_v42 = vrot.slane %v3838_v57, 2 }
0x292f   :  { %v3780_v25 = vadd.f32 %v3764_v35, %v3748_v2  ;;  %v1652_v35 = vmul.f32 %v6525_v63, %v4736_v46  ;;  %v6572_v2 = vmax.f32 %v3819_v5, %v3820_v28  ;;  %v3760_v46 = vrot.slane %v5837_v18, 5 }
0x2930   :  { %v6550_v58 = vadd.f32 %v3763_v6, %v3747_v13  ;;  %v3840_v22 = vmax.f32 %v3838_v57, %v3839_v42 }
0x2931   :  { %v3794_v1 = vsel %vm1203_vm2, %v3780_v25, -inf  ;;  %v3768_v18 = vperm.slane %v3760_v46, 0 }
0x2932   :  { %v3795_v0 = vrot.slane %v3794_v1, 4  ;;  %v3787_v32 = vsel %vm1203_vm2, %v6550_v58, -inf  ;;  %v3841_v27 = vrot.slane %v3840_v22, 1 }
0x2933   :  { %v3788_v12 = vrot.slane %v3787_v32, 4 }
0x2934   :  { %v3796_v20 = vmax.f32 %v3794_v1, %v3795_v0  ;;  %v3739_v30 = vpop.permute.xlu0 %3738  ;;  %v6578_v4 = vmax.f32 %v3840_v22, %v3841_v27  ;;  %v1908_v0 = vrot.slane %v1907_v38, 4  ;;  %v1656_v22 = vmul.f32 %v6525_v63, %v4748_v15  ;;  %v5017_v27 = vpop.eup %5016 }
0x2935   :  { %v3753_v47 = vadd.f32 %v6525_v63, %v3739_v30  ;;  %v3718_v48 = vpop.permute.xlu1 %3717  ;;  %v3789_v33 = vmax.f32 %v3787_v32, %v3788_v12  ;;  %v3847_v12 = vsub.f32 %v6534_v17, %v6572_v2  ;;  %v3881_v15 = vsel %vm1203_vm2, %v5017_v27, 0.0 }
0x2936   :  { %v3797_v34 = vrot.slane %v3796_v20, 2  ;;  %v3750_v43 = vadd.f32 %v6525_v63, %v3718_v48  ;;  %v3850_v48 = vsub.f32 %v6542_v7, %v6578_v4  ;;  %v1928_v37 = vsel %vm1203_vm2, %v1656_v22, 0.0 }
0x2937   :  { %v6563_v60 = vadd.f32 %v3769_v11, %v3753_v47  ;;  %v3790_v19 = vrot.slane %v3789_v33, 2  ;;  %v3859_v28 = vmul.f32 1.442695, %v3847_v12 }
0x2938   :  { %v3798_v40 = vmax.f32 %v3796_v20, %v3797_v34  ;;  %v6576_v57 = vadd.f32 %v3766_v50, %v3750_v43  ;;  %v1900_v20 = vsel %vm1203_vm2, %v1652_v35, 0.0  ;;  %v3865_v43 = vmul.f32 1.442695, %v3850_v48 }
0x2939   :  { %v3829_v21 = vsel %vm1203_vm2, %v6563_v60, -inf  ;;  %v3791_v8 = vmax.f32 %v3789_v33, %v3790_v19  ;;  %v1909_v33 = vadd.f32 %v1908_v0, %v1907_v38  ;;  %v1901_v17 = vrot.slane %v1900_v20, 4 }
0x293a   :  { %v3799_v39 = vrot.slane %v3798_v40, 1  ;;  %v3830_v16 = vrot.slane %v3829_v21, 4  ;;  %v3808_v42 = vsel %vm1203_vm2, %v6576_v57, -inf }
0x293b   :  { %v3792_v6 = vrot.slane %v3791_v8, 1  ;;  %v3809_v5 = vrot.slane %v3808_v42, 4 }
0x293c   :  { %v6574_v26 = vmax.f32 %v3798_v40, %v3799_v39  ;;  %v3831_v13 = vmax.f32 %v3829_v21, %v3830_v16  ;;  %v1910_v39 = vrot.slane %v1909_v33, 2 }
0x293d   :  { %v3732_v3 = vpop.permute.xlu1 %3731  ;;  %v6583_v49 = vmax.f32 %v3791_v8, %v3792_v6  ;;  %v3810_v34 = vmax.f32 %v3808_v42, %v3809_v5  ;;  %v1929_v6 = vrot.slane %v1928_v37, 4 }
0x293e   :  { %v3844_v1 = vsub.f32 %v3780_v25, %v6574_v26  ;;  %v3832_v32 = vrot.slane %v3831_v13, 2  ;;  %v4749_v25 = vunpack.i.h.bf16 %v4747_v31  ;;  %v3752_v38 = vadd.f32 %v6525_v63, %v3732_v3 }
0x293f   :  { %v3843_v11 = vsub.f32 %v6550_v58, %v6583_v49  ;;  %v3811_v40 = vrot.slane %v3810_v34, 2  ;;  %v1902_v31 = vadd.f32 %v1901_v17, %v1900_v20  ;;  %v1911_v0 = vadd.f32 %v1910_v39, %v1909_v33 }
0x2940   :  { %v3853_v30 = vmul.f32 1.442695, %v3844_v1  ;;  %v3833_v47 = vmax.f32 %v3831_v13, %v3832_v32  ;;  %v1657_v7 = vmul.f32 %v6525_v63, %v4749_v25  ;;  %v6605_v1 = vadd.f32 %v3768_v18, %v3752_v38 }
0x2941   :  { %v3851_v44 = vmul.f32 1.442695, %v3843_v11  ;;  %v3812_v21 = vmax.f32 %v3810_v34, %v3811_v40  ;;  %v3882_v11 = vrot.slane %v3881_v15, 4  ;;  %v1930_v48 = vadd.f32 %v1929_v6, %v1928_v37 }
0x2942   :  { %5018 = vpow2.f32 %v3853_v30  ;;  %v3834_v55 = vrot.slane %v3833_v47, 1  ;;  %v3822_v5 = vsel %vm1203_vm2, %v6605_v1, -inf  ;;  %v2103_v34 = vrot.slane %v5834_v10, 1 }
0x2943   :  { %5020 = vpow2.f32 %v3851_v44  ;;  %v3813_v16 = vrot.slane %v3812_v21, 1  ;;  %v1903_v33 = vrot.slane %v1902_v31, 2  ;;  %v1912_v46 = vrot.slane %v1911_v0, 1 }
0x2944   :  { %v6594_v19 = vmax.f32 %v3833_v47, %v3834_v55  ;;  %5022 = vpow2.f32 %v3859_v28  ;;  %v3823_v55 = vrot.slane %v3822_v5, 4  ;;  %v3883_v37 = vadd.f32 %v3882_v11, %v3881_v15 }
0x2945   :  { %v6596_v58 = vpop.permute.xlu1 %4740  ;;  %5024 = vpow2.f32 %v3865_v43  ;;  %v6609_v42 = vmax.f32 %v3812_v21, %v3813_v16  ;;  %v1904_v38 = vadd.f32 %v1903_v33, %v1902_v31 }
0x2946   :  { %v3849_v50 = vsub.f32 %v6563_v60, %v6594_v19  ;;  %v4743_v35 = vunpack.i.h.bf16 %v6596_v58  ;;  %v1935_v60 = vsel %vm1203_vm2, %v1657_v7, 0.0 }
0x2947   :  { %v3846_v12 = vsub.f32 %v6576_v57, %v6609_v42  ;;  %v1936_v47 = vrot.slane %v1935_v60, 4  ;;  %v3824_v57 = vmax.f32 %v3822_v5, %v3823_v55 }
0x2948   :  { %v5019_v8 = vpop.eup %5018  ;;  %v3863_v13 = vmul.f32 1.442695, %v3849_v50  ;;  %v1655_v30 = vmul.f32 %v6525_v63, %v4743_v35  ;;  %v1931_v50 = vrot.slane %v1930_v48, 2  ;;  %v4742_v35 = vunpack.i.l.bf16 %v6596_v58 }
0x2949   :  { %v3874_v9 = vsel %vm1203_vm2, %v5019_v8, 0.0  ;;  %v5021_v3 = vpop.eup %5020  ;;  %v3857_v44 = vmul.f32 1.442695, %v3846_v12  ;;  %v1937_v39 = vadd.f32 %v1936_v47, %v1935_v60  ;;  %v3825_v16 = vrot.slane %v3824_v57, 2 }
0x294a   :  { %v3875_v32 = vrot.slane %v3874_v9, 4  ;;  %5026 = vpow2.f32 %v3863_v13  ;;  %v3867_v20 = vsel %vm1203_vm2, %v5021_v3, 0.0  ;;  %v5023_v22 = vpop.eup %5022  ;;  %v1921_v21 = vsel %vm1203_vm2, %v1655_v30, 0.0 }
0x294b   :  { %v3868_v25 = vrot.slane %v3867_v20, 4  ;;  %v5025_v43 = vpop.eup %5024  ;;  %5028 = vpow2.f32 %v3857_v44  ;;  %v1922_v18 = vrot.slane %v1921_v21, 4  ;;  %v3895_v8 = vsel %vm1203_vm2, %v5023_v22, 0.0 }
0x294c   :  { %v3876_v17 = vadd.f32 %v3875_v32, %v3874_v9  ;;  %v1913_v9 = vadd.f32 %v1912_v46, %v1911_v0  ;;  %v3916_v6 = vsel %vm1203_vm2, %v5025_v43, 0.0  ;;  %v3826_v5 = vmax.f32 %v3824_v57, %v3825_v16 }
0x294d   :  { %v3869_v28 = vadd.f32 %v3868_v25, %v3867_v20  ;;  %v1923_v20 = vadd.f32 %v1922_v18, %v1921_v21  ;;  %v1654_v15 = vmul.f32 %v6525_v63, %v4742_v35  ;;  %v3884_v60 = vrot.slane %v3883_v37, 2 }
0x294e   :  { %v3877_v13 = vrot.slane %v3876_v17, 2  ;;  %v3896_v12 = vrot.slane %v3895_v8, 4  ;;  %v1938_v30 = vrot.slane %v1937_v39, 2  ;;  %v1932_v31 = vadd.f32 %v1931_v50, %v1930_v48 }
0x294f   :  { %v3870_v3 = vrot.slane %v3869_v28, 2  ;;  %v3917_v25 = vrot.slane %v3916_v6, 4  ;;  %v3827_v47 = vrot.slane %v3826_v5, 1  ;;  %v1924_v22 = vrot.slane %v1923_v20, 2 }
0x2950   :  { %v5027_v27 = vpop.eup %5026  ;;  %v1914_v58 = vsel %vm1203_vm2, %v1654_v15, 0.0  ;;  %v3878_v0 = vadd.f32 %v3877_v13, %v3876_v17  ;;  %v3885_v18 = vadd.f32 %v3884_v60, %v3883_v37  ;;  %v3897_v16 = vadd.f32 %v3896_v12, %v3895_v8 }
0x2951   :  { %v3909_v32 = vsel %vm1203_vm2, %v5027_v27, 0.0  ;;  %v5029_v11 = vpop.eup %5028  ;;  %v3871_v33 = vadd.f32 %v3870_v3, %v3869_v28  ;;  %v6628_v43 = vmax.f32 %v3826_v5, %v3827_v47  ;;  %v1925_v57 = vadd.f32 %v1924_v22, %v1923_v20 }
0x2952   :  { %v3910_v44 = vrot.slane %v3909_v32, 4  ;;  %v3888_v55 = vsel %vm1203_vm2, %v5029_v11, 0.0  ;;  %v1915_v21 = vrot.slane %v1914_v58, 4  ;;  %v1905_v27 = vrot.slane %v1904_v38, 1 }
0x2953   :  { %v3889_v46 = vrot.slane %v3888_v55, 4  ;;  %v1939_v48 = vadd.f32 %v1938_v30, %v1937_v39  ;;  %v3848_v35 = vsub.f32 %v6605_v1, %v6628_v43  ;;  %v1926_v40 = vrot.slane %v1925_v57, 1 }
0x2954   :  { %v1916_v15 = vadd.f32 %v1915_v21, %v1914_v58  ;;  %v3918_v17 = vadd.f32 %v3917_v25, %v3916_v6  ;;  %v3879_v28 = vrot.slane %v3878_v0, 1  ;;  %v1933_v13 = vrot.slane %v1932_v31, 1 }
0x2955   :  { %v3890_v50 = vadd.f32 %v3889_v46, %v3888_v55  ;;  %v3911_v3 = vadd.f32 %v3910_v44, %v3909_v32  ;;  %v3872_v11 = vrot.slane %v3871_v33, 1  ;;  %v3861_v5 = vmul.f32 1.442695, %v3848_v35 }
0x2956   :  { %v1917_v47 = vrot.slane %v1916_v15, 2  ;;  %v2213_v20 = vmul.f32 %v2103_v34, %v1913_v9  ;;  %v3898_v37 = vrot.slane %v3897_v16, 2  ;;  %v1940_v8 = vrot.slane %v1939_v48, 1 }
0x2957   :  { %v3891_v7 = vrot.slane %v3890_v50, 2  ;;  %v1927_v39 = vadd.f32 %v1926_v40, %v1925_v57  ;;  %v1906_v60 = vadd.f32 %v1905_v27, %v1904_v38  ;;  %5030 = vpow2.f32 %v3861_v5 }
0x2958   :  { %v1918_v1 = vadd.f32 %v1917_v47, %v1916_v15  ;;  %v3886_v30 = vrot.slane %v3885_v18, 1  ;;  %v3880_v22 = vadd.f32 %v3879_v28, %v3878_v0  ;;  %v1934_v6 = vadd.f32 %v1933_v13, %v1932_v31 }
0x2959   :  { %v3892_v12 = vadd.f32 %v3891_v7, %v3890_v50  ;;  %v3912_v25 = vrot.slane %v3911_v3, 2  ;;  %v3919_v58 = vrot.slane %v3918_v17, 2  ;;  %v3873_v32 = vadd.f32 %v3872_v11, %v3871_v33 }
0x295a   :  { %v1919_v55 = vrot.slane %v1918_v1, 1  ;;  %v3899_v46 = vadd.f32 %v3898_v37, %v3897_v16  ;;  %v1941_v21 = vadd.f32 %v1940_v8, %v1939_v48  ;;  %v2104_v35 = vrot.slane %v5834_v10, 2 }
0x295b   :  { %v3893_v44 = vrot.slane %v3892_v12, 1  ;;  %v7329_v34 = vrot.slane %v5834_v10, 3  ;;  %v2355_v40 = vrot.slane %v2213_v20, 7  ;;  %v2212_v7 = vmul.f32 %v5834_v10, %v1906_v60 }
0x295c   :  { %v1920_v38 = vadd.f32 %v1919_v55, %v1918_v1  ;;  %v2107_v57 = vrot.slane %v5834_v10, 5  ;;  %v3887_v0 = vadd.f32 %v3886_v30, %v3885_v18  ;;  %5032 = vlog2.f32 %v3880_v22 }
0x295d   :  { %v2215_v9 = vmul.f32 %v7329_v34, %v1927_v39  ;;  %v7330_v31 = vrot.slane %v5834_v10, 4  ;;  %v3913_v27 = vadd.f32 %v3912_v25, %v3911_v3  ;;  %v5031_v50 = vpop.eup %5030  ;;  %v3920_v16 = vadd.f32 %v3919_v58, %v3918_v17 }
0x295e   :  { %5034 = vlog2.f32 %v3873_v32  ;;  %v3894_v48 = vadd.f32 %v3893_v44, %v3892_v12  ;;  %v2214_v15 = vmul.f32 %v2104_v35, %v1920_v38  ;;  %v3900_v28 = vrot.slane %v3899_v46, 1 }
0x295f   :  { %v2216_v33 = vmul.f32 %v7330_v31, %v1934_v6  ;;  %v3902_v13 = vsel %vm1203_vm2, %v5031_v50, 0.0  ;;  %v2359_v11 = vrot.slane %v2215_v9, 5  ;;  %v2217_v5 = vmul.f32 %v2107_v57, %v1941_v21 }
0x2960   :  { %v3903_v47 = vrot.slane %v3902_v13, 4  ;;  %v2357_v20 = vrot.slane %v2214_v15, 6  ;;  %v3914_v8 = vrot.slane %v3913_v27, 1  ;;  %v2356_v18 = vsel %vm2293_vm9, %v2355_v40, %v2212_v7 }
0x2961   :  { %v2361_v37 = vrot.slane %v2216_v33, 4  ;;  %v3921_v39 = vrot.slane %v3920_v16, 1  ;;  %5036 = vlog2.f32 %v3894_v48  ;;  %v3901_v12 = vadd.f32 %v3900_v28, %v3899_v46 }
0x2962   :  { %v3904_v60 = vadd.f32 %v3903_v47, %v3902_v13  ;;  %v2358_v3 = vsel %vm2296_vm10, %v2357_v20, %v2356_v18  ;;  %v5033_v17 = vpop.eup %5032  ;;  %5038 = vlog2.f32 %v3887_v0  ;;  %v2363_v30 = vrot.slane %v2217_v5, 3  ;;  %v3951_v20 = vpop.permute.xlu0 %3950 }
0x2963   :  { %v2360_v1 = vsel %vm2299_vm11, %v2359_v11, %v2358_v3  ;;  %v3915_v58 = vadd.f32 %v3914_v8, %v3913_v27  ;;  %v3922_v44 = vadd.f32 %v3921_v39, %v3920_v16  ;;  %5040 = vlog2.f32 %v3901_v12 }
0x2964   :  { %v5035_v22 = vpop.eup %5034  ;;  %v3905_v6 = vrot.slane %v3904_v60, 2  ;;  %v2362_v25 = vsel %vm2302_vm12, %v2361_v37, %v2360_v1  ;;  %v3926_v21 = vmul.f32 0.6931472, %v5033_v17  ;;  %vm3952_vm14 = vcmp.eq.s32.totalorder %v3951_v20, 1 }
0x2965   :  { %v6647_v32 = vsel %vm2305_vm13, %v2363_v30, %v2362_v25  ;;  %v3924_v35 = vmul.f32 0.6931472, %v5035_v22  ;;  %5042 = vlog2.f32 %v3915_v58  ;;  %v1543_v25 = vperm.slane %v5834_v10, 5 }
0x2966   :  { %v3906_v55 = vadd.f32 %v3905_v6, %v3904_v60  ;;  %5044 = vlog2.f32 %v3922_v44  ;;  %v3940_v7 = vadd.f32 %v3926_v21, %v6574_v26  ;;  %v1536_v6 = vperm.slane %v5834_v10, 4 }
0x2967   :  { %v5037_v34 = vpop.eup %5036  ;;  %v3939_v38 = vadd.f32 %v3924_v35, %v6583_v49  ;;  %v1522_v58 = vperm.slane %v5834_v10, 2  ;;  %v1529_v44 = vperm.slane %v5834_v10, 3  ;;  %v1564_v35 = vperm.slane %v5892_v61, 0 }
0x2968   :  { %v3907_v9 = vrot.slane %v3906_v55, 1  ;;  %v5039_v40 = vpop.eup %5038  ;;  %v3930_v57 = vmul.f32 0.6931472, %v5037_v34  ;;  %v1571_v34 = vperm.slane %v5892_v61, 1 }
0x2969   :  { %v3928_v0 = vmul.f32 0.6931472, %v5039_v40  ;;  %v5041_v31 = vpop.eup %5040  ;;  %v3961_v27 = vsel %vm2293_vm9, %v3940_v7, %v3939_v38  ;;  %v4761_v21 = vpack.i.bf16 %v1529_v44, %v1522_v58  ;;  %v1557_v40 = vperm.slane %v5834_v10, 7  ;;  %v6692_v38 = vpop.permute.xlu2 %4756 }
0x296a   :  { %v3908_v46 = vadd.f32 %v3907_v9, %v3906_v55  ;;  %v3942_v50 = vadd.f32 %v3930_v57, %v6609_v42  ;;  %v3932_v15 = vmul.f32 0.6931472, %v5041_v31  ;;  %v4767_v55 = vpack.i.bf16 %v1543_v25, %v1536_v6 }
0x296b   :  { %v5043_v33 = vpop.eup %5042  ;;  %v3941_v48 = vadd.f32 %v3928_v0, %v6557_v53  ;;  %v1550_v9 = vperm.slane %v5834_v10, 6  ;;  %v4036_v57 = vrot.slane %v5895_v41, 2 }
0x296c   :  { %5046 = vlog2.f32 %v3908_v46  ;;  %v5045_v16 = vpop.eup %5044  ;;  %v3936_v13 = vmul.f32 0.6931472, %v5043_v33  ;;  %v3943_v47 = vadd.f32 %v3932_v15, %v6572_v2  ;;  %v4777_v46 = vpack.i.bf16 %v1571_v34, %v1564_v35 }
0x296d   :  { %v3962_v11 = vsel %vm2296_vm10, %v3941_v48, %v3961_v27  ;;  %v3938_v26 = vmul.f32 0.6931472, %v5045_v16  ;;  %v4772_v7 = vpack.i.bf16 %v1557_v40, %v1550_v9  ;;  %v4038_v27 = vrot.slane %v5895_v41, 4 }
0x296e   :  { %v3963_v49 = vsel %vm2299_vm11, %v3942_v50, %v3962_v11  ;;  %v3945_v8 = vadd.f32 %v3936_v13, %v6594_v19  ;;  %v4041_v11 = vrot.slane %v5895_v41, 7  ;;  %v4759_v9 = vunpack.i.h.bf16 %v6692_v38 }
0x296f   :  { %v3964_v42 = vsel %vm2302_vm12, %v3943_v47, %v3963_v49  ;;  %v3946_v53 = vadd.f32 %v3938_v26, %v6578_v4  ;;  %v4046_v15 = vperm.slane %v4038_v27, 0  ;;  %v6705_v49 = vpop.permute.xlu1 %4751 }
0x2970   :  { %v4049_v20 = vperm.slane %v4041_v11, 0  ;;  %v1661_v11 = vmul.f32 %v6525_v63, %v4759_v9 }
0x2972   :  { %v5047_v28 = vpop.eup %5046 }
0x2973   :  { %v3934_v5 = vmul.f32 0.6931472, %v5047_v28 }
0x2975   :  { %v3944_v37 = vadd.f32 %v3934_v5, %v6628_v43 }
0x2977   :  { %v3965_v18 = vsel %vm2305_vm13, %v3944_v37, %v3964_v42 }
0x2978   :  { %v3966_v39 = vsel %vm2308_vm15, %v3945_v8, %v3965_v18 }
0x2979   :  { %v3967_v60 = vsel %vm2311_vm3, %v3946_v53, %v3966_v39  ;;  %v4035_v39 = vrot.slane %v5895_v41, 1 }
0x297a   :  { %v6665_v3 = vsel %vm3952_vm14, %v3967_v60, %v6495_v54  ;;  %v6676_v54 = vld [vmem:[%s7287_s10 + $0x30] sm:$0xff] }
0x297b   :  { %v3984_v2 = vperm.slane %v6665_v3, 2  ;;  %v3977_v43 = vperm.slane %v6665_v3, 1  ;;  %v3970_v19 = vperm.slane %v6665_v3, 0  ;;  %v3998_v4 = vperm.slane %v6665_v3, 4 }
0x297c   :  { %v4012_v17 = vperm.slane %v6665_v3, 6  ;;  %v3991_v12 = vperm.slane %v6665_v3, 3  ;;  %vm4226_vm4 = vcmp.gt.f32.partialorder %v6676_v54, 0.5  ;;  %v4019_v1 = vperm.slane %v6665_v3, 7 }
0x297d   :  { %3989 = vperm.xlu2 %4667, %v3984_v2   ;;  %3982 = vperm.xlu0 %4760, %v3977_v43   ;;  %v4227_v30 = vsel %vm4226_vm4, 1, %v7323_v29  ;;  %v4005_v22 = vperm.slane %v6665_v3, 5 }
0x297e   :  { %3975 = vperm.xlu1 %4689, %v3970_v19  }
0x2985   :  { %4003 = vperm.xlu2 %4667, %v3998_v4   ;;  %4017 = vperm.xlu0 %4760, %v4012_v17   ;;  %v4043_v4 = vperm.slane %v4035_v39, 0 }
0x2986   :  { %3996 = vperm.xlu1 %4689, %v3991_v12  }
0x298d   :  { %4024 = vperm.xlu2 %4667, %v4019_v1   ;;  %4766 = vset.pattern.permute.xlu0 %v7323_v29 }
0x298e   :  { %4010 = vperm.xlu1 %4689, %v4005_v22   ;;  %4229 = vperm.xlu0 %4766, %v4227_v30   ;;  %v4042_v30 = vperm.slane %v5895_v41, 0 }
0x2995   :  { %4768 = vperm.xlu2 %4667, %v4767_v55  }
0x2996   :  { %4762 = vperm.xlu1 %4689, %v4761_v21   ;;  %4782 = vset.pattern.permute.xlu0 %v5800_v45  ;;  %v4044_v45 = vperm.slane %v4036_v57, 0  ;;  %v4040_v21 = vrot.slane %v5895_v41, 6 }
0x299d   :  { %4778 = vperm.xlu2 %4667, %v4777_v46  }
0x299e   :  { %4773 = vperm.xlu1 %4689, %v4772_v7  }
0x29d7   :  { %v3990_v0 = vpop.permute.xlu2 %3989 }
0x29d8   :  { %v4028_v31 = vadd.f32 %v6525_v63, %v3990_v0 }
0x29da   :  { %v6696_v33 = vadd.f32 %v4044_v45, %v4028_v31  ;;  %v4048_v45 = vperm.slane %v4040_v21, 0 }
0x29dc   :  { %v4080_v48 = vsel %vm1203_vm2, %v6696_v33, -inf }
0x29dd   :  { %v4081_v28 = vrot.slane %v4080_v48, 4 }
0x29df   :  { %v4004_v50 = vpop.permute.xlu2 %4003  ;;  %v4082_v5 = vmax.f32 %v4080_v48, %v4081_v28  ;;  %v4037_v28 = vrot.slane %v5895_v41, 3 }
0x29e0   :  { %v4030_v16 = vadd.f32 %v6525_v63, %v4004_v50 }
0x29e1   :  { %v4083_v53 = vrot.slane %v4082_v5, 2 }
0x29e2   :  { %v6702_v13 = vadd.f32 %v4046_v15, %v4030_v16 }
0x29e3   :  { %v4084_v19 = vmax.f32 %v4082_v5, %v4083_v53 }
0x29e4   :  { %v4094_v47 = vsel %vm1203_vm2, %v6702_v13, -inf }
0x29e5   :  { %v4095_v42 = vrot.slane %v4094_v47, 4  ;;  %v4085_v44 = vrot.slane %v4084_v19, 1 }
0x29e7   :  { %v4025_v26 = vpop.permute.xlu2 %4024  ;;  %v4096_v2 = vmax.f32 %v4094_v47, %v4095_v42  ;;  %v6725_v31 = vmax.f32 %v4084_v19, %v4085_v44 }
0x29e8   :  { %v4033_v37 = vadd.f32 %v6525_v63, %v4025_v26  ;;  %v4758_v26 = vunpack.i.l.bf16 %v6692_v38 }
0x29e9   :  { %v4097_v25 = vrot.slane %v4096_v2, 2  ;;  %v4124_v53 = vsub.f32 %v6696_v33, %v6725_v31 }
0x29ea   :  { %v6710_v8 = vadd.f32 %v4049_v20, %v4033_v37 }
0x29eb   :  { %v4098_v46 = vmax.f32 %v4096_v2, %v4097_v25  ;;  %v4045_v2 = vperm.slane %v4037_v28, 0  ;;  %v4134_v33 = vmul.f32 1.442695, %v4124_v53 }
0x29ec   :  { %v4115_v18 = vsel %vm1203_vm2, %v6710_v8, -inf }
0x29ed   :  { %v4116_v60 = vrot.slane %v4115_v18, 4  ;;  %v4099_v47 = vrot.slane %v4098_v46, 1  ;;  %5048 = vpow2.f32 %v4134_v33 }
0x29ef   :  { %v3983_v43 = vpop.permute.xlu0 %3982  ;;  %v4117_v1 = vmax.f32 %v4115_v18, %v4116_v60  ;;  %v4769_v38 = vpop.permute.xlu2 %4768 }
0x29f0   :  { %v4027_v17 = vadd.f32 %v6525_v63, %v3983_v43  ;;  %v3976_v12 = vpop.permute.xlu1 %3975  ;;  %v1963_v43 = vsel %vm1203_vm2, %v1661_v11, 0.0 }
0x29f1   :  { %v4026_v22 = vadd.f32 %v6525_v63, %v3976_v12  ;;  %v4118_v35 = vrot.slane %v4117_v1, 2  ;;  %v6740_v12 = vmax.f32 %v4098_v46, %v4099_v47  ;;  %v1964_v9 = vrot.slane %v1963_v43, 4 }
0x29f2   :  { %v4059_v6 = vadd.f32 %v4043_v4, %v4027_v17  ;;  %v1660_v17 = vmul.f32 %v6525_v63, %v4758_v26 }
0x29f3   :  { %v6718_v58 = vadd.f32 %v4042_v30, %v4026_v22  ;;  %v4119_v16 = vmax.f32 %v4117_v1, %v4118_v35  ;;  %v4770_v35 = vunpack.i.l.bf16 %v4769_v38  ;;  %v1965_v11 = vadd.f32 %v1964_v9, %v1963_v43 }
0x29f4   :  { %v4073_v55 = vsel %vm1203_vm2, %v4059_v6, -inf }
0x29f5   :  { %v4074_v34 = vrot.slane %v4073_v55, 4  ;;  %v4066_v40 = vsel %vm1203_vm2, %v6718_v58, -inf  ;;  %v4120_v39 = vrot.slane %v4119_v16, 1  ;;  %v1966_v43 = vrot.slane %v1965_v11, 2 }
0x29f6   :  { %v4067_v57 = vrot.slane %v4066_v40, 4 }
0x29f7   :  { %v4075_v7 = vmax.f32 %v4073_v55, %v4074_v34  ;;  %v4018_v0 = vpop.permute.xlu0 %4017  ;;  %v6746_v55 = vmax.f32 %v4119_v16, %v4120_v39 }
0x29f8   :  { %v4032_v27 = vadd.f32 %v6525_v63, %v4018_v0  ;;  %v3997_v50 = vpop.permute.xlu1 %3996  ;;  %v4068_v15 = vmax.f32 %v4066_v40, %v4067_v57  ;;  %v1956_v57 = vsel %vm1203_vm2, %v1660_v17, 0.0  ;;  %v4126_v0 = vsub.f32 %v6702_v13, %v6740_v12 }
0x29f9   :  { %v4076_v48 = vrot.slane %v4075_v7, 2  ;;  %v4029_v42 = vadd.f32 %v6525_v63, %v3997_v50  ;;  %v4771_v50 = vunpack.i.h.bf16 %v4769_v38  ;;  %v1957_v13 = vrot.slane %v1956_v57, 4 }
0x29fa   :  { %v6731_v5 = vadd.f32 %v4048_v45, %v4032_v27  ;;  %v4069_v37 = vrot.slane %v4068_v15, 2  ;;  %v4039_v27 = vrot.slane %v5895_v41, 5 }
0x29fb   :  { %v4077_v20 = vmax.f32 %v4075_v7, %v4076_v48  ;;  %v6744_v30 = vadd.f32 %v4045_v2, %v4029_v42  ;;  %v4129_v48 = vsub.f32 %v6710_v8, %v6746_v55  ;;  %v1958_v17 = vadd.f32 %v1957_v13, %v1956_v57 }
0x29fc   :  { %v4108_v18 = vsel %vm1203_vm2, %v6731_v5, -inf  ;;  %v4070_v19 = vmax.f32 %v4068_v15, %v4069_v37  ;;  %v1664_v15 = vmul.f32 %v6525_v63, %v4770_v35  ;;  %v4047_v42 = vperm.slane %v4039_v27, 0 }
0x29fd   :  { %v4078_v60 = vrot.slane %v4077_v20, 1  ;;  %v4109_v4 = vrot.slane %v4108_v18, 4  ;;  %v4087_v34 = vsel %vm1203_vm2, %v6744_v30, -inf  ;;  %v4144_v53 = vmul.f32 1.442695, %v4129_v48 }
0x29fe   :  { %v4071_v22 = vrot.slane %v4070_v19, 1  ;;  %v4088_v7 = vrot.slane %v4087_v34, 4  ;;  %v1984_v8 = vsel %vm1203_vm2, %v1664_v15, 0.0 }
0x29ff   :  { %v6742_v1 = vmax.f32 %v4077_v20, %v4078_v60  ;;  %v4110_v25 = vmax.f32 %v4108_v18, %v4109_v4  ;;  %v4138_v20 = vmul.f32 1.442695, %v4126_v0  ;;  %v1665_v18 = vmul.f32 %v6525_v63, %v4771_v50  ;;  %v5049_v60 = vpop.eup %5048 }
0x2a00   :  { %v4011_v44 = vpop.permute.xlu1 %4010  ;;  %v6751_v40 = vmax.f32 %v4070_v19, %v4071_v22  ;;  %v4089_v28 = vmax.f32 %v4087_v34, %v4088_v7  ;;  %v4160_v9 = vsel %vm1203_vm2, %v5049_v60, 0.0  ;;  %v1967_v7 = vadd.f32 %v1966_v43, %v1965_v11 }
0x2a01   :  { %v4123_v21 = vsub.f32 %v4059_v6, %v6742_v1  ;;  %v4111_v46 = vrot.slane %v4110_v25, 2  ;;  %v4031_v38 = vadd.f32 %v6525_v63, %v4011_v44  ;;  %v1959_v11 = vrot.slane %v1958_v17, 2 }
0x2a02   :  { %v4122_v6 = vsub.f32 %v6718_v58, %v6751_v40  ;;  %v4090_v37 = vrot.slane %v4089_v28, 2 }
0x2a03   :  { %v4132_v45 = vmul.f32 1.442695, %v4123_v21  ;;  %v4112_v16 = vmax.f32 %v4110_v25, %v4111_v46  ;;  %v1985_v21 = vrot.slane %v1984_v8, 4  ;;  %v6774_v34 = vadd.f32 %v4047_v42, %v4031_v38 }
0x2a04   :  { %v4130_v26 = vmul.f32 1.442695, %v4122_v6  ;;  %v4091_v39 = vmax.f32 %v4089_v28, %v4090_v37  ;;  %v1991_v46 = vsel %vm1203_vm2, %v1665_v18, 0.0  ;;  %v1968_v37 = vrot.slane %v1967_v7, 1 }
0x2a05   :  { %5050 = vpow2.f32 %v4132_v45  ;;  %v4113_v47 = vrot.slane %v4112_v16, 1  ;;  %v4101_v0 = vsel %vm1203_vm2, %v6774_v34, -inf  ;;  %v1992_v15 = vrot.slane %v1991_v46, 4 }
0x2a06   :  { %5052 = vpow2.f32 %v4130_v26  ;;  %v4092_v33 = vrot.slane %v4091_v39, 1  ;;  %v1986_v28 = vadd.f32 %v1985_v21, %v1984_v8  ;;  %v4102_v13 = vrot.slane %v4101_v0, 4 }
0x2a07   :  { %v6762_v41 = vmax.f32 %v4112_v16, %v4113_v47  ;;  %5054 = vpow2.f32 %v4138_v20  ;;  %v4161_v16 = vrot.slane %v4160_v9, 4 }
0x2a08   :  { %v6764_v58 = vpop.permute.xlu1 %4762  ;;  %5056 = vpow2.f32 %v4144_v53  ;;  %v1987_v38 = vrot.slane %v1986_v28, 2 }
0x2a09   :  { %v4128_v19 = vsub.f32 %v6731_v5, %v6762_v41  ;;  %v4765_v22 = vunpack.i.h.bf16 %v6764_v58  ;;  %v6778_v5 = vmax.f32 %v4091_v39, %v4092_v33  ;;  %v4162_v8 = vadd.f32 %v4161_v16, %v4160_v9  ;;  %v6798_v9 = vld [vmem:[%s7289_s12] sm:$0xff] }
0x2a0a   :  { %v1960_v33 = vadd.f32 %v1959_v11, %v1958_v17 }
0x2a0b   :  { %v5051_v4 = vpop.eup %5050  ;;  %v4142_v35 = vmul.f32 1.442695, %v4128_v19  ;;  %v4125_v6 = vsub.f32 %v6744_v30, %v6778_v5  ;;  %v1663_v50 = vmul.f32 %v6525_v63, %v4765_v22  ;;  %v4103_v30 = vmax.f32 %v4101_v0, %v4102_v13 }
0x2a0c   :  { %v4153_v25 = vsel %vm1203_vm2, %v5051_v4, 0.0  ;;  %v5053_v44 = vpop.eup %5052  ;;  %v1993_v19 = vadd.f32 %v1992_v15, %v1991_v46  ;;  %v4163_v46 = vrot.slane %v4162_v8, 2 }
0x2a0d   :  { %v4154_v57 = vrot.slane %v4153_v25, 4  ;;  %5058 = vpow2.f32 %v4142_v35  ;;  %v4146_v45 = vsel %vm1203_vm2, %v5053_v44, 0.0  ;;  %v5055_v26 = vpop.eup %5054  ;;  %v4136_v47 = vmul.f32 1.442695, %v4125_v6 }
0x2a0e   :  { %v4147_v48 = vrot.slane %v4146_v45, 4  ;;  %v5057_v39 = vpop.eup %5056  ;;  %v1977_v63 = vsel %vm1203_vm2, %v1663_v50, 0.0  ;;  %v4174_v22 = vsel %vm1203_vm2, %v5055_v26, 0.0  ;;  %v4104_v21 = vrot.slane %v4103_v30, 2 }
0x2a0f   :  { %v4155_v42 = vadd.f32 %v4154_v57, %v4153_v25  ;;  %5060 = vpow2.f32 %v4136_v47  ;;  %v1978_v4 = vrot.slane %v1977_v63, 4  ;;  %v4764_v25 = vunpack.i.l.bf16 %v6764_v58 }
0x2a10   :  { %v4148_v53 = vadd.f32 %v4147_v48, %v4146_v45  ;;  %v1969_v35 = vadd.f32 %v1968_v37, %v1967_v7  ;;  %v4195_v44 = vsel %vm1203_vm2, %v5057_v39, 0.0  ;;  %v4105_v6 = vmax.f32 %v4103_v30, %v4104_v21 }
0x2a11   :  { %v4156_v57 = vrot.slane %v4155_v42, 2  ;;  %v1979_v50 = vadd.f32 %v1978_v4, %v1977_v63  ;;  %v1662_v17 = vmul.f32 %v6798_v9, %v4764_v25  ;;  %v4175_v16 = vrot.slane %v4174_v22, 4 }
0x2a12   :  { %v4149_v0 = vrot.slane %v4148_v53, 2  ;;  %v1994_v48 = vrot.slane %v1993_v19, 2  ;;  %v1988_v58 = vadd.f32 %v1987_v38, %v1986_v28  ;;  %v4196_v15 = vrot.slane %v4195_v44, 4 }
0x2a13   :  { %v5059_v43 = vpop.eup %5058  ;;  %v4106_v26 = vrot.slane %v4105_v6, 1  ;;  %v1980_v11 = vrot.slane %v1979_v50, 2  ;;  %v1970_v47 = vsel %vm1203_vm2, %v1662_v17, 0.0  ;;  %v4157_v13 = vadd.f32 %v4156_v57, %v4155_v42 }
0x2a14   :  { %v4188_v45 = vsel %vm1203_vm2, %v5059_v43, 0.0  ;;  %v4150_v37 = vadd.f32 %v4149_v0, %v4148_v53  ;;  %v1971_v21 = vrot.slane %v1970_v47, 4  ;;  %v1961_v25 = vrot.slane %v1960_v33, 1 }
0x2a15   :  { %v5061_v7 = vpop.eup %5060  ;;  %v4189_v39 = vrot.slane %v4188_v45, 4  ;;  %v6803_v43 = vmax.f32 %v4105_v6, %v4106_v26  ;;  %v1981_v4 = vadd.f32 %v1980_v11, %v1979_v50  ;;  %v4164_v60 = vadd.f32 %v4163_v46, %v4162_v8 }
0x2a16   :  { %v4167_v30 = vsel %vm1203_vm2, %v5061_v7, 0.0  ;;  %v4176_v28 = vadd.f32 %v4175_v16, %v4174_v22  ;;  %v1995_v38 = vadd.f32 %v1994_v48, %v1993_v19  ;;  %v1972_v17 = vadd.f32 %v1971_v21, %v1970_v47 }
0x2a17   :  { %v4168_v63 = vrot.slane %v4167_v30, 4  ;;  %v4127_v27 = vsub.f32 %v6774_v34, %v6803_v43  ;;  %v1982_v18 = vrot.slane %v1981_v4, 1  ;;  %v4197_v42 = vadd.f32 %v4196_v15, %v4195_v44  ;;  %v1103_v34 = vld [vmem:[%s7287_s10] sm:$0xff] }
0x2a18   :  { %v4158_v53 = vrot.slane %v4157_v13, 1  ;;  %v1989_v57 = vrot.slane %v1988_v58, 1  ;;  %v4190_v0 = vadd.f32 %v4189_v39, %v4188_v45  ;;  %v4151_v7 = vrot.slane %v4150_v37, 1 }
0x2a19   :  { %v4169_v20 = vadd.f32 %v4168_v63, %v4167_v30  ;;  %v4140_v6 = vmul.f32 1.442695, %v4127_v27  ;;  %v1973_v26 = vrot.slane %v1972_v17, 2  ;;  %v7331_v50 = vrot.slane %v5892_v61, 1 }
0x2a1a   :  { %v4177_v8 = vrot.slane %v4176_v28, 2  ;;  %v1996_v22 = vrot.slane %v1995_v38, 1  ;;  %v1983_v19 = vadd.f32 %v1982_v18, %v1981_v4  ;;  %v1962_v46 = vadd.f32 %v1961_v25, %v1960_v33 }
0x2a1b   :  { %v4170_v2 = vrot.slane %v4169_v20, 2  ;;  %v2221_v11 = vmul.f32 %v7331_v50, %v1969_v35  ;;  %5062 = vpow2.f32 %v4140_v6  ;;  %v1974_v44 = vadd.f32 %v1973_v26, %v1972_v17 }
0x2a1c   :  { %v4165_v48 = vrot.slane %v4164_v60, 1  ;;  %v4159_v45 = vadd.f32 %v4158_v53, %v4157_v13  ;;  %v1990_v15 = vadd.f32 %v1989_v57, %v1988_v58  ;;  %v4191_v47 = vrot.slane %v4190_v0, 2 }
0x2a1d   :  { %v4171_v16 = vadd.f32 %v4170_v2, %v4169_v20  ;;  %v4198_v27 = vrot.slane %v4197_v42, 2  ;;  %v4152_v39 = vadd.f32 %v4151_v7, %v4150_v37  ;;  %v1975_v63 = vrot.slane %v1974_v44, 1  ;;  %v5119_v2 = vld [vmem:[%s7287_s10 + $0x8] sm:$0xff] }
0x2a1e   :  { %v2460_v35 = vsel %vm2446_vm5, %v1103_v34, 0.0  ;;  %v4178_v21 = vadd.f32 %v4177_v8, %v4176_v28  ;;  %v1997_v18 = vadd.f32 %v1996_v22, %v1995_v38  ;;  %v7332_v4 = vrot.slane %v5892_v61, 3 }
0x2a1f   :  { %v4172_v30 = vrot.slane %v4171_v16, 1  ;;  %v2461_v20 = vsel %vm2446_vm5, %v5119_v2, 0.0  ;;  %v2369_v33 = vrot.slane %v2221_v11, 7  ;;  %v2220_v58 = vmul.f32 %v5892_v61, %v1962_v46 }
0x2a20   :  { %v2223_v50 = vmul.f32 %v7332_v4, %v1983_v19  ;;  %v1976_v13 = vadd.f32 %v1975_v63, %v1974_v44  ;;  %v4166_v37 = vadd.f32 %v4165_v48, %v4164_v60  ;;  %5064 = vlog2.f32 %v4159_v45 }
0x2a21   :  { %v7333_v25 = vrot.slane %v5892_v61, 4  ;;  %v4192_v28 = vadd.f32 %v4191_v47, %v4190_v0  ;;  %v5063_v38 = vpop.eup %5062  ;;  %v4199_v53 = vadd.f32 %v4198_v27, %v4197_v42  ;;  %5066 = vlog2.f32 %v4152_v39  ;;  %v5120_v0 = vld [vmem:[%s7287_s10 + $0x10] sm:$0xff] }
0x2a22   :  { %v4173_v57 = vadd.f32 %v4172_v30, %v4171_v16  ;;  %v7334_v7 = vrot.slane %v5892_v61, 2  ;;  %v4179_v26 = vrot.slane %v4178_v21, 1  ;;  %v4181_v8 = vsel %vm1203_vm2, %v5063_v38, 0.0 }
0x2a23   :  { %v2224_v17 = vmul.f32 %v7333_v25, %v1990_v15  ;;  %v2373_v11 = vrot.slane %v2223_v50, 5  ;;  %v7335_v22 = vrot.slane %v5892_v61, 5  ;;  %v2462_v60 = vadd.f32 %v2461_v20, %v2460_v35 }
0x2a24   :  { %v2222_v6 = vmul.f32 %v7334_v7, %v1976_v13  ;;  %v4182_v34 = vrot.slane %v4181_v8, 4  ;;  %v2463_v42 = vsel %vm2446_vm5, %v5120_v0, 0.0  ;;  %v4193_v44 = vrot.slane %v4192_v28, 1 }
0x2a25   :  { %v2225_v19 = vmul.f32 %v7335_v22, %v1997_v18  ;;  %v2375_v16 = vrot.slane %v2224_v17, 4  ;;  %v2370_v48 = vsel %vm2293_vm9, %v2369_v33, %v2220_v58  ;;  %v4200_v45 = vrot.slane %v4199_v53, 1  ;;  %v5121_v33 = vld [vmem:[%s7287_s10 + $0x18] sm:$0xff] }
0x2a26   :  { %v2371_v46 = vrot.slane %v2222_v6, 6  ;;  %5068 = vlog2.f32 %v4173_v57  ;;  %v4183_v15 = vadd.f32 %v4182_v34, %v4181_v8  ;;  %v5065_v27 = vpop.eup %5064  ;;  %v4180_v39 = vadd.f32 %v4179_v26, %v4178_v21  ;;  %v5123_v34 = vld [vmem:[%s7287_s10 + $0x28] sm:$0xff] }
0x2a27   :  { %5070 = vlog2.f32 %v4166_v37  ;;  %v2377_v63 = vrot.slane %v2225_v19, 3  ;;  %v5067_v35 = vpop.eup %5066  ;;  %v2464_v50 = vadd.f32 %v2463_v42, %v2462_v60  ;;  %v4194_v2 = vadd.f32 %v4193_v44, %v4192_v28  ;;  %v5122_v28 = vld [vmem:[%s7287_s10 + $0x20] sm:$0xff] }
0x2a28   :  { %v2372_v47 = vsel %vm2296_vm10, %v2371_v46, %v2370_v48  ;;  %v4184_v18 = vrot.slane %v4183_v15, 2  ;;  %v2465_v58 = vsel %vm2446_vm5, %v5121_v33, 0.0  ;;  %v4201_v13 = vadd.f32 %v4200_v45, %v4199_v53 }
0x2a29   :  { %v2374_v30 = vsel %vm2299_vm11, %v2373_v11, %v2372_v47  ;;  %5072 = vlog2.f32 %v4180_v39  ;;  %v4205_v37 = vmul.f32 0.6931472, %v5065_v27  ;;  %v4203_v25 = vmul.f32 0.6931472, %v5067_v35 }
0x2a2a   :  { %v2376_v4 = vsel %vm2302_vm12, %v2375_v16, %v2374_v30  ;;  %v4185_v21 = vadd.f32 %v4184_v18, %v4183_v15  ;;  %v2466_v7 = vadd.f32 %v2465_v58, %v2464_v50  ;;  %5074 = vlog2.f32 %v4194_v2 }
0x2a2b   :  { %v6836_v20 = vsel %vm2305_vm13, %v2377_v63, %v2376_v4  ;;  %v2467_v6 = vsel %vm2446_vm5, %v5122_v28, 0.0  ;;  %5076 = vlog2.f32 %v4201_v13  ;;  %v4219_v8 = vadd.f32 %v4205_v37, %v6742_v1 }
0x2a2c   :  { %v5069_v17 = vpop.eup %5068  ;;  %v4186_v38 = vrot.slane %v4185_v21, 1  ;;  %v4218_v53 = vadd.f32 %v4203_v25, %v6751_v40  ;;  %v2468_v60 = vadd.f32 %v2467_v6, %v2466_v7  ;;  %v2469_v46 = vsel %vm2446_vm5, %v5123_v34, 0.0 }
0x2a2d   :  { %v5071_v57 = vpop.eup %5070  ;;  %v4209_v11 = vmul.f32 0.6931472, %v5069_v17  ;;  %v2471_v15 = vsel %vm2446_vm5, %v6676_v54, 0.0  ;;  %v1599_v34 = vperm.slane %v5892_v61, 5 }
0x2a2e   :  { %v4187_v26 = vadd.f32 %v4186_v38, %v4185_v21  ;;  %v4207_v22 = vmul.f32 0.6931472, %v5071_v57  ;;  %v4240_v42 = vsel %vm2293_vm9, %v4219_v8, %v4218_v53  ;;  %v2470_v48 = vadd.f32 %v2469_v46, %v2468_v60 }
0x2a2f   :  { %v5073_v19 = vpop.eup %5072  ;;  %v4221_v16 = vadd.f32 %v4209_v11, %v6778_v5  ;;  %v1110_v5 = vld [vmem:[%s7287_s10 + $0x38] sm:$0xff]  ;;  %v1592_v60 = vperm.slane %v5892_v61, 4  ;;  %v7336_v46 = vmov 0.0  }
0x2a30   :  { %5078 = vlog2.f32 %v4187_v26  ;;  %v5075_v0 = vpop.eup %5074  ;;  %v4220_v1 = vadd.f32 %v4207_v22, %v6725_v31  ;;  %v4211_v40 = vmul.f32 0.6931472, %v5073_v19  ;;  %v4230_v31 = vpop.permute.xlu0 %4229  ;;  %v2472_v18 = vadd.f32 %v2471_v15, %v2470_v48 }
0x2a31   :  { %v5077_v44 = vpop.eup %5076  ;;  %v4215_v47 = vmul.f32 0.6931472, %v5075_v0  ;;  %v2473_v2 = vsel %vm2446_vm5, %v1110_v5, 0.0  ;;  %vm4231_vm6 = vcmp.eq.s32.totalorder %v4230_v31, 1  ;;  %vm4505_vm0 = vcmp.gt.f32.partialorder %v1110_v5, 0.5 }
0x2a32   :  { %v4241_v27 = vsel %vm2296_vm10, %v4220_v1, %v4240_v42  ;;  %v4217_v39 = vmul.f32 0.6931472, %v5077_v44  ;;  %v4222_v35 = vadd.f32 %v4211_v40, %v6740_v12  ;;  %v2474_v12 = vadd.f32 %v2473_v2, %v2472_v18 }
0x2a33   :  { %v4242_v30 = vsel %vm2299_vm11, %v4221_v16, %v4241_v27  ;;  %v4224_v50 = vadd.f32 %v4215_v47, %v6762_v41  ;;  %v4665_v26 = vunpack.i.l.bf16 %v6112_v36  ;;  %v4506_v53 = vsel %vm4505_vm0, 1, %v7323_v29 }
0x2a34   :  { %v4243_v54 = vsel %vm2302_vm12, %v4222_v35, %v4242_v30  ;;  %v4225_v33 = vadd.f32 %v4217_v39, %v6746_v55  ;;  %v4634_v55 = vceil.f32 %v2474_v12  ;;  %v4635_v17 = vfloor.f32 %v2474_v12 }
0x2a35   :  { %vm4633_vm7 = vcmp.lt.s32.totalorder %v2474_v12, 0  ;;  %v4666_v22 = vunpack.i.h.bf16 %v6112_v36  ;;  %v1626_v19 = vmul.f32 %v6798_v9, %v4665_v26  ;;  %v1578_v16 = vperm.slane %v5892_v61, 2 }
0x2a36   :  { %v5079_v45 = vpop.eup %5078  ;;  %v4636_v38 = vsel %vm4633_vm7, %v4634_v55, %v4635_v17  ;;  %v1585_v44 = vperm.slane %v5892_v61, 3  ;;  %v4709_v40 = vunpack.i.l.bf16 %v6375_v23  ;;  %v4789_v48 = vpack.i.bf16 %v1599_v34, %v1592_v60 }
0x2a37   :  { %v4213_v63 = vmul.f32 0.6931472, %v5079_v45  ;;  %v4637_v28 = vcvt.f32.s32 %v4636_v38  ;;  %v1718_v36 = vsel %vm1203_vm2, %v1626_v19, 0.0  ;;  %v1606_v27 = vperm.slane %v5892_v61, 6 }
0x2a38   :  { %v4783_v45 = vpack.i.bf16 %v1585_v44, %v1578_v16  ;;  %v1719_v15 = vrot.slane %v1718_v36, 4  ;;  %v1613_v39 = vperm.slane %v5892_v61, 7  ;;  %v4710_v30 = vunpack.i.h.bf16 %v6375_v23  ;;  %v7338_v16 = vld [vmem:[#allocation9_spill] sm:$0xff] }
0x2a39   :  { %v4223_v4 = vadd.f32 %v4213_v63, %v6803_v43  ;;  %v6880_v6 = vadd.s32 4294967295, %v4637_v28  ;;  %v1642_v63 = vmul.f32 %v6798_v9, %v4709_v40  ;;  %v4672_v31 = vunpack.i.h.bf16 %v6102_v62  ;;  %v7337_v28 = vld [vmem:[#allocation20_spill] sm:$0xff] }
0x2a3a   :  { %v4671_v2 = vunpack.i.l.bf16 %v6102_v62  ;;  %v4794_v23 = vpack.i.bf16 %v1613_v39, %v1606_v27  ;;  %v4754_v17 = vunpack.i.h.bf16 %v6705_v49  ;;  %v4682_v26 = vunpack.i.l.bf16 %v7337_v28 }
0x2a3b   :  { %v4244_v58 = vsel %vm2305_vm13, %v4223_v4, %v4243_v54  ;;  %vm2477_vm1 = vcmp.eq.s32.totalorder %v6880_v6, 0  ;;  %vm2478_vm8 = vcmp.eq.s32.totalorder %v6880_v6, 1  ;;  %vm2479_vm14 = vcmp.eq.s32.totalorder %v6880_v6, 2 }
0x2a3c   :  { %v4245_v13 = vsel %vm2308_vm15, %v4224_v50, %v4244_v58  ;;  %v4617_v0 = vsel %vm2477_vm1, 1.0, %v7336_v46  ;;  %v4618_v42 = vsel %vm2478_vm8, 1.0, %v7336_v46  ;;  %vm2480_vm4 = vcmp.eq.s32.totalorder %v6880_v6, 3 }
0x2a3d   :  { %v4246_v21 = vsel %vm2311_vm3, %v4225_v33, %v4245_v13  ;;  %v4799_v1 = vpack.i.bf16 %v4618_v42, %v4617_v0  ;;  %v4619_v5 = vsel %vm2479_vm14, 1.0, %v7336_v46  ;;  %v4620_v35 = vsel %vm2480_vm4, 1.0, %v7336_v46 }
0x2a3e   :  { %v6872_v37 = vsel %vm4231_vm6, %v4246_v21, %v6665_v3  ;;  %v1720_v4 = vadd.f32 %v1719_v15, %v1718_v36  ;;  %v4676_v50 = vunpack.i.l.bf16 %v6206_v52  ;;  %v4804_v54 = vpack.i.bf16 %v4620_v35, %v4619_v5 }
0x2a3f   :  { %v4263_v43 = vperm.slane %v6872_v37, 2  ;;  %v4256_v41 = vperm.slane %v6872_v37, 1  ;;  %v4249_v25 = vperm.slane %v6872_v37, 0  ;;  %v4277_v57 = vperm.slane %v6872_v37, 4 }
0x2a40   :  { %v4291_v7 = vperm.slane %v6872_v37, 6  ;;  %v4270_v3 = vperm.slane %v6872_v37, 3  ;;  %v4298_v8 = vperm.slane %v6872_v37, 7  ;;  %v4284_v11 = vperm.slane %v6872_v37, 5 }
0x2a41   :  { %4268 = vperm.xlu2 %4667, %v4263_v43   ;;  %4261 = vperm.xlu0 %4782, %v4256_v41   ;;  %v1643_v33 = vmul.f32 %v6798_v9, %v4710_v30  ;;  %v1830_v58 = vsel %vm1203_vm2, %v1642_v63, 0.0  ;;  %v1629_v13 = vmul.f32 %v6798_v9, %v4672_v31  ;;  %v4753_v21 = vunpack.i.l.bf16 %v6705_v49 }
0x2a42   :  { %4254 = vperm.xlu1 %4689, %v4249_v25   ;;  %vm2481_vm6 = vcmp.eq.s32.totalorder %v6880_v6, 4  ;;  %vm2482_vm7 = vcmp.eq.s32.totalorder %v6880_v6, 5  ;;  %v1721_v43 = vrot.slane %v1720_v4, 2  ;;  %v4677_v41 = vunpack.i.h.bf16 %v6206_v52 }
0x2a43   :  { %v1630_v25 = vmul.f32 %v6798_v9, %v4676_v50  ;;  %v1831_v62 = vrot.slane %v1830_v58, 4  ;;  %v1837_v55 = vsel %vm1203_vm2, %v1643_v33, 0.0  ;;  %v4621_v38 = vsel %vm2481_vm6, 1.0, %v7336_v46 }
0x2a44   :  { %v1658_v52 = vmul.f32 %v6798_v9, %v4753_v21  ;;  %v4683_v49 = vunpack.i.h.bf16 %v7337_v28  ;;  %v1838_v19 = vrot.slane %v1837_v55, 4  ;;  %v1659_v42 = vmul.f32 %v6798_v9, %v4754_v17 }
0x2a45   :  { %v1832_v60 = vadd.f32 %v1831_v62, %v1830_v58  ;;  %v2080_v44 = vrot.slane %v7338_v16, 6  ;;  %vm2483_vm0 = vcmp.eq.s32.totalorder %v6880_v6, 6  ;;  %vm2484_vm1 = vcmp.eq.s32.totalorder %v6880_v6, 7 }
0x2a46   :  { %v1942_v36 = vsel %vm1203_vm2, %v1658_v52, 0.0  ;;  %v1839_v27 = vadd.f32 %v1838_v19, %v1837_v55  ;;  %v1949_v30 = vsel %vm1203_vm2, %v1659_v42, 0.0  ;;  %v4623_v5 = vsel %vm2483_vm0, 1.0, %v7336_v46 }
0x2a47   :  { %v1833_v39 = vrot.slane %v1832_v60, 2  ;;  %v1943_v63 = vrot.slane %v1942_v36, 4  ;;  %v4624_v35 = vsel %vm2484_vm1, 1.0, %v7336_v46  ;;  %v1950_v21 = vrot.slane %v1949_v30, 4 }
0x2a49   :  { %4282 = vperm.xlu2 %4667, %v4277_v57   ;;  %4296 = vperm.xlu0 %4782, %v4291_v7   ;;  %v4622_v57 = vsel %vm2482_vm7, 1.0, %v7336_v46  ;;  %v1739_v7 = vsel %vm1203_vm2, %v1629_v13, 0.0  ;;  %v1840_v13 = vrot.slane %v1839_v27, 2  ;;  %v1944_v46 = vadd.f32 %v1943_v63, %v1942_v36 }
0x2a4a   :  { %4275 = vperm.xlu1 %4689, %v4270_v3   ;;  %v1628_v3 = vmul.f32 %v6798_v9, %v4671_v2  ;;  %v4809_v34 = vpack.i.bf16 %v4622_v57, %v4621_v38  ;;  %v1740_v0 = vrot.slane %v1739_v7, 4  ;;  %v2094_v63 = vrot.slane %v5824_v56, 6 }
0x2a4b   :  { %v1841_v52 = vadd.f32 %v1840_v13, %v1839_v27 }
0x2a4c   :  { %v1741_v6 = vadd.f32 %v1740_v0, %v1739_v7 }
0x2a4e   :  { %v1742_v62 = vrot.slane %v1741_v6, 2 }
0x2a50   :  { %v1743_v19 = vadd.f32 %v1742_v62, %v1741_v6  ;;  %v7340_v6 = vld [vmem:[#allocation16_spill] sm:$0xff] }
0x2a51   :  { %4303 = vperm.xlu2 %4667, %v4298_v8   ;;  %4788 = vset.pattern.permute.xlu0 %v7323_v29  ;;  %v1627_v29 = vmul.f32 %v6798_v9, %v4666_v22  ;;  %v1746_v22 = vsel %vm1203_vm2, %v1630_v25, 0.0  ;;  %v1834_v25 = vadd.f32 %v1833_v39, %v1832_v60 }
0x2a52   :  { %4289 = vperm.xlu1 %4689, %v4284_v11   ;;  %4508 = vperm.xlu0 %4788, %v4506_v53   ;;  %v1722_v53 = vadd.f32 %v1721_v43, %v1720_v4  ;;  %v1631_v11 = vmul.f32 %v6798_v9, %v4677_v41  ;;  %v1744_v39 = vrot.slane %v1743_v19, 1 }
0x2a53   :  { %v1725_v47 = vsel %vm1203_vm2, %v1627_v29, 0.0  ;;  %v1632_v29 = vmul.f32 %v6798_v9, %v4682_v26 }
0x2a54   :  { %v1726_v18 = vrot.slane %v1725_v47, 4  ;;  %v1753_v15 = vsel %vm1203_vm2, %v1631_v11, 0.0  ;;  %v1835_v11 = vrot.slane %v1834_v25, 1 }
0x2a55   :  { %v1760_v50 = vsel %vm1203_vm2, %v1632_v29, 0.0  ;;  %v1754_v33 = vrot.slane %v1753_v15, 4 }
0x2a56   :  { %v1727_v12 = vadd.f32 %v1726_v18, %v1725_v47  ;;  %v1633_v47 = vmul.f32 %v6798_v9, %v4683_v49  ;;  %v7339_v18 = vld [vmem:[#allocation19_spill] sm:$0xff]  ;;  %v1761_v41 = vrot.slane %v1760_v50, 4  ;;  %v2081_v49 = vrot.slane %v7338_v16, 7 }
0x2a57   :  { %v4687_v4 = vunpack.i.l.bf16 %v7339_v18  ;;  %v1755_v38 = vadd.f32 %v1754_v33, %v1753_v15 }
0x2a58   :  { %v1728_v8 = vrot.slane %v1727_v12, 2  ;;  %v1767_v43 = vsel %vm1203_vm2, %v1633_v47, 0.0  ;;  %v1836_v47 = vadd.f32 %v1835_v11, %v1834_v25  ;;  %v2095_v25 = vrot.slane %v5824_v56, 7 }
0x2a59   :  { %4790 = vperm.xlu2 %4667, %v4789_v48   ;;  %v1723_v48 = vrot.slane %v1722_v53, 1  ;;  %v1634_v17 = vmul.f32 %v6798_v9, %v4687_v4  ;;  %v1768_v26 = vrot.slane %v1767_v43, 4  ;;  %v1756_v0 = vrot.slane %v1755_v38, 2 }
0x2a5a   :  { %4784 = vperm.xlu1 %4689, %v4783_v45   ;;  %4800 = vperm.xlu0 %4788, %v4799_v1   ;;  %v1732_v1 = vsel %vm1203_vm2, %v1628_v3, 0.0  ;;  %v1729_v40 = vadd.f32 %v1728_v8, %v1727_v12  ;;  %v1747_v45 = vrot.slane %v1746_v22, 4  ;;  %v4814_v12 = vpack.i.bf16 %v4624_v35, %v4623_v5 }
0x2a5b   :  { %v1733_v31 = vrot.slane %v1732_v1, 4  ;;  %v1724_v2 = vadd.f32 %v1723_v48, %v1722_v53  ;;  %v1951_v8 = vadd.f32 %v1950_v21, %v1949_v30  ;;  %v1762_v53 = vadd.f32 %v1761_v41, %v1760_v50  ;;  %v7341_v21 = vld [vmem:[#allocation8_spill] sm:$0xff] }
0x2a5c   :  { %v1748_v58 = vadd.f32 %v1747_v45, %v1746_v22  ;;  %v1945_v22 = vrot.slane %v1944_v46, 2  ;;  %v1757_v5 = vadd.f32 %v1756_v0, %v1755_v38  ;;  %v2202_v13 = vmul.f32 %v2094_v63, %v1836_v47 }
0x2a5d   :  { %v1734_v55 = vadd.f32 %v1733_v31, %v1732_v1  ;;  %v2186_v3 = vmul.f32 %v2080_v44, %v1724_v2  ;;  %v1769_v1 = vadd.f32 %v1768_v26, %v1767_v43  ;;  %v1952_v48 = vrot.slane %v1951_v8, 2 }
0x2a5e   :  { %v1749_v57 = vrot.slane %v1748_v58, 2  ;;  %v1763_v15 = vrot.slane %v1762_v53, 2  ;;  %v1946_v27 = vadd.f32 %v1945_v22, %v1944_v46  ;;  %v2083_v41 = vrot.slane %v7341_v21, 2 }
0x2a5f   :  { %v1735_v60 = vrot.slane %v1734_v55, 2  ;;  %v2307_v36 = vrot.slane %v2186_v3, 2  ;;  %v1770_v50 = vrot.slane %v1769_v1, 2  ;;  %v1745_v46 = vadd.f32 %v1744_v39, %v1743_v19 }
0x2a60   :  { %v1750_v42 = vadd.f32 %v1749_v57, %v1748_v58  ;;  %v1764_v58 = vadd.f32 %v1763_v15, %v1762_v53  ;;  %v1758_v62 = vrot.slane %v1757_v5, 1  ;;  %v2084_v11 = vrot.slane %v7341_v21, 3 }
0x2a61   :  { %v1736_v30 = vadd.f32 %v1735_v60, %v1734_v55  ;;  %v2309_v31 = vsel %vm2308_vm15, %v2307_v36, %v7340_v6  ;;  %v1771_v57 = vadd.f32 %v1770_v50, %v1769_v1  ;;  %v2108_v22 = vrot.slane %v5834_v10, 6 }
0x2a62   :  { %4795 = vperm.xlu1 %4689, %v4794_v23   ;;  %4805 = vperm.xlu0 %4788, %v4804_v54   ;;  %v1730_v54 = vrot.slane %v1729_v40, 1  ;;  %v4688_v23 = vunpack.i.h.bf16 %v7339_v18  ;;  %v1751_v35 = vrot.slane %v1750_v42, 1  ;;  %v1765_v26 = vrot.slane %v1764_v58, 1 }
0x2a63   :  { %v1737_v43 = vrot.slane %v1736_v30, 1  ;;  %v1759_v60 = vadd.f32 %v1758_v62, %v1757_v5  ;;  %v2085_v39 = vrot.slane %v7341_v21, 4 }
0x2a64   :  { %v1731_v7 = vadd.f32 %v1730_v54, %v1729_v40  ;;  %v1635_v28 = vmul.f32 %v6798_v9, %v4688_v23  ;;  %v1842_v40 = vrot.slane %v1841_v52, 1  ;;  %v1953_v54 = vadd.f32 %v1952_v48, %v1951_v8 }
0x2a65   :  { %v1947_v23 = vrot.slane %v1946_v27, 1  ;;  %v1752_v55 = vadd.f32 %v1751_v35, %v1750_v42  ;;  %v2337_v8 = vrot.slane %v2202_v13, 2  ;;  %v1738_v53 = vadd.f32 %v1737_v43, %v1736_v30 }
0x2a66   :  { %v2187_v29 = vmul.f32 %v2081_v49, %v1731_v7  ;;  %v1781_v44 = vsel %vm1203_vm2, %v1635_v28, 0.0  ;;  %v1843_v2 = vadd.f32 %v1842_v40, %v1841_v52  ;;  %v1954_v7 = vrot.slane %v1953_v54, 1 }
0x2a67   :  { %v1782_v4 = vrot.slane %v1781_v44, 4  ;;  %v1948_v52 = vadd.f32 %v1947_v23, %v1946_v27  ;;  %v2190_v19 = vmul.f32 %v2083_v41, %v1752_v55  ;;  %v1772_v42 = vrot.slane %v1771_v57, 1 }
0x2a68   :  { %v2310_v18 = vrot.slane %v2187_v29, 1  ;;  %v2203_v3 = vmul.f32 %v2095_v25, %v1843_v2  ;;  %v1955_v36 = vadd.f32 %v1954_v7, %v1953_v54  ;;  %v1766_v1 = vadd.f32 %v1765_v26, %v1764_v58  ;;  %v4779_v26 = vpop.permute.xlu2 %4778 }
0x2a69   :  { %v1783_v38 = vadd.f32 %v1782_v4, %v1781_v44  ;;  %v2338_v40 = vsel %vm2308_vm15, %v2337_v8, %v6320_v24  ;;  %v2218_v48 = vmul.f32 %v2108_v22, %v1948_v52  ;;  %v2188_v47 = vmul.f32 %v7341_v21, %v1738_v53 }
0x2a6a   :  { %4810 = vperm.xlu0 %4788, %v4809_v34   ;;  %v1774_v34 = vsel %vm1203_vm2, %v1634_v17, 0.0  ;;  %v2312_v17 = vsel %vm2311_vm3, %v2310_v18, %v2309_v31  ;;  %v2339_v29 = vrot.slane %v2203_v3, 1  ;;  %v2191_v27 = vmul.f32 %v2084_v11, %v1759_v60  ;;  %v7342_v11 = vld [vmem:[#allocation13_spill] sm:$0xff] }
0x2a6b   :  { %v1775_v45 = vrot.slane %v1774_v34, 4  ;;  %v1784_v0 = vrot.slane %v1783_v38, 2  ;;  %v1773_v63 = vadd.f32 %v1772_v42, %v1771_v57  ;;  %v2315_v6 = vrot.slane %v2190_v19, 6 }
0x2a6c   :  { %v2340_v5 = vsel %vm2311_vm3, %v2339_v29, %v2338_v40  ;;  %v2192_v18 = vmul.f32 %v2085_v39, %v1766_v1  ;;  %v2365_v4 = vrot.slane %v2218_v48, 2  ;;  %v2086_v24 = vrot.slane %v7341_v21, 5 }
0x2a6d   :  { %v1776_v33 = vadd.f32 %v1775_v45, %v1774_v34  ;;  %v2404_v34 = vsel %vm1203_vm2, %v2312_v17, 0.0  ;;  %v2109_v45 = vrot.slane %v5834_v10, 7  ;;  %v1785_v30 = vadd.f32 %v1784_v0, %v1783_v38 }
0x2a6e   :  { %v2410_v50 = vsel %vm1203_vm2, %v2340_v5, 0.0  ;;  %v2317_v2 = vrot.slane %v2191_v27, 5  ;;  %v2193_v23 = vmul.f32 %v2086_v24, %v1773_v63  ;;  %v2366_v43 = vsel %vm2308_vm15, %v2365_v4, %v6647_v32 }
0x2a6f   :  { %v1777_v28 = vrot.slane %v1776_v33, 2  ;;  %v2219_v35 = vmul.f32 %v2109_v45, %v1955_v36  ;;  %v2087_v25 = vrot.slane %v7341_v21, 6  ;;  %v2088_v7 = vrot.slane %v7341_v21, 7 }
0x2a70   :  { %v2321_v17 = vrot.slane %v2193_v23, 3  ;;  %v4315_v22 = vrot.slane %v7342_v11, 2  ;;  %v4781_v29 = vunpack.i.h.bf16 %v4779_v26  ;;  %v4320_v5 = vrot.slane %v7342_v11, 7 }
0x2a71   :  { %v1778_v44 = vadd.f32 %v1777_v28, %v1776_v33  ;;  %v1786_v33 = vrot.slane %v1785_v30, 1  ;;  %v2367_v58 = vrot.slane %v2219_v35, 1 }
0x2a72   :  { %4815 = vperm.xlu0 %4788, %v4814_v12   ;;  %v2082_v12 = vrot.slane %v7341_v21, 1  ;;  %v1669_v40 = vmul.f32 %v6798_v9, %v4781_v29 }
0x2a73   :  { %v1779_v31 = vrot.slane %v1778_v44, 1  ;;  %v1787_v62 = vadd.f32 %v1786_v33, %v1785_v30  ;;  %v4732_v33 = vunpack.i.h.bf16 %v6537_v14 }
0x2a74   :  { %v2189_v49 = vmul.f32 %v2082_v12, %v1745_v46  ;;  %v2319_v12 = vrot.slane %v2192_v18, 4  ;;  %v2368_v46 = vsel %vm2311_vm3, %v2367_v58, %v2366_v43  ;;  %v2019_v30 = vsel %vm1203_vm2, %v1669_v40, 0.0 }
0x2a75   :  { %v1780_v13 = vadd.f32 %v1779_v31, %v1778_v44  ;;  %v2416_v3 = vsel %vm1203_vm2, %v2368_v46, 0.0  ;;  %v2195_v28 = vmul.f32 %v2088_v7, %v1787_v62  ;;  %v4317_v44 = vrot.slane %v7342_v11, 4 }
0x2a76   :  { %v2313_v15 = vrot.slane %v2189_v49, 7  ;;  %v2020_v31 = vrot.slane %v2019_v30, 4  ;;  %v4314_v46 = vrot.slane %v7342_v11, 1  ;;  %v1651_v62 = vmul.f32 %v6798_v9, %v4732_v33 }
0x2a77   :  { %v2194_v38 = vmul.f32 %v2087_v25, %v1780_v13  ;;  %v2325_v53 = vrot.slane %v2195_v28, 1  ;;  %v4325_v45 = vperm.slane %v4317_v44, 0 }
0x2a78   :  { %v2314_v54 = vsel %vm2293_vm9, %v2313_v15, %v2188_v47  ;;  %v4780_v47 = vunpack.i.l.bf16 %v4779_v26  ;;  %v2021_v23 = vadd.f32 %v2020_v31, %v2019_v30  ;;  %v4319_v26 = vrot.slane %v7342_v11, 6 }
0x2a79   :  { %v2316_v41 = vsel %vm2296_vm10, %v2315_v6, %v2314_v54  ;;  %v2323_v52 = vrot.slane %v2194_v38, 2  ;;  %v4328_v54 = vperm.slane %v4320_v5, 0  ;;  %v7343_v5 = vld [vmem:[#allocation12_spill] sm:$0xff] }
0x2a7a   :  { %v2318_v55 = vsel %vm2299_vm11, %v2317_v2, %v2316_v41  ;;  %v1668_v35 = vmul.f32 %v6798_v9, %v4780_v47  ;;  %v2022_v38 = vrot.slane %v2021_v23, 2 }
0x2a7b   :  { %v2320_v57 = vsel %vm2302_vm12, %v2319_v12, %v2318_v55  ;;  %v4731_v55 = vunpack.i.l.bf16 %v6537_v14  ;;  %v1893_v14 = vsel %vm1203_vm2, %v1651_v62, 0.0 }
0x2a7c   :  { %v2322_v32 = vsel %vm2305_vm13, %v2321_v17, %v2320_v57  ;;  %v2012_v58 = vsel %vm1203_vm2, %v1668_v35, 0.0  ;;  %v2023_v29 = vadd.f32 %v2022_v38, %v2021_v23  ;;  %v1894_v30 = vrot.slane %v1893_v14, 4 }
0x2a7d   :  { %v2324_v8 = vsel %vm2308_vm15, %v2323_v52, %v2322_v32  ;;  %v2013_v41 = vrot.slane %v2012_v58, 4  ;;  %v4321_v32 = vperm.slane %v7342_v11, 0  ;;  %v4316_v52 = vrot.slane %v7342_v11, 3 }
0x2a7e   :  { %v2326_v49 = vsel %vm2311_vm3, %v2325_v53, %v2324_v8  ;;  %v4322_v53 = vperm.slane %v4314_v46, 0  ;;  %v2117_v35 = vrot.slane %v7343_v5, 1  ;;  %v2024_v31 = vrot.slane %v2023_v29, 1 }
0x2a7f   :  { %v2407_v19 = vsel %vm1203_vm2, %v2326_v49, 0.0  ;;  %v2014_v8 = vadd.f32 %v2013_v41, %v2012_v58  ;;  %v4324_v47 = vperm.slane %v4316_v52, 0  ;;  %v2120_v58 = vrot.slane %v7343_v5, 4 }
0x2a80   :  { %v2119_v46 = vrot.slane %v7343_v5, 3  ;;  %v2025_v38 = vadd.f32 %v2024_v31, %v2023_v29 }
0x2a82   :  { %2405 = vadd.xlane.f32.xlu2 %v2404_v34  ;;  %v4323_v34 = vperm.slane %v4315_v22, 0 }
0x2a8a   :  { %2411 = vadd.xlane.f32.xlu2 %v2410_v50  ;;  %v7000_v50 = vpop.permute.xlu1 %4773 }
0x2a92   :  { %2417 = vadd.xlane.f32.xlu2 %v2416_v3 }
0x2a9b   :  { %v4269_v60 = vpop.permute.xlu2 %4268 }
0x2a9c   :  { %v4307_v0 = vadd.f32 %v6798_v9, %v4269_v60  ;;  %2408 = vadd.xlane.f32.xlu0 %v2407_v19  ;;  %v4318_v60 = vrot.slane %v7342_v11, 5  ;;  %v1650_v19 = vmul.f32 %v6798_v9, %v4731_v55 }
0x2a9e   :  { %v6986_v42 = vadd.f32 %v4323_v34, %v4307_v0 }
0x2aa0   :  { %v4359_v36 = vsel %vm1203_vm2, %v6986_v42, -inf }
0x2aa1   :  { %v4360_v1 = vrot.slane %v4359_v36, 4 }
0x2aa3   :  { %v4283_v48 = vpop.permute.xlu2 %4282  ;;  %v4361_v27 = vmax.f32 %v4359_v36, %v4360_v1 }
0x2aa4   :  { %v4309_v15 = vadd.f32 %v6798_v9, %v4283_v48 }
0x2aa5   :  { %v4362_v18 = vrot.slane %v4361_v27, 2 }
0x2aa6   :  { %v6993_v39 = vadd.f32 %v4325_v45, %v4309_v15  ;;  %v4327_v45 = vperm.slane %v4319_v26, 0  ;;  %v2015_v15 = vrot.slane %v2014_v8, 2 }
0x2aa7   :  { %v4363_v13 = vmax.f32 %v4361_v27, %v4362_v18  ;;  %v7028_v27 = vperm.slane %v4318_v60, 0 }
0x2aa8   :  { %v4373_v63 = vsel %vm1203_vm2, %v6993_v39, -inf }
0x2aa9   :  { %v4374_v6 = vrot.slane %v4373_v63, 4  ;;  %v4364_v57 = vrot.slane %v4363_v13, 1 }
0x2aab   :  { %v4375_v4 = vmax.f32 %v4373_v63, %v4374_v6  ;;  %v4304_v24 = vpop.permute.xlu2 %4303  ;;  %v7020_v36 = vmax.f32 %v4363_v13, %v4364_v57  ;;  %v1886_v63 = vsel %vm1203_vm2, %v1650_v19, 0.0  ;;  %v2016_v13 = vadd.f32 %v2015_v15, %v2014_v8 }
0x2aac   :  { %v4312_v2 = vadd.f32 %v6798_v9, %v4304_v24  ;;  %v1887_v62 = vrot.slane %v1886_v63, 4 }
0x2aad   :  { %v4376_v12 = vrot.slane %v4375_v4, 2  ;;  %v4403_v18 = vsub.f32 %v6986_v42, %v7020_v36  ;;  %v7042_v42 = vadd.f32 %v1894_v30, %v1893_v14  ;;  %v2017_v8 = vrot.slane %v2016_v13, 1 }
0x2aae   :  { %v7005_v43 = vadd.f32 %v4328_v54, %v4312_v2  ;;  %v7056_v14 = vadd.f32 %v1887_v62, %v1886_v63 }
0x2aaf   :  { %v4377_v7 = vmax.f32 %v4375_v4, %v4376_v12  ;;  %v4413_v57 = vmul.f32 1.442695, %v4403_v18  ;;  %v4776_v18 = vunpack.i.h.bf16 %v7000_v50 }
0x2ab0   :  { %v4394_v25 = vsel %vm1203_vm2, %v7005_v43, -inf }
0x2ab1   :  { %v4395_v17 = vrot.slane %v4394_v25, 4  ;;  %v4378_v44 = vrot.slane %v4377_v7, 1  ;;  %5080 = vpow2.f32 %v4413_v57 }
0x2ab3   :  { %v4396_v3 = vmax.f32 %v4394_v25, %v4395_v17  ;;  %v4262_v28 = vpop.permute.xlu0 %4261  ;;  %v7034_v4 = vmax.f32 %v4377_v7, %v4378_v44  ;;  %v2118_v25 = vrot.slane %v7343_v5, 2  ;;  %v4791_v19 = vpop.permute.xlu2 %4790  ;;  %v7059_v44 = vmul.f32 %v2117_v35, %v2025_v38 }
0x2ab4   :  { %v4306_v22 = vadd.f32 %v6798_v9, %v4262_v28  ;;  %v4255_v49 = vpop.permute.xlu1 %4254  ;;  %v4793_v63 = vunpack.i.h.bf16 %v4791_v19 }
0x2ab5   :  { %v4397_v34 = vrot.slane %v4396_v3, 2  ;;  %v4305_v0 = vadd.f32 %v6798_v9, %v4255_v49  ;;  %v4405_v7 = vsub.f32 %v6993_v39, %v7034_v4  ;;  %v2383_v62 = vrot.slane %v7059_v44, 7 }
0x2ab6   :  { %v7022_v1 = vadd.f32 %v4322_v53, %v4306_v22 }
0x2ab7   :  { %v4398_v40 = vmax.f32 %v4396_v3, %v4397_v34  ;;  %v7024_v48 = vadd.f32 %v4321_v32, %v4305_v0  ;;  %v4417_v0 = vmul.f32 1.442695, %v4405_v7 }
0x2ab8   :  { %v4352_v11 = vsel %vm1203_vm2, %v7022_v1, -inf }
0x2ab9   :  { %v4353_v6 = vrot.slane %v4352_v11, 4  ;;  %v4345_v24 = vsel %vm1203_vm2, %v7024_v48, -inf  ;;  %v4399_v54 = vrot.slane %v4398_v40, 1  ;;  %5082 = vpow2.f32 %v4417_v0 }
0x2aba   :  { %v4346_v33 = vrot.slane %v4345_v24, 4 }
0x2abb   :  { %v4354_v2 = vmax.f32 %v4352_v11, %v4353_v6  ;;  %v4297_v23 = vpop.permute.xlu0 %4296  ;;  %v7048_v28 = vmax.f32 %v4398_v40, %v4399_v54  ;;  %v2018_v11 = vadd.f32 %v2017_v8, %v2016_v13  ;;  %v4792_v54 = vunpack.i.l.bf16 %v4791_v19 }
0x2abc   :  { %v4311_v12 = vadd.f32 %v6798_v9, %v4297_v23  ;;  %v4276_v41 = vpop.permute.xlu1 %4275  ;;  %v4347_v17 = vmax.f32 %v4345_v24, %v4346_v33 }
0x2abd   :  { %v4355_v55 = vrot.slane %v4354_v2, 2  ;;  %v4308_v52 = vadd.f32 %v6798_v9, %v4276_v41  ;;  %v4408_v40 = vsub.f32 %v7005_v43, %v7048_v28  ;;  %v5081_v41 = vpop.eup %5080 }
0x2abe   :  { %v7046_v3 = vadd.f32 %v4327_v45, %v4311_v12  ;;  %v4348_v26 = vrot.slane %v4347_v17, 2  ;;  %v7078_v12 = vld [vmem:[%s7289_s12] sm:$0xff] }
0x2abf   :  { %v4356_v32 = vmax.f32 %v4354_v2, %v4355_v55  ;;  %v7065_v15 = vadd.f32 %v4324_v47, %v4308_v52  ;;  %v4423_v23 = vmul.f32 1.442695, %v4408_v40  ;;  %v1667_v57 = vmul.f32 %v7078_v12, %v4776_v18  ;;  %v5083_v0 = vpop.eup %5082 }
0x2ac0   :  { %v4387_v53 = vsel %vm1203_vm2, %v7046_v3, -inf  ;;  %v4349_v29 = vmax.f32 %v4347_v17, %v4348_v26  ;;  %v1673_v17 = vmul.f32 %v7078_v12, %v4793_v63  ;;  %v1672_v7 = vmul.f32 %v7078_v12, %v4792_v54 }
0x2ac1   :  { %v4357_v39 = vrot.slane %v4356_v32, 1  ;;  %v4388_v9 = vrot.slane %v4387_v53, 4  ;;  %v4366_v35 = vsel %vm1203_vm2, %v7065_v15, -inf  ;;  %v7088_v26 = vmul.f32 %v7343_v5, %v2018_v11 }
0x2ac2   :  { %v4350_v30 = vrot.slane %v4349_v29, 1  ;;  %v4367_v47 = vrot.slane %v4366_v35, 4 }
0x2ac3   :  { %v7063_v45 = vmax.f32 %v4356_v32, %v4357_v39  ;;  %v4389_v6 = vmax.f32 %v4387_v53, %v4388_v9  ;;  %v4775_v39 = vunpack.i.l.bf16 %v7000_v50 }
0x2ac4   :  { %v4290_v31 = vpop.permute.xlu1 %4289  ;;  %v7072_v43 = vmax.f32 %v4349_v29, %v4350_v30  ;;  %v4368_v32 = vmax.f32 %v4366_v35, %v4367_v47  ;;  %v2047_v29 = vsel %vm1203_vm2, %v1673_v17, 0.0  ;;  %v7101_v30 = vsel %vm1203_vm2, %v1667_v57, 0.0 }
0x2ac5   :  { %v4402_v24 = vsub.f32 %v7022_v1, %v7063_v45  ;;  %v4390_v2 = vrot.slane %v4389_v6, 2  ;;  %v4310_v1 = vadd.f32 %v7078_v12, %v4290_v31  ;;  %v2048_v47 = vrot.slane %v2047_v29, 4 }
0x2ac6   :  { %v4401_v55 = vsub.f32 %v7024_v48, %v7072_v43  ;;  %v4439_v48 = vsel %vm1203_vm2, %v5081_v41, 0.0  ;;  %v4369_v19 = vrot.slane %v4368_v32, 2 }
0x2ac7   :  { %v4411_v13 = vmul.f32 1.442695, %v4402_v24  ;;  %v4391_v38 = vmax.f32 %v4389_v6, %v4390_v2  ;;  %v7091_v53 = vadd.f32 %v7028_v27, %v4310_v1  ;;  %v2040_v27 = vsel %vm1203_vm2, %v1672_v7, 0.0 }
0x2ac8   :  { %v4409_v52 = vmul.f32 1.442695, %v4401_v55  ;;  %v4370_v63 = vmax.f32 %v4368_v32, %v4369_v19  ;;  %v4440_v31 = vrot.slane %v4439_v48, 4  ;;  %v4453_v2 = vsel %vm1203_vm2, %v5083_v0, 0.0 }
0x2ac9   :  { %5084 = vpow2.f32 %v4411_v13  ;;  %v4392_v8 = vrot.slane %v4391_v38, 1  ;;  %v4380_v40 = vsel %vm1203_vm2, %v7091_v53, -inf  ;;  %v2041_v7 = vrot.slane %v2040_v27, 4 }
0x2aca   :  { %5086 = vpow2.f32 %v4423_v23  ;;  %v4381_v6 = vrot.slane %v4380_v40, 4  ;;  %v4371_v23 = vrot.slane %v4370_v63, 1 }
0x2acb   :  { %5088 = vpow2.f32 %v4409_v52  ;;  %v7096_v9 = vmax.f32 %v4391_v38, %v4392_v8  ;;  %v4441_v8 = vadd.f32 %v4440_v31, %v4439_v48 }
0x2acc   :  { %v4785_v11 = vpop.permute.xlu1 %4784  ;;  %v4382_v13 = vmax.f32 %v4380_v40, %v4381_v6  ;;  %v7110_v32 = vmax.f32 %v4370_v63, %v4371_v23  ;;  %v4454_v40 = vrot.slane %v4453_v2, 4 }
0x2acd   :  { %v4407_v18 = vsub.f32 %v7046_v3, %v7096_v9  ;;  %v4787_v24 = vunpack.i.h.bf16 %v4785_v11  ;;  %v4786_v54 = vunpack.i.l.bf16 %v4785_v11 }
0x2ace   :  { %v4383_v3 = vrot.slane %v4382_v13, 2 }
0x2acf   :  { %v5085_v35 = vpop.eup %5084  ;;  %v4421_v41 = vmul.f32 1.442695, %v4407_v18  ;;  %v1671_v55 = vmul.f32 %v7078_v12, %v4787_v24  ;;  %v1670_v17 = vmul.f32 %v7078_v12, %v4786_v54  ;;  %v4404_v18 = vsub.f32 %v7065_v15, %v7110_v32 }
0x2ad0   :  { %v4432_v1 = vsel %vm1203_vm2, %v5085_v35, 0.0  ;;  %v5087_v38 = vpop.eup %5086  ;;  %v2049_v54 = vadd.f32 %v2048_v47, %v2047_v29  ;;  %v4384_v35 = vmax.f32 %v4382_v13, %v4383_v3 }
0x2ad1   :  { %v4433_v57 = vrot.slane %v4432_v1, 4  ;;  %v5089_v52 = vpop.eup %5088  ;;  %5090 = vpow2.f32 %v4421_v41  ;;  %v2033_v19 = vsel %vm1203_vm2, %v1671_v55, 0.0  ;;  %v2026_v0 = vsel %vm1203_vm2, %v1670_v17, 0.0 }
0x2ad2   :  { %v4425_v6 = vsel %vm1203_vm2, %v5089_v52, 0.0  ;;  %v2034_v63 = vrot.slane %v2033_v19, 4  ;;  %v4474_v23 = vsel %vm1203_vm2, %v5087_v38, 0.0  ;;  %v4415_v48 = vmul.f32 1.442695, %v4404_v18 }
0x2ad3   :  { %v4434_v11 = vadd.f32 %v4433_v57, %v4432_v1  ;;  %v4426_v24 = vrot.slane %v4425_v6, 4  ;;  %v2027_v31 = vrot.slane %v2026_v0, 4  ;;  %v2042_v55 = vadd.f32 %v2041_v7, %v2040_v27 }
0x2ad4   :  { %v4385_v60 = vrot.slane %v4384_v35, 1  ;;  %v2035_v17 = vadd.f32 %v2034_v63, %v2033_v19  ;;  %v4796_v34 = vpop.permute.xlu1 %4795  ;;  %v4442_v1 = vrot.slane %v4441_v8, 2  ;;  %v4455_v57 = vadd.f32 %v4454_v40, %v4453_v2 }
0x2ad5   :  { %v4435_v49 = vrot.slane %v4434_v11, 2  ;;  %v4427_v41 = vadd.f32 %v4426_v24, %v4425_v6  ;;  %5092 = vpow2.f32 %v4415_v48  ;;  %v2028_v52 = vadd.f32 %v2027_v31, %v2026_v0 }
0x2ad6   :  { %v4475_v15 = vrot.slane %v4474_v23, 4  ;;  %v7118_v47 = vmax.f32 %v4384_v35, %v4385_v60  ;;  %v2036_v38 = vrot.slane %v2035_v17, 2  ;;  %v4798_v18 = vunpack.i.h.bf16 %v4796_v34 }
0x2ad7   :  { %v5091_v22 = vpop.eup %5090  ;;  %v4436_v33 = vadd.f32 %v4435_v49, %v4434_v11  ;;  %v4428_v29 = vrot.slane %v4427_v41, 2  ;;  %v2029_v3 = vrot.slane %v2028_v52, 2  ;;  %v2050_v27 = vrot.slane %v2049_v54, 2 }
0x2ad8   :  { %v4467_v13 = vsel %vm1203_vm2, %v5091_v22, 0.0  ;;  %v4406_v19 = vsub.f32 %v7091_v53, %v7118_v47  ;;  %v1666_v2 = vmul.f32 %v7078_v12, %v4775_v39  ;;  %v4456_v0 = vrot.slane %v4455_v57, 2 }
0x2ad9   :  { %v4429_v6 = vadd.f32 %v4428_v29, %v4427_v41  ;;  %v4468_v7 = vrot.slane %v4467_v13, 4  ;;  %v2043_v49 = vrot.slane %v2042_v55, 2  ;;  %v2030_v40 = vadd.f32 %v2029_v3, %v2028_v52 }
0x2ada   :  { %v4437_v60 = vrot.slane %v4436_v33, 1  ;;  %v4419_v24 = vmul.f32 1.442695, %v4406_v19  ;;  %v1675_v22 = vmul.f32 %v7078_v12, %v4798_v18  ;;  %v4476_v63 = vadd.f32 %v4475_v15, %v4474_v23 }
0x2adb   :  { %v4469_v11 = vadd.f32 %v4468_v7, %v4467_v13  ;;  %v5093_v35 = vpop.eup %5092  ;;  %v4430_v48 = vrot.slane %v4429_v6, 1  ;;  %v2037_v31 = vadd.f32 %v2036_v38, %v2035_v17  ;;  %v7131_v53 = vsel %vm2293_vm9, %v2383_v62, %v7088_v26 }
0x2adc   :  { %v4443_v50 = vadd.f32 %v4442_v1, %v4441_v8  ;;  %v2051_v39 = vadd.f32 %v2050_v27, %v2049_v54  ;;  %v4446_v41 = vsel %vm1203_vm2, %v5093_v35, 0.0  ;;  %v2031_v52 = vrot.slane %v2030_v40, 1 }
0x2add   :  { %v4457_v29 = vadd.f32 %v4456_v0, %v4455_v57  ;;  %v2044_v13 = vadd.f32 %v2043_v49, %v2042_v55  ;;  %v4447_v3 = vrot.slane %v4446_v41, 4  ;;  %5094 = vpow2.f32 %v4419_v24 }
0x2ade   :  { %v7135_v18 = vsel %vm1203_vm2, %v1666_v2, 0.0  ;;  %v4438_v23 = vadd.f32 %v4437_v60, %v4436_v33  ;;  %v4470_v17 = vrot.slane %v4469_v11, 2  ;;  %v2061_v15 = vsel %vm1203_vm2, %v1675_v22, 0.0 }
0x2adf   :  { %v4477_v44 = vrot.slane %v4476_v63, 2  ;;  %v4431_v38 = vadd.f32 %v4430_v48, %v4429_v6  ;;  %v4448_v62 = vadd.f32 %v4447_v3, %v4446_v41  ;;  %v2038_v26 = vrot.slane %v2037_v31, 1 }
0x2ae0   :  { %v4444_v8 = vrot.slane %v4443_v50, 1  ;;  %v2032_v54 = vadd.f32 %v2031_v52, %v2030_v40  ;;  %v2062_v1 = vrot.slane %v2061_v15, 4  ;;  %v4797_v27 = vunpack.i.l.bf16 %v4796_v34 }
0x2ae1   :  { %v4458_v7 = vrot.slane %v4457_v29, 1  ;;  %v2052_v57 = vrot.slane %v2051_v39, 1  ;;  %v2045_v55 = vrot.slane %v2044_v13, 1  ;;  %v4449_v19 = vrot.slane %v4448_v62, 2 }
0x2ae2   :  { %5096 = vlog2.f32 %v4438_v23  ;;  %v4471_v0 = vadd.f32 %v4470_v17, %v4469_v11  ;;  %v2063_v2 = vadd.f32 %v2062_v1, %v2061_v15  ;;  %v1674_v33 = vmul.f32 %v7078_v12, %v4797_v27 }
0x2ae3   :  { %v5095_v49 = vpop.eup %5094  ;;  %v4478_v60 = vadd.f32 %v4477_v44, %v4476_v63  ;;  %5098 = vlog2.f32 %v4431_v38  ;;  %v4450_v24 = vadd.f32 %v4449_v19, %v4448_v62  ;;  %v2039_v6 = vadd.f32 %v2038_v26, %v2037_v31 }
0x2ae4   :  { %v4445_v22 = vadd.f32 %v4444_v8, %v4443_v50  ;;  %v4460_v35 = vsel %vm1203_vm2, %v5095_v49, 0.0  ;;  %v2230_v34 = vmul.f32 %v2118_v25, %v2032_v54  ;;  %v2064_v40 = vrot.slane %v2063_v2, 2 }
0x2ae5   :  { %v2046_v48 = vadd.f32 %v2045_v55, %v2044_v13  ;;  %v4451_v41 = vrot.slane %v4450_v24, 1  ;;  %v4461_v52 = vrot.slane %v4460_v35, 4  ;;  %v2054_v11 = vsel %vm1203_vm2, %v1674_v33, 0.0 }
0x2ae6   :  { %v4459_v3 = vadd.f32 %v4458_v7, %v4457_v29  ;;  %v4472_v23 = vrot.slane %v4471_v0, 1  ;;  %v2065_v12 = vadd.f32 %v2064_v40, %v2063_v2  ;;  %v2055_v17 = vrot.slane %v2054_v11, 4 }
0x2ae7   :  { %v4479_v63 = vrot.slane %v4478_v60, 1  ;;  %v4452_v15 = vadd.f32 %v4451_v41, %v4450_v24  ;;  %v4462_v44 = vadd.f32 %v4461_v52, %v4460_v35  ;;  %v2231_v31 = vmul.f32 %v2119_v46, %v2039_v6 }
0x2ae8   :  { %v5097_v50 = vpop.eup %5096  ;;  %5100 = vlog2.f32 %v4445_v22  ;;  %v2385_v38 = vrot.slane %v2230_v34, 6  ;;  %v2066_v25 = vrot.slane %v2065_v12, 1  ;;  %v2056_v62 = vadd.f32 %v2055_v17, %v2054_v11 }
0x2ae9   :  { %v5099_v13 = vpop.eup %5098  ;;  %v1999_v26 = vrot.slane %v7135_v18, 4  ;;  %v2053_v8 = vadd.f32 %v2052_v57, %v2051_v39  ;;  %5102 = vlog2.f32 %v4452_v15  ;;  %v4463_v29 = vrot.slane %v4462_v44, 2 }
0x2aea   :  { %5104 = vlog2.f32 %v4459_v3  ;;  %v2232_v54 = vmul.f32 %v2120_v58, %v2046_v48  ;;  %v4473_v1 = vadd.f32 %v4472_v23, %v4471_v0  ;;  %v2057_v27 = vrot.slane %v2056_v62, 2 }
0x2aeb   :  { %v4480_v7 = vadd.f32 %v4479_v63, %v4478_v60  ;;  %v4484_v55 = vmul.f32 0.6931472, %v5097_v50  ;;  %v4464_v46 = vadd.f32 %v4463_v29, %v4462_v44  ;;  %v2387_v19 = vrot.slane %v2231_v31, 5 }
0x2aec   :  { %v4482_v2 = vmul.f32 0.6931472, %v5099_v13  ;;  %v2058_v33 = vadd.f32 %v2057_v27, %v2056_v62  ;;  %v2067_v49 = vadd.f32 %v2066_v25, %v2065_v12  ;;  %v2386_v24 = vsel %vm2296_vm10, %v2385_v38, %v7131_v53 }
0x2aed   :  { %v7344_v39 = vrot.slane %v7056_v14, 2  ;;  %v2006_v6 = vrot.slane %v7101_v30, 4  ;;  %v2000_v58 = vadd.f32 %v1999_v26, %v7135_v18  ;;  %v4465_v0 = vrot.slane %v4464_v46, 1 }
0x2aee   :  { %v5101_v22 = vpop.eup %5100  ;;  %v2389_v60 = vrot.slane %v2232_v54, 4  ;;  %5106 = vlog2.f32 %v4473_v1  ;;  %v2059_v35 = vrot.slane %v2058_v33, 1  ;;  %v7345_v34 = vrot.slane %v7343_v5, 5 }
0x2aef   :  { %v1890_v57 = vadd.f32 %v7344_v39, %v7056_v14  ;;  %v5103_v48 = vpop.eup %5102  ;;  %5108 = vlog2.f32 %v4480_v7  ;;  %v4466_v41 = vadd.f32 %v4465_v0, %v4464_v46  ;;  %v7346_v53 = vrot.slane %v7343_v5, 7 }
0x2af0   :  { %v2233_v40 = vmul.f32 %v7345_v34, %v2053_v8  ;;  %v2388_v14 = vsel %vm2299_vm11, %v2387_v19, %v2386_v24  ;;  %v5105_v11 = vpop.eup %5104  ;;  %v4498_v3 = vadd.f32 %v4484_v55, %v7063_v45  ;;  %v4497_v18 = vadd.f32 %v4482_v2, %v7072_v43 }
0x2af1   :  { %v2235_v52 = vmul.f32 %v7346_v53, %v2067_v49  ;;  %v4488_v23 = vmul.f32 0.6931472, %v5103_v48  ;;  %v2060_v12 = vadd.f32 %v2059_v35, %v2058_v33  ;;  %v7347_v17 = vrot.slane %v7042_v42, 2 }
0x2af2   :  { %v4486_v15 = vmul.f32 0.6931472, %v5101_v22  ;;  %5110 = vlog2.f32 %v4466_v41  ;;  %v1891_v44 = vrot.slane %v1890_v57, 1  ;;  %v2007_v31 = vadd.f32 %v2006_v6, %v7101_v30  ;;  %v4509_v41 = vpop.permute.xlu0 %4508 }
0x2af3   :  { %v1897_v63 = vadd.f32 %v7347_v17, %v7042_v42  ;;  %v7348_v50 = vrot.slane %v7343_v5, 6  ;;  %v2390_v25 = vsel %vm2302_vm12, %v2389_v60, %v2388_v14  ;;  %v2001_v62 = vrot.slane %v2000_v58, 2  ;;  %v7349_v60 = vld [vmem:[#allocation5_spill] sm:$0xff] }
0x2af4   :  { %v2391_v45 = vrot.slane %v2233_v40, 3  ;;  %v2395_v13 = vrot.slane %v2235_v52, 1  ;;  %v5107_v43 = vpop.eup %5106  ;;  %v4519_v26 = vsel %vm2293_vm9, %v4498_v3, %v4497_v18  ;;  %v4500_v8 = vadd.f32 %v4488_v23, %v7110_v32 }
0x2af5   :  { %v2234_v38 = vmul.f32 %v7348_v50, %v2060_v12  ;;  %v5109_v42 = vpop.eup %5108  ;;  %v4499_v54 = vadd.f32 %v4486_v15, %v7020_v36  ;;  %v4490_v1 = vmul.f32 0.6931472, %v5105_v11  ;;  %v1898_v27 = vrot.slane %v1897_v63, 1 }
0x2af6   :  { %v2392_v30 = vsel %vm2305_vm13, %v2391_v45, %v2390_v25  ;;  %v1892_v7 = vadd.f32 %v1891_v44, %v1890_v57  ;;  %v2008_v55 = vrot.slane %v2007_v31, 2  ;;  %v2002_v2 = vadd.f32 %v2001_v62, %v2000_v58  ;;  %v5125_v58 = vld [vmem:[%s7290_s13] ss:$0 sm:$0xff] }
0x2af7   :  { %v2393_v29 = vrot.slane %v2234_v38, 2  ;;  %v4494_v33 = vmul.f32 0.6931472, %v5107_v43  ;;  %v4520_v49 = vsel %vm2296_vm10, %v4499_v54, %v4519_v26  ;;  %v4496_v32 = vmul.f32 0.6931472, %v5109_v42 }
0x2af8   :  { %v5111_v19 = vpop.eup %5110  ;;  %v4521_v39 = vsel %vm2299_vm11, %v4500_v8, %v4520_v49  ;;  %v4501_v0 = vadd.f32 %v4490_v1, %v7034_v4  ;;  %v2101_v57 = vrot.slane %v5858_v51, 6  ;;  %v2428_v35 = vmul.f32 %v5125_v58, %v7349_v60 }
0x2af9   :  { %v2394_v46 = vsel %vm2308_vm15, %v2393_v29, %v2392_v30  ;;  %v4492_v6 = vmul.f32 0.6931472, %v5111_v19  ;;  %v1899_v34 = vadd.f32 %v1898_v27, %v1897_v63  ;;  %v2009_v40 = vadd.f32 %v2008_v55, %v2007_v31 }
0x2afa   :  { %v2396_v24 = vsel %vm2311_vm3, %v2395_v13, %v2394_v46  ;;  %v4503_v48 = vadd.f32 %v4494_v33, %v7096_v9  ;;  %v4522_v53 = vsel %vm2302_vm12, %v4501_v0, %v4521_v39  ;;  %v2210_v52 = vmul.f32 %v2101_v57, %v1892_v7  ;;  %v7195_v9 = vld [vmem:[%s7291_s14] ss:$0 sm:$0xff] }
0x2afb   :  { %v2422_v36 = vsel %vm1203_vm2, %v2396_v24, 0.0  ;;  %v4502_v22 = vadd.f32 %v4492_v6, %v7118_v47  ;;  %v2003_v4 = vrot.slane %v2002_v2, 1  ;;  %v4504_v14 = vadd.f32 %v4496_v32, %v7048_v28 }
0x2afc   :  { %2423 = vadd.xlane.f32.xlu2 %v2422_v36  ;;  %vm4510_vm9 = vcmp.eq.s32.totalorder %v4509_v41, 1  ;;  %v2102_v3 = vrot.slane %v5858_v51, 7  ;;  %v2010_v23 = vrot.slane %v2009_v40, 1  ;;  %v2429_v28 = vsel %vm1203_vm2, %v2428_v35, 0.0 }
0x2afd   :  { %v4523_v47 = vsel %vm2305_vm13, %v4502_v22, %v4522_v53  ;;  %v2004_v63 = vadd.f32 %v2003_v4, %v2002_v2  ;;  %v2351_v44 = vrot.slane %v2210_v52, 2  ;;  %v2115_v50 = vrot.slane %v5892_v61, 6 }
0x2afe   :  { %v4524_v11 = vsel %vm2308_vm15, %v4503_v48, %v4523_v47  ;;  %v2211_v17 = vmul.f32 %v2102_v3, %v1899_v34  ;;  %v2011_v25 = vadd.f32 %v2010_v23, %v2009_v40 }
0x2aff   :  { %v4525_v18 = vsel %vm2311_vm3, %v4504_v14, %v4524_v11  ;;  %v2352_v62 = vsel %vm2308_vm15, %v2351_v44, %v6477_v59  ;;  %v2226_v45 = vmul.f32 %v2115_v50, %v2004_v63  ;;  %v4801_v59 = vpop.permute.xlu0 %4800  ;;  %v7350_v44 = vld [vmem:[#allocation10_spill] sm:$0xff] }
0x2b00   :  { %v4527_v12 = vsel %vm4510_vm9, %v4525_v18, %v6872_v37  ;;  %v2353_v38 = vrot.slane %v2211_v17, 1  ;;  %v2116_v37 = vrot.slane %v5892_v61, 7  ;;  %v4803_v27 = vunpack.i.h.bf16 %v4801_v59  ;;  %v2406_v17 = vpop.xlane.xlu2 %2405 }
0x2b01   :  { %v4528_v15 = vadd.f32 %v7195_v9, %v4527_v12  ;;  %v2379_v26 = vrot.slane %v2226_v45, 2  ;;  %v4802_v7 = vunpack.i.l.bf16 %v4801_v59  ;;  %v7352_v45 = vld [vmem:[#allocation6_spill] sm:$0xff]  ;;  %v5129_v59 = vld [vmem:[%s7287_s10 + $0x20] sm:$0xff] }
0x2b02   :  { %v2354_v13 = vsel %vm2311_vm3, %v2353_v38, %v2352_v62  ;;  %v2227_v43 = vmul.f32 %v2116_v37, %v2011_v25  ;;  %v2542_v19 = vmul.f32 %v4803_v27, %v7338_v16  ;;  %v5126_v38 = vld [vmem:[%s7287_s10 + $0x10] sm:$0xff] }
0x2b03   :  { %v4529_v31 = vsel %vm1203_vm2, %v4528_v15, -inf  ;;  %v2413_v8 = vsel %vm1203_vm2, %v2354_v13, 0.0  ;;  %v2380_v42 = vsel %vm2308_vm15, %v2379_v26, %v6836_v20  ;;  %v2541_v2 = vmul.f32 %v4802_v7, %v7349_v60  ;;  %v7353_v13 = vld [vmem:[#allocation14_spill] sm:$0xff]  ;;  %v7354_v7 = vld [vmem:[#allocation7_spill] sm:$0xff] }
0x2b04   :  { %2430 = vadd.xlane.f32.xlu2 %v2429_v28  ;;  %4530 = vmax.xlane.f32.xlu1 %v4529_v31  ;;  %v2381_v29 = vrot.slane %v2227_v43, 1  ;;  %v2550_v49 = vsel %vm1203_vm2, %v2542_v19, 0.0 }
0x2b05   :  { %v2549_v20 = vsel %vm1203_vm2, %v2541_v2, 0.0 }
0x2b06   :  { %v2382_v54 = vsel %vm2311_vm3, %v2381_v29, %v2380_v42  ;;  %v2551_v6 = vadd.f32 %v2550_v49, %v2549_v20 }
0x2b07   :  { %v2419_v1 = vsel %vm1203_vm2, %v2382_v54, 0.0  ;;  %v4806_v30 = vpop.permute.xlu0 %4805  ;;  %v5128_v54 = vld [vmem:[%s7287_s10 + $0x18] sm:$0xff] }
0x2b08   :  { %v4807_v46 = vunpack.i.l.bf16 %v4806_v30  ;;  %v4808_v24 = vunpack.i.h.bf16 %v4806_v30  ;;  %v2412_v63 = vpop.xlane.xlu2 %2411 }
0x2b09   :  { %v2434_v37 = vadd.f32 %v2412_v63, %v7352_v45 }
0x2b0a   :  { %v2543_v33 = vmul.f32 %v4807_v46, %v7341_v21  ;;  %v2544_v0 = vmul.f32 %v4808_v24, %v5824_v56  ;;  %v7355_v46 = vld [vmem:[#allocation11_spill] sm:$0xff]  ;;  %v5130_v24 = vld [vmem:[%s7287_s10 + $0x28] sm:$0xff] }
0x2b0c   :  { %2414 = vadd.xlane.f32.xlu1 %v2413_v8  ;;  %v2552_v39 = vsel %vm1203_vm2, %v2543_v33, 0.0  ;;  %v2554_v60 = vsel %vm1203_vm2, %v2544_v0, 0.0  ;;  %v7356_v0 = vld [vmem:[#allocation18_spill] sm:$0xff] }
0x2b0d   :  { %v2553_v22 = vadd.f32 %v2552_v39, %v2551_v6  ;;  %v5131_v39 = vld [vmem:[%s7287_s10 + $0x30] sm:$0xff] }
0x2b0f   :  { %v4811_v55 = vpop.permute.xlu0 %4810  ;;  %v2555_v35 = vadd.f32 %v2554_v60, %v2553_v22  ;;  %v5132_v60 = vld [vmem:[%s7287_s10 + $0x38] sm:$0xff] }
0x2b10   :  { %v4812_v32 = vunpack.i.l.bf16 %v4811_v55  ;;  %v4813_v16 = vunpack.i.h.bf16 %v4811_v55  ;;  %v2418_v26 = vpop.xlane.xlu2 %2417 }
0x2b11   :  { %v2436_v55 = vadd.f32 %v2418_v26, %v7354_v7 }
0x2b12   :  { %v2545_v57 = vmul.f32 %v4812_v32, %v5858_v51  ;;  %v2546_v40 = vmul.f32 %v4813_v16, %v5834_v10 }
0x2b13   :  { %v2443_v32 = vmul.f32 %v5130_v24, %v2436_v55 }
0x2b14   :  { %2420 = vadd.xlane.f32.xlu1 %v2419_v1  ;;  %v2556_v21 = vsel %vm1203_vm2, %v2545_v57, 0.0  ;;  %v2558_v51 = vsel %vm1203_vm2, %v2546_v40, 0.0  ;;  %v2441_v1 = vmul.f32 %v5128_v54, %v2434_v37 }
0x2b15   :  { %v2557_v53 = vadd.f32 %v2556_v21, %v2555_v35  ;;  %v2454_v22 = vsel %vm2446_vm5, %v2443_v32, 0.0 }
0x2b16   :  { %v2450_v2 = vsel %vm2446_vm5, %v2441_v1, 0.0 }
0x2b17   :  { %v4816_v36 = vpop.permute.xlu0 %4815  ;;  %v2559_v14 = vadd.f32 %v2558_v51, %v2557_v53 }
0x2b18   :  { %v4817_v58 = vunpack.i.l.bf16 %v4816_v36  ;;  %v4818_v56 = vunpack.i.h.bf16 %v4816_v36 }
0x2b1a   :  { %v2547_v48 = vmul.f32 %v4817_v58, %v5892_v61  ;;  %v2548_v47 = vmul.f32 %v4818_v56, %v7343_v5  ;;  %v7351_v5 = vld [vmem:[#allocation17_spill] sm:$0xff]  ;;  %v7357_v56 = vld [vmem:[#allocation15_spill] sm:$0xff] }
0x2b1b   :  { %v2432_v50 = vadd.f32 %v2406_v17, %v7351_v5 }
0x2b1c   :  { %v2560_v4 = vsel %vm1203_vm2, %v2547_v48, 0.0  ;;  %v2562_v18 = vsel %vm1203_vm2, %v2548_v47, 0.0 }
0x2b1d   :  { %v2561_v11 = vadd.f32 %v2560_v4, %v2559_v14 }
0x2b1f   :  { %v2563_v61 = vadd.f32 %v2562_v18, %v2561_v11  ;;  %v2409_v28 = vpop.xlane.xlu0 %2408  ;;  %v1111_v18 = vld [vmem:[%s7288_s11] sm:$0xff] }
0x2b20   :  { %v2433_v31 = vadd.f32 %v2409_v28, %v7350_v44 }
0x2b21   :  { %v2567_v23 = vmul.f32 %v7195_v9, %v2563_v61  ;;  %v5127_v9 = vld [vmem:[%s7287_s10 + $0x8] sm:$0xff]  ;;  %s5163_s10 = smov [#allocation2]  }
0x2b22   :  { %v2440_v25 = vmul.f32 %v5126_v38, %v2433_v31  ;;  %v2439_v62 = vmul.f32 %v5127_v9, %v2432_v50  ;;  %s4559_s2 = sshll.u32 %s5163_s10, 4  ;;  %s4560_s2 = int_to_ptr.vmem [resolvable:$true] %s4559_s2 }
0x2b23   :  { %v2568_v12 = vsel %vm1203_vm2, %v2567_v23, 0.0 }
0x2b24   :  { %v2448_v8 = vsel %vm2446_vm5, %v2440_v25, 0.0  ;;  %v2447_v42 = vsel %vm2446_vm5, %v2439_v62, 0.0 }
0x2b25   :  { %v2449_v27 = vadd.f32 %v2448_v8, %v2447_v42 }
0x2b27   :  { %v2451_v20 = vadd.f32 %v2450_v2, %v2449_v27 }
0x2b6f   :  { %v2424_v49 = vpop.xlane.xlu2 %2423 }
0x2b70   :  { %v2438_v57 = vadd.f32 %v2424_v49, %v7356_v0 }
0x2b72   :  { %v2445_v21 = vmul.f32 %v5132_v60, %v2438_v57 }
0x2b74   :  { %v2458_v48 = vsel %vm2446_vm5, %v2445_v21, 0.0 }
0x2b77   :  { %v7221_v34 = vpop.xlane.xlu1 %4530 }
0x2b78   :  { %v4532_v41 = vsub.f32 %v4528_v15, %v7221_v34 }
0x2b7a   :  { %v4533_v52 = vmul.f32 1.442695, %v4532_v41  ;;  %v2431_v41 = vpop.xlane.xlu2 %2430 }
0x2b7c   :  { %5112 = vpow2.f32 %v4533_v52  ;;  %v2571_v52 = vadd.f32 %v2431_v41, %v7357_v56 }
0x2b7f   :  { %v2415_v15 = vpop.xlane.xlu1 %2414 }
0x2b80   :  { %v2435_v43 = vadd.f32 %v2415_v15, %v7353_v13 }
0x2b82   :  { %v5113_v3 = vpop.eup %5112  ;;  %v2442_v30 = vmul.f32 %v5129_v59, %v2435_v43 }
0x2b83   :  { %v4535_v10 = vsel %vm1203_vm2, %v5113_v3, 0.0  ;;  %vm4552_vm2 = vcmask 0  }
0x2b84   :  { %4536 = vadd.xlane.f32.xlu1 %v4535_v10  ;;  %v2452_v33 = vsel %vm2446_vm5, %v2442_v30, 0.0 }
0x2b85   :  { %v2453_v36 = vadd.f32 %v2452_v33, %v2451_v20 }
0x2b87   :  { %v2421_v29 = vpop.xlane.xlu1 %2420  ;;  %v2455_v58 = vadd.f32 %v2454_v22, %v2453_v36 }
0x2b88   :  { %v2437_v19 = vadd.f32 %v2421_v29, %v7355_v46 }
0x2b8a   :  { %v2444_v6 = vmul.f32 %v5131_v39, %v2437_v19 }
0x2b8c   :  { %2569 = vadd.xlane.f32.xlu1 %v2568_v12  ;;  %v2456_v16 = vsel %vm2446_vm5, %v2444_v6, 0.0 }
0x2b8d   :  { %v2457_v35 = vadd.f32 %v2456_v16, %v2455_v58 }
0x2b8f   :  { %v2459_v53 = vadd.f32 %v2458_v48, %v2457_v35 }
0x2b91   :  { %v2572_v4 = vadd.f32 %v2571_v52, %v2459_v53 }
0x2bf7   :  { %v4537_v40 = vpop.xlane.xlu1 %4536 }
0x2bf8   :  { %5114 = vlog2.f32 %v4537_v40 }
0x2bfe   :  { %v5115_v51 = vpop.eup %5114 }
0x2bff   :  { %v4539_v14 = vmul.f32 0.6931472, %v5115_v51  ;;  %v2570_v47 = vpop.xlane.xlu1 %2569 }
0x2c00   :  { %v2573_v11 = vadd.f32 %v2572_v4, %v2570_v47 }
0x2c01   :  { %v4540_v3 = vadd.f32 %v4539_v14, %v7221_v34 }
0x2c03   :  { %v4541_v10 = vsub.f32 %v2573_v11, %v4540_v3 }
0x2c05   :  { %v4542_v61 = vmul.f32 %v4541_v10, %v1111_v18 }
0x2c07   :  { %v4543_v23 = vsel %vm2446_vm5, %v4542_v61, 0.0 }
0x2c08   :  { %v4544_v12 = vrot.slane %v4543_v23, 4 }
0x2c0a   :  { %v4545_v17 = vadd.f32 %v4544_v12, %v4543_v23 }
0x2c0c   :  { %v4546_v63 = vrot.slane %v4545_v17, 2 }
0x2c0e   :  { %v4547_v28 = vadd.f32 %v4546_v63, %v4545_v17 }
0x2c10   :  { %v4548_v15 = vrot.slane %v4547_v28, 1 }
0x2c12   :  { %v4549_v44 = vadd.f32 %v4548_v15, %v4547_v28 }
0x2c14   :  { %v4550_v34 = vsub.f32 0.0, %v4549_v44 }
0x2c16   :  { %v4551_v31 = vmul.f32 0.5, %v4550_v34 }
0x2c18   :  { %4553 = vst.msk [vmem:[#allocation2] sm:$0x1] %vm4552_vm2, %v4551_v31 }
0x2c19   :  { %4564 = dma.vmem_to_hbm [thread:$0]  %s4560_s2, 16, %s4562_s30, [#allocation3]  }
0x2c1a   :  { %5157 = dma.done.wait [#allocation3], 16  }
0x2c1b   :  { %5158 = vsyncadd [#allocation3], 4294967280 }
0x2c1c   :  { %4569 = vsyncpa [#allocation3], 1 }

</bundles_post_ra>
